<compile_context>
chip_gen: v6e
topology: v6e:2x2x1
jax: 0.10.0
libtpu: 0.0.40
codegen_flags: <defaults>
</compile_context>

<pallas_src>
import jax
import jax.numpy as jnp
import numpy as np
from jax.experimental import pallas as pl
from jax.experimental.pallas import tpu as pltpu

# ---------------------------------------------------------------------------
# Hyperparameters implied by the PyTorch module
# ---------------------------------------------------------------------------
DA = 160
DIM = 50
LAYER_GNN = 4
N_FINGERPRINT = 100            # stand-in for len(fingerprint_dict) (pickle not loaded)
UNITS = 840
HIDDEN = 75                    # GRU hidden size
CNN_OUT = 36                   # conv1 out_channels
KW = 20                        # conv1 kernel width == PSSM width
PSSM_LEN = 50                  # PSSM length so 36 * 50 * 1 == GRU input_size
GRU_IN0 = CNN_OUT * PSSM_LEN   # 1800
GRU_IN1 = 2 * HIDDEN           # 150
CAT = 4 * HIDDEN + DIM         # 350
N_ATOMS = 12                   # number of fingerprints in the example peptide graph

F32 = jnp.float32
BF16 = jnp.bfloat16

# ----- offsets inside the packed (1, BIAS_TOTAL) bias slab -----
BIH0_O = 0                         # GRU layer-0 bias_ih (+bias_hh[r,z])   (450)
BHHN0_O = BIH0_O + 6 * HIDDEN      # GRU layer-0 bias_hh n-gate            (150)
BIH1_O = BHHN0_O + 2 * HIDDEN      # GRU layer-1 bias_ih (+bias_hh[r,z])   (450)
BHHN1_O = BIH1_O + 6 * HIDDEN      # GRU layer-1 bias_hh n-gate            (150)
FC1B_O = BHHN1_O + 2 * HIDDEN      # fc1 bias                              (840)
FC2B_O = FC1B_O + UNITS            # fc2 bias                              (2)
BIAS_TOTAL = FC2B_O + 2            # 2042


# ---------------------------------------------------------------------------
# Fused kernel
# ---------------------------------------------------------------------------
def _gru_gates(gi, bhhn):
    """GRU gate math for one bidirectional layer, seq_len==1, h0==0.

    gi    : (1, 6H) precomputed x @ W_ih_cat + bias_ih_cat (bias_hh[r,z] folded)
    bhhn  : (1, 2H) [fwd n-gate bias_hh | bwd n-gate bias_hh]
    Because h_{t-1} == 0, W_hh drops out entirely; only bias_hh survives.
    """
    def _dir(o, bn):
        r = jax.nn.sigmoid(gi[:, o:o + HIDDEN])
        z = jax.nn.sigmoid(gi[:, o + HIDDEN:o + 2 * HIDDEN])
        n = jnp.tanh(gi[:, o + 2 * HIDDEN:o + 3 * HIDDEN] + r * bn)
        return (1.0 - z) * n                                        # + z * 0

    hf = _dir(0, bhhn[:, :HIDDEN])
    hb = _dir(3 * HIDDEN, bhhn[:, HIDDEN:])
    return hf, hb


def fused_kernel(xs_ref, a_ref, pssm_ref,
                 wgb_ref, convwb_ref,
                 wih0_ref, wih1_ref, fc1w_ref, fc2w_ref, bias_ref,
                 out_ref):
    # -------- packed bias slab (static lane slices of one (1, 2042) input) ----
    bih0 = bias_ref[:, BIH0_O:BIH0_O + 6 * HIDDEN]        # (1, 450)
    bhhn0 = bias_ref[:, BHHN0_O:BHHN0_O + 2 * HIDDEN]     # (1, 150)
    bih1 = bias_ref[:, BIH1_O:BIH1_O + 6 * HIDDEN]        # (1, 450)
    bhhn1 = bias_ref[:, BHHN1_O:BHHN1_O + 2 * HIDDEN]     # (1, 150)
    fc1_b = bias_ref[:, FC1B_O:FC1B_O + UNITS]            # (1, 840)
    fc2_b = bias_ref[:, FC2B_O:FC2B_O + 2]                # (1, 2)

    # ---------------- GNN: xs <- xs + A @ relu(xs @ W_i + b_i) ----------------
    # Weights are indexed per layer (low vreg pressure); the per-layer mean is
    # hoisted: sum over layers of means == mean over atoms of the running sum.
    xs = xs_ref[...]                                      # (N_ATOMS, DIM)
    A = a_ref[...]                                        # (N_ATOMS, N_ATOMS)
    xs_acc = jnp.zeros((N_ATOMS, DIM), jnp.float32)
    for i in range(LAYER_GNN):
        layer = wgb_ref[i]                                # (DIM+1, DIM): [W_i ; b_i]
        w_i = layer[:DIM, :]
        b_i = layer[DIM:DIM + 1, :]
        hs = jnp.maximum(
            jnp.dot(xs, w_i, preferred_element_type=jnp.float32) + b_i, 0.0)
        xs = xs + jnp.dot(A, hs, preferred_element_type=jnp.float32)
        xs_acc = xs_acc + xs
    gnn_sum = jnp.sum(xs_acc, axis=0, keepdims=True) * (1.0 / N_ATOMS)  # (1, DIM)

    # ------------- Conv2d(1,36,(1,20)) + BN(identity) + ReLU ------------------
    # Contract conv_w (36,20) with pssm (50,20) along the width axis (the
    # transpose is folded into the MXU contraction).
    # TODO(synk): BatchNorm2d is identity only for fresh running stats; fold
    # trained BN scale/shift into conv_w/conv_b when loading real weights.
    convwb = convwb_ref[...]                              # (36, 21): [conv_w | conv_b]
    conv = jax.lax.dot_general(
        convwb[:, :KW], pssm_ref[...],
        dimension_numbers=(((1,), (1,)), ((), ())),
        preferred_element_type=jnp.float32) + convwb[:, KW:KW + 1]      # (36, 50)
    conv = jnp.maximum(conv, 0.0)

    # ---------------- 2-layer bidirectional GRU, seq_len=1, h0=0 --------------
    # Layer 0: gi0 = flatten(conv) @ W_ih + bias, computed WITHOUT the flatten:
    # W_ih is reshaped host-side to (36, 50, 6H); accumulate 36 plain 2-D dots
    # (same FLOPs / MXU weight streaming as the single K=1800 GEMV, no relayout).
    # TODO(synk): inter-layer dropout (p=0.5) is train-mode only; eval semantics.
    gi0 = bih0                                            # (1, 450) f32
    for c in range(CNN_OUT):
        gi0 = gi0 + jnp.dot(conv[c:c + 1, :].astype(BF16), wih0_ref[c],
                            preferred_element_type=jnp.float32)
    h0f, h0b = _gru_gates(gi0, bhhn0)

    x1 = jnp.concatenate([h0f, h0b], axis=1).astype(BF16)                # (1, 150)
    gi1 = jnp.dot(x1, wih1_ref[...], preferred_element_type=jnp.float32) + bih1
    h1f, h1b = _gru_gates(gi1, bhhn1)
    # torch.cat([hidden[-1], hidden[-2], hidden[-3], hidden[-4]], dim=1)
    cnn_vec = jnp.concatenate([h1b, h1f, h0b, h0f], axis=1)              # (1, 300)

    # ------------- self-attention (weights == 1) + fc head --------------------
    # hidden_matrix = sum over the 4 rows of all_vector
    #              == [sum of GNN layer means | 4 * cnn_vec]
    hidden = jnp.concatenate([gnn_sum, 4.0 * cnn_vec], axis=1)           # (1, 350)

    xfc = jnp.maximum(
        jnp.dot(hidden.astype(BF16), fc1w_ref[...],
                preferred_element_type=jnp.float32) + fc1_b, 0.0)        # (1, 840)
    label = jnp.dot(xfc, fc2w_ref[...],
                    preferred_element_type=jnp.float32) + fc2_b          # (1, 2)
    m = jnp.max(label, axis=-1, keepdims=True)
    e = jnp.exp(label - m)
    out_ref[...] = e / jnp.sum(e, axis=-1, keepdims=True)                # softmax


# ---------------------------------------------------------------------------
# Wrapper: grid over the batch, weights resident via constant index_maps
# ---------------------------------------------------------------------------
@jax.jit
def attention_prediction(params, gnn_peptide, gnn_adjacencies, cnn_pssm):
    # Embedding gather (data-dependent gather; plain JAX glue outside the kernel)
    xs = params["embed"][gnn_peptide]                      # (B, N_ATOMS, DIM)
    B = xs.shape[0]

    def nbytes(a):
        return int(np.prod(a.shape)) * a.dtype.itemsize

    weights = (params["wgb"], params["convwb"], params["wih0"], params["wih1"],
               params["fc1_w"], params["fc2_w"], params["bias"])
    weight_bytes = sum(nbytes(w) for w in weights)
    sample_bytes = 4 * (N_ATOMS * DIM + N_ATOMS * N_ATOMS + PSSM_LEN * KW + 2)
    flops = 2 * B * (LAYER_GNN * (N_ATOMS * DIM * DIM + N_ATOMS * N_ATOMS * DIM)
                     + CNN_OUT * PSSM_LEN * KW
                     + GRU_IN0 * 6 * HIDDEN + GRU_IN1 * 6 * HIDDEN
                     + CAT * UNITS + UNITS * 2)
    cost = pl.CostEstimate(flops=int(flops),
                           transcendentals=int(B * (12 * HIDDEN + 2)),
                           bytes_accessed=int(weight_bytes + B * sample_bytes))

    out = pl.pallas_call(
        fused_kernel,
        out_shape=jax.ShapeDtypeStruct((B, 1, 2), F32),
        grid=(B,),
        in_specs=[
            # per-sample activations (batch dim squeezed)
            pl.BlockSpec((None, N_ATOMS, DIM), lambda b: (b, 0, 0)),
            pl.BlockSpec((None, N_ATOMS, N_ATOMS), lambda b: (b, 0, 0)),
            pl.BlockSpec((None, PSSM_LEN, KW), lambda b: (b, 0, 0)),
            # weights: constant index_map -> fetched once, resident across grid
            pl.BlockSpec((LAYER_GNN, DIM + 1, DIM), lambda b: (0, 0, 0)),
            pl.BlockSpec((CNN_OUT, KW + 1), lambda b: (0, 0)),
            pl.BlockSpec((CNN_OUT, PSSM_LEN, 6 * HIDDEN), lambda b: (0, 0, 0)),
            pl.BlockSpec((GRU_IN1, 6 * HIDDEN), lambda b: (0, 0)),
            pl.BlockSpec((CAT, UNITS), lambda b: (0, 0)),
            pl.BlockSpec((UNITS, 2), lambda b: (0, 0)),
            pl.BlockSpec((1, BIAS_TOTAL), lambda b: (0, 0)),
        ],
        out_specs=pl.BlockSpec((None, 1, 2), lambda b: (b, 0, 0)),
        compiler_params=pltpu.CompilerParams(
            dimension_semantics=("parallel",)),
        cost_estimate=cost,
    )(xs, gnn_adjacencies, cnn_pssm,
      params["wgb"], params["convwb"],
      params["wih0"], params["wih1"],
      params["fc1_w"], params["fc2_w"], params["bias"])
    return out[:, 0, :]


# ---------------------------------------------------------------------------
# Deterministic parameter construction (shapes from the module's __init__)
# ---------------------------------------------------------------------------
def init_params(key):
    keys = jax.random.split(key, 32)
    it = iter(keys)

    def nrm(shape, scale=0.05):
        return (scale * jax.random.normal(next(it), shape)).astype(F32)

    p = {}
    p["embed"] = nrm((N_FINGERPRINT, DIM), 0.1)          # Embedding(n_fingerprint, 50)
    p["wg_t"] = nrm((LAYER_GNN, DIM, DIM))               # 4 x Linear(50, 50), transposed
    p["bg"] = nrm((LAYER_GNN, 1, DIM))
    p["conv_w"] = nrm((CNN_OUT, KW))                     # Conv2d weight (36,1,1,20) squeezed
    p["conv_b"] = nrm((CNN_OUT, 1))
    # GRU(1800, 75, num_layers=2, bidirectional).  With h0 == 0 and seq_len == 1,
    # weight_hh_* never touches the output (only bias_hh_* does), so it is omitted.
    for name, in_sz in (("l0f", GRU_IN0), ("l0b", GRU_IN0),
                        ("l1f", GRU_IN1), ("l1b", GRU_IN1)):
        p[f"wih_{name}_t"] = nrm((in_sz, 3 * HIDDEN))
        p[f"bih_{name}"] = nrm((1, 3 * HIDDEN))
        p[f"bhh_{name}"] = nrm((1, 3 * HIDDEN))
    # W_s1 / W_s2 feed a softmax over a singleton dim -> attention weights are
    # identically 1.  Kept only for the reference check (dead math in the kernel).
    p["ws1_t"] = nrm((CAT, DA));      p["bs1"] = nrm((1, DA))
    p["ws2_t"] = nrm((DA, 1));        p["bs2"] = nrm((1, 1))
    p["fc1_w_t"] = nrm((CAT, UNITS)); p["fc1_b"] = nrm((1, UNITS))   # fc1
    p["fc2_w_t"] = nrm((UNITS, 2));   p["fc2_b"] = nrm((1, 2))       # fc2
    return p


def pack_params(p):
    """Host-side param prep for the fused kernel:
      * concat fwd/bwd GRU input weights -> one GEMV per layer,
      * fold bias_hh[r,z] into bias_ih, keep only the n-gate bias_hh,
      * reshape GRU layer-0 weight to (36, 50, 450) so the conv activation can
        be contracted without an in-kernel flatten,
      * pack GNN bias into the GNN weight stack, conv bias into the conv
        weight, and every remaining bias into one (1, 2042) slab,
      * cast the three GEMV weights (GRU l0, GRU l1, fc1) to bf16."""
    kp = {"embed": p["embed"]}

    def fold(bih, bhh):
        return bih.at[:, :2 * HIDDEN].add(bhh[:, :2 * HIDDEN])

    cat = {}
    for layer in ("l0", "l1"):
        cat[f"wih_{layer}"] = jnp.concatenate(
            [p[f"wih_{layer}f_t"], p[f"wih_{layer}b_t"]], axis=1)         # (in, 6H)
        cat[f"bih_{layer}"] = jnp.concatenate(
            [fold(p[f"bih_{layer}f"], p[f"bhh_{layer}f"]),
             fold(p[f"bih_{layer}b"], p[f"bhh_{layer}b"])], axis=1)       # (1, 6H)
        cat[f"bhhn_{layer}"] = jnp.concatenate(
            [p[f"bhh_{layer}f"][:, 2 * HIDDEN:],
             p[f"bhh_{layer}b"][:, 2 * HIDDEN:]], axis=1)                 # (1, 2H)

    kp["wih0"] = cat["wih_l0"].reshape(CNN_OUT, PSSM_LEN, 6 * HIDDEN).astype(BF16)
    kp["wih1"] = cat["wih_l1"].astype(BF16)
    kp["fc1_w"] = p["fc1_w_t"].astype(BF16)
    kp["fc2_w"] = p["fc2_w_t"]

    kp["wgb"] = jnp.concatenate([p["wg_t"], p["bg"]], axis=1)             # (4, 51, 50)
    kp["convwb"] = jnp.concatenate([p["conv_w"], p["conv_b"]], axis=1)    # (36, 21)
    kp["bias"] = jnp.concatenate(
        [cat["bih_l0"], cat["bhhn_l0"], cat["bih_l1"], cat["bhhn_l1"],
         p["fc1_b"], p["fc2_b"]], axis=1)                                 # (1, 2042)
    assert kp["bias"].shape == (1, BIAS_TOTAL)
    return kp


# ---------------------------------------------------------------------------
# Pure-JAX reference: the FULL original math (including the dead attention
# path) on raw f32 parameters -- proves the kernel's simplifications exact.
# ---------------------------------------------------------------------------
def _reference_forward(params, gnn_peptide, A, pssm):
    xs = params["embed"][gnn_peptide]
    means = []
    for i in range(LAYER_GNN):
        hs = jnp.maximum(xs @ params["wg_t"][i] + params["bg"][i], 0.0)
        xs = xs + A @ hs
        means.append(jnp.mean(xs, axis=0, keepdims=True))
    gnn_means = jnp.concatenate(means, axis=0)                       # (4, 50)

    conv = jnp.maximum(params["conv_w"] @ pssm.T + params["conv_b"], 0.0)
    x = conv.reshape(1, GRU_IN0)

    def gru(x, w, bi, bh):
        gi = x @ w + bi
        r = jax.nn.sigmoid(gi[:, :HIDDEN] + bh[:, :HIDDEN])
        z = jax.nn.sigmoid(gi[:, HIDDEN:2 * HIDDEN] + bh[:, HIDDEN:2 * HIDDEN])
        n = jnp.tanh(gi[:, 2 * HIDDEN:] + r * bh[:, 2 * HIDDEN:])
        return (1.0 - z) * n

    h0f = gru(x, params["wih_l0f_t"], params["bih_l0f"], params["bhh_l0f"])
    h0b = gru(x, params["wih_l0b_t"], params["bih_l0b"], params["bhh_l0b"])
    x1 = jnp.concatenate([h0f, h0b], axis=1)
    h1f = gru(x1, params["wih_l1f_t"], params["bih_l1f"], params["bhh_l1f"])
    h1b = gru(x1, params["wih_l1b_t"], params["bih_l1b"], params["bhh_l1b"])
    cnn_vec = jnp.concatenate([h1b, h1f, h0b, h0f], axis=1)          # (1, 300)

    all_vector = jnp.concatenate(
        [gnn_means, jnp.broadcast_to(cnn_vec, (LAYER_GNN, 4 * HIDDEN))], axis=1)  # (4, 350)
    # full self-attention path (softmax over a singleton dim -> all ones)
    s1 = jnp.tanh(all_vector @ params["ws1_t"] + params["bs1"])      # (4, DA)
    s2 = s1 @ params["ws2_t"] + params["bs2"]                        # (4, 1)
    attn = jax.nn.softmax(s2.T[None, :, :], axis=1)                  # (1, 1, 4) == ones
    hidden = attn[0] @ all_vector                                    # (1, 350)
    xfc = jnp.maximum(hidden @ params["fc1_w_t"] + params["fc1_b"], 0.0)
    label = xfc @ params["fc2_w_t"] + params["fc2_b"]
    return jax.nn.softmax(label, axis=-1)


# ---------------------------------------------------------------------------
if __name__ == "__main__":
    key = jax.random.PRNGKey(0)
    kparam, k1, k2, k3 = jax.random.split(key, 4)
    params = init_params(kparam)
    kernel_params = pack_params(params)

    B = 8
    gnn_peptide = jax.random.randint(k1, (B, N_ATOMS), 0, N_FINGERPRINT, dtype=jnp.int32)
    gnn_adjacencies = (jax.random.uniform(k2, (B, N_ATOMS, N_ATOMS)) < 0.3).astype(F32)
    cnn_pssm = jax.random.normal(k3, (B, PSSM_LEN, KW), dtype=F32)

    pred = attention_prediction(kernel_params, gnn_peptide, gnn_adjacencies, cnn_pssm)
    pred = jax.block_until_ready(pred)
    assert pred.shape == (B, 2)

    ref = jax.vmap(lambda pep, A, ps: _reference_forward(params, pep, A, ps)[0])(
        gnn_peptide, gnn_adjacencies, cnn_pssm)                         # (B, 2)
    np.testing.assert_allclose(np.asarray(pred), np.asarray(ref), atol=1e-2, rtol=1e-2)

    print("KERNEL_OK")
</pallas_src>

<mosaic_0001>
module attributes {stable_mosaic.version = 11 : i64} {
  func.func @fused_kernel(%arg0: i32, %arg1: memref<1x12x50xf32, #tpu.memory_space<vmem>>, %arg2: memref<1x12x12xf32, #tpu.memory_space<vmem>>, %arg3: memref<1x50x20xf32, #tpu.memory_space<vmem>>, %arg4: memref<4x51x50xf32, #tpu.memory_space<vmem>>, %arg5: memref<36x21xf32, #tpu.memory_space<vmem>>, %arg6: memref<36x50x450xbf16, #tpu.memory_space<vmem>>, %arg7: memref<150x450xbf16, #tpu.memory_space<vmem>>, %arg8: memref<350x840xbf16, #tpu.memory_space<vmem>>, %arg9: memref<840x2xf32, #tpu.memory_space<vmem>>, %arg10: memref<1x2042xf32, #tpu.memory_space<vmem>>, %arg11: memref<1x1x2xf32, #tpu.memory_space<vmem>>) attributes {dimension_semantics = [#tpu.dimension_semantics<parallel>], iteration_bounds = array<i64: 8>, scalar_prefetch = 0 : i64, scratch_operands = 0 : i64, tpu.core_type = #tpu.core_type<tc>, window_params = [{transform_indices = @transform_0, window_bounds = array<i64: 1, 12, 50>}, {transform_indices = @transform_1, window_bounds = array<i64: 1, 12, 12>}, {transform_indices = @transform_2, window_bounds = array<i64: 1, 50, 20>}, {pipeline_mode = #tpu.pipeline_mode<synchronous>, transform_indices = @transform_3, window_bounds = array<i64: 4, 51, 50>}, {pipeline_mode = #tpu.pipeline_mode<synchronous>, transform_indices = @transform_4, window_bounds = array<i64: 36, 21>}, {pipeline_mode = #tpu.pipeline_mode<synchronous>, transform_indices = @transform_5, window_bounds = array<i64: 36, 50, 450>}, {pipeline_mode = #tpu.pipeline_mode<synchronous>, transform_indices = @transform_6, window_bounds = array<i64: 150, 450>}, {pipeline_mode = #tpu.pipeline_mode<synchronous>, transform_indices = @transform_7, window_bounds = array<i64: 350, 840>}, {pipeline_mode = #tpu.pipeline_mode<synchronous>, transform_indices = @transform_8, window_bounds = array<i64: 840, 2>}, {pipeline_mode = #tpu.pipeline_mode<synchronous>, transform_indices = @transform_9, window_bounds = array<i64: 1, 2042>}, {transform_indices = @transform_10, window_bounds = array<i64: 1, 1, 2>}]} {
    %c0 = arith.constant 0 : index
    %c0_0 = arith.constant 0 : index
    %0 = vector.load %arg10[%c0, %c0_0] : memref<1x2042xf32, #tpu.memory_space<vmem>>, vector<1x450xf32>
    %c0_1 = arith.constant 0 : index
    %c450 = arith.constant 450 : index
    %1 = vector.load %arg10[%c0_1, %c450] : memref<1x2042xf32, #tpu.memory_space<vmem>>, vector<1x150xf32>
    %c0_2 = arith.constant 0 : index
    %c600 = arith.constant 600 : index
    %2 = vector.load %arg10[%c0_2, %c600] : memref<1x2042xf32, #tpu.memory_space<vmem>>, vector<1x450xf32>
    %c0_3 = arith.constant 0 : index
    %c1050 = arith.constant 1050 : index
    %3 = vector.load %arg10[%c0_3, %c1050] : memref<1x2042xf32, #tpu.memory_space<vmem>>, vector<1x150xf32>
    %c0_4 = arith.constant 0 : index
    %c1200 = arith.constant 1200 : index
    %4 = vector.load %arg10[%c0_4, %c1200] : memref<1x2042xf32, #tpu.memory_space<vmem>>, vector<1x840xf32>
    %c0_5 = arith.constant 0 : index
    %c2040 = arith.constant 2040 : index
    %5 = vector.load %arg10[%c0_5, %c2040] : memref<1x2042xf32, #tpu.memory_space<vmem>>, vector<1x2xf32>
    %c0_6 = arith.constant 0 : index
    %c0_7 = arith.constant 0 : index
    %c0_8 = arith.constant 0 : index
    %6 = vector.load %arg1[%c0_6, %c0_7, %c0_8] : memref<1x12x50xf32, #tpu.memory_space<vmem>>, vector<1x12x50xf32>
    %7 = vector.shape_cast %6 : vector<1x12x50xf32> to vector<12x50xf32>
    %c0_9 = arith.constant 0 : index
    %c0_10 = arith.constant 0 : index
    %c0_11 = arith.constant 0 : index
    %8 = vector.load %arg2[%c0_9, %c0_10, %c0_11] : memref<1x12x12xf32, #tpu.memory_space<vmem>>, vector<1x12x12xf32>
    %9 = vector.shape_cast %8 : vector<1x12x12xf32> to vector<12x12xf32>
    %cst = arith.constant 0.000000e+00 : f32
    %10 = vector.broadcast %cst : f32 to vector<12x50xf32>
    %c0_12 = arith.constant 0 : index
    %c0_13 = arith.constant 0 : index
    %c0_14 = arith.constant 0 : index
    %11 = vector.load %arg4[%c0_12, %c0_13, %c0_14] : memref<4x51x50xf32, #tpu.memory_space<vmem>>, vector<1x51x50xf32>
    %12 = vector.shape_cast %11 : vector<1x51x50xf32> to vector<51x50xf32>
    %13 = vector.extract_strided_slice %12 {offsets = [0, 0], sizes = [50, 50], strides = [1, 1]} : vector<51x50xf32> to vector<50x50xf32>
    %14 = vector.extract_strided_slice %12 {offsets = [50, 0], sizes = [1, 50], strides = [1, 1]} : vector<51x50xf32> to vector<1x50xf32>
    %cst_15 = arith.constant dense<0.000000e+00> : vector<12x50xf32>
    %15 = tpu.matmul %7, %13, %cst_15 {dimension_numbers = #tpu.dot_dimension_numbers<[1], [0], [0], [1], [0, 0, 1, 1], [], []>} : vector<12x50xf32>, vector<50x50xf32>, vector<12x50xf32> -> vector<12x50xf32>
    %16 = vector.broadcast %14 : vector<1x50xf32> to vector<12x50xf32>
    %17 = arith.addf %15, %16 : vector<12x50xf32>
    %cst_16 = arith.constant 0.000000e+00 : f32
    %18 = vector.broadcast %cst_16 : f32 to vector<12x50xf32>
    %19 = arith.maximumf %17, %18 : vector<12x50xf32>
    %cst_17 = arith.constant dense<0.000000e+00> : vector<12x50xf32>
    %20 = tpu.matmul %9, %19, %cst_17 {dimension_numbers = #tpu.dot_dimension_numbers<[1], [0], [0], [1], [0, 0, 1, 1], [], []>} : vector<12x12xf32>, vector<12x50xf32>, vector<12x50xf32> -> vector<12x50xf32>
    %21 = arith.addf %7, %20 : vector<12x50xf32>
    %22 = arith.addf %10, %21 : vector<12x50xf32>
    %c1 = arith.constant 1 : index
    %c0_18 = arith.constant 0 : index
    %c0_19 = arith.constant 0 : index
    %23 = vector.load %arg4[%c1, %c0_18, %c0_19] : memref<4x51x50xf32, #tpu.memory_space<vmem>>, vector<1x51x50xf32>
    %24 = vector.shape_cast %23 : vector<1x51x50xf32> to vector<51x50xf32>
    %25 = vector.extract_strided_slice %24 {offsets = [0, 0], sizes = [50, 50], strides = [1, 1]} : vector<51x50xf32> to vector<50x50xf32>
    %26 = vector.extract_strided_slice %24 {offsets = [50, 0], sizes = [1, 50], strides = [1, 1]} : vector<51x50xf32> to vector<1x50xf32>
    %cst_20 = arith.constant dense<0.000000e+00> : vector<12x50xf32>
    %27 = tpu.matmul %21, %25, %cst_20 {dimension_numbers = #tpu.dot_dimension_numbers<[1], [0], [0], [1], [0, 0, 1, 1], [], []>} : vector<12x50xf32>, vector<50x50xf32>, vector<12x50xf32> -> vector<12x50xf32>
    %28 = vector.broadcast %26 : vector<1x50xf32> to vector<12x50xf32>
    %29 = arith.addf %27, %28 : vector<12x50xf32>
    %cst_21 = arith.constant 0.000000e+00 : f32
    %30 = vector.broadcast %cst_21 : f32 to vector<12x50xf32>
    %31 = arith.maximumf %29, %30 : vector<12x50xf32>
    %cst_22 = arith.constant dense<0.000000e+00> : vector<12x50xf32>
    %32 = tpu.matmul %9, %31, %cst_22 {dimension_numbers = #tpu.dot_dimension_numbers<[1], [0], [0], [1], [0, 0, 1, 1], [], []>} : vector<12x12xf32>, vector<12x50xf32>, vector<12x50xf32> -> vector<12x50xf32>
    %33 = arith.addf %21, %32 : vector<12x50xf32>
    %34 = arith.addf %22, %33 : vector<12x50xf32>
    %c2 = arith.constant 2 : index
    %c0_23 = arith.constant 0 : index
    %c0_24 = arith.constant 0 : index
    %35 = vector.load %arg4[%c2, %c0_23, %c0_24] : memref<4x51x50xf32, #tpu.memory_space<vmem>>, vector<1x51x50xf32>
    %36 = vector.shape_cast %35 : vector<1x51x50xf32> to vector<51x50xf32>
    %37 = vector.extract_strided_slice %36 {offsets = [0, 0], sizes = [50, 50], strides = [1, 1]} : vector<51x50xf32> to vector<50x50xf32>
    %38 = vector.extract_strided_slice %36 {offsets = [50, 0], sizes = [1, 50], strides = [1, 1]} : vector<51x50xf32> to vector<1x50xf32>
    %cst_25 = arith.constant dense<0.000000e+00> : vector<12x50xf32>
    %39 = tpu.matmul %33, %37, %cst_25 {dimension_numbers = #tpu.dot_dimension_numbers<[1], [0], [0], [1], [0, 0, 1, 1], [], []>} : vector<12x50xf32>, vector<50x50xf32>, vector<12x50xf32> -> vector<12x50xf32>
    %40 = vector.broadcast %38 : vector<1x50xf32> to vector<12x50xf32>
    %41 = arith.addf %39, %40 : vector<12x50xf32>
    %cst_26 = arith.constant 0.000000e+00 : f32
    %42 = vector.broadcast %cst_26 : f32 to vector<12x50xf32>
    %43 = arith.maximumf %41, %42 : vector<12x50xf32>
    %cst_27 = arith.constant dense<0.000000e+00> : vector<12x50xf32>
    %44 = tpu.matmul %9, %43, %cst_27 {dimension_numbers = #tpu.dot_dimension_numbers<[1], [0], [0], [1], [0, 0, 1, 1], [], []>} : vector<12x12xf32>, vector<12x50xf32>, vector<12x50xf32> -> vector<12x50xf32>
    %45 = arith.addf %33, %44 : vector<12x50xf32>
    %46 = arith.addf %34, %45 : vector<12x50xf32>
    %c3 = arith.constant 3 : index
    %c0_28 = arith.constant 0 : index
    %c0_29 = arith.constant 0 : index
    %47 = vector.load %arg4[%c3, %c0_28, %c0_29] : memref<4x51x50xf32, #tpu.memory_space<vmem>>, vector<1x51x50xf32>
    %48 = vector.shape_cast %47 : vector<1x51x50xf32> to vector<51x50xf32>
    %49 = vector.extract_strided_slice %48 {offsets = [0, 0], sizes = [50, 50], strides = [1, 1]} : vector<51x50xf32> to vector<50x50xf32>
    %50 = vector.extract_strided_slice %48 {offsets = [50, 0], sizes = [1, 50], strides = [1, 1]} : vector<51x50xf32> to vector<1x50xf32>
    %cst_30 = arith.constant dense<0.000000e+00> : vector<12x50xf32>
    %51 = tpu.matmul %45, %49, %cst_30 {dimension_numbers = #tpu.dot_dimension_numbers<[1], [0], [0], [1], [0, 0, 1, 1], [], []>} : vector<12x50xf32>, vector<50x50xf32>, vector<12x50xf32> -> vector<12x50xf32>
    %52 = vector.broadcast %50 : vector<1x50xf32> to vector<12x50xf32>
    %53 = arith.addf %51, %52 : vector<12x50xf32>
    %cst_31 = arith.constant 0.000000e+00 : f32
    %54 = vector.broadcast %cst_31 : f32 to vector<12x50xf32>
    %55 = arith.maximumf %53, %54 : vector<12x50xf32>
    %cst_32 = arith.constant dense<0.000000e+00> : vector<12x50xf32>
    %56 = tpu.matmul %9, %55, %cst_32 {dimension_numbers = #tpu.dot_dimension_numbers<[1], [0], [0], [1], [0, 0, 1, 1], [], []>} : vector<12x12xf32>, vector<12x50xf32>, vector<12x50xf32> -> vector<12x50xf32>
    %57 = arith.addf %45, %56 : vector<12x50xf32>
    %58 = arith.addf %46, %57 : vector<12x50xf32>
    %cst_33 = arith.constant dense<0.000000e+00> : vector<50xf32>
    %59 = vector.multi_reduction <add>, %58, %cst_33 [0] : vector<12x50xf32> to vector<50xf32>
    %60 = vector.shape_cast %59 : vector<50xf32> to vector<1x50xf32>
    %cst_34 = arith.constant 0.0833333358 : f32
    %61 = vector.broadcast %cst_34 : f32 to vector<1x50xf32>
    %62 = arith.mulf %60, %61 : vector<1x50xf32>
    %c0_35 = arith.constant 0 : index
    %c0_36 = arith.constant 0 : index
    %63 = vector.load %arg5[%c0_35, %c0_36] : memref<36x21xf32, #tpu.memory_space<vmem>>, vector<36x21xf32>
    %64 = vector.extract_strided_slice %63 {offsets = [0, 0], sizes = [36, 20], strides = [1, 1]} : vector<36x21xf32> to vector<36x20xf32>
    %c0_37 = arith.constant 0 : index
    %c0_38 = arith.constant 0 : index
    %c0_39 = arith.constant 0 : index
    %65 = vector.load %arg3[%c0_37, %c0_38, %c0_39] : memref<1x50x20xf32, #tpu.memory_space<vmem>>, vector<1x50x20xf32>
    %66 = vector.shape_cast %65 : vector<1x50x20xf32> to vector<50x20xf32>
    %cst_40 = arith.constant dense<0.000000e+00> : vector<36x50xf32>
    %67 = tpu.matmul %64, %66, %cst_40 {dimension_numbers = #tpu.dot_dimension_numbers<[1], [1], [0], [0], [0, 0, 1, 0], [], []>} : vector<36x20xf32>, vector<50x20xf32>, vector<36x50xf32> -> vector<36x50xf32>
    %68 = vector.extract_strided_slice %63 {offsets = [0, 20], sizes = [36, 1], strides = [1, 1]} : vector<36x21xf32> to vector<36x1xf32>
    %69 = vector.broadcast %68 : vector<36x1xf32> to vector<36x50xf32>
    %70 = arith.addf %67, %69 : vector<36x50xf32>
    %cst_41 = arith.constant 0.000000e+00 : f32
    %71 = vector.broadcast %cst_41 : f32 to vector<36x50xf32>
    %72 = arith.maximumf %70, %71 : vector<36x50xf32>
    %73 = vector.extract_strided_slice %72 {offsets = [0, 0], sizes = [1, 50], strides = [1, 1]} : vector<36x50xf32> to vector<1x50xf32>
    %74 = arith.truncf %73 : vector<1x50xf32> to vector<1x50xbf16>
    %c0_42 = arith.constant 0 : index
    %c0_43 = arith.constant 0 : index
    %c0_44 = arith.constant 0 : index
    %75 = vector.load %arg6[%c0_42, %c0_43, %c0_44] : memref<36x50x450xbf16, #tpu.memory_space<vmem>>, vector<1x50x450xbf16>
    %76 = vector.shape_cast %75 : vector<1x50x450xbf16> to vector<50x450xbf16>
    %cst_45 = arith.constant dense<0.000000e+00> : vector<1x450xf32>
    %77 = tpu.matmul %74, %76, %cst_45 {dimension_numbers = #tpu.dot_dimension_numbers<[1], [0], [0], [1], [0, 0, 1, 1], [], []>} : vector<1x50xbf16>, vector<50x450xbf16>, vector<1x450xf32> -> vector<1x450xf32>
    %78 = arith.addf %0, %77 : vector<1x450xf32>
    %79 = vector.extract_strided_slice %72 {offsets = [1, 0], sizes = [1, 50], strides = [1, 1]} : vector<36x50xf32> to vector<1x50xf32>
    %80 = arith.truncf %79 : vector<1x50xf32> to vector<1x50xbf16>
    %c1_46 = arith.constant 1 : index
    %c0_47 = arith.constant 0 : index
    %c0_48 = arith.constant 0 : index
    %81 = vector.load %arg6[%c1_46, %c0_47, %c0_48] : memref<36x50x450xbf16, #tpu.memory_space<vmem>>, vector<1x50x450xbf16>
    %82 = vector.shape_cast %81 : vector<1x50x450xbf16> to vector<50x450xbf16>
    %cst_49 = arith.constant dense<0.000000e+00> : vector<1x450xf32>
    %83 = tpu.matmul %80, %82, %cst_49 {dimension_numbers = #tpu.dot_dimension_numbers<[1], [0], [0], [1], [0, 0, 1, 1], [], []>} : vector<1x50xbf16>, vector<50x450xbf16>, vector<1x450xf32> -> vector<1x450xf32>
    %84 = arith.addf %78, %83 : vector<1x450xf32>
    %85 = vector.extract_strided_slice %72 {offsets = [2, 0], sizes = [1, 50], strides = [1, 1]} : vector<36x50xf32> to vector<1x50xf32>
    %86 = arith.truncf %85 : vector<1x50xf32> to vector<1x50xbf16>
    %c2_50 = arith.constant 2 : index
    %c0_51 = arith.constant 0 : index
    %c0_52 = arith.constant 0 : index
    %87 = vector.load %arg6[%c2_50, %c0_51, %c0_52] : memref<36x50x450xbf16, #tpu.memory_space<vmem>>, vector<1x50x450xbf16>
    %88 = vector.shape_cast %87 : vector<1x50x450xbf16> to vector<50x450xbf16>
    %cst_53 = arith.constant dense<0.000000e+00> : vector<1x450xf32>
    %89 = tpu.matmul %86, %88, %cst_53 {dimension_numbers = #tpu.dot_dimension_numbers<[1], [0], [0], [1], [0, 0, 1, 1], [], []>} : vector<1x50xbf16>, vector<50x450xbf16>, vector<1x450xf32> -> vector<1x450xf32>
    %90 = arith.addf %84, %89 : vector<1x450xf32>
    %91 = vector.extract_strided_slice %72 {offsets = [3, 0], sizes = [1, 50], strides = [1, 1]} : vector<36x50xf32> to vector<1x50xf32>
    %92 = arith.truncf %91 : vector<1x50xf32> to vector<1x50xbf16>
    %c3_54 = arith.constant 3 : index
    %c0_55 = arith.constant 0 : index
    %c0_56 = arith.constant 0 : index
    %93 = vector.load %arg6[%c3_54, %c0_55, %c0_56] : memref<36x50x450xbf16, #tpu.memory_space<vmem>>, vector<1x50x450xbf16>
    %94 = vector.shape_cast %93 : vector<1x50x450xbf16> to vector<50x450xbf16>
    %cst_57 = arith.constant dense<0.000000e+00> : vector<1x450xf32>
    %95 = tpu.matmul %92, %94, %cst_57 {dimension_numbers = #tpu.dot_dimension_numbers<[1], [0], [0], [1], [0, 0, 1, 1], [], []>} : vector<1x50xbf16>, vector<50x450xbf16>, vector<1x450xf32> -> vector<1x450xf32>
    %96 = arith.addf %90, %95 : vector<1x450xf32>
    %97 = vector.extract_strided_slice %72 {offsets = [4, 0], sizes = [1, 50], strides = [1, 1]} : vector<36x50xf32> to vector<1x50xf32>
    %98 = arith.truncf %97 : vector<1x50xf32> to vector<1x50xbf16>
    %c4 = arith.constant 4 : index
    %c0_58 = arith.constant 0 : index
    %c0_59 = arith.constant 0 : index
    %99 = vector.load %arg6[%c4, %c0_58, %c0_59] : memref<36x50x450xbf16, #tpu.memory_space<vmem>>, vector<1x50x450xbf16>
    %100 = vector.shape_cast %99 : vector<1x50x450xbf16> to vector<50x450xbf16>
    %cst_60 = arith.constant dense<0.000000e+00> : vector<1x450xf32>
    %101 = tpu.matmul %98, %100, %cst_60 {dimension_numbers = #tpu.dot_dimension_numbers<[1], [0], [0], [1], [0, 0, 1, 1], [], []>} : vector<1x50xbf16>, vector<50x450xbf16>, vector<1x450xf32> -> vector<1x450xf32>
    %102 = arith.addf %96, %101 : vector<1x450xf32>
    %103 = vector.extract_strided_slice %72 {offsets = [5, 0], sizes = [1, 50], strides = [1, 1]} : vector<36x50xf32> to vector<1x50xf32>
    %104 = arith.truncf %103 : vector<1x50xf32> to vector<1x50xbf16>
    %c5 = arith.constant 5 : index
    %c0_61 = arith.constant 0 : index
    %c0_62 = arith.constant 0 : index
    %105 = vector.load %arg6[%c5, %c0_61, %c0_62] : memref<36x50x450xbf16, #tpu.memory_space<vmem>>, vector<1x50x450xbf16>
    %106 = vector.shape_cast %105 : vector<1x50x450xbf16> to vector<50x450xbf16>
    %cst_63 = arith.constant dense<0.000000e+00> : vector<1x450xf32>
    %107 = tpu.matmul %104, %106, %cst_63 {dimension_numbers = #tpu.dot_dimension_numbers<[1], [0], [0], [1], [0, 0, 1, 1], [], []>} : vector<1x50xbf16>, vector<50x450xbf16>, vector<1x450xf32> -> vector<1x450xf32>
    %108 = arith.addf %102, %107 : vector<1x450xf32>
    %109 = vector.extract_strided_slice %72 {offsets = [6, 0], sizes = [1, 50], strides = [1, 1]} : vector<36x50xf32> to vector<1x50xf32>
    %110 = arith.truncf %109 : vector<1x50xf32> to vector<1x50xbf16>
    %c6 = arith.constant 6 : index
    %c0_64 = arith.constant 0 : index
    %c0_65 = arith.constant 0 : index
    %111 = vector.load %arg6[%c6, %c0_64, %c0_65] : memref<36x50x450xbf16, #tpu.memory_space<vmem>>, vector<1x50x450xbf16>
    %112 = vector.shape_cast %111 : vector<1x50x450xbf16> to vector<50x450xbf16>
    %cst_66 = arith.constant dense<0.000000e+00> : vector<1x450xf32>
    %113 = tpu.matmul %110, %112, %cst_66 {dimension_numbers = #tpu.dot_dimension_numbers<[1], [0], [0], [1], [0, 0, 1, 1], [], []>} : vector<1x50xbf16>, vector<50x450xbf16>, vector<1x450xf32> -> vector<1x450xf32>
    %114 = arith.addf %108, %113 : vector<1x450xf32>
    %115 = vector.extract_strided_slice %72 {offsets = [7, 0], sizes = [1, 50], strides = [1, 1]} : vector<36x50xf32> to vector<1x50xf32>
    %116 = arith.truncf %115 : vector<1x50xf32> to vector<1x50xbf16>
    %c7 = arith.constant 7 : index
    %c0_67 = arith.constant 0 : index
    %c0_68 = arith.constant 0 : index
    %117 = vector.load %arg6[%c7, %c0_67, %c0_68] : memref<36x50x450xbf16, #tpu.memory_space<vmem>>, vector<1x50x450xbf16>
    %118 = vector.shape_cast %117 : vector<1x50x450xbf16> to vector<50x450xbf16>
    %cst_69 = arith.constant dense<0.000000e+00> : vector<1x450xf32>
    %119 = tpu.matmul %116, %118, %cst_69 {dimension_numbers = #tpu.dot_dimension_numbers<[1], [0], [0], [1], [0, 0, 1, 1], [], []>} : vector<1x50xbf16>, vector<50x450xbf16>, vector<1x450xf32> -> vector<1x450xf32>
    %120 = arith.addf %114, %119 : vector<1x450xf32>
    %121 = vector.extract_strided_slice %72 {offsets = [8, 0], sizes = [1, 50], strides = [1, 1]} : vector<36x50xf32> to vector<1x50xf32>
    %122 = arith.truncf %121 : vector<1x50xf32> to vector<1x50xbf16>
    %c8 = arith.constant 8 : index
    %c0_70 = arith.constant 0 : index
    %c0_71 = arith.constant 0 : index
    %123 = vector.load %arg6[%c8, %c0_70, %c0_71] : memref<36x50x450xbf16, #tpu.memory_space<vmem>>, vector<1x50x450xbf16>
    %124 = vector.shape_cast %123 : vector<1x50x450xbf16> to vector<50x450xbf16>
    %cst_72 = arith.constant dense<0.000000e+00> : vector<1x450xf32>
    %125 = tpu.matmul %122, %124, %cst_72 {dimension_numbers = #tpu.dot_dimension_numbers<[1], [0], [0], [1], [0, 0, 1, 1], [], []>} : vector<1x50xbf16>, vector<50x450xbf16>, vector<1x450xf32> -> vector<1x450xf32>
    %126 = arith.addf %120, %125 : vector<1x450xf32>
    %127 = vector.extract_strided_slice %72 {offsets = [9, 0], sizes = [1, 50], strides = [1, 1]} : vector<36x50xf32> to vector<1x50xf32>
    %128 = arith.truncf %127 : vector<1x50xf32> to vector<1x50xbf16>
    %c9 = arith.constant 9 : index
    %c0_73 = arith.constant 0 : index
    %c0_74 = arith.constant 0 : index
    %129 = vector.load %arg6[%c9, %c0_73, %c0_74] : memref<36x50x450xbf16, #tpu.memory_space<vmem>>, vector<1x50x450xbf16>
    %130 = vector.shape_cast %129 : vector<1x50x450xbf16> to vector<50x450xbf16>
    %cst_75 = arith.constant dense<0.000000e+00> : vector<1x450xf32>
    %131 = tpu.matmul %128, %130, %cst_75 {dimension_numbers = #tpu.dot_dimension_numbers<[1], [0], [0], [1], [0, 0, 1, 1], [], []>} : vector<1x50xbf16>, vector<50x450xbf16>, vector<1x450xf32> -> vector<1x450xf32>
    %132 = arith.addf %126, %131 : vector<1x450xf32>
    %133 = vector.extract_strided_slice %72 {offsets = [10, 0], sizes = [1, 50], strides = [1, 1]} : vector<36x50xf32> to vector<1x50xf32>
    %134 = arith.truncf %133 : vector<1x50xf32> to vector<1x50xbf16>
    %c10 = arith.constant 10 : index
    %c0_76 = arith.constant 0 : index
    %c0_77 = arith.constant 0 : index
    %135 = vector.load %arg6[%c10, %c0_76, %c0_77] : memref<36x50x450xbf16, #tpu.memory_space<vmem>>, vector<1x50x450xbf16>
    %136 = vector.shape_cast %135 : vector<1x50x450xbf16> to vector<50x450xbf16>
    %cst_78 = arith.constant dense<0.000000e+00> : vector<1x450xf32>
    %137 = tpu.matmul %134, %136, %cst_78 {dimension_numbers = #tpu.dot_dimension_numbers<[1], [0], [0], [1], [0, 0, 1, 1], [], []>} : vector<1x50xbf16>, vector<50x450xbf16>, vector<1x450xf32> -> vector<1x450xf32>
    %138 = arith.addf %132, %137 : vector<1x450xf32>
    %139 = vector.extract_strided_slice %72 {offsets = [11, 0], sizes = [1, 50], strides = [1, 1]} : vector<36x50xf32> to vector<1x50xf32>
    %140 = arith.truncf %139 : vector<1x50xf32> to vector<1x50xbf16>
    %c11 = arith.constant 11 : index
    %c0_79 = arith.constant 0 : index
    %c0_80 = arith.constant 0 : index
    %141 = vector.load %arg6[%c11, %c0_79, %c0_80] : memref<36x50x450xbf16, #tpu.memory_space<vmem>>, vector<1x50x450xbf16>
    %142 = vector.shape_cast %141 : vector<1x50x450xbf16> to vector<50x450xbf16>
    %cst_81 = arith.constant dense<0.000000e+00> : vector<1x450xf32>
    %143 = tpu.matmul %140, %142, %cst_81 {dimension_numbers = #tpu.dot_dimension_numbers<[1], [0], [0], [1], [0, 0, 1, 1], [], []>} : vector<1x50xbf16>, vector<50x450xbf16>, vector<1x450xf32> -> vector<1x450xf32>
    %144 = arith.addf %138, %143 : vector<1x450xf32>
    %145 = vector.extract_strided_slice %72 {offsets = [12, 0], sizes = [1, 50], strides = [1, 1]} : vector<36x50xf32> to vector<1x50xf32>
    %146 = arith.truncf %145 : vector<1x50xf32> to vector<1x50xbf16>
    %c12 = arith.constant 12 : index
    %c0_82 = arith.constant 0 : index
    %c0_83 = arith.constant 0 : index
    %147 = vector.load %arg6[%c12, %c0_82, %c0_83] : memref<36x50x450xbf16, #tpu.memory_space<vmem>>, vector<1x50x450xbf16>
    %148 = vector.shape_cast %147 : vector<1x50x450xbf16> to vector<50x450xbf16>
    %cst_84 = arith.constant dense<0.000000e+00> : vector<1x450xf32>
    %149 = tpu.matmul %146, %148, %cst_84 {dimension_numbers = #tpu.dot_dimension_numbers<[1], [0], [0], [1], [0, 0, 1, 1], [], []>} : vector<1x50xbf16>, vector<50x450xbf16>, vector<1x450xf32> -> vector<1x450xf32>
    %150 = arith.addf %144, %149 : vector<1x450xf32>
    %151 = vector.extract_strided_slice %72 {offsets = [13, 0], sizes = [1, 50], strides = [1, 1]} : vector<36x50xf32> to vector<1x50xf32>
    %152 = arith.truncf %151 : vector<1x50xf32> to vector<1x50xbf16>
    %c13 = arith.constant 13 : index
    %c0_85 = arith.constant 0 : index
    %c0_86 = arith.constant 0 : index
    %153 = vector.load %arg6[%c13, %c0_85, %c0_86] : memref<36x50x450xbf16, #tpu.memory_space<vmem>>, vector<1x50x450xbf16>
    %154 = vector.shape_cast %153 : vector<1x50x450xbf16> to vector<50x450xbf16>
    %cst_87 = arith.constant dense<0.000000e+00> : vector<1x450xf32>
    %155 = tpu.matmul %152, %154, %cst_87 {dimension_numbers = #tpu.dot_dimension_numbers<[1], [0], [0], [1], [0, 0, 1, 1], [], []>} : vector<1x50xbf16>, vector<50x450xbf16>, vector<1x450xf32> -> vector<1x450xf32>
    %156 = arith.addf %150, %155 : vector<1x450xf32>
    %157 = vector.extract_strided_slice %72 {offsets = [14, 0], sizes = [1, 50], strides = [1, 1]} : vector<36x50xf32> to vector<1x50xf32>
    %158 = arith.truncf %157 : vector<1x50xf32> to vector<1x50xbf16>
    %c14 = arith.constant 14 : index
    %c0_88 = arith.constant 0 : index
    %c0_89 = arith.constant 0 : index
    %159 = vector.load %arg6[%c14, %c0_88, %c0_89] : memref<36x50x450xbf16, #tpu.memory_space<vmem>>, vector<1x50x450xbf16>
    %160 = vector.shape_cast %159 : vector<1x50x450xbf16> to vector<50x450xbf16>
    %cst_90 = arith.constant dense<0.000000e+00> : vector<1x450xf32>
    %161 = tpu.matmul %158, %160, %cst_90 {dimension_numbers = #tpu.dot_dimension_numbers<[1], [0], [0], [1], [0, 0, 1, 1], [], []>} : vector<1x50xbf16>, vector<50x450xbf16>, vector<1x450xf32> -> vector<1x450xf32>
    %162 = arith.addf %156, %161 : vector<1x450xf32>
    %163 = vector.extract_strided_slice %72 {offsets = [15, 0], sizes = [1, 50], strides = [1, 1]} : vector<36x50xf32> to vector<1x50xf32>
    %164 = arith.truncf %163 : vector<1x50xf32> to vector<1x50xbf16>
    %c15 = arith.constant 15 : index
    %c0_91 = arith.constant 0 : index
    %c0_92 = arith.constant 0 : index
    %165 = vector.load %arg6[%c15, %c0_91, %c0_92] : memref<36x50x450xbf16, #tpu.memory_space<vmem>>, vector<1x50x450xbf16>
    %166 = vector.shape_cast %165 : vector<1x50x450xbf16> to vector<50x450xbf16>
    %cst_93 = arith.constant dense<0.000000e+00> : vector<1x450xf32>
    %167 = tpu.matmul %164, %166, %cst_93 {dimension_numbers = #tpu.dot_dimension_numbers<[1], [0], [0], [1], [0, 0, 1, 1], [], []>} : vector<1x50xbf16>, vector<50x450xbf16>, vector<1x450xf32> -> vector<1x450xf32>
    %168 = arith.addf %162, %167 : vector<1x450xf32>
    %169 = vector.extract_strided_slice %72 {offsets = [16, 0], sizes = [1, 50], strides = [1, 1]} : vector<36x50xf32> to vector<1x50xf32>
    %170 = arith.truncf %169 : vector<1x50xf32> to vector<1x50xbf16>
    %c16 = arith.constant 16 : index
    %c0_94 = arith.constant 0 : index
    %c0_95 = arith.constant 0 : index
    %171 = vector.load %arg6[%c16, %c0_94, %c0_95] : memref<36x50x450xbf16, #tpu.memory_space<vmem>>, vector<1x50x450xbf16>
    %172 = vector.shape_cast %171 : vector<1x50x450xbf16> to vector<50x450xbf16>
    %cst_96 = arith.constant dense<0.000000e+00> : vector<1x450xf32>
    %173 = tpu.matmul %170, %172, %cst_96 {dimension_numbers = #tpu.dot_dimension_numbers<[1], [0], [0], [1], [0, 0, 1, 1], [], []>} : vector<1x50xbf16>, vector<50x450xbf16>, vector<1x450xf32> -> vector<1x450xf32>
    %174 = arith.addf %168, %173 : vector<1x450xf32>
    %175 = vector.extract_strided_slice %72 {offsets = [17, 0], sizes = [1, 50], strides = [1, 1]} : vector<36x50xf32> to vector<1x50xf32>
    %176 = arith.truncf %175 : vector<1x50xf32> to vector<1x50xbf16>
    %c17 = arith.constant 17 : index
    %c0_97 = arith.constant 0 : index
    %c0_98 = arith.constant 0 : index
    %177 = vector.load %arg6[%c17, %c0_97, %c0_98] : memref<36x50x450xbf16, #tpu.memory_space<vmem>>, vector<1x50x450xbf16>
    %178 = vector.shape_cast %177 : vector<1x50x450xbf16> to vector<50x450xbf16>
    %cst_99 = arith.constant dense<0.000000e+00> : vector<1x450xf32>
    %179 = tpu.matmul %176, %178, %cst_99 {dimension_numbers = #tpu.dot_dimension_numbers<[1], [0], [0], [1], [0, 0, 1, 1], [], []>} : vector<1x50xbf16>, vector<50x450xbf16>, vector<1x450xf32> -> vector<1x450xf32>
    %180 = arith.addf %174, %179 : vector<1x450xf32>
    %181 = vector.extract_strided_slice %72 {offsets = [18, 0], sizes = [1, 50], strides = [1, 1]} : vector<36x50xf32> to vector<1x50xf32>
    %182 = arith.truncf %181 : vector<1x50xf32> to vector<1x50xbf16>
    %c18 = arith.constant 18 : index
    %c0_100 = arith.constant 0 : index
    %c0_101 = arith.constant 0 : index
    %183 = vector.load %arg6[%c18, %c0_100, %c0_101] : memref<36x50x450xbf16, #tpu.memory_space<vmem>>, vector<1x50x450xbf16>
    %184 = vector.shape_cast %183 : vector<1x50x450xbf16> to vector<50x450xbf16>
    %cst_102 = arith.constant dense<0.000000e+00> : vector<1x450xf32>
    %185 = tpu.matmul %182, %184, %cst_102 {dimension_numbers = #tpu.dot_dimension_numbers<[1], [0], [0], [1], [0, 0, 1, 1], [], []>} : vector<1x50xbf16>, vector<50x450xbf16>, vector<1x450xf32> -> vector<1x450xf32>
    %186 = arith.addf %180, %185 : vector<1x450xf32>
    %187 = vector.extract_strided_slice %72 {offsets = [19, 0], sizes = [1, 50], strides = [1, 1]} : vector<36x50xf32> to vector<1x50xf32>
    %188 = arith.truncf %187 : vector<1x50xf32> to vector<1x50xbf16>
    %c19 = arith.constant 19 : index
    %c0_103 = arith.constant 0 : index
    %c0_104 = arith.constant 0 : index
    %189 = vector.load %arg6[%c19, %c0_103, %c0_104] : memref<36x50x450xbf16, #tpu.memory_space<vmem>>, vector<1x50x450xbf16>
    %190 = vector.shape_cast %189 : vector<1x50x450xbf16> to vector<50x450xbf16>
    %cst_105 = arith.constant dense<0.000000e+00> : vector<1x450xf32>
    %191 = tpu.matmul %188, %190, %cst_105 {dimension_numbers = #tpu.dot_dimension_numbers<[1], [0], [0], [1], [0, 0, 1, 1], [], []>} : vector<1x50xbf16>, vector<50x450xbf16>, vector<1x450xf32> -> vector<1x450xf32>
    %192 = arith.addf %186, %191 : vector<1x450xf32>
    %193 = vector.extract_strided_slice %72 {offsets = [20, 0], sizes = [1, 50], strides = [1, 1]} : vector<36x50xf32> to vector<1x50xf32>
    %194 = arith.truncf %193 : vector<1x50xf32> to vector<1x50xbf16>
    %c20 = arith.constant 20 : index
    %c0_106 = arith.constant 0 : index
    %c0_107 = arith.constant 0 : index
    %195 = vector.load %arg6[%c20, %c0_106, %c0_107] : memref<36x50x450xbf16, #tpu.memory_space<vmem>>, vector<1x50x450xbf16>
    %196 = vector.shape_cast %195 : vector<1x50x450xbf16> to vector<50x450xbf16>
    %cst_108 = arith.constant dense<0.000000e+00> : vector<1x450xf32>
    %197 = tpu.matmul %194, %196, %cst_108 {dimension_numbers = #tpu.dot_dimension_numbers<[1], [0], [0], [1], [0, 0, 1, 1], [], []>} : vector<1x50xbf16>, vector<50x450xbf16>, vector<1x450xf32> -> vector<1x450xf32>
    %198 = arith.addf %192, %197 : vector<1x450xf32>
    %199 = vector.extract_strided_slice %72 {offsets = [21, 0], sizes = [1, 50], strides = [1, 1]} : vector<36x50xf32> to vector<1x50xf32>
    %200 = arith.truncf %199 : vector<1x50xf32> to vector<1x50xbf16>
    %c21 = arith.constant 21 : index
    %c0_109 = arith.constant 0 : index
    %c0_110 = arith.constant 0 : index
    %201 = vector.load %arg6[%c21, %c0_109, %c0_110] : memref<36x50x450xbf16, #tpu.memory_space<vmem>>, vector<1x50x450xbf16>
    %202 = vector.shape_cast %201 : vector<1x50x450xbf16> to vector<50x450xbf16>
    %cst_111 = arith.constant dense<0.000000e+00> : vector<1x450xf32>
    %203 = tpu.matmul %200, %202, %cst_111 {dimension_numbers = #tpu.dot_dimension_numbers<[1], [0], [0], [1], [0, 0, 1, 1], [], []>} : vector<1x50xbf16>, vector<50x450xbf16>, vector<1x450xf32> -> vector<1x450xf32>
    %204 = arith.addf %198, %203 : vector<1x450xf32>
    %205 = vector.extract_strided_slice %72 {offsets = [22, 0], sizes = [1, 50], strides = [1, 1]} : vector<36x50xf32> to vector<1x50xf32>
    %206 = arith.truncf %205 : vector<1x50xf32> to vector<1x50xbf16>
    %c22 = arith.constant 22 : index
    %c0_112 = arith.constant 0 : index
    %c0_113 = arith.constant 0 : index
    %207 = vector.load %arg6[%c22, %c0_112, %c0_113] : memref<36x50x450xbf16, #tpu.memory_space<vmem>>, vector<1x50x450xbf16>
    %208 = vector.shape_cast %207 : vector<1x50x450xbf16> to vector<50x450xbf16>
    %cst_114 = arith.constant dense<0.000000e+00> : vector<1x450xf32>
    %209 = tpu.matmul %206, %208, %cst_114 {dimension_numbers = #tpu.dot_dimension_numbers<[1], [0], [0], [1], [0, 0, 1, 1], [], []>} : vector<1x50xbf16>, vector<50x450xbf16>, vector<1x450xf32> -> vector<1x450xf32>
    %210 = arith.addf %204, %209 : vector<1x450xf32>
    %211 = vector.extract_strided_slice %72 {offsets = [23, 0], sizes = [1, 50], strides = [1, 1]} : vector<36x50xf32> to vector<1x50xf32>
    %212 = arith.truncf %211 : vector<1x50xf32> to vector<1x50xbf16>
    %c23 = arith.constant 23 : index
    %c0_115 = arith.constant 0 : index
    %c0_116 = arith.constant 0 : index
    %213 = vector.load %arg6[%c23, %c0_115, %c0_116] : memref<36x50x450xbf16, #tpu.memory_space<vmem>>, vector<1x50x450xbf16>
    %214 = vector.shape_cast %213 : vector<1x50x450xbf16> to vector<50x450xbf16>
    %cst_117 = arith.constant dense<0.000000e+00> : vector<1x450xf32>
    %215 = tpu.matmul %212, %214, %cst_117 {dimension_numbers = #tpu.dot_dimension_numbers<[1], [0], [0], [1], [0, 0, 1, 1], [], []>} : vector<1x50xbf16>, vector<50x450xbf16>, vector<1x450xf32> -> vector<1x450xf32>
    %216 = arith.addf %210, %215 : vector<1x450xf32>
    %217 = vector.extract_strided_slice %72 {offsets = [24, 0], sizes = [1, 50], strides = [1, 1]} : vector<36x50xf32> to vector<1x50xf32>
    %218 = arith.truncf %217 : vector<1x50xf32> to vector<1x50xbf16>
    %c24 = arith.constant 24 : index
    %c0_118 = arith.constant 0 : index
    %c0_119 = arith.constant 0 : index
    %219 = vector.load %arg6[%c24, %c0_118, %c0_119] : memref<36x50x450xbf16, #tpu.memory_space<vmem>>, vector<1x50x450xbf16>
    %220 = vector.shape_cast %219 : vector<1x50x450xbf16> to vector<50x450xbf16>
    %cst_120 = arith.constant dense<0.000000e+00> : vector<1x450xf32>
    %221 = tpu.matmul %218, %220, %cst_120 {dimension_numbers = #tpu.dot_dimension_numbers<[1], [0], [0], [1], [0, 0, 1, 1], [], []>} : vector<1x50xbf16>, vector<50x450xbf16>, vector<1x450xf32> -> vector<1x450xf32>
    %222 = arith.addf %216, %221 : vector<1x450xf32>
    %223 = vector.extract_strided_slice %72 {offsets = [25, 0], sizes = [1, 50], strides = [1, 1]} : vector<36x50xf32> to vector<1x50xf32>
    %224 = arith.truncf %223 : vector<1x50xf32> to vector<1x50xbf16>
    %c25 = arith.constant 25 : index
    %c0_121 = arith.constant 0 : index
    %c0_122 = arith.constant 0 : index
    %225 = vector.load %arg6[%c25, %c0_121, %c0_122] : memref<36x50x450xbf16, #tpu.memory_space<vmem>>, vector<1x50x450xbf16>
    %226 = vector.shape_cast %225 : vector<1x50x450xbf16> to vector<50x450xbf16>
    %cst_123 = arith.constant dense<0.000000e+00> : vector<1x450xf32>
    %227 = tpu.matmul %224, %226, %cst_123 {dimension_numbers = #tpu.dot_dimension_numbers<[1], [0], [0], [1], [0, 0, 1, 1], [], []>} : vector<1x50xbf16>, vector<50x450xbf16>, vector<1x450xf32> -> vector<1x450xf32>
    %228 = arith.addf %222, %227 : vector<1x450xf32>
    %229 = vector.extract_strided_slice %72 {offsets = [26, 0], sizes = [1, 50], strides = [1, 1]} : vector<36x50xf32> to vector<1x50xf32>
    %230 = arith.truncf %229 : vector<1x50xf32> to vector<1x50xbf16>
    %c26 = arith.constant 26 : index
    %c0_124 = arith.constant 0 : index
    %c0_125 = arith.constant 0 : index
    %231 = vector.load %arg6[%c26, %c0_124, %c0_125] : memref<36x50x450xbf16, #tpu.memory_space<vmem>>, vector<1x50x450xbf16>
    %232 = vector.shape_cast %231 : vector<1x50x450xbf16> to vector<50x450xbf16>
    %cst_126 = arith.constant dense<0.000000e+00> : vector<1x450xf32>
    %233 = tpu.matmul %230, %232, %cst_126 {dimension_numbers = #tpu.dot_dimension_numbers<[1], [0], [0], [1], [0, 0, 1, 1], [], []>} : vector<1x50xbf16>, vector<50x450xbf16>, vector<1x450xf32> -> vector<1x450xf32>
    %234 = arith.addf %228, %233 : vector<1x450xf32>
    %235 = vector.extract_strided_slice %72 {offsets = [27, 0], sizes = [1, 50], strides = [1, 1]} : vector<36x50xf32> to vector<1x50xf32>
    %236 = arith.truncf %235 : vector<1x50xf32> to vector<1x50xbf16>
    %c27 = arith.constant 27 : index
    %c0_127 = arith.constant 0 : index
    %c0_128 = arith.constant 0 : index
    %237 = vector.load %arg6[%c27, %c0_127, %c0_128] : memref<36x50x450xbf16, #tpu.memory_space<vmem>>, vector<1x50x450xbf16>
    %238 = vector.shape_cast %237 : vector<1x50x450xbf16> to vector<50x450xbf16>
    %cst_129 = arith.constant dense<0.000000e+00> : vector<1x450xf32>
    %239 = tpu.matmul %236, %238, %cst_129 {dimension_numbers = #tpu.dot_dimension_numbers<[1], [0], [0], [1], [0, 0, 1, 1], [], []>} : vector<1x50xbf16>, vector<50x450xbf16>, vector<1x450xf32> -> vector<1x450xf32>
    %240 = arith.addf %234, %239 : vector<1x450xf32>
    %241 = vector.extract_strided_slice %72 {offsets = [28, 0], sizes = [1, 50], strides = [1, 1]} : vector<36x50xf32> to vector<1x50xf32>
    %242 = arith.truncf %241 : vector<1x50xf32> to vector<1x50xbf16>
    %c28 = arith.constant 28 : index
    %c0_130 = arith.constant 0 : index
    %c0_131 = arith.constant 0 : index
    %243 = vector.load %arg6[%c28, %c0_130, %c0_131] : memref<36x50x450xbf16, #tpu.memory_space<vmem>>, vector<1x50x450xbf16>
    %244 = vector.shape_cast %243 : vector<1x50x450xbf16> to vector<50x450xbf16>
    %cst_132 = arith.constant dense<0.000000e+00> : vector<1x450xf32>
    %245 = tpu.matmul %242, %244, %cst_132 {dimension_numbers = #tpu.dot_dimension_numbers<[1], [0], [0], [1], [0, 0, 1, 1], [], []>} : vector<1x50xbf16>, vector<50x450xbf16>, vector<1x450xf32> -> vector<1x450xf32>
    %246 = arith.addf %240, %245 : vector<1x450xf32>
    %247 = vector.extract_strided_slice %72 {offsets = [29, 0], sizes = [1, 50], strides = [1, 1]} : vector<36x50xf32> to vector<1x50xf32>
    %248 = arith.truncf %247 : vector<1x50xf32> to vector<1x50xbf16>
    %c29 = arith.constant 29 : index
    %c0_133 = arith.constant 0 : index
    %c0_134 = arith.constant 0 : index
    %249 = vector.load %arg6[%c29, %c0_133, %c0_134] : memref<36x50x450xbf16, #tpu.memory_space<vmem>>, vector<1x50x450xbf16>
    %250 = vector.shape_cast %249 : vector<1x50x450xbf16> to vector<50x450xbf16>
    %cst_135 = arith.constant dense<0.000000e+00> : vector<1x450xf32>
    %251 = tpu.matmul %248, %250, %cst_135 {dimension_numbers = #tpu.dot_dimension_numbers<[1], [0], [0], [1], [0, 0, 1, 1], [], []>} : vector<1x50xbf16>, vector<50x450xbf16>, vector<1x450xf32> -> vector<1x450xf32>
    %252 = arith.addf %246, %251 : vector<1x450xf32>
    %253 = vector.extract_strided_slice %72 {offsets = [30, 0], sizes = [1, 50], strides = [1, 1]} : vector<36x50xf32> to vector<1x50xf32>
    %254 = arith.truncf %253 : vector<1x50xf32> to vector<1x50xbf16>
    %c30 = arith.constant 30 : index
    %c0_136 = arith.constant 0 : index
    %c0_137 = arith.constant 0 : index
    %255 = vector.load %arg6[%c30, %c0_136, %c0_137] : memref<36x50x450xbf16, #tpu.memory_space<vmem>>, vector<1x50x450xbf16>
    %256 = vector.shape_cast %255 : vector<1x50x450xbf16> to vector<50x450xbf16>
    %cst_138 = arith.constant dense<0.000000e+00> : vector<1x450xf32>
    %257 = tpu.matmul %254, %256, %cst_138 {dimension_numbers = #tpu.dot_dimension_numbers<[1], [0], [0], [1], [0, 0, 1, 1], [], []>} : vector<1x50xbf16>, vector<50x450xbf16>, vector<1x450xf32> -> vector<1x450xf32>
    %258 = arith.addf %252, %257 : vector<1x450xf32>
    %259 = vector.extract_strided_slice %72 {offsets = [31, 0], sizes = [1, 50], strides = [1, 1]} : vector<36x50xf32> to vector<1x50xf32>
    %260 = arith.truncf %259 : vector<1x50xf32> to vector<1x50xbf16>
    %c31 = arith.constant 31 : index
    %c0_139 = arith.constant 0 : index
    %c0_140 = arith.constant 0 : index
    %261 = vector.load %arg6[%c31, %c0_139, %c0_140] : memref<36x50x450xbf16, #tpu.memory_space<vmem>>, vector<1x50x450xbf16>
    %262 = vector.shape_cast %261 : vector<1x50x450xbf16> to vector<50x450xbf16>
    %cst_141 = arith.constant dense<0.000000e+00> : vector<1x450xf32>
    %263 = tpu.matmul %260, %262, %cst_141 {dimension_numbers = #tpu.dot_dimension_numbers<[1], [0], [0], [1], [0, 0, 1, 1], [], []>} : vector<1x50xbf16>, vector<50x450xbf16>, vector<1x450xf32> -> vector<1x450xf32>
    %264 = arith.addf %258, %263 : vector<1x450xf32>
    %265 = vector.extract_strided_slice %72 {offsets = [32, 0], sizes = [1, 50], strides = [1, 1]} : vector<36x50xf32> to vector<1x50xf32>
    %266 = arith.truncf %265 : vector<1x50xf32> to vector<1x50xbf16>
    %c32 = arith.constant 32 : index
    %c0_142 = arith.constant 0 : index
    %c0_143 = arith.constant 0 : index
    %267 = vector.load %arg6[%c32, %c0_142, %c0_143] : memref<36x50x450xbf16, #tpu.memory_space<vmem>>, vector<1x50x450xbf16>
    %268 = vector.shape_cast %267 : vector<1x50x450xbf16> to vector<50x450xbf16>
    %cst_144 = arith.constant dense<0.000000e+00> : vector<1x450xf32>
    %269 = tpu.matmul %266, %268, %cst_144 {dimension_numbers = #tpu.dot_dimension_numbers<[1], [0], [0], [1], [0, 0, 1, 1], [], []>} : vector<1x50xbf16>, vector<50x450xbf16>, vector<1x450xf32> -> vector<1x450xf32>
    %270 = arith.addf %264, %269 : vector<1x450xf32>
    %271 = vector.extract_strided_slice %72 {offsets = [33, 0], sizes = [1, 50], strides = [1, 1]} : vector<36x50xf32> to vector<1x50xf32>
    %272 = arith.truncf %271 : vector<1x50xf32> to vector<1x50xbf16>
    %c33 = arith.constant 33 : index
    %c0_145 = arith.constant 0 : index
    %c0_146 = arith.constant 0 : index
    %273 = vector.load %arg6[%c33, %c0_145, %c0_146] : memref<36x50x450xbf16, #tpu.memory_space<vmem>>, vector<1x50x450xbf16>
    %274 = vector.shape_cast %273 : vector<1x50x450xbf16> to vector<50x450xbf16>
    %cst_147 = arith.constant dense<0.000000e+00> : vector<1x450xf32>
    %275 = tpu.matmul %272, %274, %cst_147 {dimension_numbers = #tpu.dot_dimension_numbers<[1], [0], [0], [1], [0, 0, 1, 1], [], []>} : vector<1x50xbf16>, vector<50x450xbf16>, vector<1x450xf32> -> vector<1x450xf32>
    %276 = arith.addf %270, %275 : vector<1x450xf32>
    %277 = vector.extract_strided_slice %72 {offsets = [34, 0], sizes = [1, 50], strides = [1, 1]} : vector<36x50xf32> to vector<1x50xf32>
    %278 = arith.truncf %277 : vector<1x50xf32> to vector<1x50xbf16>
    %c34 = arith.constant 34 : index
    %c0_148 = arith.constant 0 : index
    %c0_149 = arith.constant 0 : index
    %279 = vector.load %arg6[%c34, %c0_148, %c0_149] : memref<36x50x450xbf16, #tpu.memory_space<vmem>>, vector<1x50x450xbf16>
    %280 = vector.shape_cast %279 : vector<1x50x450xbf16> to vector<50x450xbf16>
    %cst_150 = arith.constant dense<0.000000e+00> : vector<1x450xf32>
    %281 = tpu.matmul %278, %280, %cst_150 {dimension_numbers = #tpu.dot_dimension_numbers<[1], [0], [0], [1], [0, 0, 1, 1], [], []>} : vector<1x50xbf16>, vector<50x450xbf16>, vector<1x450xf32> -> vector<1x450xf32>
    %282 = arith.addf %276, %281 : vector<1x450xf32>
    %283 = vector.extract_strided_slice %72 {offsets = [35, 0], sizes = [1, 50], strides = [1, 1]} : vector<36x50xf32> to vector<1x50xf32>
    %284 = arith.truncf %283 : vector<1x50xf32> to vector<1x50xbf16>
    %c35 = arith.constant 35 : index
    %c0_151 = arith.constant 0 : index
    %c0_152 = arith.constant 0 : index
    %285 = vector.load %arg6[%c35, %c0_151, %c0_152] : memref<36x50x450xbf16, #tpu.memory_space<vmem>>, vector<1x50x450xbf16>
    %286 = vector.shape_cast %285 : vector<1x50x450xbf16> to vector<50x450xbf16>
    %cst_153 = arith.constant dense<0.000000e+00> : vector<1x450xf32>
    %287 = tpu.matmul %284, %286, %cst_153 {dimension_numbers = #tpu.dot_dimension_numbers<[1], [0], [0], [1], [0, 0, 1, 1], [], []>} : vector<1x50xbf16>, vector<50x450xbf16>, vector<1x450xf32> -> vector<1x450xf32>
    %288 = arith.addf %282, %287 : vector<1x450xf32>
    %289 = vector.extract_strided_slice %1 {offsets = [0, 0], sizes = [1, 75], strides = [1, 1]} : vector<1x150xf32> to vector<1x75xf32>
    %290 = vector.extract_strided_slice %288 {offsets = [0, 0], sizes = [1, 75], strides = [1, 1]} : vector<1x450xf32> to vector<1x75xf32>
    %291 = arith.negf %290 : vector<1x75xf32>
    %292 = math.exp %291 : vector<1x75xf32>
    %cst_154 = arith.constant 1.000000e+00 : f32
    %293 = vector.broadcast %cst_154 : f32 to vector<1x75xf32>
    %294 = arith.addf %293, %292 : vector<1x75xf32>
    %295 = arith.divf %293, %294 : vector<1x75xf32>
    %296 = vector.extract_strided_slice %288 {offsets = [0, 75], sizes = [1, 75], strides = [1, 1]} : vector<1x450xf32> to vector<1x75xf32>
    %297 = arith.negf %296 : vector<1x75xf32>
    %298 = math.exp %297 : vector<1x75xf32>
    %cst_155 = arith.constant 1.000000e+00 : f32
    %299 = vector.broadcast %cst_155 : f32 to vector<1x75xf32>
    %300 = arith.addf %299, %298 : vector<1x75xf32>
    %301 = arith.divf %299, %300 : vector<1x75xf32>
    %302 = vector.extract_strided_slice %288 {offsets = [0, 150], sizes = [1, 75], strides = [1, 1]} : vector<1x450xf32> to vector<1x75xf32>
    %303 = arith.mulf %295, %289 : vector<1x75xf32>
    %304 = arith.addf %302, %303 : vector<1x75xf32>
    %305 = math.tanh %304 : vector<1x75xf32>
    %cst_156 = arith.constant 1.000000e+00 : f32
    %306 = vector.broadcast %cst_156 : f32 to vector<1x75xf32>
    %307 = arith.subf %306, %301 : vector<1x75xf32>
    %308 = arith.mulf %307, %305 : vector<1x75xf32>
    %309 = vector.extract_strided_slice %1 {offsets = [0, 75], sizes = [1, 75], strides = [1, 1]} : vector<1x150xf32> to vector<1x75xf32>
    %310 = vector.extract_strided_slice %288 {offsets = [0, 225], sizes = [1, 75], strides = [1, 1]} : vector<1x450xf32> to vector<1x75xf32>
    %311 = arith.negf %310 : vector<1x75xf32>
    %312 = math.exp %311 : vector<1x75xf32>
    %cst_157 = arith.constant 1.000000e+00 : f32
    %313 = vector.broadcast %cst_157 : f32 to vector<1x75xf32>
    %314 = arith.addf %313, %312 : vector<1x75xf32>
    %315 = arith.divf %313, %314 : vector<1x75xf32>
    %316 = vector.extract_strided_slice %288 {offsets = [0, 300], sizes = [1, 75], strides = [1, 1]} : vector<1x450xf32> to vector<1x75xf32>
    %317 = arith.negf %316 : vector<1x75xf32>
    %318 = math.exp %317 : vector<1x75xf32>
    %cst_158 = arith.constant 1.000000e+00 : f32
    %319 = vector.broadcast %cst_158 : f32 to vector<1x75xf32>
    %320 = arith.addf %319, %318 : vector<1x75xf32>
    %321 = arith.divf %319, %320 : vector<1x75xf32>
    %322 = vector.extract_strided_slice %288 {offsets = [0, 375], sizes = [1, 75], strides = [1, 1]} : vector<1x450xf32> to vector<1x75xf32>
    %323 = arith.mulf %315, %309 : vector<1x75xf32>
    %324 = arith.addf %322, %323 : vector<1x75xf32>
    %325 = math.tanh %324 : vector<1x75xf32>
    %cst_159 = arith.constant 1.000000e+00 : f32
    %326 = vector.broadcast %cst_159 : f32 to vector<1x75xf32>
    %327 = arith.subf %326, %321 : vector<1x75xf32>
    %328 = arith.mulf %327, %325 : vector<1x75xf32>
    %329 = tpu.concatenate %308, %328 in 1 : vector<1x75xf32>, vector<1x75xf32> -> vector<1x150xf32>
    %330 = arith.truncf %329 : vector<1x150xf32> to vector<1x150xbf16>
    %c0_160 = arith.constant 0 : index
    %c0_161 = arith.constant 0 : index
    %331 = vector.load %arg7[%c0_160, %c0_161] : memref<150x450xbf16, #tpu.memory_space<vmem>>, vector<150x450xbf16>
    %cst_162 = arith.constant dense<0.000000e+00> : vector<1x450xf32>
    %332 = tpu.matmul %330, %331, %cst_162 {dimension_numbers = #tpu.dot_dimension_numbers<[1], [0], [0], [1], [0, 0, 1, 1], [], []>} : vector<1x150xbf16>, vector<150x450xbf16>, vector<1x450xf32> -> vector<1x450xf32>
    %333 = arith.addf %332, %2 : vector<1x450xf32>
    %334 = vector.extract_strided_slice %3 {offsets = [0, 0], sizes = [1, 75], strides = [1, 1]} : vector<1x150xf32> to vector<1x75xf32>
    %335 = vector.extract_strided_slice %333 {offsets = [0, 0], sizes = [1, 75], strides = [1, 1]} : vector<1x450xf32> to vector<1x75xf32>
    %336 = arith.negf %335 : vector<1x75xf32>
    %337 = math.exp %336 : vector<1x75xf32>
    %cst_163 = arith.constant 1.000000e+00 : f32
    %338 = vector.broadcast %cst_163 : f32 to vector<1x75xf32>
    %339 = arith.addf %338, %337 : vector<1x75xf32>
    %340 = arith.divf %338, %339 : vector<1x75xf32>
    %341 = vector.extract_strided_slice %333 {offsets = [0, 75], sizes = [1, 75], strides = [1, 1]} : vector<1x450xf32> to vector<1x75xf32>
    %342 = arith.negf %341 : vector<1x75xf32>
    %343 = math.exp %342 : vector<1x75xf32>
    %cst_164 = arith.constant 1.000000e+00 : f32
    %344 = vector.broadcast %cst_164 : f32 to vector<1x75xf32>
    %345 = arith.addf %344, %343 : vector<1x75xf32>
    %346 = arith.divf %344, %345 : vector<1x75xf32>
    %347 = vector.extract_strided_slice %333 {offsets = [0, 150], sizes = [1, 75], strides = [1, 1]} : vector<1x450xf32> to vector<1x75xf32>
    %348 = arith.mulf %340, %334 : vector<1x75xf32>
    %349 = arith.addf %347, %348 : vector<1x75xf32>
    %350 = math.tanh %349 : vector<1x75xf32>
    %cst_165 = arith.constant 1.000000e+00 : f32
    %351 = vector.broadcast %cst_165 : f32 to vector<1x75xf32>
    %352 = arith.subf %351, %346 : vector<1x75xf32>
    %353 = arith.mulf %352, %350 : vector<1x75xf32>
    %354 = vector.extract_strided_slice %3 {offsets = [0, 75], sizes = [1, 75], strides = [1, 1]} : vector<1x150xf32> to vector<1x75xf32>
    %355 = vector.extract_strided_slice %333 {offsets = [0, 225], sizes = [1, 75], strides = [1, 1]} : vector<1x450xf32> to vector<1x75xf32>
    %356 = arith.negf %355 : vector<1x75xf32>
    %357 = math.exp %356 : vector<1x75xf32>
    %cst_166 = arith.constant 1.000000e+00 : f32
    %358 = vector.broadcast %cst_166 : f32 to vector<1x75xf32>
    %359 = arith.addf %358, %357 : vector<1x75xf32>
    %360 = arith.divf %358, %359 : vector<1x75xf32>
    %361 = vector.extract_strided_slice %333 {offsets = [0, 300], sizes = [1, 75], strides = [1, 1]} : vector<1x450xf32> to vector<1x75xf32>
    %362 = arith.negf %361 : vector<1x75xf32>
    %363 = math.exp %362 : vector<1x75xf32>
    %cst_167 = arith.constant 1.000000e+00 : f32
    %364 = vector.broadcast %cst_167 : f32 to vector<1x75xf32>
    %365 = arith.addf %364, %363 : vector<1x75xf32>
    %366 = arith.divf %364, %365 : vector<1x75xf32>
    %367 = vector.extract_strided_slice %333 {offsets = [0, 375], sizes = [1, 75], strides = [1, 1]} : vector<1x450xf32> to vector<1x75xf32>
    %368 = arith.mulf %360, %354 : vector<1x75xf32>
    %369 = arith.addf %367, %368 : vector<1x75xf32>
    %370 = math.tanh %369 : vector<1x75xf32>
    %cst_168 = arith.constant 1.000000e+00 : f32
    %371 = vector.broadcast %cst_168 : f32 to vector<1x75xf32>
    %372 = arith.subf %371, %366 : vector<1x75xf32>
    %373 = arith.mulf %372, %370 : vector<1x75xf32>
    %374 = tpu.concatenate %373, %353, %328, %308 in 1 : vector<1x75xf32>, vector<1x75xf32>, vector<1x75xf32>, vector<1x75xf32> -> vector<1x300xf32>
    %cst_169 = arith.constant 4.000000e+00 : f32
    %375 = vector.broadcast %cst_169 : f32 to vector<1x300xf32>
    %376 = arith.mulf %375, %374 : vector<1x300xf32>
    %377 = tpu.concatenate %62, %376 in 1 : vector<1x50xf32>, vector<1x300xf32> -> vector<1x350xf32>
    %378 = arith.truncf %377 : vector<1x350xf32> to vector<1x350xbf16>
    %c0_170 = arith.constant 0 : index
    %c0_171 = arith.constant 0 : index
    %379 = vector.load %arg8[%c0_170, %c0_171] : memref<350x840xbf16, #tpu.memory_space<vmem>>, vector<350x840xbf16>
    %cst_172 = arith.constant dense<0.000000e+00> : vector<1x840xf32>
    %380 = tpu.matmul %378, %379, %cst_172 {dimension_numbers = #tpu.dot_dimension_numbers<[1], [0], [0], [1], [0, 0, 1, 1], [], []>} : vector<1x350xbf16>, vector<350x840xbf16>, vector<1x840xf32> -> vector<1x840xf32>
    %381 = arith.addf %380, %4 : vector<1x840xf32>
    %cst_173 = arith.constant 0.000000e+00 : f32
    %382 = vector.broadcast %cst_173 : f32 to vector<1x840xf32>
    %383 = arith.maximumf %381, %382 : vector<1x840xf32>
    %c0_174 = arith.constant 0 : index
    %c0_175 = arith.constant 0 : index
    %384 = vector.load %arg9[%c0_174, %c0_175] : memref<840x2xf32, #tpu.memory_space<vmem>>, vector<840x2xf32>
    %cst_176 = arith.constant dense<0.000000e+00> : vector<1x2xf32>
    %385 = tpu.matmul %383, %384, %cst_176 {dimension_numbers = #tpu.dot_dimension_numbers<[1], [0], [0], [1], [0, 0, 1, 1], [], []>} : vector<1x840xf32>, vector<840x2xf32>, vector<1x2xf32> -> vector<1x2xf32>
    %386 = arith.addf %385, %5 : vector<1x2xf32>
    %cst_177 = arith.constant dense<0xFF800000> : vector<1xf32>
    %387 = vector.multi_reduction <maximumf>, %386, %cst_177 [1] : vector<1x2xf32> to vector<1xf32>
    %388 = vector.shape_cast %387 : vector<1xf32> to vector<1x1xf32>
    %389 = vector.broadcast %388 : vector<1x1xf32> to vector<1x2xf32>
    %390 = arith.subf %386, %389 : vector<1x2xf32>
    %391 = math.exp %390 : vector<1x2xf32>
    %cst_178 = arith.constant dense<0.000000e+00> : vector<1xf32>
    %392 = vector.multi_reduction <add>, %391, %cst_178 [1] : vector<1x2xf32> to vector<1xf32>
    %393 = vector.shape_cast %392 : vector<1xf32> to vector<1x1xf32>
    %394 = vector.broadcast %393 : vector<1x1xf32> to vector<1x2xf32>
    %395 = arith.divf %391, %394 : vector<1x2xf32>
    %c0_179 = arith.constant 0 : index
    %c0_180 = arith.constant 0 : index
    %c0_181 = arith.constant 0 : index
    %396 = vector.load %arg11[%c0_179, %c0_180, %c0_181] : memref<1x1x2xf32, #tpu.memory_space<vmem>>, vector<1x1x2xf32>
    %397 = vector.shape_cast %396 : vector<1x1x2xf32> to vector<1x2xf32>
    %398 = vector.shape_cast %395 : vector<1x2xf32> to vector<1x1x2xf32>
    tpu.vector_store %arg11[%c0_179, %c0_180, %c0_181], %398 {strides = array<i32>} : memref<1x1x2xf32, #tpu.memory_space<vmem>>, vector<1x1x2xf32>,
    return
  }
  func.func @transform_0(%arg0: i32) -> (i32, i32, i32) {
    %c0_i32 = arith.constant 0 : i32
    %c0_i32_0 = arith.constant 0 : i32
    %c0_i32_1 = arith.constant 0 : i32
    return %arg0, %c0_i32, %c0_i32_0 : i32, i32, i32
  }
  func.func @transform_1(%arg0: i32) -> (i32, i32, i32) {
    %c0_i32 = arith.constant 0 : i32
    %c0_i32_0 = arith.constant 0 : i32
    %c0_i32_1 = arith.constant 0 : i32
    return %arg0, %c0_i32, %c0_i32_0 : i32, i32, i32
  }
  func.func @transform_2(%arg0: i32) -> (i32, i32, i32) {
    %c0_i32 = arith.constant 0 : i32
    %c0_i32_0 = arith.constant 0 : i32
    %c0_i32_1 = arith.constant 0 : i32
    return %arg0, %c0_i32, %c0_i32_0 : i32, i32, i32
  }
  func.func @transform_3(%arg0: i32) -> (i32, i32, i32) {
    %c0_i32 = arith.constant 0 : i32
    %c0_i32_0 = arith.constant 0 : i32
    %c0_i32_1 = arith.constant 0 : i32
    %c0_i32_2 = arith.constant 0 : i32
    return %c0_i32, %c0_i32_0, %c0_i32_1 : i32, i32, i32
  }
  func.func @transform_4(%arg0: i32) -> (i32, i32) {
    %c0_i32 = arith.constant 0 : i32
    %c0_i32_0 = arith.constant 0 : i32
    %c0_i32_1 = arith.constant 0 : i32
    return %c0_i32, %c0_i32_0 : i32, i32
  }
  func.func @transform_5(%arg0: i32) -> (i32, i32, i32) {
    %c0_i32 = arith.constant 0 : i32
    %c0_i32_0 = arith.constant 0 : i32
    %c0_i32_1 = arith.constant 0 : i32
    %c0_i32_2 = arith.constant 0 : i32
    return %c0_i32, %c0_i32_0, %c0_i32_1 : i32, i32, i32
  }
  func.func @transform_6(%arg0: i32) -> (i32, i32) {
    %c0_i32 = arith.constant 0 : i32
    %c0_i32_0 = arith.constant 0 : i32
    %c0_i32_1 = arith.constant 0 : i32
    return %c0_i32, %c0_i32_0 : i32, i32
  }
  func.func @transform_7(%arg0: i32) -> (i32, i32) {
    %c0_i32 = arith.constant 0 : i32
    %c0_i32_0 = arith.constant 0 : i32
    %c0_i32_1 = arith.constant 0 : i32
    return %c0_i32, %c0_i32_0 : i32, i32
  }
  func.func @transform_8(%arg0: i32) -> (i32, i32) {
    %c0_i32 = arith.constant 0 : i32
    %c0_i32_0 = arith.constant 0 : i32
    %c0_i32_1 = arith.constant 0 : i32
    return %c0_i32, %c0_i32_0 : i32, i32
  }
  func.func @transform_9(%arg0: i32) -> (i32, i32) {
    %c0_i32 = arith.constant 0 : i32
    %c0_i32_0 = arith.constant 0 : i32
    %c0_i32_1 = arith.constant 0 : i32
    return %c0_i32, %c0_i32_0 : i32, i32
  }
  func.func @transform_10(%arg0: i32) -> (i32, i32, i32) {
    %c0_i32 = arith.constant 0 : i32
    %c0_i32_0 = arith.constant 0 : i32
    %c0_i32_1 = arith.constant 0 : i32
    return %arg0, %c0_i32, %c0_i32_0 : i32, i32, i32
  }
}

</mosaic_0001>

<bundles_post_ra>
// kernel: attention_prediction.1
= control target key start
LH: loop header
LB: loop body
LE: loop exit
PB: predicated region body
PF: predicated region fallthrough
CT: control target
= control target key end

     0   :  { %s14526_s13 = smov 0   ;;  %s18165_s0 = inlined_call_operand.vmem [shape: f32[8,12,50], index: 0, kind: input, shape index: {}]   ;;  %s18166_s1 = inlined_call_operand.vmem [shape: f32[8,12,12], index: 1, kind: input, shape index: {}]   ;;  %s18167_s2 = inlined_call_operand.vmem [shape: f32[8,50,20], index: 2, kind: input, shape index: {}]   ;;  %s18168_s3 = inlined_call_operand.vmem [shape: f32[4,51,50], index: 3, kind: input, shape index: {}]   ;;  %s18169_s4 = inlined_call_operand.vmem [shape: f32[36,21], index: 4, kind: input, shape index: {}]   ;;  %s18170_s5 = inlined_call_operand.vmem [shape: bf16[36,50,450], index: 5, kind: input, shape index: {}]   ;;  %s18171_s6 = inlined_call_operand.vmem [shape: bf16[150,450], index: 6, kind: input, shape index: {}]   ;;  %s18172_s7 = inlined_call_operand.vmem [shape: bf16[350,840], index: 7, kind: input, shape index: {}]   ;;  %s18173_s8 = inlined_call_operand.vmem [shape: f32[840,2], index: 8, kind: input, shape index: {}]   ;;  %s18174_s9 = inlined_call_operand.vmem [shape: f32[1,2042], index: 9, kind: input, shape index: {}]   ;;  %s18175_s10 = inlined_call_operand.vmem [shape: f32[8,1,2], index: 10, kind: output, shape index: {}]  }
   0x1 LB: > { %s11427_s14 = sadd.s32 4294967295, %s14449_s13   ;;  %p11431_p0 = scmp.ge.s32.totalorder %s14449_s13, 1  ;;  %s14449_s13 = sphi %s14526_s13, %s20_s13  }
   0x2   : > { %p332_p1 = scmp.lt.s32.totalorder %s14449_s13, 9 }
   0x4   : > { %p333_p2 = pnand %p11431_p0, %p332_p1 }
   0x5   : > { %p378_p3 = scmp.lt.s32.totalorder (!%p333_p2), %s11427_s14, 7  ;;  %s14456_s24 = smov (!%p333_p2), 62  }
   0x6   : > { %336 = sbr.rel (%p333_p2) target bundleno = 4332 (0x10ec), region = 60  ;;  %s14457_s27 = smov (!%p333_p2), 31  }
   0x7   : > { %s14458_s29 = smov (!%p333_p2), 106   ;;  %s14459_s30 = smov (!%p333_p2), 84  }
   0x8   : > { %s14460_s11 = smov (!%p333_p2), 115   ;;  %s14461_s12 = smov (!%p333_p2), 9  }
   0x9   : > { %s14462_s15 = smov (!%p333_p2), 75   ;;  %s14463_s26 = smov (!%p333_p2), 40  }
   0xa   : > { %s14466_s16 = smov (!%p333_p2), 102   ;;  %s14468_s19 = smov (!%p333_p2), 50  }
   0xb   : > { %v413_v0 = vld [vmem:[%s18168_s3 + $0x30] sm:$0x7]  ;;  %vm425_vm0 = vcmask 1041408   ;;  %v412_v1 = vld [vmem:[%s18168_s3 + $0x28] sm:$0xff]  ;;  %v411_v2 = vld [vmem:[%s18168_s3 + $0x20] sm:$0xff]  ;;  %s18177_s14 = smov (!%p378_p3, %s11427_s14), 7  ;;  %v414_v10 = vlaneseq }
   0xc   : > { %13129 = vmatprep.subr.msk.mxu0 %vm425_vm0, %v413_v0  ;;  %v410_v3 = vld [vmem:[%s18168_s3 + $0x18] sm:$0xff]  ;;  %v409_v4 = vld [vmem:[%s18168_s3 + $0x10] sm:$0xff]  ;;  %s12919_s25 = sshll.u32 %s18177_s14, 4  ;;  %vm418_vm1 = vcmask 408576   ;;  %v408_v5 = vld [vmem:[%s18168_s3 + $0x8] sm:$0xff]  ;;  %vm506_vm2 = vcmask 97280  }
   0xd   : > { %13130 = vmatpush3.msk.msra.mxu0 %vm425_vm0, %v413_v0  ;;  %s14557_s28 = scalar_lea.vmem %s18165_s0, %s12919_s25  ;;  %v407_v7 = vld [vmem:[%s18168_s3] sm:$0xff]  ;;  %s387_s17 = scalar_lea.vmem %s18166_s1, %s12919_s25  ;;  %v14578_v11 = vshrl.u32 %v414_v10, 7  ;;  %v14440_v13 = vld [vmem:[%s18168_s3 + $0x30] sm:$0x7]  ;;  %vm513_vm3 = vcmask 1043456   ;;  %v11447_v24 = vld [vmem:[%s18168_s3 + $0x58] sm:$0xff] }
   0xe   : > { %13131 = vmatprep.subr.mxu0 %v412_v1  ;;  %v403_v6 = vld [vmem:[%s14557_s28] sm:$0xff]  ;;  %v404_v8 = vld [vmem:[%s14557_s28 + $0x8] sm:$0xf]  ;;  %v11446_v25 = vld [vmem:[%s18168_s3 + $0x50] sm:$0xff]  ;;  %s13291_s18 = smul.u32 56, %s18177_s14  ;;  %vm1184_vm4 = vcmask 162816   ;;  %s395_s25 = scalar_lea.vmem %s18175_s10, %s18177_s14 }
   0xf   : > { %13132 = vmatpush3.msra.mxu0 %v412_v1  ;;  %13143 = vmatprep.mubr.msk.f32.mxu0 %vm418_vm1, %v403_v6  ;;  %v14572_v9 = vld [vmem:[%s387_s17] sm:$0xff]  ;;  %v14581_v12 = vsub.s32 2, %v14578_v11  ;;  %v14587_v20 = vld [vmem:[%s387_s17 + $0x8] sm:$0xf]  ;;  %v11443_v28 = vld [vmem:[%s18168_s3 + $0x38] sm:$0xff]  ;;  %vm14453_vm5 = vmmov 0  }
  0x10   : > { %13133 = vmatprep.subr.mxu0 %v411_v2  ;;  %13150 = vmatprep.mubr.msk.f32.mxu1 %vm506_vm2, %v14572_v9  ;;  %v11449_v21 = vld [vmem:[%s18168_s3 + $0x68] sm:$0x7]  ;;  %v11448_v23 = vld [vmem:[%s18168_s3 + $0x60] sm:$0xff]  ;;  %v11461_v43 = vld [vmem:[%s18168_s3 + $0x98] sm:$0xff]  ;;  %s392_s21 = scalar_lea.vmem %s18167_s2, %s13291_s18  ;;  %vm1399_vm6 = vcmask 1040384   ;;  %vm1137_vm7 = vcmask 404480  }
  0x11   : > { %13134 = vmatpush3.msra.mxu0 %v411_v2  ;;  %v417_v14 = vrot.slane %v14440_v13, %v14581_v12  ;;  %v11445_v26 = vld [vmem:[%s18168_s3 + $0x48] sm:$0xff]  ;;  %v11444_v27 = vld [vmem:[%s18168_s3 + $0x40] sm:$0xff]  ;;  %v607_v35 = vrot.slane %v11449_v21, %v14581_v12  ;;  %v11460_v44 = vld [vmem:[%s18168_s3 + $0x90] sm:$0xff]  ;;  %vm8999_vm8 = vcmask 506880   ;;  %vm9023_vm9 = vcmask 252928  }
  0x12   : > { %13135 = vmatprep.subr.mxu0 %v410_v3  ;;  %v14441_v31 = vld [vmem:[%s14557_s28] sm:$0xff]  ;;  %v14442_v33 = vld [vmem:[%s14557_s28 + $0x8] sm:$0xf]  ;;  %v11457_v47 = vld [vmem:[%s18168_s3 + $0x78] sm:$0xff]  ;;  %vm9051_vm10 = vcmask 72704   ;;  %vm9357_vm11 = vcmask 1042432  }
  0x13   : > { %13136 = vmatpush3.msra.mxu0 %v410_v3  ;;  %v11462_v42 = vld [vmem:[%s18168_s3 + $0xa0] sm:$0x7]  ;;  %v11459_v45 = vld [vmem:[%s18168_s3 + $0x88] sm:$0xff]  ;;  %v11456_v48 = vld [vmem:[%s18168_s3 + $0x70] sm:$0xff]  ;;  %vm9015_vm12 = vcmask 613376   ;;  %vm9353_vm13 = vcmask 179200  }
  0x14   : > { %13137 = vmatprep.subr.mxu0 %v409_v4  ;;  %v11458_v46 = vld [vmem:[%s18168_s3 + $0x80] sm:$0xff]  ;;  %v787_v53 = vrot.slane %v11462_v42, %v14581_v12  ;;  %v11475_v60 = vld [vmem:[%s18168_s3 + $0xd8] sm:$0x7]  ;;  %v11474_v61 = vld [vmem:[%s18168_s3 + $0xd0] sm:$0xff]  ;;  %vm9071_vm14 = vcmask 433152   ;;  %vm9344_vm15 = vcmask 326656  }
  0x15   : > { %13138 = vmatpush3.msra.mxu0 %v409_v4  ;;  %v11473_v62 = vld [vmem:[%s18168_s3 + $0xc8] sm:$0xff]  ;;  %v11472_v63 = vld [vmem:[%s18168_s3 + $0xc0] sm:$0xff]  ;;  %v11471_v0 = vld [vmem:[%s18168_s3 + $0xb8] sm:$0xff]  ;;  %s14467_s28 = smov 22  }
  0x16   : > { %13139 = vmatprep.subr.mxu0 %v408_v5  ;;  %v11470_v1 = vld [vmem:[%s18168_s3 + $0xb0] sm:$0xff]  ;;  %v11469_v2 = vld [vmem:[%s18168_s3 + $0xa8] sm:$0xff]  ;;  %v1150_v13 = vld [vmem:[%s18169_s4 + $0x18] sm:$0xff] }
  0x17   : > { %13140 = vmatpush3.msra.mxu0 %v408_v5  ;;  %v1148_v10 = vld [vmem:[%s18169_s4 + $0x8] sm:$0xff] }
  0x18   : > { %13141 = vmatprep.subr.mxu0 %v407_v7 }
  0x19   : > { %13142 = vmatpush3.msra.mxu0 %v407_v7  ;;  %v1147_v7 = vld [vmem:[%s18169_s4] sm:$0xff] }
  0x1a   : > { %13144 = vmatmul.mubr.msk.f32.vlgmr.msra.gmra.mxu0 %vm418_vm1, %v404_v8  ;;  %v1149_v8 = vld [vmem:[%s18169_s4 + $0x10] sm:$0xff] }
  0x1b   : > { %13174 = vmatprep.mubr.msk.f32.mxu0 %vm506_vm2, %v14572_v9 }
  0xda   : > { %v13145_v15 = vpop.f32.mrf.mxu0 }
  0xdb   : > { %v501_v16 = vadd.f32 %v13145_v15, %v417_v14  ;;  %v967_v15 = vrot.slane %v11475_v60, %v14581_v12 }
  0xdc   : > { %v495_v17 = vpop.f32.mrf.mxu0 }
  0xdd   : > { %v505_v18 = vmax.f32 %v501_v16, 0.0  ;;  %v496_v19 = vadd.f32 %v495_v17, %v417_v14  ;;  %v1151_v14 = vld [vmem:[%s18169_s4 + $0x20] sm:$0xf] }
  0xdf   : > { %v504_v22 = vmax.f32 %v496_v19, 0.0  ;;  %13146 = vmatprep.subr.msk.mxu1 %vm513_vm3, %v505_v18 }
  0xe0   : > { %13147 = vmatpush3.msk.msra.mxu1 %vm513_vm3, %v505_v18 }
  0xe1   : > { %13148 = vmatprep.subr.mxu1 %v504_v22 }
  0xe2   : > { %13149 = vmatpush3.msra.mxu1 %v504_v22 }
  0xe3   : > { %13151 = vmatmul.mubr.msk.f32.vlgmr.msra.gmra.mxu1 %vm506_vm2, %v14587_v20  ;;  %13153 = vmatprep.subr.msk.mxu1 %vm425_vm0, %v11449_v21 }
  0xe4   : > { %13154 = vmatpush3.msk.msra.mxu1 %vm425_vm0, %v11449_v21 }
  0xe5   : > { %13155 = vmatprep.subr.mxu1 %v11448_v23 }
  0xe6   : > { %13156 = vmatpush3.msra.mxu1 %v11448_v23  ;;  %v1158_v23 = vld [vmem:[%s392_s21 + $0x30] sm:$0x3] }
  0xe7   : > { %13157 = vmatprep.subr.mxu1 %v11447_v24 }
  0xe8   : > { %13158 = vmatpush3.msra.mxu1 %v11447_v24  ;;  %v14452_v24 = vmov 0.0  }
  0xe9   : > { %13159 = vmatprep.subr.mxu1 %v11446_v25 }
  0xea   : > { %13160 = vmatpush3.msra.mxu1 %v11446_v25  ;;  %v1157_v25 = vld [vmem:[%s392_s21 + $0x28] sm:$0xff] }
  0xeb   : > { %13161 = vmatprep.subr.mxu1 %v11445_v26 }
  0xec   : > { %13162 = vmatpush3.msra.mxu1 %v11445_v26  ;;  %v1156_v26 = vld [vmem:[%s392_s21 + $0x20] sm:$0xff] }
  0xed   : > { %13163 = vmatprep.subr.mxu1 %v11444_v27 }
  0xee   : > { %13164 = vmatpush3.msra.mxu1 %v11444_v27  ;;  %v1154_v27 = vld [vmem:[%s392_s21 + $0x10] sm:$0xff] }
  0xef   : > { %13165 = vmatprep.subr.mxu1 %v11443_v28 }
  0xf0   : > { %13166 = vmatpush3.msra.mxu1 %v11443_v28  ;;  %v1153_v28 = vld [vmem:[%s392_s21 + $0x8] sm:$0xff] }
 0x1a3   : > { %v13152_v29 = vpop.f32.mrf.mxu1 }
 0x1a4   : > { %v14620_v34 = vadd.f32 %v14442_v33, %v13152_v29  ;;  %v1152_v29 = vld [vmem:[%s392_s21] sm:$0xff] }
 0x1a5   : > { %v583_v30 = vpop.f32.mrf.mxu1 }
 0x1a6   : > { %v14617_v32 = vadd.f32 %v14441_v31, %v583_v30  ;;  %v1324_v30 = vld [vmem:[%s18170_s5 + $0x60] sm:$0x11]  ;;  %v11526_v31 = vld [vmem:[%s18170_s5 + $0xd0] sm:$0x11] }
 0x1a7   : > { %v11507_v33 = vcombine.high %v1324_v30, %v1324_v30 }
 0x1a8   : > { %13167 = vmatprep.mubr.msk.f32.mxu1 %vm418_vm1, %v14617_v32 }
 0x1a9   : > { %13168 = vmatmul.mubr.msk.f32.vlgmr.msra.gmra.mxu1 %vm418_vm1, %v14620_v34 }
 0x1aa   : > { %13198 = vmatprep.mubr.msk.f32.mxu1 %vm506_vm2, %v14572_v9 }
 0x269   : > { %v13169_v36 = vpop.f32.mrf.mxu1 }
 0x26a   : > { %v689_v37 = vadd.f32 %v13169_v36, %v607_v35  ;;  %v11541_v36 = vcombine.high %v11526_v31, %v11526_v31 }
 0x26b   : > { %v683_v38 = vpop.f32.mrf.mxu1 }
 0x26c   : > { %v693_v39 = vmax.f32 %v689_v37, 0.0  ;;  %v684_v40 = vadd.f32 %v683_v38, %v607_v35  ;;  %v11506_v35 = vcombine.low %v1324_v30, %v1324_v30  ;;  %v11540_v37 = vcombine.low %v11526_v31, %v11526_v31  ;;  %v13338_v38 = vld [vmem:[%s18170_s5 + $0x44] ss:$16 sps:$4 sm:$0xff]   ;;  %v13372_v30 = vld [vmem:[%s18170_s5 + $0xc] ss:$16 sps:$4 sm:$0xff]  }
 0x26e   : > { %v692_v41 = vmax.f32 %v684_v40, 0.0  ;;  %13170 = vmatprep.subr.msk.mxu0 %vm513_vm3, %v693_v39  ;;  %v1401_v40 = vsel %vm1399_vm6, %v11506_v35, 0  ;;  %v11527_v35 = vld [vmem:[%s18170_s5 + $0xd8] sm:$0x11] }
 0x26f   : > { %13171 = vmatpush3.msk.msra.mxu0 %vm513_vm3, %v693_v39  ;;  %v13341_v39 = vld [vmem:[%s18170_s5 + $0xb4] ss:$16 sps:$4 sm:$0xff]  }
 0x270   : > { %13172 = vmatprep.subr.mxu0 %v692_v41 }
 0x271   : > { %13173 = vmatpush3.msra.mxu0 %v692_v41  ;;  %v1615_v41 = vsel %vm1399_vm6, %v11540_v37, 0 }
 0x272   : > { %13175 = vmatmul.mubr.msk.f32.vlgmr.msra.gmra.mxu0 %vm506_vm2, %v14587_v20  ;;  %13177 = vmatprep.subr.msk.mxu0 %vm425_vm0, %v11462_v42 }
 0x273   : > { %13178 = vmatpush3.msk.msra.mxu0 %vm425_vm0, %v11462_v42  ;;  %v13336_v42 = vld [vmem:[%s18170_s5 + $0x40] ss:$16 sps:$4 sm:$0xff]  }
 0x274   : > { %13179 = vmatprep.subr.mxu0 %v11461_v43 }
 0x275   : > { %13180 = vmatpush3.msra.mxu0 %v11461_v43  ;;  %v13339_v43 = vld [vmem:[%s18170_s5 + $0xb0] ss:$16 sps:$4 sm:$0xff]  }
 0x276   : > { %13181 = vmatprep.subr.mxu0 %v11460_v44 }
 0x277   : > { %13182 = vmatpush3.msra.mxu0 %v11460_v44  ;;  %v13344_v44 = vld [vmem:[%s18170_s5 + $0x24] ss:$16 sps:$4 sm:$0xff]  }
 0x278   : > { %13183 = vmatprep.subr.mxu0 %v11459_v45 }
 0x279   : > { %13184 = vmatpush3.msra.mxu0 %v11459_v45  ;;  %v13342_v45 = vld [vmem:[%s18170_s5 + $0x20] ss:$16 sps:$4 sm:$0xff]  }
 0x27a   : > { %13185 = vmatprep.subr.mxu0 %v11458_v46 }
 0x27b   : > { %13186 = vmatpush3.msra.mxu0 %v11458_v46  ;;  %v13347_v46 = vld [vmem:[%s18170_s5 + $0x94] ss:$16 sps:$4 sm:$0xff]  }
 0x27c   : > { %13187 = vmatprep.subr.mxu0 %v11457_v47 }
 0x27d   : > { %13188 = vmatpush3.msra.mxu0 %v11457_v47  ;;  %v13345_v47 = vld [vmem:[%s18170_s5 + $0x90] ss:$16 sps:$4 sm:$0xff]  }
 0x27e   : > { %13189 = vmatprep.subr.mxu0 %v11456_v48 }
 0x27f   : > { %13190 = vmatpush3.msra.mxu0 %v11456_v48  ;;  %v13350_v48 = vld [vmem:[%s18170_s5 + $0x4] ss:$16 sps:$4 sm:$0xff]  }
 0x332   : > { %v13176_v49 = vpop.f32.mrf.mxu0 }
 0x333   : > { %v14660_v52 = vadd.f32 %v13176_v49, %v14620_v34  ;;  %v13348_v49 = vld [vmem:[%s18170_s5] ss:$16 sps:$4 sm:$0xff]  }
 0x334   : > { %v763_v50 = vpop.f32.mrf.mxu0 }
 0x335   : > { %v14657_v51 = vadd.f32 %v763_v50, %v14617_v32  ;;  %v13353_v50 = vld [vmem:[%s18170_s5 + $0x74] ss:$16 sps:$4 sm:$0xff]  }
 0x337   : > { %13191 = vmatprep.mubr.msk.f32.mxu0 %vm418_vm1, %v14657_v51 }
 0x338   : > { %13192 = vmatmul.mubr.msk.f32.vlgmr.msra.gmra.mxu0 %vm418_vm1, %v14660_v52 }
 0x339   : > { %13222 = vmatprep.mubr.msk.f32.mxu0 %vm506_vm2, %v14572_v9  ;;  %v14451_v9 = vmov 20  }
 0x33a   : > { %13320 = vset.pattern.permute.xlu0 %v14451_v9  ;;  %13321 = vset.pattern.permute.xlu1 %v14451_v9 }
 0x33b   : > { %1161 = vperm.xlu0 %13320, %v1147_v7   ;;  %1171 = vperm.xlu1 %13321, %v1149_v8  }
 0x33f   : > { %1166 = vperm.xlu0 %13320, %v1148_v10   ;;  %1176 = vperm.xlu1 %13321, %v1150_v13  }
 0x343   : > { %1181 = vperm.xlu0 %13320, %v1151_v14  }
 0x3f8   : > { %v13193_v54 = vpop.f32.mrf.mxu0 }
 0x3f9   : > { %v869_v55 = vadd.f32 %v13193_v54, %v787_v53  ;;  %v1325_v54 = vld [vmem:[%s18170_s5 + $0x68] sm:$0x11] }
 0x3fa   : > { %v863_v56 = vpop.f32.mrf.mxu0 }
 0x3fb   : > { %v873_v57 = vmax.f32 %v869_v55, 0.0  ;;  %v864_v58 = vadd.f32 %v863_v56, %v787_v53  ;;  %v13351_v53 = vld [vmem:[%s18170_s5 + $0x70] ss:$16 sps:$4 sm:$0xff]   ;;  %v11509_v55 = vcombine.high %v1325_v54, %v1325_v54  ;;  %v14454_v56 = vmov 0  }
 0x3fd   : > { %v872_v59 = vmax.f32 %v864_v58, 0.0  ;;  %13194 = vmatprep.subr.msk.mxu1 %vm513_vm3, %v873_v57 }
 0x3fe   : > { %13195 = vmatpush3.msk.msra.mxu1 %vm513_vm3, %v873_v57  ;;  %v11560_v57 = vld [vmem:[%s18170_s5 + $0x140] sm:$0x11] }
 0x3ff   : > { %13196 = vmatprep.subr.mxu1 %v872_v59  ;;  %v11575_v58 = vcombine.high %v11560_v57, %v11560_v57 }
 0x400   : > { %13197 = vmatpush3.msra.mxu1 %v872_v59  ;;  %v775_v59 = vadd.f32 %v14660_v52, %v14620_v34 }
 0x401   : > { %13199 = vmatmul.mubr.msk.f32.vlgmr.msra.gmra.mxu1 %vm506_vm2, %v14587_v20  ;;  %13201 = vmatprep.subr.msk.mxu1 %vm425_vm0, %v11475_v60 }
 0x402   : > { %13202 = vmatpush3.msk.msra.mxu1 %vm425_vm0, %v11475_v60  ;;  %vm9501_vm0 = vcmask 1014784  }
 0x403   : > { %13203 = vmatprep.subr.mxu1 %v11474_v61 }
 0x404   : > { %13204 = vmatpush3.msra.mxu1 %v11474_v61  ;;  %v774_v61 = vadd.f32 %v14657_v51, %v14617_v32 }
 0x405   : > { %13205 = vmatprep.subr.mxu1 %v11473_v62 }
 0x406   : > { %13206 = vmatpush3.msra.mxu1 %v11473_v62 }
 0x407   : > { %13207 = vmatprep.subr.mxu1 %v11472_v63 }
 0x408   : > { %13208 = vmatpush3.msra.mxu1 %v11472_v63 }
 0x409   : > { %13209 = vmatprep.subr.mxu1 %v11471_v0 }
 0x40a   : > { %13210 = vmatpush3.msra.mxu1 %v11471_v0 }
 0x40b   : > { %13211 = vmatprep.subr.mxu1 %v11470_v1 }
 0x40c   : > { %13212 = vmatpush3.msra.mxu1 %v11470_v1 }
 0x40d   : > { %13213 = vmatprep.subr.mxu1 %v11469_v2 }
 0x40e   : > { %13214 = vmatpush3.msra.mxu1 %v11469_v2 }
 0x40f   : > { %11510 = vmatprep.subr.msk.bf16.mxu1 %vm1399_vm6, %v11507_v33  ;;  %v13367_v33 = vld [vmem:[%s18170_s5 + $0x100] ss:$16 sps:$4 sm:$0xff]  }
 0x4c1   : > { %v13200_v3 = vpop.f32.mrf.mxu1 }
 0x4c2   : > { %v14700_v6 = vadd.f32 %v13200_v3, %v14660_v52  ;;  %v1162_v52 = vpop.permute.xlu0 %1161 }
 0x4c3   : > { %v943_v4 = vpop.f32.mrf.mxu1 }
 0x4c4   : > { %v14697_v5 = vadd.f32 %v943_v4, %v14657_v51  ;;  %v955_v62 = vadd.f32 %v14700_v6, %v775_v59  ;;  %v11508_v51 = vcombine.low %v1325_v54, %v1325_v54  ;;  %v13388_v54 = vld [vmem:[%s18170_s5 + $0x9c] ss:$16 sps:$4 sm:$0xff]  }
 0x4c5   : > { %v13394_v59 = vld [vmem:[%s18170_s5 + $0x7c] ss:$16 sps:$4 sm:$0xff]  }
 0x4c6   : > { %13215 = vmatprep.mubr.msk.f32.mxu1 %vm418_vm1, %v14697_v5  ;;  %v954_v2 = vadd.f32 %v14697_v5, %v774_v61  ;;  %v11561_v61 = vld [vmem:[%s18170_s5 + $0x148] sm:$0x11] }
 0x4c7   : > { %13216 = vmatmul.mubr.msk.f32.vlgmr.msra.gmra.mxu1 %vm418_vm1, %v14700_v6 }
 0x4c8   : > { %1421 = vmatpush1.bf16.msra.mxu1 %v1401_v40  ;;  %1444 = vmatprep.mubr.bf16.mxu1 %v14454_v56  ;;  %v11543_v40 = vcombine.high %v11527_v35, %v11527_v35 }
 0x4c9   : > { %1422 = vmatprep.subr.bf16.mxu1 %v13338_v38  ;;  %v13370_v38 = vld [vmem:[%s18170_s5 + $0x8] ss:$16 sps:$4 sm:$0xff]  }
 0x4cc   : > { %1423 = vmatpush1.bf16.msra.mxu1 %v13336_v42  ;;  %v13373_v42 = vld [vmem:[%s18170_s5 + $0xe0] ss:$16 sps:$4 sm:$0xff]  }
 0x4cd   : > { %1424 = vmatprep.subr.bf16.mxu1 %v13344_v44 }
 0x4d0   : > { %1425 = vmatpush1.bf16.msra.mxu1 %v13342_v45 }
 0x4d1   : > { %1426 = vmatprep.subr.bf16.mxu1 %v13350_v48 }
 0x4d4   : > { %1427 = vmatpush1.bf16.msra.mxu1 %v13348_v49 }
 0x4d5   : > { %11512 = vmatprep.subr.msk.bf16.mxu1 %vm1399_vm6, %v11509_v55  ;;  %v13383_v55 = vld [vmem:[%s18170_s5 + $0x190] ss:$16 sps:$4 sm:$0xff]  }
 0x587   : > { %v13217_v16 = vpop.f32.mrf.mxu1 }
 0x588   : > { %v1049_v17 = vadd.f32 %v13217_v16, %v967_v15  ;;  %v13360_v16 = vld [vmem:[%s18170_s5 + $0x4c] ss:$16 sps:$4 sm:$0xff]  }
 0x589   : > { %v1043_v18 = vpop.f32.mrf.mxu1 }
 0x58a   : > { %v1053_v19 = vmax.f32 %v1049_v17, 0.0  ;;  %v1044_v21 = vadd.f32 %v1043_v18, %v967_v15 }
 0x58c   : > { %v1052_v22 = vmax.f32 %v1044_v21, 0.0  ;;  %13218 = vmatprep.subr.msk.mxu0 %vm513_vm3, %v1053_v19  ;;  %v13363_v21 = vld [vmem:[%s18170_s5 + $0x124] ss:$16 sps:$4 sm:$0xff]  }
 0x58d   : > { %13219 = vmatpush3.msk.msra.mxu0 %vm513_vm3, %v1053_v19  ;;  %vm9546_vm3 = vcmask 793600  }
 0x58e   : > { %13220 = vmatprep.subr.mxu0 %v1052_v22 }
 0x58f   : > { %13221 = vmatpush3.msra.mxu0 %v1052_v22 }
 0x590   : > { %13223 = vmatmul.mubr.msk.f32.vlgmr.msra.gmra.mxu0 %vm506_vm2, %v14587_v20  ;;  %13225 = vmatprep.subr.mxu0 %v14452_v24  ;;  %v1155_v20 = vld [vmem:[%s392_s21 + $0x18] sm:$0xff]  ;;  %vm10591_vm2 = vcmask 1046528  }
 0x591   : > { %13226 = vmatpush3.xpose.msk.msra.mxu0 %vm1184_vm4, %v1158_v23  ;;  %13239 = vmatprep.mubr.msk.f32.mxu0 %vm14453_vm5, %v14452_v24  ;;  %v13358_v23 = vld [vmem:[%s18170_s5 + $0x48] ss:$16 sps:$4 sm:$0xff]  }
 0x592   : > { %13227 = vmatprep.subr.mxu0 %v14452_v24 }
 0x595   : > { %13228 = vmatpush3.xpose.msk.msra.mxu0 %vm1184_vm4, %v1157_v25  ;;  %v13366_v25 = vld [vmem:[%s18170_s5 + $0x2c] ss:$16 sps:$4 sm:$0xff]  }
 0x596   : > { %13229 = vmatprep.subr.mxu0 %v14452_v24 }
 0x599   : > { %13230 = vmatpush3.xpose.msk.msra.mxu0 %vm1184_vm4, %v1156_v26 }
 0x59a   : > { %13231 = vmatprep.subr.mxu0 %v14452_v24 }
 0x59d   : > { %13232 = vmatpush3.xpose.msk.msra.mxu0 %vm1184_vm4, %v1155_v20  ;;  %v13361_v20 = vld [vmem:[%s18170_s5 + $0x120] ss:$16 sps:$4 sm:$0xff]  }
 0x59e   : > { %13233 = vmatprep.subr.mxu0 %v14452_v24 }
 0x5a1   : > { %13234 = vmatpush3.xpose.msk.msra.mxu0 %vm1184_vm4, %v1154_v27  ;;  %v13369_v27 = vld [vmem:[%s18170_s5 + $0x104] ss:$16 sps:$4 sm:$0xff]  }
 0x5a2   : > { %13235 = vmatprep.subr.mxu0 %v14452_v24 }
 0x5a5   : > { %13236 = vmatpush3.xpose.msk.msra.mxu0 %vm1184_vm4, %v1153_v28 }
 0x5a6   : > { %13237 = vmatprep.subr.mxu0 %v14452_v24 }
 0x5a9   : > { %13238 = vmatpush3.xpose.msk.msra.mxu0 %vm1184_vm4, %v1152_v29  ;;  %v13364_v29 = vld [vmem:[%s18170_s5 + $0x28] ss:$16 sps:$4 sm:$0xff]  }
 0x5aa   : > { %11544 = vmatprep.subr.msk.bf16.mxu0 %vm1399_vm6, %v11541_v36  ;;  %v13375_v36 = vld [vmem:[%s18170_s5 + $0xe4] ss:$16 sps:$4 sm:$0xff]  }
 0x5ac   : > { %13240 = vmatmul.mubr.msk.f32.vlgmr.msra.gmra.mxu0 %vm1184_vm4, %v1147_v7 }
 0x5ad   : > { %13242 = vmatprep.mubr.msk.f32.mxu0 %vm14453_vm5, %v14452_v24  ;;  %1635 = vmatpush1.bf16.msra.mxu0 %v1615_v41  ;;  %v11542_v41 = vcombine.low %v11527_v35, %v11527_v35  ;;  %v13426_v35 = vld [vmem:[%s18170_s5 + $0x19c] ss:$16 sps:$4 sm:$0xff]  }
 0x5ae   : > { %1636 = vmatprep.subr.bf16.mxu0 %v13341_v39  ;;  %v11594_v39 = vld [vmem:[%s18170_s5 + $0x1b0] sm:$0x11] }
 0x5af   : > { %v11609_v44 = vcombine.high %v11594_v39, %v11594_v39  ;;  %v11608_v45 = vcombine.low %v11594_v39, %v11594_v39  ;;  %v13429_v39 = vld [vmem:[%s18170_s5 + $0x274] ss:$16 sps:$4 sm:$0xff]  }
 0x5b0   : > { %13243 = vmatmul.mubr.msk.f32.gmra.mxu0 %vm1184_vm4, %v1148_v10 }
 0x5b1   : > { %13245 = vmatprep.mubr.msk.f32.mxu0 %vm14453_vm5, %v14452_v24  ;;  %1637 = vmatpush1.bf16.msra.mxu0 %v13339_v43  ;;  %v2042_v49 = vsel %vm1399_vm6, %v11608_v45, 0  ;;  %v13438_v45 = vld [vmem:[%s18170_s5 + $0x15c] ss:$16 sps:$4 sm:$0xff]  }
 0x5b2   : > { %1638 = vmatprep.subr.bf16.mxu0 %v13347_v46  ;;  %v1621_v46 = vsel %vm1399_vm6, %v11542_v41, 0  ;;  %v13432_v41 = vld [vmem:[%s18170_s5 + $0x17c] ss:$16 sps:$4 sm:$0xff]  }
 0x5b4   : > { %13246 = vmatmul.mubr.msk.f32.gmra.mxu0 %vm1184_vm4, %v1149_v8 }
 0x5b5   : > { %13248 = vmatprep.mubr.msk.f32.mxu0 %vm14453_vm5, %v14452_v24  ;;  %1639 = vmatpush1.bf16.msra.mxu0 %v13345_v47  ;;  %v13382_v47 = vld [vmem:[%s18170_s5 + $0xbc] ss:$16 sps:$4 sm:$0xff]  }
 0x5b6   : > { %1640 = vmatprep.subr.bf16.mxu0 %v13353_v50  ;;  %v13385_v50 = vld [vmem:[%s18170_s5 + $0x194] ss:$16 sps:$4 sm:$0xff]  }
 0x5b8   : > { %13249 = vmatmul.mubr.msk.f32.gmra.mxu0 %vm1184_vm4, %v1150_v13 }
 0x5b9   : > { %13251 = vmatprep.mubr.msk.f32.mxu0 %vm14453_vm5, %v14452_v24  ;;  %1641 = vmatpush1.bf16.msra.mxu0 %v13351_v53  ;;  %v13380_v53 = vld [vmem:[%s18170_s5 + $0xb8] ss:$16 sps:$4 sm:$0xff]  }
 0x5ba   : > { %11578 = vmatprep.subr.msk.bf16.mxu0 %vm1399_vm6, %v11575_v58  ;;  %v13386_v58 = vld [vmem:[%s18170_s5 + $0x98] ss:$16 sps:$4 sm:$0xff]  }
 0x5bc   : > { %13252 = vmatmul.mubr.msk.f32.gmra.mxu0 %vm1184_vm4, %v1151_v14  ;;  %vm10587_vm4 = vcmask 769024  }
 0x5bd   : > { %1658 = vmatprep.mubr.bf16.mxu0 %v14454_v56 }
 0x650   : > { %v13224_v60 = vpop.f32.mrf.mxu0 }
 0x651   : > { %v1133_v63 = vadd.f32 %v13224_v60, %v14700_v6  ;;  %v11574_v6 = vcombine.low %v11560_v57, %v11560_v57  ;;  %v13391_v57 = vld [vmem:[%s18170_s5 + $0x174] ss:$16 sps:$4 sm:$0xff]   ;;  %v13389_v60 = vld [vmem:[%s18170_s5 + $0x170] ss:$16 sps:$4 sm:$0xff]  }
 0x652   : > { %v1123_v0 = vpop.f32.mrf.mxu0 }
 0x653   : > { %v1135_v1 = vadd.f32 %v1133_v63, %v955_v62  ;;  %v1132_v3 = vadd.f32 %v1123_v0, %v14697_v5  ;;  %v1407_v5 = vsel %vm1399_vm6, %v11508_v51, 0  ;;  %v1829_v19 = vsel %vm1399_vm6, %v11574_v6, 0  ;;  %v13397_v62 = vld [vmem:[%s18170_s5 + $0x154] ss:$16 sps:$4 sm:$0xff]   ;;  %v13392_v63 = vld [vmem:[%s18170_s5 + $0x78] ss:$16 sps:$4 sm:$0xff]  }
 0x654   : > { %v11628_v0 = vld [vmem:[%s18170_s5 + $0x220] sm:$0x11] }
 0x655   : > { %v1134_v4 = vadd.f32 %v1132_v3, %v954_v2  ;;  %v1138_v7 = vsel %vm1137_vm7, %v1135_v1, 0.0  ;;  %v11577_v1 = vcombine.high %v11561_v61, %v11561_v61  ;;  %v11576_v2 = vcombine.low %v11561_v61, %v11561_v61  ;;  %v13395_v3 = vld [vmem:[%s18170_s5 + $0x150] ss:$16 sps:$4 sm:$0xff]   ;;  %v13407_v51 = vld [vmem:[%s18170_s5 + $0x204] ss:$16 sps:$4 sm:$0xff]  }
 0x656   : > { %v13405_v6 = vld [vmem:[%s18170_s5 + $0x200] ss:$16 sps:$4 sm:$0xff]  }
 0x657   : > { %v1136_v8 = vsel %vm418_vm1, %v1134_v4, 0.0  ;;  %v11643_v4 = vcombine.high %v11628_v0, %v11628_v0 }
 0x658   : > { %v14824_v34 = vadd.f32 %v1138_v7, %v1136_v8  ;;  %v11642_v7 = vcombine.low %v11628_v0, %v11628_v0  ;;  %v1835_v8 = vsel %vm1399_vm6, %v11576_v2, 0  ;;  %v13446_v0 = vld [vmem:[%s18170_s5 + $0x208] ss:$16 sps:$4 sm:$0xff]   ;;  %v13449_v2 = vld [vmem:[%s18170_s5 + $0x2e0] ss:$16 sps:$4 sm:$0xff]  }
 0x66c   : > { %v1282_v9 = vpop.f32.mrf.mxu0 }
 0x66d   : > { %v1283_v32 = vadd.f32 %v1282_v9, %v1162_v52  ;;  %v13404_v52 = vld [vmem:[%s18170_s5 + $0x12c] ss:$16 sps:$4 sm:$0xff]  }
 0x66e   : > { %v13241_v10 = vpop.f32.mrf.mxu0 }
 0x66f   : > { %v1306_v13 = vmax.f32 %v1283_v32, 0.0  ;;  %v2255_v32 = vsel %vm1399_vm6, %v11642_v7, 0  ;;  %v13402_v10 = vld [vmem:[%s18170_s5 + $0x128] ss:$16 sps:$4 sm:$0xff]   ;;  %v13460_v7 = vld [vmem:[%s18170_s5 + $0x1cc] ss:$16 sps:$4 sm:$0xff]  }
 0x670   : > { %v14826_v14 = vpop.f32.mrf.mxu0 }
 0x671   : > { %v14828_v15 = vpack.c.bf16 %v1306_v13, %v1306_v13  ;;  %v13410_v13 = vld [vmem:[%s18170_s5 + $0x10c] ss:$16 sps:$4 sm:$0xff]  }
 0x672   : > { %v13244_v17 = vpop.f32.mrf.mxu0 }
 0x673   : > { %11511 = vmatmul.mubr.msk.bf16.vlgmr.msra.gmra.mxu1 %vm418_vm1, %v14828_v15  ;;  %v14837_v18 = vshrl.u32 %v14828_v15, 16  ;;  %v1754_v48 = vrot.slane %v14828_v15, 1  ;;  %v13416_v17 = vld [vmem:[%s18170_s5 + $0xec] ss:$16 sps:$4 sm:$0xff]  }
 0x674   : > { %1462 = vmatpush1.bf16.msra.mxu1 %v1407_v5  ;;  %v14843_v22 = vpop.f32.mrf.mxu0  ;;  %1485 = vmatprep.mubr.bf16.mxu1 %v14454_v56  ;;  %v13413_v5 = vld [vmem:[%s18170_s5 + $0x1e4] ss:$16 sps:$4 sm:$0xff]  }
 0x675   : > { %11545 = vmatmul.mubr.msk.bf16.vlgmr.msra.gmra.mxu0 %vm418_vm1, %v14837_v18  ;;  %1463 = vmatprep.subr.bf16.mxu1 %v13360_v16  ;;  %v1967_v9 = vrot.slane %v14837_v18, 1  ;;  %v13408_v16 = vld [vmem:[%s18170_s5 + $0x108] ss:$16 sps:$4 sm:$0xff]   ;;  %v2393_v61 = vrot.slane %v14837_v18, 2 }
 0x676   : > { %1849 = vmatpush1.bf16.msra.mxu0 %v1829_v19  ;;  %v13247_v26 = vpop.f32.mrf.mxu0  ;;  %1872 = vmatprep.mubr.bf16.mxu0 %v14454_v56  ;;  %v13411_v19 = vld [vmem:[%s18170_s5 + $0x1e0] ss:$16 sps:$4 sm:$0xff]  }
 0x677   : > { %1850 = vmatprep.subr.bf16.mxu0 %v13363_v21  ;;  %v11595_v21 = vld [vmem:[%s18170_s5 + $0x1b8] sm:$0x11]  ;;  %v11662_v26 = vld [vmem:[%s18170_s5 + $0x290] sm:$0x11] }
 0x678   : > { %1464 = vmatpush1.bf16.msra.mxu1 %v13358_v23  ;;  %v14861_v28 = vpop.f32.mrf.mxu0  ;;  %v13419_v23 = vld [vmem:[%s18170_s5 + $0x1c4] ss:$16 sps:$4 sm:$0xff]  }
 0x679   : > { %1465 = vmatprep.subr.bf16.mxu1 %v13366_v25  ;;  %v13414_v25 = vld [vmem:[%s18170_s5 + $0xe8] ss:$16 sps:$4 sm:$0xff]  }
 0x67a   : > { %1851 = vmatpush1.bf16.msra.mxu0 %v13361_v20  ;;  %v13250_v31 = vpop.f32.mrf.mxu0  ;;  %v11611_v20 = vcombine.high %v11595_v21, %v11595_v21 }
 0x67b   : > { %1852 = vmatprep.subr.bf16.mxu0 %v13369_v27  ;;  %v11610_v27 = vcombine.low %v11595_v21, %v11595_v21  ;;  %v11676_v31 = vcombine.low %v11662_v26, %v11662_v26  ;;  %v2606_v21 = vrot.slane %v14828_v15, 3 }
 0x67c   : > { %1466 = vmatpush1.bf16.msra.mxu1 %v13364_v29  ;;  %v14878_v37 = vpop.f32.mrf.mxu0  ;;  %v13417_v29 = vld [vmem:[%s18170_s5 + $0x1c0] ss:$16 sps:$4 sm:$0xff]  }
 0x67d   : > { %1467 = vmatprep.subr.bf16.mxu1 %v13372_v30  ;;  %v11677_v30 = vcombine.high %v11662_v26, %v11662_v26  ;;  %v13468_v26 = vld [vmem:[%s18170_s5 + $0x278] ss:$16 sps:$4 sm:$0xff]  }
 0x67e   : > { %1853 = vmatpush1.bf16.msra.mxu0 %v13367_v33  ;;  %v13253_v43 = vpop.f32.mrf.mxu0  ;;  %v2048_v33 = vsel %vm1399_vm6, %v11610_v27, 0  ;;  %v13471_v27 = vld [vmem:[%s18170_s5 + $0x350] ss:$16 sps:$4 sm:$0xff]  }
 0x67f   : > { %1854 = vmatprep.subr.bf16.mxu0 %v13375_v36  ;;  %v2180_v36 = vrot.slane %v14828_v15, 2  ;;  %v13435_v43 = vld [vmem:[%s18170_s5 + $0x254] ss:$16 sps:$4 sm:$0xff]  }
 0x680   : > { %1468 = vmatpush1.bf16.msra.mxu1 %v13370_v38  ;;  %v2468_v38 = vsel %vm1399_vm6, %v11676_v31, 0  ;;  %v13482_v31 = vld [vmem:[%s18170_s5 + $0x23c] ss:$16 sps:$4 sm:$0xff]  }
 0x681   : > { %11546 = vmatprep.subr.msk.bf16.mxu1 %vm1399_vm6, %v11543_v40  ;;  %v13424_v40 = vld [vmem:[%s18170_s5 + $0x198] ss:$16 sps:$4 sm:$0xff]  }
 0x682   : > { %1855 = vmatpush1.bf16.msra.mxu0 %v13373_v42  ;;  %v13427_v42 = vld [vmem:[%s18170_s5 + $0x270] ss:$16 sps:$4 sm:$0xff]  }
 0x683   : > { %11513 = vmatmul.mubr.msk.bf16.vlgmr.msra.gmra.mxu1 %vm418_vm1, %v14828_v15  ;;  %11612 = vmatprep.subr.msk.bf16.mxu0 %vm1399_vm6, %v11609_v44  ;;  %v13430_v44 = vld [vmem:[%s18170_s5 + $0x178] ss:$16 sps:$4 sm:$0xff]   ;;  %v13520_v15 = vld [vmem:[%s18170_s5 + $0x33c] ss:$16 sps:$4 sm:$0xff]  }
 0x684   : > { %1676 = vmatpush1.bf16.msra.mxu1 %v1621_v46  ;;  %1699 = vmatprep.mubr.bf16.mxu1 %v14454_v56  ;;  %v13433_v46 = vld [vmem:[%s18170_s5 + $0x250] ss:$16 sps:$4 sm:$0xff]  }
 0x685   : > { %11579 = vmatmul.mubr.msk.bf16.vlgmr.msra.gmra.mxu0 %vm418_vm1, %v1754_v48  ;;  %1677 = vmatprep.subr.bf16.mxu1 %v13382_v47  ;;  %v11629_v47 = vld [vmem:[%s18170_s5 + $0x228] sm:$0x11] }
 0x686   : > { %2062 = vmatpush1.bf16.msra.mxu0 %v2042_v49  ;;  %2085 = vmatprep.mubr.bf16.mxu0 %v14454_v56  ;;  %v13436_v49 = vld [vmem:[%s18170_s5 + $0x158] ss:$16 sps:$4 sm:$0xff]  }
 0x687   : > { %2063 = vmatprep.subr.bf16.mxu0 %v13385_v50  ;;  %v11696_v50 = vld [vmem:[%s18170_s5 + $0x300] sm:$0x11] }
 0x688   : > { %1678 = vmatpush1.bf16.msra.mxu1 %v13380_v53  ;;  %v11645_v53 = vcombine.high %v11629_v47, %v11629_v47 }
 0x689   : > { %1679 = vmatprep.subr.bf16.mxu1 %v13388_v54  ;;  %v11644_v54 = vcombine.low %v11629_v47, %v11629_v47  ;;  %v2819_v47 = vrot.slane %v14837_v18, 3 }
 0x68a   : > { %2064 = vmatpush1.bf16.msra.mxu0 %v13383_v55  ;;  %v13439_v55 = vld [vmem:[%s18170_s5 + $0x230] ss:$16 sps:$4 sm:$0xff]  }
 0x68b   : > { %2065 = vmatprep.subr.bf16.mxu0 %v13391_v57  ;;  %v11711_v57 = vcombine.high %v11696_v50, %v11696_v50 }
 0x68c   : > { %1680 = vmatpush1.bf16.msra.mxu1 %v13386_v58  ;;  %v11710_v58 = vcombine.low %v11696_v50, %v11696_v50  ;;  %v13490_v50 = vld [vmem:[%s18170_s5 + $0x2e8] ss:$16 sps:$4 sm:$0xff]  }
 0x68d   : > { %1681 = vmatprep.subr.bf16.mxu1 %v13394_v59  ;;  %v2261_v59 = vsel %vm1399_vm6, %v11644_v54, 0  ;;  %v13493_v54 = vld [vmem:[%s18170_s5 + $0x3c0] ss:$16 sps:$4 sm:$0xff]  }
 0x68e   : > { %2066 = vmatpush1.bf16.msra.mxu0 %v13389_v60  ;;  %v13448_v60 = vld [vmem:[%s18170_s5 + $0x20c] ss:$16 sps:$4 sm:$0xff]  }
 0x68f   : > { %2067 = vmatprep.subr.bf16.mxu0 %v13397_v62  ;;  %v2681_v62 = vsel %vm1399_vm6, %v11710_v58, 0  ;;  %v13504_v58 = vld [vmem:[%s18170_s5 + $0x2ac] ss:$16 sps:$4 sm:$0xff]  }
 0x690   : > { %1682 = vmatpush1.bf16.msra.mxu1 %v13392_v63  ;;  %v13451_v63 = vld [vmem:[%s18170_s5 + $0x2e4] ss:$16 sps:$4 sm:$0xff]  }
 0x691   : > { %11580 = vmatprep.subr.msk.bf16.mxu1 %vm1399_vm6, %v11577_v1  ;;  %v13454_v1 = vld [vmem:[%s18170_s5 + $0x1ec] ss:$16 sps:$4 sm:$0xff]  }
 0x692   : > { %2068 = vmatpush1.bf16.msra.mxu0 %v13395_v3  ;;  %v13457_v3 = vld [vmem:[%s18170_s5 + $0x2c4] ss:$16 sps:$4 sm:$0xff]  }
 0x693   : > { %11547 = vmatmul.mubr.msk.bf16.vlgmr.msra.gmra.mxu1 %vm418_vm1, %v14837_v18  ;;  %11646 = vmatprep.subr.msk.bf16.mxu0 %vm1399_vm6, %v11643_v4  ;;  %v13452_v4 = vld [vmem:[%s18170_s5 + $0x1e8] ss:$16 sps:$4 sm:$0xff]   ;;  %v13542_v18 = vld [vmem:[%s18170_s5 + $0x3ac] ss:$16 sps:$4 sm:$0xff]  }
 0x694   : > { %1890 = vmatpush1.bf16.msra.mxu1 %v1835_v8  ;;  %1913 = vmatprep.mubr.bf16.mxu1 %v14454_v56  ;;  %v13455_v8 = vld [vmem:[%s18170_s5 + $0x2c0] ss:$16 sps:$4 sm:$0xff]  }
 0x695   : > { %11613 = vmatmul.mubr.msk.bf16.vlgmr.msra.gmra.mxu0 %vm418_vm1, %v1967_v9  ;;  %1891 = vmatprep.subr.bf16.mxu1 %v13404_v52  ;;  %v11663_v52 = vld [vmem:[%s18170_s5 + $0x298] sm:$0x11] }
 0x696   : > { %2275 = vmatpush1.bf16.msra.mxu0 %v2255_v32  ;;  %2298 = vmatprep.mubr.bf16.mxu0 %v14454_v56  ;;  %v13458_v32 = vld [vmem:[%s18170_s5 + $0x1c8] ss:$16 sps:$4 sm:$0xff]  }
 0x697   : > { %2276 = vmatprep.subr.bf16.mxu0 %v13407_v51  ;;  %v11730_v51 = vld [vmem:[%s18170_s5 + $0x370] sm:$0x11] }
 0x698   : > { %1892 = vmatpush1.bf16.msra.mxu1 %v13402_v10  ;;  %v11679_v10 = vcombine.high %v11663_v52, %v11663_v52 }
 0x699   : > { %1893 = vmatprep.subr.bf16.mxu1 %v13410_v13  ;;  %v11678_v13 = vcombine.low %v11663_v52, %v11663_v52 }
 0x69a   : > { %2277 = vmatpush1.bf16.msra.mxu0 %v13405_v6  ;;  %v13461_v6 = vld [vmem:[%s18170_s5 + $0x2a0] ss:$16 sps:$4 sm:$0xff]  }
 0x69b   : > { %2278 = vmatprep.subr.bf16.mxu0 %v13413_v5  ;;  %v11745_v5 = vcombine.high %v11730_v51, %v11730_v51 }
 0x69c   : > { %1894 = vmatpush1.bf16.msra.mxu1 %v13408_v16  ;;  %v11744_v16 = vcombine.low %v11730_v51, %v11730_v51 }
 0x69d   : > { %1895 = vmatprep.subr.bf16.mxu1 %v13416_v17  ;;  %v2474_v17 = vsel %vm1399_vm6, %v11678_v13, 0  ;;  %v13512_v13 = vld [vmem:[%s18170_s5 + $0x358] ss:$16 sps:$4 sm:$0xff]  }
 0x69e   : > { %2279 = vmatpush1.bf16.msra.mxu0 %v13411_v19  ;;  %v13470_v19 = vld [vmem:[%s18170_s5 + $0x27c] ss:$16 sps:$4 sm:$0xff]  }
 0x69f   : > { %2280 = vmatprep.subr.bf16.mxu0 %v13419_v23  ;;  %v2894_v23 = vsel %vm1399_vm6, %v11744_v16, 0  ;;  %v13518_v16 = vld [vmem:[%s18170_s5 + $0x338] ss:$16 sps:$4 sm:$0xff]  }
 0x6a0   : > { %1896 = vmatpush1.bf16.msra.mxu1 %v13414_v25  ;;  %v13473_v25 = vld [vmem:[%s18170_s5 + $0x354] ss:$16 sps:$4 sm:$0xff]  }
 0x6a1   : > { %11614 = vmatprep.subr.msk.bf16.mxu1 %vm1399_vm6, %v11611_v20  ;;  %v13476_v20 = vld [vmem:[%s18170_s5 + $0x25c] ss:$16 sps:$4 sm:$0xff]  }
 0x6a2   : > { %2281 = vmatpush1.bf16.msra.mxu0 %v13417_v29  ;;  %v13479_v29 = vld [vmem:[%s18170_s5 + $0x334] ss:$16 sps:$4 sm:$0xff]  }
 0x6a3   : > { %11581 = vmatmul.mubr.msk.bf16.vlgmr.msra.gmra.mxu1 %vm418_vm1, %v1754_v48  ;;  %11680 = vmatprep.subr.msk.bf16.mxu0 %vm1399_vm6, %v11677_v30  ;;  %v13441_v48 = vld [vmem:[%s18170_s5 + $0x234] ss:$16 sps:$4 sm:$0xff]   ;;  %v13474_v30 = vld [vmem:[%s18170_s5 + $0x258] ss:$16 sps:$4 sm:$0xff]  }
 0x6a4   : > { %2103 = vmatpush1.bf16.msra.mxu1 %v2048_v33  ;;  %2126 = vmatprep.mubr.bf16.mxu1 %v14454_v56  ;;  %v13477_v33 = vld [vmem:[%s18170_s5 + $0x330] ss:$16 sps:$4 sm:$0xff]  }
 0x6a5   : > { %11647 = vmatmul.mubr.msk.bf16.vlgmr.msra.gmra.mxu0 %vm418_vm1, %v2180_v36  ;;  %2104 = vmatprep.subr.bf16.mxu1 %v13426_v35  ;;  %v11697_v35 = vld [vmem:[%s18170_s5 + $0x308] sm:$0x11] }
 0x6a6   : > { %2488 = vmatpush1.bf16.msra.mxu0 %v2468_v38  ;;  %2511 = vmatprep.mubr.bf16.mxu0 %v14454_v56  ;;  %v13480_v38 = vld [vmem:[%s18170_s5 + $0x238] ss:$16 sps:$4 sm:$0xff]  }
 0x6a7   : > { %2489 = vmatprep.subr.bf16.mxu0 %v13429_v39  ;;  %v11764_v39 = vld [vmem:[%s18170_s5 + $0x3e0] sm:$0x11] }
 0x6a8   : > { %2105 = vmatpush1.bf16.msra.mxu1 %v13424_v40  ;;  %v11713_v40 = vcombine.high %v11697_v35, %v11697_v35 }
 0x6a9   : > { %2106 = vmatprep.subr.bf16.mxu1 %v13432_v41  ;;  %v11712_v41 = vcombine.low %v11697_v35, %v11697_v35  ;;  %v13536_v35 = vld [vmem:[%s18170_s5 + $0x3cc] ss:$16 sps:$4 sm:$0xff]  }
 0x6aa   : > { %2490 = vmatpush1.bf16.msra.mxu0 %v13427_v42  ;;  %v13483_v42 = vld [vmem:[%s18170_s5 + $0x310] ss:$16 sps:$4 sm:$0xff]  }
 0x6ab   : > { %2491 = vmatprep.subr.bf16.mxu0 %v13435_v43  ;;  %v11779_v43 = vcombine.high %v11764_v39, %v11764_v39 }
 0x6ac   : > { %2107 = vmatpush1.bf16.msra.mxu1 %v13430_v44  ;;  %v11778_v44 = vcombine.low %v11764_v39, %v11764_v39  ;;  %v13539_v39 = vld [vmem:[%s18170_s5 + $0x4a4] ss:$16 sps:$4 sm:$0xff]  }
 0x6ad   : > { %2108 = vmatprep.subr.bf16.mxu1 %v13438_v45  ;;  %v2687_v45 = vsel %vm1399_vm6, %v11712_v41, 0  ;;  %v13537_v41 = vld [vmem:[%s18170_s5 + $0x4a0] ss:$16 sps:$4 sm:$0xff]  }
 0x6ae   : > { %2492 = vmatpush1.bf16.msra.mxu0 %v13433_v46  ;;  %v13492_v46 = vld [vmem:[%s18170_s5 + $0x2ec] ss:$16 sps:$4 sm:$0xff]  }
 0x6af   : > { %2493 = vmatprep.subr.bf16.mxu0 %v13441_v48  ;;  %v3107_v48 = vsel %vm1399_vm6, %v11778_v44, 0  ;;  %v13548_v44 = vld [vmem:[%s18170_s5 + $0x38c] ss:$16 sps:$4 sm:$0xff]  }
 0x6b0   : > { %2109 = vmatpush1.bf16.msra.mxu1 %v13436_v49  ;;  %v13495_v49 = vld [vmem:[%s18170_s5 + $0x3c4] ss:$16 sps:$4 sm:$0xff]  }
 0x6b1   : > { %11648 = vmatprep.subr.msk.bf16.mxu1 %vm1399_vm6, %v11645_v53  ;;  %v13498_v53 = vld [vmem:[%s18170_s5 + $0x2cc] ss:$16 sps:$4 sm:$0xff]  }
 0x6b2   : > { %2494 = vmatpush1.bf16.msra.mxu0 %v13439_v55  ;;  %v13501_v55 = vld [vmem:[%s18170_s5 + $0x3a4] ss:$16 sps:$4 sm:$0xff]  }
 0x6b3   : > { %11615 = vmatmul.mubr.msk.bf16.vlgmr.msra.gmra.mxu1 %vm418_vm1, %v1967_v9  ;;  %11714 = vmatprep.subr.msk.bf16.mxu0 %vm1399_vm6, %v11711_v57  ;;  %v13463_v9 = vld [vmem:[%s18170_s5 + $0x2a4] ss:$16 sps:$4 sm:$0xff]   ;;  %v13496_v57 = vld [vmem:[%s18170_s5 + $0x2c8] ss:$16 sps:$4 sm:$0xff]  }
 0x6b4   : > { %2316 = vmatpush1.bf16.msra.mxu1 %v2261_v59  ;;  %2339 = vmatprep.mubr.bf16.mxu1 %v14454_v56  ;;  %v1167_v59 = vpop.permute.xlu0 %1166 }
 0x6b5   : > { %11681 = vmatmul.mubr.msk.bf16.vlgmr.msra.gmra.mxu0 %vm418_vm1, %v2393_v61  ;;  %2317 = vmatprep.subr.bf16.mxu1 %v13448_v60  ;;  %v13499_v60 = vld [vmem:[%s18170_s5 + $0x3a0] ss:$16 sps:$4 sm:$0xff]  }
 0x6b6   : > { %2701 = vmatpush1.bf16.msra.mxu0 %v2681_v62  ;;  %2724 = vmatprep.mubr.bf16.mxu0 %v14454_v56  ;;  %v1288_v62 = vadd.f32 %v14826_v14, %v1167_v59  ;;  %v13505_v14 = vld [vmem:[%s18170_s5 + $0x380] ss:$16 sps:$4 sm:$0xff]   ;;  %v13558_v59 = vld [vmem:[%s18170_s5 + $0x43c] ss:$16 sps:$4 sm:$0xff]  }
 0x6b7   : > { %2702 = vmatprep.subr.bf16.mxu0 %v13451_v63  ;;  %v13507_v63 = vld [vmem:[%s18170_s5 + $0x384] ss:$16 sps:$4 sm:$0xff]  }
 0x6b8   : > { %2318 = vmatpush1.bf16.msra.mxu1 %v13446_v0  ;;  %v13502_v0 = vld [vmem:[%s18170_s5 + $0x2a8] ss:$16 sps:$4 sm:$0xff]  }
 0x6b9   : > { %2319 = vmatprep.subr.bf16.mxu1 %v13454_v1  ;;  %v11798_v1 = vld [vmem:[%s18170_s5 + $0x450] sm:$0x11] }
 0x6ba   : > { %2703 = vmatpush1.bf16.msra.mxu0 %v13449_v2 }
 0x6bb   : > { %2704 = vmatprep.subr.bf16.mxu0 %v13457_v3 }
 0x6bc   : > { %2320 = vmatpush1.bf16.msra.mxu1 %v13452_v4  ;;  %v1307_v4 = vmax.f32 %v1288_v62, 0.0  ;;  %v13561_v62 = vld [vmem:[%s18170_s5 + $0x514] ss:$16 sps:$4 sm:$0xff]  }
 0x6bd   : > { %2321 = vmatprep.subr.bf16.mxu1 %v13460_v7  ;;  %v11813_v7 = vcombine.high %v11798_v1, %v11798_v1 }
 0x6be   : > { %2705 = vmatpush1.bf16.msra.mxu0 %v13455_v8  ;;  %v11812_v8 = vcombine.low %v11798_v1, %v11798_v1  ;;  %v13559_v1 = vld [vmem:[%s18170_s5 + $0x510] ss:$16 sps:$4 sm:$0xff]  }
 0x6bf   : > { %2706 = vmatprep.subr.bf16.mxu0 %v13463_v9  ;;  %v13514_v9 = vld [vmem:[%s18170_s5 + $0x35c] ss:$16 sps:$4 sm:$0xff]  }
 0x6c0   : > { %2322 = vmatpush1.bf16.msra.mxu1 %v13458_v32  ;;  %v15223_v32 = vpack.c.bf16 %v1307_v4, %v1307_v4  ;;  %v3321_v51 = vsel %vm1399_vm6, %v11812_v8, 0  ;;  %v13565_v4 = vld [vmem:[%s18170_s5 + $0x4f0] ss:$16 sps:$4 sm:$0xff]   ;;  %v13573_v8 = vld [vmem:[%s18170_s5 + $0x4d4] ss:$16 sps:$4 sm:$0xff]  }
 0x6c1   : > { %11682 = vmatprep.subr.msk.bf16.mxu1 %vm1399_vm6, %v11679_v10  ;;  %v13517_v10 = vld [vmem:[%s18170_s5 + $0x434] ss:$16 sps:$4 sm:$0xff]  }
 0x6c2   : > { %2707 = vmatpush1.bf16.msra.mxu0 %v13461_v6  ;;  %v13515_v6 = vld [vmem:[%s18170_s5 + $0x430] ss:$16 sps:$4 sm:$0xff]  }
 0x6c3   : > { %11649 = vmatmul.mubr.msk.bf16.vlgmr.msra.gmra.mxu1 %vm418_vm1, %v2180_v36  ;;  %11748 = vmatprep.subr.msk.bf16.mxu0 %vm1399_vm6, %v11745_v5  ;;  %v13485_v36 = vld [vmem:[%s18170_s5 + $0x314] ss:$16 sps:$4 sm:$0xff]  }
 0x6c4   : > { %2529 = vmatpush1.bf16.msra.mxu1 %v2474_v17  ;;  %2552 = vmatprep.mubr.bf16.mxu1 %v14454_v56  ;;  %v13523_v5 = vld [vmem:[%s18170_s5 + $0x414] ss:$16 sps:$4 sm:$0xff]   ;;  %v13526_v17 = vld [vmem:[%s18170_s5 + $0x31c] ss:$16 sps:$4 sm:$0xff]  }
 0x6c5   : > { %11715 = vmatmul.mubr.msk.bf16.vlgmr.msra.gmra.mxu0 %vm418_vm1, %v2606_v21  ;;  %2530 = vmatprep.subr.bf16.mxu1 %v13470_v19  ;;  %v13521_v19 = vld [vmem:[%s18170_s5 + $0x410] ss:$16 sps:$4 sm:$0xff]  }
 0x6c6   : > { %2914 = vmatpush1.bf16.msra.mxu0 %v2894_v23  ;;  %2937 = vmatprep.mubr.bf16.mxu0 %v14454_v56  ;;  %v13529_v23 = vld [vmem:[%s18170_s5 + $0x3f4] ss:$16 sps:$4 sm:$0xff]  }
 0x6c7   : > { %2915 = vmatprep.subr.bf16.mxu0 %v13473_v25  ;;  %v13524_v25 = vld [vmem:[%s18170_s5 + $0x318] ss:$16 sps:$4 sm:$0xff]  }
 0x6c8   : > { %2531 = vmatpush1.bf16.msra.mxu1 %v13468_v26  ;;  %v11832_v26 = vld [vmem:[%s18170_s5 + $0x4c0] sm:$0x11] }
 0x6c9   : > { %2532 = vmatprep.subr.bf16.mxu1 %v13476_v20 }
 0x6ca   : > { %2916 = vmatpush1.bf16.msra.mxu0 %v13471_v27 }
 0x6cb   : > { %2917 = vmatprep.subr.bf16.mxu0 %v13479_v29  ;;  %v13527_v29 = vld [vmem:[%s18170_s5 + $0x3f0] ss:$16 sps:$4 sm:$0xff]  }
 0x6cc   : > { %2533 = vmatpush1.bf16.msra.mxu1 %v13474_v30  ;;  %v11847_v30 = vcombine.high %v11832_v26, %v11832_v26 }
 0x6cd   : > { %2534 = vmatprep.subr.bf16.mxu1 %v13482_v31  ;;  %v11846_v31 = vcombine.low %v11832_v26, %v11832_v26  ;;  %v13581_v26 = vld [vmem:[%s18170_s5 + $0x580] ss:$16 sps:$4 sm:$0xff]  }
 0x6ce   : > { %2918 = vmatpush1.bf16.msra.mxu0 %v13477_v33 }
 0x6cf   : > { %2919 = vmatprep.subr.bf16.mxu0 %v13485_v36  ;;  %v15282_v36 = vshrl.u32 %v15223_v32, 16 }
 0x6d0   : > { %2535 = vmatpush1.bf16.msra.mxu1 %v13480_v38  ;;  %v3535_v38 = vsel %vm1399_vm6, %v11846_v31, 0  ;;  %v11867_v31 = vld [vmem:[%s18170_s5 + $0x538] sm:$0x11] }
 0x6d1   : > { %11716 = vmatprep.subr.msk.bf16.mxu1 %vm1399_vm6, %v11713_v40  ;;  %v13534_v40 = vld [vmem:[%s18170_s5 + $0x3c8] ss:$16 sps:$4 sm:$0xff]  }
 0x6d2   : > { %2920 = vmatpush1.bf16.msra.mxu0 %v13483_v42  ;;  %v13545_v42 = vld [vmem:[%s18170_s5 + $0x484] ss:$16 sps:$4 sm:$0xff]  }
 0x6d3   : > { %11683 = vmatmul.mubr.msk.bf16.vlgmr.msra.gmra.mxu1 %vm418_vm1, %v2393_v61  ;;  %11782 = vmatprep.subr.msk.bf16.mxu0 %vm1399_vm6, %v11779_v43  ;;  %v11731_v61 = vld [vmem:[%s18170_s5 + $0x378] sm:$0x11] }
 0x6d4   : > { %2742 = vmatpush1.bf16.msra.mxu1 %v2687_v45  ;;  %2765 = vmatprep.mubr.bf16.mxu1 %v14454_v56  ;;  %v11747_v2 = vcombine.high %v11731_v61, %v11731_v61  ;;  %v11746_v3 = vcombine.low %v11731_v61, %v11731_v61  ;;  %v13540_v43 = vld [vmem:[%s18170_s5 + $0x3a8] ss:$16 sps:$4 sm:$0xff]   ;;  %v13543_v45 = vld [vmem:[%s18170_s5 + $0x480] ss:$16 sps:$4 sm:$0xff]  }
 0x6d5   : > { %11749 = vmatmul.mubr.msk.bf16.vlgmr.msra.gmra.mxu0 %vm418_vm1, %v2819_v47  ;;  %2743 = vmatprep.subr.bf16.mxu1 %v13492_v46  ;;  %v11799_v46 = vld [vmem:[%s18170_s5 + $0x458] sm:$0x11] }
 0x6d6   : > { %3127 = vmatpush1.bf16.msra.mxu0 %v3107_v48  ;;  %3150 = vmatprep.mubr.bf16.mxu0 %v14454_v56  ;;  %v2900_v52 = vsel %vm1399_vm6, %v11746_v3, 0  ;;  %v13546_v48 = vld [vmem:[%s18170_s5 + $0x388] ss:$16 sps:$4 sm:$0xff]  }
 0x6d7   : > { %3128 = vmatprep.subr.bf16.mxu0 %v13495_v49  ;;  %v11866_v49 = vld [vmem:[%s18170_s5 + $0x530] sm:$0x11]  ;;  %v13562_v3 = vld [vmem:[%s18170_s5 + $0x418] ss:$16 sps:$4 sm:$0xff]  }
 0x6d8   : > { %2744 = vmatpush1.bf16.msra.mxu1 %v13490_v50  ;;  %v11815_v50 = vcombine.high %v11799_v46, %v11799_v46 }
 0x6d9   : > { %2745 = vmatprep.subr.bf16.mxu1 %v13498_v53  ;;  %v11814_v53 = vcombine.low %v11799_v46, %v11799_v46 }
 0x6da   : > { %3129 = vmatpush1.bf16.msra.mxu0 %v13493_v54  ;;  %v13549_v54 = vld [vmem:[%s18170_s5 + $0x460] ss:$16 sps:$4 sm:$0xff]  }
 0x6db   : > { %3130 = vmatprep.subr.bf16.mxu0 %v13501_v55  ;;  %v11881_v55 = vcombine.high %v11866_v49, %v11866_v49 }
 0x6dc   : > { %2746 = vmatpush1.bf16.msra.mxu1 %v13496_v57  ;;  %v11880_v57 = vcombine.low %v11866_v49, %v11866_v49  ;;  %v13608_v49 = vld [vmem:[%s18170_s5 + $0x4fc] ss:$16 sps:$4 sm:$0xff]  }
 0x6dd   : > { %2747 = vmatprep.subr.bf16.mxu1 %v13504_v58  ;;  %v3327_v58 = vsel %vm1399_vm6, %v11814_v53, 0  ;;  %v13611_v53 = vld [vmem:[%s18170_s5 + $0x5d4] ss:$16 sps:$4 sm:$0xff]  }
 0x6de   : > { %3131 = vmatpush1.bf16.msra.mxu0 %v13499_v60  ;;  %v3460_v60 = vrot.slane %v15223_v32, 1  ;;  %v3748_v61 = vsel %vm1399_vm6, %v11880_v57, 0  ;;  %v13609_v57 = vld [vmem:[%s18170_s5 + $0x5d0] ss:$16 sps:$4 sm:$0xff]  }
 0x6df   : > { %3132 = vmatprep.subr.bf16.mxu0 %v13507_v63  ;;  %v13556_v63 = vld [vmem:[%s18170_s5 + $0x438] ss:$16 sps:$4 sm:$0xff]  }
 0x6e0   : > { %2748 = vmatpush1.bf16.msra.mxu1 %v13502_v0  ;;  %v13564_v0 = vld [vmem:[%s18170_s5 + $0x41c] ss:$16 sps:$4 sm:$0xff]  }
 0x6e1   : > { %11750 = vmatprep.subr.msk.bf16.mxu1 %vm1399_vm6, %v11747_v2  ;;  %v13567_v2 = vld [vmem:[%s18170_s5 + $0x4f4] ss:$16 sps:$4 sm:$0xff]  }
 0x6e2   : > { %3133 = vmatpush1.bf16.msra.mxu0 %v13505_v14  ;;  %v13570_v14 = vld [vmem:[%s18170_s5 + $0x3fc] ss:$16 sps:$4 sm:$0xff]  }
 0x6e3   : > { %11717 = vmatmul.mubr.msk.bf16.vlgmr.msra.gmra.mxu1 %vm418_vm1, %v2606_v21  ;;  %11816 = vmatprep.subr.msk.bf16.mxu0 %vm1399_vm6, %v11813_v7  ;;  %v11765_v21 = vld [vmem:[%s18170_s5 + $0x3e8] sm:$0x11] }
 0x6e4   : > { %2955 = vmatpush1.bf16.msra.mxu1 %v2900_v52  ;;  %2978 = vmatprep.mubr.bf16.mxu1 %v14454_v56  ;;  %v11781_v20 = vcombine.high %v11765_v21, %v11765_v21  ;;  %v11780_v27 = vcombine.low %v11765_v21, %v11765_v21  ;;  %v11833_v7 = vld [vmem:[%s18170_s5 + $0x4c8] sm:$0x11]  ;;  %v13583_v21 = vld [vmem:[%s18170_s5 + $0x584] ss:$16 sps:$4 sm:$0xff]  }
 0x6e5   : > { %11783 = vmatmul.mubr.msk.bf16.vlgmr.msra.gmra.mxu0 %vm418_vm1, %v15223_v32  ;;  %2956 = vmatprep.subr.bf16.mxu1 %v13514_v9  ;;  %v13568_v52 = vld [vmem:[%s18170_s5 + $0x3f8] ss:$16 sps:$4 sm:$0xff]   ;;  %v11900_v9 = vld [vmem:[%s18170_s5 + $0x5a0] sm:$0x11] }
 0x6e6   : > { %3341 = vmatpush1.bf16.msra.mxu0 %v3321_v51  ;;  %3364 = vmatprep.mubr.bf16.mxu0 %v14454_v56  ;;  %v3113_v33 = vsel %vm1399_vm6, %v11780_v27, 0  ;;  %v11849_v51 = vcombine.high %v11833_v7, %v11833_v7  ;;  %v13584_v27 = vld [vmem:[%s18170_s5 + $0x488] ss:$16 sps:$4 sm:$0xff]  }
 0x6e7   : > { %3342 = vmatprep.subr.bf16.mxu0 %v13517_v10  ;;  %v11848_v10 = vcombine.low %v11833_v7, %v11833_v7  ;;  %v4099_v7 = vrot.slane %v15282_v36, 2 }
 0x6e8   : > { %2957 = vmatpush1.bf16.msra.mxu1 %v13512_v13  ;;  %v13571_v13 = vld [vmem:[%s18170_s5 + $0x4d0] ss:$16 sps:$4 sm:$0xff]  }
 0x6e9   : > { %2958 = vmatprep.subr.bf16.mxu1 %v13520_v15  ;;  %v11915_v15 = vcombine.high %v11900_v9, %v11900_v9 }
 0x6ea   : > { %3343 = vmatpush1.bf16.msra.mxu0 %v13515_v6  ;;  %v11914_v6 = vcombine.low %v11900_v9, %v11900_v9  ;;  %v13622_v9 = vld [vmem:[%s18170_s5 + $0x588] ss:$16 sps:$4 sm:$0xff]  }
 0x6eb   : > { %3344 = vmatprep.subr.bf16.mxu0 %v13523_v5  ;;  %v3541_v5 = vsel %vm1399_vm6, %v11848_v10, 0 }
 0x6ec   : > { %2959 = vmatpush1.bf16.msra.mxu1 %v13518_v16  ;;  %v13580_v16 = vld [vmem:[%s18170_s5 + $0x4ac] ss:$16 sps:$4 sm:$0xff]  }
 0x6ed   : > { %2960 = vmatprep.subr.bf16.mxu1 %v13526_v17  ;;  %v3673_v17 = vrot.slane %v15282_v36, 1 }
 0x6ee   : > { %3345 = vmatpush1.bf16.msra.mxu0 %v13521_v19  ;;  %v3961_v19 = vsel %vm1399_vm6, %v11914_v6, 0  ;;  %v13625_v6 = vld [vmem:[%s18170_s5 + $0x660] ss:$16 sps:$4 sm:$0xff]  }
 0x6ef   : > { %3346 = vmatprep.subr.bf16.mxu0 %v13529_v23  ;;  %v13578_v23 = vld [vmem:[%s18170_s5 + $0x4a8] ss:$16 sps:$4 sm:$0xff]  }
 0x6f0   : > { %2961 = vmatpush1.bf16.msra.mxu1 %v13524_v25  ;;  %v13586_v25 = vld [vmem:[%s18170_s5 + $0x48c] ss:$16 sps:$4 sm:$0xff]  }
 0x6f1   : > { %11784 = vmatprep.subr.msk.bf16.mxu1 %vm1399_vm6, %v11781_v20  ;;  %v13589_v20 = vld [vmem:[%s18170_s5 + $0x564] ss:$16 sps:$4 sm:$0xff]  }
 0x6f2   : > { %3347 = vmatpush1.bf16.msra.mxu0 %v13527_v29  ;;  %v13592_v29 = vld [vmem:[%s18170_s5 + $0x46c] ss:$16 sps:$4 sm:$0xff]  }
 0x6f3   : > { %11751 = vmatmul.mubr.msk.bf16.vlgmr.msra.gmra.mxu1 %vm418_vm1, %v2819_v47  ;;  %11850 = vmatprep.subr.msk.bf16.mxu0 %vm1399_vm6, %v11847_v30  ;;  %v13551_v47 = vld [vmem:[%s18170_s5 + $0x464] ss:$16 sps:$4 sm:$0xff]   ;;  %v13587_v30 = vld [vmem:[%s18170_s5 + $0x560] ss:$16 sps:$4 sm:$0xff]  }
 0x6f4   : > { %3168 = vmatpush1.bf16.msra.mxu1 %v3113_v33  ;;  %3191 = vmatprep.mubr.bf16.mxu1 %v14454_v56  ;;  %v13595_v33 = vld [vmem:[%s18170_s5 + $0x544] ss:$16 sps:$4 sm:$0xff]  }
 0x6f5   : > { %11817 = vmatmul.mubr.msk.bf16.vlgmr.msra.gmra.mxu0 %vm418_vm1, %v15282_v36  ;;  %3169 = vmatprep.subr.bf16.mxu1 %v13536_v35  ;;  %v13590_v35 = vld [vmem:[%s18170_s5 + $0x468] ss:$16 sps:$4 sm:$0xff]  }
 0x6f6   : > { %3555 = vmatpush1.bf16.msra.mxu0 %v3535_v38  ;;  %3578 = vmatprep.mubr.bf16.mxu0 %v14454_v56  ;;  %v11934_v38 = vld [vmem:[%s18170_s5 + $0x610] sm:$0x11] }
 0x6f7   : > { %3556 = vmatprep.subr.bf16.mxu0 %v13539_v39  ;;  %v11883_v39 = vcombine.high %v11867_v31, %v11867_v31 }
 0x6f8   : > { %3170 = vmatpush1.bf16.msra.mxu1 %v13534_v40  ;;  %v11882_v40 = vcombine.low %v11867_v31, %v11867_v31  ;;  %v14455_v31 = vmov 1966171168  }
 0x6f9   : > { %3171 = vmatprep.subr.bf16.mxu1 %v13542_v18  ;;  %v13593_v18 = vld [vmem:[%s18170_s5 + $0x540] ss:$16 sps:$4 sm:$0xff]  }
 0x6fa   : > { %3557 = vmatpush1.bf16.msra.mxu0 %v13537_v41  ;;  %v11949_v41 = vcombine.high %v11934_v38, %v11934_v38 }
 0x6fb   : > { %3558 = vmatprep.subr.bf16.mxu0 %v13545_v42  ;;  %v11948_v42 = vcombine.low %v11934_v38, %v11934_v38  ;;  %v12002_v38 = vld [vmem:[%s18170_s5 + $0x6f0] sm:$0x11] }
 0x6fc   : > { %3172 = vmatpush1.bf16.msra.mxu1 %v13540_v43  ;;  %v3754_v43 = vsel %vm1399_vm6, %v11882_v40, 0 }
 0x6fd   : > { %3173 = vmatprep.subr.bf16.mxu1 %v13548_v44  ;;  %v13602_v44 = vld [vmem:[%s18170_s5 + $0x51c] ss:$16 sps:$4 sm:$0xff]   ;;  %v4174_v46 = vsel %vm1399_vm6, %v11948_v42, 0  ;;  %v12016_v42 = vcombine.low %v12002_v38, %v12002_v38 }
 0x6fe   : > { %3559 = vmatpush1.bf16.msra.mxu0 %v13543_v45  ;;  %v3886_v45 = vrot.slane %v15223_v32, 2 }
 0x6ff   : > { %3560 = vmatprep.subr.bf16.mxu0 %v13551_v47  ;;  %v13605_v47 = vld [vmem:[%s18170_s5 + $0x5f4] ss:$16 sps:$4 sm:$0xff]  }
 0x700   : > { %3174 = vmatpush1.bf16.msra.mxu1 %v13546_v48  ;;  %v13600_v48 = vld [vmem:[%s18170_s5 + $0x518] ss:$16 sps:$4 sm:$0xff]  }
 0x701   : > { %11818 = vmatprep.subr.msk.bf16.mxu1 %vm1399_vm6, %v11815_v50  ;;  %v13603_v50 = vld [vmem:[%s18170_s5 + $0x5f0] ss:$16 sps:$4 sm:$0xff]  }
 0x702   : > { %3561 = vmatpush1.bf16.msra.mxu0 %v13549_v54  ;;  %v13606_v54 = vld [vmem:[%s18170_s5 + $0x4f8] ss:$16 sps:$4 sm:$0xff]  }
 0x703   : > { %11785 = vmatmul.mubr.msk.bf16.vlgmr.msra.gmra.mxu1 %vm418_vm1, %v15223_v32  ;;  %11884 = vmatprep.subr.msk.bf16.mxu0 %vm1399_vm6, %v11881_v55  ;;  %v13614_v55 = vld [vmem:[%s18170_s5 + $0x4dc] ss:$16 sps:$4 sm:$0xff]  }
 0x704   : > { %3382 = vmatpush1.bf16.msra.mxu1 %v3327_v58  ;;  %3405 = vmatprep.mubr.bf16.mxu1 %v14454_v56  ;;  %v11901_v58 = vld [vmem:[%s18170_s5 + $0x5a8] sm:$0x11] }
 0x705   : > { %11851 = vmatmul.mubr.msk.bf16.vlgmr.msra.gmra.mxu0 %vm418_vm1, %v3460_v60  ;;  %3383 = vmatprep.subr.bf16.mxu1 %v13558_v59  ;;  %v13617_v59 = vld [vmem:[%s18170_s5 + $0x5b4] ss:$16 sps:$4 sm:$0xff]  }
 0x706   : > { %3768 = vmatpush1.bf16.msra.mxu0 %v3748_v61  ;;  %3791 = vmatprep.mubr.bf16.mxu0 %v14454_v56  ;;  %v11968_v61 = vld [vmem:[%s18170_s5 + $0x680] sm:$0x11] }
 0x707   : > { %3769 = vmatprep.subr.bf16.mxu0 %v13561_v62  ;;  %v11917_v62 = vcombine.high %v11901_v58, %v11901_v58 }
 0x708   : > { %3384 = vmatpush1.bf16.msra.mxu1 %v13556_v63  ;;  %v11916_v63 = vcombine.low %v11901_v58, %v11901_v58 }
 0x709   : > { %3385 = vmatprep.subr.bf16.mxu1 %v13564_v0  ;;  %v13615_v0 = vld [vmem:[%s18170_s5 + $0x5b0] ss:$16 sps:$4 sm:$0xff]  }
 0x70a   : > { %3770 = vmatpush1.bf16.msra.mxu0 %v13559_v1  ;;  %v11983_v1 = vcombine.high %v11968_v61, %v11968_v61 }
 0x70b   : > { %3771 = vmatprep.subr.bf16.mxu0 %v13567_v2  ;;  %v11982_v2 = vcombine.low %v11968_v61, %v11968_v61 }
 0x70c   : > { %3386 = vmatpush1.bf16.msra.mxu1 %v13562_v3  ;;  %v3967_v3 = vsel %vm1399_vm6, %v11916_v63, 0 }
 0x70d   : > { %3387 = vmatprep.subr.bf16.mxu1 %v13570_v14  ;;  %v13624_v14 = vld [vmem:[%s18170_s5 + $0x58c] ss:$16 sps:$4 sm:$0xff]  }
 0x70e   : > { %3772 = vmatpush1.bf16.msra.mxu0 %v13565_v4 }
 0x70f   : > { %3773 = vmatprep.subr.bf16.mxu0 %v13573_v8  ;;  %v4387_v8 = vsel %vm1399_vm6, %v11982_v2, 0  ;;  %v13650_v2 = vld [vmem:[%s18170_s5 + $0x5d8] ss:$16 sps:$4 sm:$0xff]  }
 0x710   : > { %3388 = vmatpush1.bf16.msra.mxu1 %v13568_v52  ;;  %v13627_v52 = vld [vmem:[%s18170_s5 + $0x664] ss:$16 sps:$4 sm:$0xff]  }
 0x711   : > { %11852 = vmatprep.subr.msk.bf16.mxu1 %vm1399_vm6, %v11849_v51 }
 0x712   : > { %3774 = vmatpush1.bf16.msra.mxu0 %v13571_v13  ;;  %v13630_v13 = vld [vmem:[%s18170_s5 + $0x56c] ss:$16 sps:$4 sm:$0xff]  }
 0x713   : > { %11819 = vmatmul.mubr.msk.bf16.vlgmr.msra.gmra.mxu1 %vm418_vm1, %v15282_v36  ;;  %11918 = vmatprep.subr.msk.bf16.mxu0 %vm1399_vm6, %v11915_v15 }
 0x714   : > { %3596 = vmatpush1.bf16.msra.mxu1 %v3541_v5  ;;  %3619 = vmatprep.mubr.bf16.mxu1 %v14454_v56 }
 0x715   : > { %11885 = vmatmul.mubr.msk.bf16.vlgmr.msra.gmra.mxu0 %vm418_vm1, %v3673_v17  ;;  %3597 = vmatprep.subr.bf16.mxu1 %v13580_v16 }
 0x716   : > { %3981 = vmatpush1.bf16.msra.mxu0 %v3961_v19  ;;  %4004 = vmatprep.mubr.bf16.mxu0 %v14454_v56 }
 0x717   : > { %3982 = vmatprep.subr.bf16.mxu0 %v13583_v21  ;;  %v13628_v21 = vld [vmem:[%s18170_s5 + $0x568] ss:$16 sps:$4 sm:$0xff]  }
 0x718   : > { %3598 = vmatpush1.bf16.msra.mxu1 %v13578_v23 }
 0x719   : > { %3599 = vmatprep.subr.bf16.mxu1 %v13586_v25 }
 0x71a   : > { %3983 = vmatpush1.bf16.msra.mxu0 %v13581_v26  ;;  %v13636_v26 = vld [vmem:[%s18170_s5 + $0x54c] ss:$16 sps:$4 sm:$0xff]  }
 0x71b   : > { %3984 = vmatprep.subr.bf16.mxu0 %v13589_v20  ;;  %v13631_v20 = vld [vmem:[%s18170_s5 + $0x640] ss:$16 sps:$4 sm:$0xff]  }
 0x71c   : > { %3600 = vmatpush1.bf16.msra.mxu1 %v13584_v27  ;;  %v11935_v27 = vld [vmem:[%s18170_s5 + $0x618] sm:$0x11] }
 0x71d   : > { %3601 = vmatprep.subr.bf16.mxu1 %v13592_v29  ;;  %v11950_v40 = vcombine.low %v11935_v27, %v11935_v27 }
 0x71e   : > { %3985 = vmatpush1.bf16.msra.mxu0 %v13587_v30  ;;  %v13639_v30 = vld [vmem:[%s18170_s5 + $0x624] ss:$16 sps:$4 sm:$0xff]  }
 0x71f   : > { %3986 = vmatprep.subr.bf16.mxu0 %v13595_v33  ;;  %v1501_v33 = vunpack.c.l.s4 %v14455_v31  ;;  %v13671_v31 = vld [vmem:[%s18170_s5 + $0x744] ss:$16 sps:$4 sm:$0xff]  }
 0x720   : > { %3602 = vmatpush1.bf16.msra.mxu1 %v13590_v35  ;;  %v13634_v35 = vld [vmem:[%s18170_s5 + $0x548] ss:$16 sps:$4 sm:$0xff]  }
 0x721   : > { %11886 = vmatprep.subr.msk.bf16.mxu1 %vm1399_vm6, %v11883_v39  ;;  %v11951_v39 = vcombine.high %v11935_v27, %v11935_v27 }
 0x722   : > { %3987 = vmatpush1.bf16.msra.mxu0 %v13593_v18  ;;  %v13637_v18 = vld [vmem:[%s18170_s5 + $0x620] ss:$16 sps:$4 sm:$0xff]  }
 0x723   : > { %11853 = vmatmul.mubr.msk.bf16.vlgmr.msra.gmra.mxu1 %vm418_vm1, %v3460_v60  ;;  %11952 = vmatprep.subr.msk.bf16.mxu0 %vm1399_vm6, %v11949_v41  ;;  %v13612_v60 = vld [vmem:[%s18170_s5 + $0x4d8] ss:$16 sps:$4 sm:$0xff]   ;;  %v12017_v41 = vcombine.high %v12002_v38, %v12002_v38 }
 0x724   : > { %3809 = vmatpush1.bf16.msra.mxu1 %v3754_v43  ;;  %3832 = vmatprep.mubr.bf16.mxu1 %v14454_v56  ;;  %v1502_v43 = vunpack.c.0.s8 %v1501_v33  ;;  %v13666_v33 = vld [vmem:[%s18170_s5 + $0x668] ss:$16 sps:$4 sm:$0xff]  }
 0x725   : > { %11919 = vmatmul.mubr.msk.bf16.vlgmr.msra.gmra.mxu0 %vm418_vm1, %v3886_v45  ;;  %3810 = vmatprep.subr.bf16.mxu1 %v13602_v44  ;;  %v4180_v44 = vsel %vm1399_vm6, %v11950_v40, 0  ;;  %v13669_v40 = vld [vmem:[%s18170_s5 + $0x740] ss:$16 sps:$4 sm:$0xff]  }
 0x726   : > { %4194 = vmatpush1.bf16.msra.mxu0 %v4174_v46  ;;  %4217 = vmatprep.mubr.bf16.mxu0 %v14454_v56  ;;  %v13646_v46 = vld [vmem:[%s18170_s5 + $0x5fc] ss:$16 sps:$4 sm:$0xff]  }
 0x727   : > { %4195 = vmatprep.subr.bf16.mxu0 %v13605_v47 }
 0x728   : > { %3811 = vmatpush1.bf16.msra.mxu1 %v13600_v48  ;;  %v4312_v48 = vrot.slane %v15223_v32, 3  ;;  %v13696_v32 = vld [vmem:[%s18170_s5 + $0x6bc] ss:$16 sps:$4 sm:$0xff]  }
 0x729   : > { %3812 = vmatprep.subr.bf16.mxu1 %v13608_v49  ;;  %v4600_v49 = vsel %vm1399_vm6, %v12016_v42, 0  ;;  %v13677_v42 = vld [vmem:[%s18170_s5 + $0x724] ss:$16 sps:$4 sm:$0xff]  }
 0x72a   : > { %4196 = vmatpush1.bf16.msra.mxu0 %v13603_v50  ;;  %v13649_v50 = vld [vmem:[%s18170_s5 + $0x6d4] ss:$16 sps:$4 sm:$0xff]  }
 0x72b   : > { %4197 = vmatprep.subr.bf16.mxu0 %v13611_v53  ;;  %v15574_v53 = vsub.s32 %v1502_v43, %v14578_v11 }
 0x72c   : > { %3813 = vmatpush1.bf16.msra.mxu1 %v13606_v54  ;;  %v13644_v54 = vld [vmem:[%s18170_s5 + $0x5f8] ss:$16 sps:$4 sm:$0xff]  }
 0x72d   : > { %3814 = vmatprep.subr.bf16.mxu1 %v13614_v55 }
 0x72e   : > { %4198 = vmatpush1.bf16.msra.mxu0 %v13609_v57  ;;  %v13652_v57 = vld [vmem:[%s18170_s5 + $0x5dc] ss:$16 sps:$4 sm:$0xff]  }
 0x72f   : > { %4199 = vmatprep.subr.bf16.mxu0 %v13617_v59  ;;  %v13647_v59 = vld [vmem:[%s18170_s5 + $0x6d0] ss:$16 sps:$4 sm:$0xff]  }
 0x730   : > { %3815 = vmatpush1.bf16.msra.mxu1 %v13612_v60 }
 0x731   : > { %11920 = vmatprep.subr.msk.bf16.mxu1 %vm1399_vm6, %v11917_v62  ;;  %v13655_v62 = vld [vmem:[%s18170_s5 + $0x6b4] ss:$16 sps:$4 sm:$0xff]  }
 0x732   : > { %4200 = vmatpush1.bf16.msra.mxu0 %v13615_v0 }
 0x733   : > { %11887 = vmatmul.mubr.msk.bf16.vlgmr.msra.gmra.mxu1 %vm418_vm1, %v3673_v17  ;;  %v15500_v4 = vpop.f32.mrf.mxu1  ;;  %11986 = vmatprep.subr.msk.bf16.mxu0 %vm1399_vm6, %v11983_v1  ;;  %v13633_v17 = vld [vmem:[%s18170_s5 + $0x644] ss:$16 sps:$4 sm:$0xff]  }
 0x734   : > { %4022 = vmatpush1.bf16.msra.mxu1 %v3967_v3  ;;  %4045 = vmatprep.mubr.bf16.mxu1 %v14454_v56 }
 0x735   : > { %11953 = vmatmul.mubr.msk.bf16.vlgmr.msra.gmra.mxu0 %vm418_vm1, %v4099_v7  ;;  %v15515_v51 = vpop.f32.mrf.mxu1  ;;  %v15517_v10 = vpop.f32.mrf.mxu0  ;;  %4023 = vmatprep.subr.bf16.mxu1 %v13624_v14 }
 0x736   : > { %v1498_v15 = vcombine.low %v15500_v4, %v15515_v51  ;;  %4407 = vmatpush1.bf16.msra.mxu0 %v4387_v8  ;;  %4430 = vmatprep.mubr.bf16.mxu0 %v14454_v56  ;;  %v13658_v8 = vld [vmem:[%s18170_s5 + $0x5bc] ss:$16 sps:$4 sm:$0xff]   ;;  %v13653_v4 = vld [vmem:[%s18170_s5 + $0x6b0] ss:$16 sps:$4 sm:$0xff]  }
 0x737   : > { %v1450_v5 = vpop.f32.mrf.mxu1  ;;  %v15528_v16 = vpop.f32.mrf.mxu0  ;;  %4408 = vmatprep.subr.bf16.mxu0 %v13627_v52 }
 0x738   : > { %v1712_v19 = vcombine.low %v15517_v10, %v15528_v16  ;;  %4024 = vmatpush1.bf16.msra.mxu1 %v13622_v9  ;;  %v1506_v63 = vrot.slane %v1498_v15, %v15574_v53  ;;  %v11969_v9 = vld [vmem:[%s18170_s5 + $0x688] sm:$0x11] }
 0x739   : > { %v1451_v23 = vpop.f32.mrf.mxu1  ;;  %v1664_v25 = vpop.f32.mrf.mxu0  ;;  %4025 = vmatprep.subr.bf16.mxu1 %v13630_v13  ;;  %v13661_v13 = vld [vmem:[%s18170_s5 + $0x694] ss:$16 sps:$4 sm:$0xff]   ;;  %v13656_v15 = vld [vmem:[%s18170_s5 + $0x5b8] ss:$16 sps:$4 sm:$0xff]   ;;  %v11985_v5 = vcombine.high %v11969_v9, %v11969_v9  ;;  %v13680_v16 = vld [vmem:[%s18170_s5 + $0x62c] ss:$16 sps:$4 sm:$0xff]  }
 0x73a   : > { %4409 = vmatpush1.bf16.msra.mxu0 %v13625_v6  ;;  %v12036_v6 = vld [vmem:[%s18170_s5 + $0x760] sm:$0x11]  ;;  %v1720_v43 = vrot.slane %v1712_v19, %v15574_v53 }
 0x73b   : > { %v1665_v29 = vpop.f32.mrf.mxu0  ;;  %4410 = vmatprep.subr.bf16.mxu0 %v13633_v17  ;;  %v11984_v17 = vcombine.low %v11969_v9, %v11969_v9  ;;  %v12051_v23 = vcombine.high %v12036_v6, %v12036_v6  ;;  %v12050_v25 = vcombine.low %v12036_v6, %v12036_v6 }
 0x73c   : > { %4026 = vmatpush1.bf16.msra.mxu1 %v13628_v21  ;;  %v13659_v21 = vld [vmem:[%s18170_s5 + $0x690] ss:$16 sps:$4 sm:$0xff]   ;;  %v4525_v29 = vrot.slane %v15282_v36, 3 }
 0x73d   : > { %4027 = vmatprep.subr.bf16.mxu1 %v13636_v26  ;;  %v4393_v26 = vsel %vm1399_vm6, %v11984_v17, 0 }
 0x73e   : > { %4411 = vmatpush1.bf16.msra.mxu0 %v13631_v20  ;;  %v13668_v20 = vld [vmem:[%s18170_s5 + $0x66c] ss:$16 sps:$4 sm:$0xff]  }
 0x73f   : > { %4412 = vmatprep.subr.bf16.mxu0 %v13639_v30  ;;  %v4813_v30 = vsel %vm1399_vm6, %v12050_v25, 0 }
 0x740   : > { %4028 = vmatpush1.bf16.msra.mxu1 %v13634_v35 }
 0x741   : > { %11954 = vmatprep.subr.msk.bf16.mxu1 %vm1399_vm6, %v11951_v39 }
 0x742   : > { %4413 = vmatpush1.bf16.msra.mxu0 %v13637_v18 }
 0x743   : > { %v1487_v47 = vpop.f32.mrf.mxu1  ;;  %11921 = vmatmul.mubr.msk.bf16.vlgmr.msra.gmra.mxu1 %vm418_vm1, %v3886_v45  ;;  %12020 = vmatprep.subr.msk.bf16.mxu0 %vm1399_vm6, %v12017_v41 }
 0x744   : > { %4235 = vmatpush1.bf16.msra.mxu1 %v4180_v44  ;;  %4258 = vmatprep.mubr.bf16.mxu1 %v14454_v56 }
 0x745   : > { %v1489_v45 = vpop.f32.mrf.mxu1  ;;  %v15580_v55 = vpop.f32.mrf.mxu0  ;;  %11987 = vmatmul.mubr.msk.bf16.vlgmr.msra.gmra.mxu0 %vm418_vm1, %v4312_v48  ;;  %4236 = vmatprep.subr.bf16.mxu1 %v13646_v46 }
 0x746   : > { %v1499_v58 = vcombine.low %v1487_v47, %v1489_v45  ;;  %4620 = vmatpush1.bf16.msra.mxu0 %v4600_v49  ;;  %4643 = vmatprep.mubr.bf16.mxu0 %v14454_v56  ;;  %v1172_v46 = vpop.permute.xlu1 %1171 }
 0x747   : > { %v1491_v60 = vpop.f32.mrf.mxu1  ;;  %v15592_v61 = vpop.f32.mrf.mxu0  ;;  %4621 = vmatprep.subr.bf16.mxu0 %v13649_v50  ;;  %v13672_v50 = vld [vmem:[%s18170_s5 + $0x648] ss:$16 sps:$4 sm:$0xff]  }
 0x748   : > { %v1513_v0 = vrot.slane %v1499_v58, %v15574_v53  ;;  %v1926_v1 = vcombine.low %v15580_v55, %v15592_v61  ;;  %4237 = vmatpush1.bf16.msra.mxu1 %v13644_v54  ;;  %v397_v54 = vld [vmem:[%s18174_s9] sm:$0xf]  ;;  %v12003_v58 = vld [vmem:[%s18170_s5 + $0x6f8] sm:$0x11]  ;;  %v12037_v61 = vld [vmem:[%s18170_s5 + $0x768] sm:$0x11] }
 0x749   : > { %v1492_v3 = vpop.f32.mrf.mxu1  ;;  %v1878_v14 = vpop.f32.mrf.mxu0  ;;  %4238 = vmatprep.subr.bf16.mxu1 %v13652_v57  ;;  %v13675_v57 = vld [vmem:[%s18170_s5 + $0x720] ss:$16 sps:$4 sm:$0xff]  }
 0x74a   : > { %v1514_v52 = vcombine.low %v1506_v63, %v1513_v0  ;;  %4622 = vmatpush1.bf16.msra.mxu0 %v13647_v59  ;;  %v1293_v59 = vadd.f32 %v14843_v22, %v1172_v46  ;;  %v12070_v3 = vld [vmem:[%s18170_s5 + $0x7d0] sm:$0x11]  ;;  %v12019_v22 = vcombine.high %v12003_v58, %v12003_v58  ;;  %v12018_v14 = vcombine.low %v12003_v58, %v12003_v58 }
 0x74b   : > { %v1879_v51 = vpop.f32.mrf.mxu0  ;;  %4623 = vmatprep.subr.bf16.mxu0 %v13655_v62  ;;  %v13683_v62 = vld [vmem:[%s18170_s5 + $0x704] ss:$16 sps:$4 sm:$0xff]   ;;  %v12085_v9 = vcombine.high %v12070_v3, %v12070_v3  ;;  %v13697_v55 = vld [vmem:[%s18170_s5 + $0x790] ss:$16 sps:$4 sm:$0xff]  }
 0x74c   : > { %4239 = vmatpush1.bf16.msra.mxu1 %v13650_v2  ;;  %v1521_v44 = vrot.slane %v1514_v52, %v15574_v53  ;;  %v13678_v2 = vld [vmem:[%s18170_s5 + $0x628] ss:$16 sps:$4 sm:$0xff]   ;;  %v13681_v52 = vld [vmem:[%s18170_s5 + $0x700] ss:$16 sps:$4 sm:$0xff]   ;;  %v12084_v51 = vcombine.low %v12070_v3, %v12070_v3  ;;  %v13718_v3 = vld [vmem:[%s18170_s5 + $0x72c] ss:$16 sps:$4 sm:$0xff]  }
 0x74d   : > { %4240 = vmatprep.subr.bf16.mxu1 %v13658_v8 }
 0x74e   : > { %4624 = vmatpush1.bf16.msra.mxu0 %v13653_v4  ;;  %v1523_v63 = vadd.f32 %v1521_v44, %v397_v54  ;;  %v1308_v4 = vmax.f32 %v1293_v59, 0.0  ;;  %v5027_v17 = vsel %vm1399_vm6, %v12084_v51, 0  ;;  %v13705_v44 = vld [vmem:[%s18170_s5 + $0x774] ss:$16 sps:$4 sm:$0xff]   ;;  %v12053_v54 = vcombine.high %v12037_v61, %v12037_v61  ;;  %v13712_v59 = vld [vmem:[%s18170_s5 + $0x74c] ss:$16 sps:$4 sm:$0xff]  }
 0x74f   : > { %4625 = vmatprep.subr.bf16.mxu0 %v13661_v13  ;;  %v4606_v13 = vsel %vm1399_vm6, %v12018_v14, 0  ;;  %v13713_v14 = vld [vmem:[%s18170_s5 + $0x820] ss:$16 sps:$4 sm:$0xff]  }
 0x750   : > { %4241 = vmatpush1.bf16.msra.mxu1 %v13656_v15  ;;  %v13690_v15 = vld [vmem:[%s18170_s5 + $0x6dc] ss:$16 sps:$4 sm:$0xff]   ;;  %v15705_v6 = vpack.c.bf16 %v1308_v4, %v1308_v4  ;;  %v13721_v4 = vld [vmem:[%s18170_s5 + $0x804] ss:$16 sps:$4 sm:$0xff]  }
 0x751   : > { %11988 = vmatprep.subr.msk.bf16.mxu1 %vm1399_vm6, %v11985_v5 }
 0x752   : > { %4626 = vmatpush1.bf16.msra.mxu0 %v13659_v21  ;;  %v13693_v21 = vld [vmem:[%s18170_s5 + $0x7b4] ss:$16 sps:$4 sm:$0xff]  }
 0x753   : > { %v1701_v27 = vpop.f32.mrf.mxu1  ;;  %11955 = vmatmul.mubr.msk.bf16.vlgmr.msra.gmra.mxu1 %vm418_vm1, %v4099_v7  ;;  %12054 = vmatprep.subr.msk.bf16.mxu0 %vm1399_vm6, %v12051_v23  ;;  %v13674_v7 = vld [vmem:[%s18170_s5 + $0x64c] ss:$16 sps:$4 sm:$0xff]   ;;  %v13688_v23 = vld [vmem:[%s18170_s5 + $0x6d8] ss:$16 sps:$4 sm:$0xff]  }
 0x754   : > { %4448 = vmatpush1.bf16.msra.mxu1 %v4393_v26  ;;  %4471 = vmatprep.mubr.bf16.mxu1 %v14454_v56 }
 0x755   : > { %v1703_v35 = vpop.f32.mrf.mxu1  ;;  %v15646_v38 = vpop.f32.mrf.mxu0  ;;  %12021 = vmatmul.mubr.msk.bf16.vlgmr.msra.gmra.mxu0 %vm418_vm1, %v4525_v29  ;;  %4449 = vmatprep.subr.bf16.mxu1 %v13668_v20  ;;  %v13691_v20 = vld [vmem:[%s18170_s5 + $0x7b0] ss:$16 sps:$4 sm:$0xff]  }
 0x756   : > { %v1713_v39 = vcombine.low %v1701_v27, %v1703_v35  ;;  %4833 = vmatpush1.bf16.msra.mxu0 %v4813_v30  ;;  %4856 = vmatprep.mubr.bf16.mxu0 %v14454_v56 }
 0x757   : > { %v1705_v18 = vpop.f32.mrf.mxu1  ;;  %v15658_v41 = vpop.f32.mrf.mxu0  ;;  %4834 = vmatprep.subr.bf16.mxu0 %v13671_v31  ;;  %v13699_v31 = vld [vmem:[%s18170_s5 + $0x794] ss:$16 sps:$4 sm:$0xff]  }
 0x758   : > { %v1727_v47 = vrot.slane %v1713_v39, %v15574_v53  ;;  %v2139_v49 = vcombine.low %v15646_v38, %v15658_v41  ;;  %4450 = vmatpush1.bf16.msra.mxu1 %v13666_v33  ;;  %v1934_v33 = vrot.slane %v1926_v1, %v15574_v53  ;;  %v13694_v39 = vld [vmem:[%s18170_s5 + $0x6b8] ss:$16 sps:$4 sm:$0xff]   ;;  %v13719_v38 = vld [vmem:[%s18170_s5 + $0x800] ss:$16 sps:$4 sm:$0xff]  }
 0x759   : > { %v1706_v45 = vpop.f32.mrf.mxu1  ;;  %v2091_v10 = vpop.f32.mrf.mxu0  ;;  %4451 = vmatprep.subr.bf16.mxu1 %v13674_v7  ;;  %v12071_v41 = vld [vmem:[%s18170_s5 + $0x7d8] sm:$0x11] }
 0x75a   : > { %v1728_v19 = vcombine.low %v1720_v43, %v1727_v47  ;;  %4835 = vmatpush1.bf16.msra.mxu0 %v13669_v40  ;;  %v13700_v47 = vld [vmem:[%s18170_s5 + $0x698] ss:$16 sps:$4 sm:$0xff]   ;;  %v12052_v45 = vcombine.low %v12037_v61, %v12037_v61 }
 0x75b   : > { %v2092_v60 = vpop.f32.mrf.mxu0  ;;  %4836 = vmatprep.subr.bf16.mxu0 %v13677_v42  ;;  %v13702_v42 = vld [vmem:[%s18170_s5 + $0x69c] ss:$16 sps:$4 sm:$0xff]  }
 0x75c   : > { %v1735_v0 = vrot.slane %v1728_v19, %v15574_v53  ;;  %4452 = vmatpush1.bf16.msra.mxu1 %v13672_v50  ;;  %v12104_v50 = vld [vmem:[%s18170_s5 + $0x840] sm:$0x11]  ;;  %v4819_v58 = vsel %vm1399_vm6, %v12052_v45, 0 }
 0x75d   : > { %4453 = vmatprep.subr.bf16.mxu1 %v13680_v16  ;;  %v13703_v16 = vld [vmem:[%s18170_s5 + $0x770] ss:$16 sps:$4 sm:$0xff]   ;;  %v12119_v19 = vcombine.high %v12104_v50, %v12104_v50 }
 0x75e   : > { %v1737_v8 = vadd.f32 %v1735_v0, %v1523_v63  ;;  %4837 = vmatpush1.bf16.msra.mxu0 %v13675_v57  ;;  %v12118_v57 = vcombine.low %v12104_v50, %v12104_v50  ;;  %v13715_v0 = vld [vmem:[%s18170_s5 + $0x824] ss:$16 sps:$4 sm:$0xff]   ;;  %v13740_v50 = vld [vmem:[%s18170_s5 + $0x79c] ss:$16 sps:$4 sm:$0xff]   ;;  %v13735_v45 = vld [vmem:[%s18170_s5 + $0x890] ss:$16 sps:$4 sm:$0xff]  }
 0x75f   : > { %4838 = vmatprep.subr.bf16.mxu0 %v13683_v62  ;;  %v15776_v62 = vshrl.u32 %v15705_v6, 16 }
 0x760   : > { %4454 = vmatpush1.bf16.msra.mxu1 %v13678_v2  ;;  %v5241_v63 = vsel %vm1399_vm6, %v12118_v57, 0  ;;  %v13710_v2 = vld [vmem:[%s18170_s5 + $0x748] ss:$16 sps:$4 sm:$0xff]  }
 0x761   : > { %12022 = vmatprep.subr.msk.bf16.mxu1 %vm1399_vm6, %v12019_v22 }
 0x762   : > { %4839 = vmatpush1.bf16.msra.mxu0 %v13681_v52 }
 0x763   : > { %v1915_v5 = vpop.f32.mrf.mxu1  ;;  %11989 = vmatmul.mubr.msk.bf16.vlgmr.msra.gmra.mxu1 %vm418_vm1, %v4312_v48  ;;  %12088 = vmatprep.subr.msk.bf16.mxu0 %vm1399_vm6, %v12085_v9  ;;  %v2147_v9 = vrot.slane %v2139_v49, %v15574_v53 }
 0x764   : > { %4661 = vmatpush1.bf16.msra.mxu1 %v4606_v13  ;;  %4684 = vmatprep.mubr.bf16.mxu1 %v14454_v56 }
 0x765   : > { %v1917_v25 = vpop.f32.mrf.mxu1  ;;  %v15719_v26 = vpop.f32.mrf.mxu0  ;;  %12055 = vmatmul.mubr.msk.bf16.vlgmr.msra.gmra.mxu0 %vm418_vm1, %v15705_v6  ;;  %4662 = vmatprep.subr.bf16.mxu1 %v13690_v15  ;;  %v13716_v15 = vld [vmem:[%s18170_s5 + $0x728] ss:$16 sps:$4 sm:$0xff]  }
 0x766   : > { %v1927_v48 = vcombine.low %v1915_v5, %v1917_v25  ;;  %5047 = vmatpush1.bf16.msra.mxu0 %v5027_v17  ;;  %5070 = vmatprep.mubr.bf16.mxu0 %v14454_v56  ;;  %v13727_v25 = vld [vmem:[%s18170_s5 + $0x7e4] ss:$16 sps:$4 sm:$0xff]  }
 0x767   : > { %v1919_v27 = vpop.f32.mrf.mxu1  ;;  %v15730_v30 = vpop.f32.mrf.mxu0  ;;  %5048 = vmatprep.subr.bf16.mxu0 %v13693_v21  ;;  %v13724_v21 = vld [vmem:[%s18170_s5 + $0x70c] ss:$16 sps:$4 sm:$0xff]  }
 0x768   : > { %v1941_v35 = vrot.slane %v1927_v48, %v15574_v53  ;;  %v2352_v7 = vcombine.low %v15719_v26, %v15730_v30  ;;  %4663 = vmatpush1.bf16.msra.mxu1 %v13688_v23  ;;  %v13722_v48 = vld [vmem:[%s18170_s5 + $0x708] ss:$16 sps:$4 sm:$0xff]   ;;  %v12087_v27 = vcombine.high %v12071_v41, %v12071_v41  ;;  %v13741_v26 = vld [vmem:[%s18170_s5 + $0x870] ss:$16 sps:$4 sm:$0xff]  }
 0x769   : > { %v1920_v40 = vpop.f32.mrf.mxu1  ;;  %v2304_v18 = vpop.f32.mrf.mxu0  ;;  %4664 = vmatprep.subr.bf16.mxu1 %v13696_v32  ;;  %v12105_v30 = vld [vmem:[%s18170_s5 + $0x848] sm:$0x11] }
 0x76a   : > { %v1942_v43 = vcombine.low %v1934_v33, %v1941_v35  ;;  %5049 = vmatpush1.bf16.msra.mxu0 %v13691_v20  ;;  %v12138_v20 = vld [vmem:[%s18170_s5 + $0x8b0] sm:$0x11]  ;;  %v2360_v57 = vrot.slane %v2352_v7, %v15574_v53 }
 0x76b   : > { %v2305_v1 = vpop.f32.mrf.mxu0  ;;  %5050 = vmatprep.subr.bf16.mxu0 %v13699_v31  ;;  %v12086_v31 = vcombine.low %v12071_v41, %v12071_v41  ;;  %v13725_v35 = vld [vmem:[%s18170_s5 + $0x7e0] ss:$16 sps:$4 sm:$0xff]   ;;  %v12152_v40 = vcombine.low %v12138_v20, %v12138_v20  ;;  %v5379_v41 = vrot.slane %v15776_v62, 1 }
 0x76c   : > { %v1949_v46 = vrot.slane %v1942_v43, %v15574_v53  ;;  %4665 = vmatpush1.bf16.msra.mxu1 %v13694_v39  ;;  %v12153_v39 = vcombine.high %v12138_v20, %v12138_v20  ;;  %v13737_v1 = vld [vmem:[%s18170_s5 + $0x894] ss:$16 sps:$4 sm:$0xff]  }
 0x76d   : > { %4666 = vmatprep.subr.bf16.mxu1 %v13702_v42  ;;  %v5033_v18 = vsel %vm1399_vm6, %v12086_v31, 0  ;;  %v13734_v42 = vld [vmem:[%s18170_s5 + $0x7bc] ss:$16 sps:$4 sm:$0xff]   ;;  %v5454_v61 = vsel %vm1399_vm6, %v12152_v40, 0  ;;  %v13765_v40 = vld [vmem:[%s18170_s5 + $0x8e4] ss:$16 sps:$4 sm:$0xff]  }
 0x76e   : > { %v1951_v10 = vadd.f32 %v1949_v46, %v1737_v8  ;;  %5051 = vmatpush1.bf16.msra.mxu0 %v13697_v55  ;;  %v5166_v55 = vrot.slane %v15705_v6, 1 }
 0x76f   : > { %5052 = vmatprep.subr.bf16.mxu0 %v13705_v44  ;;  %v13732_v44 = vld [vmem:[%s18170_s5 + $0x7b8] ss:$16 sps:$4 sm:$0xff]  }
 0x770   : > { %4667 = vmatpush1.bf16.msra.mxu1 %v13700_v47 }
 0x771   : > { %12056 = vmatprep.subr.msk.bf16.mxu1 %vm1399_vm6, %v12053_v54 }
 0x772   : > { %5053 = vmatpush1.bf16.msra.mxu0 %v13703_v16 }
 0x773   : > { %v2128_v60 = vpop.f32.mrf.mxu1  ;;  %12023 = vmatmul.mubr.msk.bf16.vlgmr.msra.gmra.mxu1 %vm418_vm1, %v4525_v29  ;;  %12122 = vmatprep.subr.msk.bf16.mxu0 %vm1399_vm6, %v12119_v19  ;;  %v13743_v19 = vld [vmem:[%s18170_s5 + $0x874] ss:$16 sps:$4 sm:$0xff]  }
 0x774   : > { %4874 = vmatpush1.bf16.msra.mxu1 %v4819_v58  ;;  %4897 = vmatprep.mubr.bf16.mxu1 %v14454_v56 }
 0x775   : > { %v2130_v36 = vpop.f32.mrf.mxu1  ;;  %v15787_v29 = vpop.f32.mrf.mxu0  ;;  %12089 = vmatmul.mubr.msk.bf16.vlgmr.msra.gmra.mxu0 %vm418_vm1, %v15776_v62  ;;  %4875 = vmatprep.subr.bf16.mxu1 %v13712_v59 }
 0x776   : > { %v2140_v22 = vcombine.low %v2128_v60, %v2130_v36  ;;  %5261 = vmatpush1.bf16.msra.mxu0 %v5241_v63  ;;  %5284 = vmatprep.mubr.bf16.mxu0 %v14454_v56  ;;  %v13738_v60 = vld [vmem:[%s18170_s5 + $0x798] ss:$16 sps:$4 sm:$0xff]  }
 0x777   : > { %v2132_v8 = vpop.f32.mrf.mxu1  ;;  %v15798_v52 = vpop.f32.mrf.mxu0  ;;  %5262 = vmatprep.subr.bf16.mxu0 %v13715_v0 }
 0x778   : > { %v2154_v51 = vrot.slane %v2140_v22, %v15574_v53  ;;  %v2565_v13 = vcombine.low %v15787_v29, %v15798_v52  ;;  %4876 = vmatpush1.bf16.msra.mxu1 %v13710_v2  ;;  %v13746_v2 = vld [vmem:[%s18170_s5 + $0x77c] ss:$16 sps:$4 sm:$0xff]   ;;  %v12172_v8 = vld [vmem:[%s18170_s5 + $0x920] sm:$0x11] }
 0x779   : > { %v2133_v5 = vpop.f32.mrf.mxu1  ;;  %v2517_v17 = vpop.f32.mrf.mxu0  ;;  %4877 = vmatprep.subr.bf16.mxu1 %v13718_v3  ;;  %v13749_v3 = vld [vmem:[%s18170_s5 + $0x854] ss:$16 sps:$4 sm:$0xff]   ;;  %v13763_v29 = vld [vmem:[%s18170_s5 + $0x8e0] ss:$16 sps:$4 sm:$0xff]   ;;  %v12139_v52 = vld [vmem:[%s18170_s5 + $0x8b8] sm:$0x11] }
 0x77a   : > { %v2155_v23 = vcombine.low %v2147_v9, %v2154_v51  ;;  %5263 = vmatpush1.bf16.msra.mxu0 %v13713_v14  ;;  %v13744_v14 = vld [vmem:[%s18170_s5 + $0x778] ss:$16 sps:$4 sm:$0xff]   ;;  %v12120_v9 = vcombine.low %v12105_v30, %v12105_v30  ;;  %v12187_v5 = vcombine.high %v12172_v8, %v12172_v8  ;;  %v12186_v17 = vcombine.low %v12172_v8, %v12172_v8 }
 0x77b   : > { %v2518_v49 = vpop.f32.mrf.mxu0  ;;  %5264 = vmatprep.subr.bf16.mxu0 %v13721_v4  ;;  %v12121_v4 = vcombine.high %v12105_v30, %v12105_v30 }
 0x77c   : > { %v2162_v32 = vrot.slane %v2155_v23, %v15574_v53  ;;  %4878 = vmatpush1.bf16.msra.mxu1 %v13716_v15  ;;  %v13747_v15 = vld [vmem:[%s18170_s5 + $0x850] ss:$16 sps:$4 sm:$0xff]   ;;  %v13756_v23 = vld [vmem:[%s18170_s5 + $0x82c] ss:$16 sps:$4 sm:$0xff]   ;;  %v5667_v49 = vsel %vm1399_vm6, %v12186_v17, 0 }
 0x77d   : > { %4879 = vmatprep.subr.bf16.mxu1 %v13724_v21  ;;  %v5247_v21 = vsel %vm1399_vm6, %v12120_v9, 0  ;;  %v13787_v17 = vld [vmem:[%s18170_s5 + $0x954] ss:$16 sps:$4 sm:$0xff]  }
 0x77e   : > { %v2164_v33 = vadd.f32 %v2162_v32, %v1951_v10  ;;  %5265 = vmatpush1.bf16.msra.mxu0 %v13719_v38  ;;  %v13754_v32 = vld [vmem:[%s18170_s5 + $0x828] ss:$16 sps:$4 sm:$0xff]  }
 0x77f   : > { %5266 = vmatprep.subr.bf16.mxu0 %v13727_v25  ;;  %v13759_v25 = vld [vmem:[%s18170_s5 + $0x904] ss:$16 sps:$4 sm:$0xff]  }
 0x780   : > { %4880 = vmatpush1.bf16.msra.mxu1 %v13722_v48 }
 0x781   : > { %12090 = vmatprep.subr.msk.bf16.mxu1 %vm1399_vm6, %v12087_v27  ;;  %v13762_v27 = vld [vmem:[%s18170_s5 + $0x80c] ss:$16 sps:$4 sm:$0xff]  }
 0x782   : > { %5267 = vmatpush1.bf16.msra.mxu0 %v13725_v35 }
 0x783   : > { %v2341_v43 = vpop.f32.mrf.mxu1  ;;  %12057 = vmatmul.mubr.msk.bf16.vlgmr.msra.gmra.mxu1 %vm418_vm1, %v15705_v6  ;;  %12156 = vmatprep.subr.msk.bf16.mxu0 %vm1399_vm6, %v12153_v39 }
 0x784   : > { %5088 = vmatpush1.bf16.msra.mxu1 %v5033_v18  ;;  %5111 = vmatprep.mubr.bf16.mxu1 %v14454_v56  ;;  %v2573_v18 = vrot.slane %v2565_v13, %v15574_v53 }
 0x785   : > { %v2343_v46 = vpop.f32.mrf.mxu1  ;;  %v15852_v47 = vpop.f32.mrf.mxu0  ;;  %12123 = vmatmul.mubr.msk.bf16.vlgmr.msra.gmra.mxu0 %vm418_vm1, %v5166_v55  ;;  %5089 = vmatprep.subr.bf16.mxu1 %v13734_v42 }
 0x786   : > { %v2353_v54 = vcombine.low %v2341_v43, %v2343_v46  ;;  %5474 = vmatpush1.bf16.msra.mxu0 %v5454_v61  ;;  %5497 = vmatprep.mubr.bf16.mxu0 %v14454_v56  ;;  %v13760_v61 = vld [vmem:[%s18170_s5 + $0x808] ss:$16 sps:$4 sm:$0xff]   ;;  %v13768_v46 = vld [vmem:[%s18170_s5 + $0x7ec] ss:$16 sps:$4 sm:$0xff]  }
 0x787   : > { %v2345_v10 = vpop.f32.mrf.mxu1  ;;  %v15864_v16 = vpop.f32.mrf.mxu0  ;;  %5475 = vmatprep.subr.bf16.mxu0 %v13737_v1 }
 0x788   : > { %v2367_v58 = vrot.slane %v2353_v54, %v15574_v53  ;;  %v2778_v59 = vcombine.low %v15852_v47, %v15864_v16  ;;  %5090 = vmatpush1.bf16.msra.mxu1 %v13732_v44  ;;  %v13771_v54 = vld [vmem:[%s18170_s5 + $0x8c4] ss:$16 sps:$4 sm:$0xff]   ;;  %v13766_v10 = vld [vmem:[%s18170_s5 + $0x7e8] ss:$16 sps:$4 sm:$0xff]   ;;  %v13785_v47 = vld [vmem:[%s18170_s5 + $0x950] ss:$16 sps:$4 sm:$0xff]  }
 0x789   : > { %v2346_v63 = vpop.f32.mrf.mxu1  ;;  %v2730_v0 = vpop.f32.mrf.mxu0  ;;  %5091 = vmatprep.subr.bf16.mxu1 %v13740_v50  ;;  %v12173_v16 = vld [vmem:[%s18170_s5 + $0x928] sm:$0x11] }
 0x78a   : > { %v2368_v36 = vcombine.low %v2360_v57, %v2367_v58  ;;  %5476 = vmatpush1.bf16.msra.mxu0 %v13735_v45  ;;  %v12155_v57 = vcombine.high %v12139_v52, %v12139_v52  ;;  %v12154_v58 = vcombine.low %v12139_v52, %v12139_v52  ;;  %v13769_v63 = vld [vmem:[%s18170_s5 + $0x8c0] ss:$16 sps:$4 sm:$0xff]  }
 0x78b   : > { %v2731_v7 = vpop.f32.mrf.mxu0  ;;  %5477 = vmatprep.subr.bf16.mxu0 %v13743_v19  ;;  %v12206_v19 = vld [vmem:[%s18170_s5 + $0x990] sm:$0x11] }
 0x78c   : > { %v2375_v22 = vrot.slane %v2368_v36, %v15574_v53  ;;  %5092 = vmatpush1.bf16.msra.mxu1 %v13738_v60  ;;  %v12221_v0 = vcombine.high %v12206_v19, %v12206_v19  ;;  %v5460_v36 = vsel %vm1399_vm6, %v12154_v58, 0  ;;  %v5592_v7 = vrot.slane %v15705_v6, 2 }
 0x78d   : > { %5093 = vmatprep.subr.bf16.mxu1 %v13746_v2  ;;  %v12220_v2 = vcombine.low %v12206_v19, %v12206_v19 }
 0x78e   : > { %v2377_v51 = vadd.f32 %v2375_v22, %v2164_v33  ;;  %5478 = vmatpush1.bf16.msra.mxu0 %v13741_v26  ;;  %v13757_v33 = vld [vmem:[%s18170_s5 + $0x900] ss:$16 sps:$4 sm:$0xff]   ;;  %v13778_v26 = vld [vmem:[%s18170_s5 + $0x89c] ss:$16 sps:$4 sm:$0xff]   ;;  %v13781_v22 = vld [vmem:[%s18170_s5 + $0x974] ss:$16 sps:$4 sm:$0xff]  }
 0x78f   : > { %5479 = vmatprep.subr.bf16.mxu0 %v13749_v3  ;;  %v5880_v3 = vsel %vm1399_vm6, %v12220_v2, 0  ;;  %v13809_v2 = vld [vmem:[%s18170_s5 + $0x9c4] ss:$16 sps:$4 sm:$0xff]  }
 0x790   : > { %5094 = vmatpush1.bf16.msra.mxu1 %v13744_v14  ;;  %v13776_v14 = vld [vmem:[%s18170_s5 + $0x898] ss:$16 sps:$4 sm:$0xff]  }
 0x791   : > { %12124 = vmatprep.subr.msk.bf16.mxu1 %vm1399_vm6, %v12121_v4 }
 0x792   : > { %5480 = vmatpush1.bf16.msra.mxu0 %v13747_v15 }
 0x793   : > { %v2554_v38 = vpop.f32.mrf.mxu1  ;;  %12091 = vmatmul.mubr.msk.bf16.vlgmr.msra.gmra.mxu1 %vm418_vm1, %v15776_v62  ;;  %12190 = vmatprep.subr.msk.bf16.mxu0 %vm1399_vm6, %v12187_v5 }
 0x794   : > { %5302 = vmatpush1.bf16.msra.mxu1 %v5247_v21  ;;  %5325 = vmatprep.mubr.bf16.mxu1 %v14454_v56  ;;  %v2786_v21 = vrot.slane %v2778_v59, %v15574_v53 }
 0x795   : > { %v2556_v48 = vpop.f32.mrf.mxu1  ;;  %v15918_v20 = vpop.f32.mrf.mxu0  ;;  %12157 = vmatmul.mubr.msk.bf16.vlgmr.msra.gmra.mxu0 %vm418_vm1, %v5379_v41  ;;  %5303 = vmatprep.subr.bf16.mxu1 %v13756_v23 }
 0x796   : > { %v2566_v31 = vcombine.low %v2554_v38, %v2556_v48  ;;  %5687 = vmatpush1.bf16.msra.mxu0 %v5667_v49  ;;  %5710 = vmatprep.mubr.bf16.mxu0 %v14454_v56  ;;  %v13782_v49 = vld [vmem:[%s18170_s5 + $0x878] ss:$16 sps:$4 sm:$0xff]   ;;  %v13790_v48 = vld [vmem:[%s18170_s5 + $0x85c] ss:$16 sps:$4 sm:$0xff]  }
 0x797   : > { %v2558_v35 = vpop.f32.mrf.mxu1  ;;  %v15930_v39 = vpop.f32.mrf.mxu0  ;;  %5688 = vmatprep.subr.bf16.mxu0 %v13759_v25 }
 0x798   : > { %v2580_v42 = vrot.slane %v2566_v31, %v15574_v53  ;;  %v2991_v43 = vcombine.low %v15918_v20, %v15930_v39  ;;  %5304 = vmatpush1.bf16.msra.mxu1 %v13754_v32  ;;  %v13793_v31 = vld [vmem:[%s18170_s5 + $0x934] ss:$16 sps:$4 sm:$0xff]   ;;  %v13788_v35 = vld [vmem:[%s18170_s5 + $0x858] ss:$16 sps:$4 sm:$0xff]   ;;  %v13807_v20 = vld [vmem:[%s18170_s5 + $0x9c0] ss:$16 sps:$4 sm:$0xff]  }
 0x799   : > { %v2559_v1 = vpop.f32.mrf.mxu1  ;;  %v2943_v44 = vpop.f32.mrf.mxu0  ;;  %5305 = vmatprep.subr.bf16.mxu1 %v13762_v27  ;;  %v12207_v39 = vld [vmem:[%s18170_s5 + $0x998] sm:$0x11] }
 0x79a   : > { %v2581_v50 = vcombine.low %v2573_v18, %v2580_v42  ;;  %5689 = vmatpush1.bf16.msra.mxu0 %v13757_v33  ;;  %v12189_v18 = vcombine.high %v12173_v16, %v12173_v16  ;;  %v12188_v42 = vcombine.low %v12173_v16, %v12173_v16  ;;  %v13791_v1 = vld [vmem:[%s18170_s5 + $0x930] ss:$16 sps:$4 sm:$0xff]  }
 0x79b   : > { %v2944_v13 = vpop.f32.mrf.mxu0  ;;  %5690 = vmatprep.subr.bf16.mxu0 %v13765_v40  ;;  %v12240_v40 = vld [vmem:[%s18170_s5 + $0xa00] sm:$0x11] }
 0x79c   : > { %v2588_v45 = vrot.slane %v2581_v50, %v15574_v53  ;;  %5306 = vmatpush1.bf16.msra.mxu1 %v13760_v61  ;;  %v12255_v44 = vcombine.high %v12240_v40, %v12240_v40  ;;  %v5673_v50 = vsel %vm1399_vm6, %v12188_v42, 0  ;;  %v5805_v13 = vrot.slane %v15776_v62, 2 }
 0x79d   : > { %5307 = vmatprep.subr.bf16.mxu1 %v13768_v46  ;;  %v12254_v46 = vcombine.low %v12240_v40, %v12240_v40 }
 0x79e   : > { %v2590_v60 = vadd.f32 %v2588_v45, %v2377_v51  ;;  %5691 = vmatpush1.bf16.msra.mxu0 %v13763_v29  ;;  %v13779_v51 = vld [vmem:[%s18170_s5 + $0x970] ss:$16 sps:$4 sm:$0xff]   ;;  %v13800_v29 = vld [vmem:[%s18170_s5 + $0x90c] ss:$16 sps:$4 sm:$0xff]   ;;  %v13803_v45 = vld [vmem:[%s18170_s5 + $0x9e4] ss:$16 sps:$4 sm:$0xff]  }
 0x79f   : > { %5692 = vmatprep.subr.bf16.mxu0 %v13771_v54  ;;  %v6093_v54 = vsel %vm1399_vm6, %v12254_v46, 0  ;;  %v13831_v46 = vld [vmem:[%s18170_s5 + $0xa34] ss:$16 sps:$4 sm:$0xff]  }
 0x7a0   : > { %5308 = vmatpush1.bf16.msra.mxu1 %v13766_v10  ;;  %v13798_v10 = vld [vmem:[%s18170_s5 + $0x908] ss:$16 sps:$4 sm:$0xff]  }
 0x7a1   : > { %12158 = vmatprep.subr.msk.bf16.mxu1 %vm1399_vm6, %v12155_v57 }
 0x7a2   : > { %5693 = vmatpush1.bf16.msra.mxu0 %v13769_v63 }
 0x7a3   : > { %v2767_v30 = vpop.f32.mrf.mxu1  ;;  %12125 = vmatmul.mubr.msk.bf16.vlgmr.msra.gmra.mxu1 %vm418_vm1, %v5166_v55  ;;  %12224 = vmatprep.subr.msk.bf16.mxu0 %vm1399_vm6, %v12221_v0  ;;  %v13784_v55 = vld [vmem:[%s18170_s5 + $0x87c] ss:$16 sps:$4 sm:$0xff]  }
 0x7a4   : > { %5515 = vmatpush1.bf16.msra.mxu1 %v5460_v36  ;;  %5538 = vmatprep.mubr.bf16.mxu1 %v14454_v56  ;;  %v2999_v36 = vrot.slane %v2991_v43, %v15574_v53 }
 0x7a5   : > { %v2769_v8 = vpop.f32.mrf.mxu1  ;;  %v15985_v4 = vpop.f32.mrf.mxu0  ;;  %12191 = vmatmul.mubr.msk.bf16.vlgmr.msra.gmra.mxu0 %vm418_vm1, %v5592_v7  ;;  %5516 = vmatprep.subr.bf16.mxu1 %v13778_v26 }
 0x7a6   : > { %v2779_v9 = vcombine.low %v2767_v30, %v2769_v8  ;;  %5900 = vmatpush1.bf16.msra.mxu0 %v5880_v3  ;;  %5923 = vmatprep.mubr.bf16.mxu0 %v14454_v56  ;;  %v13804_v3 = vld [vmem:[%s18170_s5 + $0x8e8] ss:$16 sps:$4 sm:$0xff]   ;;  %v13812_v8 = vld [vmem:[%s18170_s5 + $0x8cc] ss:$16 sps:$4 sm:$0xff]  }
 0x7a7   : > { %v2771_v15 = vpop.f32.mrf.mxu1  ;;  %v15997_v5 = vpop.f32.mrf.mxu0  ;;  %5901 = vmatprep.subr.bf16.mxu0 %v13781_v22 }
 0x7a8   : > { %v2793_v23 = vrot.slane %v2779_v9, %v15574_v53  ;;  %v3204_v38 = vcombine.low %v15985_v4, %v15997_v5  ;;  %5517 = vmatpush1.bf16.msra.mxu1 %v13776_v14  ;;  %v13815_v9 = vld [vmem:[%s18170_s5 + $0x9a4] ss:$16 sps:$4 sm:$0xff]   ;;  %v13810_v15 = vld [vmem:[%s18170_s5 + $0x8c8] ss:$16 sps:$4 sm:$0xff]   ;;  %v13829_v4 = vld [vmem:[%s18170_s5 + $0xa30] ss:$16 sps:$4 sm:$0xff]  }
 0x7a9   : > { %v2772_v25 = vpop.f32.mrf.mxu1  ;;  %v3156_v32 = vpop.f32.mrf.mxu0  ;;  %5518 = vmatprep.subr.bf16.mxu1 %v13784_v55  ;;  %v12241_v5 = vld [vmem:[%s18170_s5 + $0xa08] sm:$0x11] }
 0x7aa   : > { %v2794_v27 = vcombine.low %v2786_v21, %v2793_v23  ;;  %5902 = vmatpush1.bf16.msra.mxu0 %v13779_v51  ;;  %v12223_v21 = vcombine.high %v12207_v39, %v12207_v39  ;;  %v12222_v23 = vcombine.low %v12207_v39, %v12207_v39  ;;  %v13813_v25 = vld [vmem:[%s18170_s5 + $0x9a0] ss:$16 sps:$4 sm:$0xff]  }
 0x7ab   : > { %v3157_v59 = vpop.f32.mrf.mxu0  ;;  %5903 = vmatprep.subr.bf16.mxu0 %v13787_v17  ;;  %v12274_v17 = vld [vmem:[%s18170_s5 + $0xa70] sm:$0x11] }
 0x7ac   : > { %v2801_v33 = vrot.slane %v2794_v27, %v15574_v53  ;;  %5519 = vmatpush1.bf16.msra.mxu1 %v13782_v49  ;;  %v12289_v32 = vcombine.high %v12274_v17, %v12274_v17  ;;  %v5886_v27 = vsel %vm1399_vm6, %v12222_v23, 0  ;;  %v6018_v59 = vrot.slane %v15705_v6, 3  ;;  %v13872_v6 = vld [vmem:[%s18170_s5 + $0xa3c] ss:$16 sps:$4 sm:$0xff]  }
 0x7ad   : > { %5520 = vmatprep.subr.bf16.mxu1 %v13790_v48  ;;  %v12288_v48 = vcombine.low %v12274_v17, %v12274_v17 }
 0x7ae   : > { %v2803_v61 = vadd.f32 %v2801_v33, %v2590_v60  ;;  %5904 = vmatpush1.bf16.msra.mxu0 %v13785_v47  ;;  %v13801_v60 = vld [vmem:[%s18170_s5 + $0x9e0] ss:$16 sps:$4 sm:$0xff]   ;;  %v13822_v47 = vld [vmem:[%s18170_s5 + $0x97c] ss:$16 sps:$4 sm:$0xff]   ;;  %v13825_v33 = vld [vmem:[%s18170_s5 + $0xa54] ss:$16 sps:$4 sm:$0xff]  }
 0x7af   : > { %5905 = vmatprep.subr.bf16.mxu0 %v13793_v31  ;;  %v6306_v31 = vsel %vm1399_vm6, %v12288_v48, 0  ;;  %v13853_v48 = vld [vmem:[%s18170_s5 + $0xaa4] ss:$16 sps:$4 sm:$0xff]  }
 0x7b0   : > { %5521 = vmatpush1.bf16.msra.mxu1 %v13788_v35  ;;  %v13820_v35 = vld [vmem:[%s18170_s5 + $0x978] ss:$16 sps:$4 sm:$0xff]  }
 0x7b1   : > { %12192 = vmatprep.subr.msk.bf16.mxu1 %vm1399_vm6, %v12189_v18 }
 0x7b2   : > { %5906 = vmatpush1.bf16.msra.mxu0 %v13791_v1 }
 0x7b3   : > { %v2980_v52 = vpop.f32.mrf.mxu1  ;;  %12159 = vmatmul.mubr.msk.bf16.vlgmr.msra.gmra.mxu1 %vm418_vm1, %v5379_v41  ;;  %12258 = vmatprep.subr.msk.bf16.mxu0 %vm1399_vm6, %v12255_v44  ;;  %v13806_v41 = vld [vmem:[%s18170_s5 + $0x8ec] ss:$16 sps:$4 sm:$0xff]  }
 0x7b4   : > { %5728 = vmatpush1.bf16.msra.mxu1 %v5673_v50  ;;  %5751 = vmatprep.mubr.bf16.mxu1 %v14454_v56  ;;  %v3212_v50 = vrot.slane %v3204_v38, %v15574_v53 }
 0x7b5   : > { %v2982_v19 = vpop.f32.mrf.mxu1  ;;  %v16052_v57 = vpop.f32.mrf.mxu0  ;;  %12225 = vmatmul.mubr.msk.bf16.vlgmr.msra.gmra.mxu0 %vm418_vm1, %v5805_v13  ;;  %5729 = vmatprep.subr.bf16.mxu1 %v13800_v29 }
 0x7b6   : > { %v2992_v58 = vcombine.low %v2980_v52, %v2982_v19  ;;  %6113 = vmatpush1.bf16.msra.mxu0 %v6093_v54  ;;  %6136 = vmatprep.mubr.bf16.mxu0 %v14454_v56  ;;  %v13826_v54 = vld [vmem:[%s18170_s5 + $0x958] ss:$16 sps:$4 sm:$0xff]   ;;  %v13834_v19 = vld [vmem:[%s18170_s5 + $0x93c] ss:$16 sps:$4 sm:$0xff]  }
 0x7b7   : > { %v2984_v63 = vpop.f32.mrf.mxu1  ;;  %v16064_v0 = vpop.f32.mrf.mxu0  ;;  %6114 = vmatprep.subr.bf16.mxu0 %v13803_v45 }
 0x7b8   : > { %v3006_v26 = vrot.slane %v2992_v58, %v15574_v53  ;;  %v3418_v30 = vcombine.low %v16052_v57, %v16064_v0  ;;  %5730 = vmatpush1.bf16.msra.mxu1 %v13798_v10  ;;  %v13837_v58 = vld [vmem:[%s18170_s5 + $0xa14] ss:$16 sps:$4 sm:$0xff]   ;;  %v13832_v63 = vld [vmem:[%s18170_s5 + $0x938] ss:$16 sps:$4 sm:$0xff]   ;;  %v13851_v57 = vld [vmem:[%s18170_s5 + $0xaa0] ss:$16 sps:$4 sm:$0xff]  }
 0x7b9   : > { %v2985_v22 = vpop.f32.mrf.mxu1  ;;  %v3370_v14 = vpop.f32.mrf.mxu0  ;;  %5731 = vmatprep.subr.bf16.mxu1 %v13806_v41  ;;  %v12275_v0 = vld [vmem:[%s18170_s5 + $0xa78] sm:$0x11] }
 0x7ba   : > { %v3007_v55 = vcombine.low %v2999_v36, %v3006_v26  ;;  %6115 = vmatpush1.bf16.msra.mxu0 %v13801_v60  ;;  %v12257_v36 = vcombine.high %v12241_v5, %v12241_v5  ;;  %v12256_v26 = vcombine.low %v12241_v5, %v12241_v5  ;;  %v13835_v22 = vld [vmem:[%s18170_s5 + $0xa10] ss:$16 sps:$4 sm:$0xff]  }
 0x7bb   : > { %v3371_v43 = vpop.f32.mrf.mxu0  ;;  %6116 = vmatprep.subr.bf16.mxu0 %v13809_v2  ;;  %v12308_v2 = vld [vmem:[%s18170_s5 + $0xae0] sm:$0x11] }
 0x7bc   : > { %v3014_v51 = vrot.slane %v3007_v55, %v15574_v53  ;;  %5732 = vmatpush1.bf16.msra.mxu1 %v13804_v3  ;;  %v12323_v14 = vcombine.high %v12308_v2, %v12308_v2  ;;  %v6099_v55 = vsel %vm1399_vm6, %v12256_v26, 0  ;;  %v6231_v43 = vrot.slane %v15776_v62, 3 }
 0x7bd   : > { %5733 = vmatprep.subr.bf16.mxu1 %v13812_v8  ;;  %v12322_v8 = vcombine.low %v12308_v2, %v12308_v2  ;;  %v13869_v2 = vld [vmem:[%s18170_s5 + $0xb34] ss:$16 sps:$4 sm:$0xff]  }
 0x7be   : > { %v3016_v49 = vadd.f32 %v3014_v51, %v2803_v61  ;;  %6117 = vmatpush1.bf16.msra.mxu0 %v13807_v20  ;;  %v13823_v61 = vld [vmem:[%s18170_s5 + $0xa50] ss:$16 sps:$4 sm:$0xff]   ;;  %v13844_v20 = vld [vmem:[%s18170_s5 + $0x9ec] ss:$16 sps:$4 sm:$0xff]   ;;  %v13847_v51 = vld [vmem:[%s18170_s5 + $0xac4] ss:$16 sps:$4 sm:$0xff]  }
 0x7bf   : > { %6118 = vmatprep.subr.bf16.mxu0 %v13815_v9  ;;  %v6519_v9 = vsel %vm1399_vm6, %v12322_v8, 0 }
 0x7c0   : > { %5734 = vmatpush1.bf16.msra.mxu1 %v13810_v15  ;;  %v13842_v15 = vld [vmem:[%s18170_s5 + $0x9e8] ss:$16 sps:$4 sm:$0xff]  }
 0x7c1   : > { %12226 = vmatprep.subr.msk.bf16.mxu1 %vm1399_vm6, %v12223_v21 }
 0x7c2   : > { %6119 = vmatpush1.bf16.msra.mxu0 %v13813_v25 }
 0x7c3   : > { %v3193_v16 = vpop.f32.mrf.mxu1  ;;  %12193 = vmatmul.mubr.msk.bf16.vlgmr.msra.gmra.mxu1 %vm418_vm1, %v5592_v7  ;;  %12292 = vmatprep.subr.msk.bf16.mxu0 %vm1399_vm6, %v12289_v32  ;;  %v13828_v7 = vld [vmem:[%s18170_s5 + $0x95c] ss:$16 sps:$4 sm:$0xff]  }
 0x7c4   : > { %5941 = vmatpush1.bf16.msra.mxu1 %v5886_v27  ;;  %5964 = vmatprep.mubr.bf16.mxu1 %v14454_v56  ;;  %v1177_v27 = vpop.permute.xlu1 %1176 }
 0x7c5   : > { %v3195_v40 = vpop.f32.mrf.mxu1  ;;  %v16119_v18 = vpop.f32.mrf.mxu0  ;;  %12259 = vmatmul.mubr.msk.bf16.vlgmr.msra.gmra.mxu0 %vm418_vm1, %v6018_v59  ;;  %5942 = vmatprep.subr.bf16.mxu1 %v13822_v47  ;;  %v3426_v47 = vrot.slane %v3418_v30, %v15574_v53  ;;  %v1298_v30 = vadd.f32 %v14861_v28, %v1177_v27  ;;  %v12290_v28 = vcombine.low %v12275_v0, %v12275_v0 }
 0x7c6   : > { %v3205_v42 = vcombine.low %v3193_v16, %v3195_v40  ;;  %6326 = vmatpush1.bf16.msra.mxu0 %v6306_v31  ;;  %6349 = vmatprep.mubr.bf16.mxu0 %v14454_v56 }
 0x7c7   : > { %v3197_v1 = vpop.f32.mrf.mxu1  ;;  %v16131_v44 = vpop.f32.mrf.mxu0  ;;  %6327 = vmatprep.subr.bf16.mxu0 %v13825_v33  ;;  %v13848_v33 = vld [vmem:[%s18170_s5 + $0x9c8] ss:$16 sps:$4 sm:$0xff]   ;;  %v6312_v5 = vsel %vm1399_vm6, %v12290_v28, 0 }
 0x7c8   : > { %v3219_v29 = vrot.slane %v3205_v42, %v15574_v53  ;;  %v3632_v52 = vcombine.low %v16119_v18, %v16131_v44  ;;  %5943 = vmatpush1.bf16.msra.mxu1 %v13820_v35  ;;  %v13859_v1 = vld [vmem:[%s18170_s5 + $0xa84] ss:$16 sps:$4 sm:$0xff]   ;;  %v13873_v18 = vld [vmem:[%s18170_s5 + $0xb10] ss:$16 sps:$4 sm:$0xff]   ;;  %v12309_v44 = vld [vmem:[%s18170_s5 + $0xae8] sm:$0x11] }
 0x7c9   : > { %v3198_v45 = vpop.f32.mrf.mxu1  ;;  %v3584_v10 = vpop.f32.mrf.mxu0  ;;  %5944 = vmatprep.subr.bf16.mxu1 %v13828_v7  ;;  %v13856_v7 = vld [vmem:[%s18170_s5 + $0x9ac] ss:$16 sps:$4 sm:$0xff]   ;;  %v12325_v27 = vcombine.high %v12309_v44, %v12309_v44 }
 0x7ca   : > { %v3220_v41 = vcombine.low %v3212_v50, %v3219_v29  ;;  %6328 = vmatpush1.bf16.msra.mxu0 %v13823_v61  ;;  %v13854_v50 = vld [vmem:[%s18170_s5 + $0x9a8] ss:$16 sps:$4 sm:$0xff]   ;;  %v12342_v29 = vld [vmem:[%s18170_s5 + $0xb50] sm:$0x11] }
 0x7cb   : > { %v3585_v38 = vpop.f32.mrf.mxu0  ;;  %6329 = vmatprep.subr.bf16.mxu0 %v13831_v46  ;;  %v13857_v10 = vld [vmem:[%s18170_s5 + $0xa80] ss:$16 sps:$4 sm:$0xff]  }
 0x7cc   : > { %v3227_v60 = vrot.slane %v3220_v41, %v15574_v53  ;;  %5945 = vmatpush1.bf16.msra.mxu1 %v13826_v54  ;;  %v12291_v54 = vcombine.high %v12275_v0, %v12275_v0  ;;  %v12357_v41 = vcombine.high %v12342_v29, %v12342_v29  ;;  %v13866_v38 = vld [vmem:[%s18170_s5 + $0xa5c] ss:$16 sps:$4 sm:$0xff]  }
 0x7cd   : > { %5946 = vmatprep.subr.bf16.mxu1 %v13834_v19  ;;  %v1309_v19 = vmax.f32 %v1298_v30, 0.0 }
 0x7ce   : > { %v3229_v3 = vadd.f32 %v3227_v60, %v3016_v49  ;;  %6330 = vmatpush1.bf16.msra.mxu0 %v13829_v4  ;;  %v13845_v49 = vld [vmem:[%s18170_s5 + $0xac0] ss:$16 sps:$4 sm:$0xff]   ;;  %v12356_v4 = vcombine.low %v12342_v29, %v12342_v29 }
 0x7cf   : > { %6331 = vmatprep.subr.bf16.mxu0 %v13837_v58  ;;  %v16241_v58 = vpack.c.bf16 %v1309_v19, %v1309_v19  ;;  %v13889_v29 = vld [vmem:[%s18170_s5 + $0xba0] ss:$16 sps:$4 sm:$0xff]  }
 0x7d0   : > { %5947 = vmatpush1.bf16.msra.mxu1 %v13832_v63  ;;  %v6733_v63 = vsel %vm1399_vm6, %v12356_v4, 0  ;;  %v13892_v4 = vld [vmem:[%s18170_s5 + $0xaa8] ss:$16 sps:$4 sm:$0xff]  }
 0x7d1   : > { %12260 = vmatprep.subr.msk.bf16.mxu1 %vm1399_vm6, %v12257_v36  ;;  %v13864_v36 = vld [vmem:[%s18170_s5 + $0xa58] ss:$16 sps:$4 sm:$0xff]   ;;  %v16310_v0 = vshrl.u32 %v16241_v58, 16 }
 0x7d2   : > { %6332 = vmatpush1.bf16.msra.mxu0 %v13835_v22  ;;  %v13867_v22 = vld [vmem:[%s18170_s5 + $0xb30] ss:$16 sps:$4 sm:$0xff]  }
 0x7d3   : > { %v3407_v39 = vpop.f32.mrf.mxu1  ;;  %12227 = vmatmul.mubr.msk.bf16.vlgmr.msra.gmra.mxu1 %vm418_vm1, %v5805_v13  ;;  %12326 = vmatprep.subr.msk.bf16.mxu0 %vm1399_vm6, %v12323_v14  ;;  %v13850_v13 = vld [vmem:[%s18170_s5 + $0x9cc] ss:$16 sps:$4 sm:$0xff]  }
 0x7d4   : > { %6154 = vmatpush1.bf16.msra.mxu1 %v6099_v55  ;;  %6177 = vmatprep.mubr.bf16.mxu1 %v14454_v56  ;;  %v13875_v55 = vld [vmem:[%s18170_s5 + $0xb14] ss:$16 sps:$4 sm:$0xff]  }
 0x7d5   : > { %v3409_v17 = vpop.f32.mrf.mxu1  ;;  %v16186_v21 = vpop.f32.mrf.mxu0  ;;  %12293 = vmatmul.mubr.msk.bf16.vlgmr.msra.gmra.mxu0 %vm418_vm1, %v6231_v43  ;;  %6155 = vmatprep.subr.bf16.mxu1 %v13844_v20  ;;  %v3640_v20 = vrot.slane %v3632_v52, %v15574_v53 }
 0x7d6   : > { %v3419_v23 = vcombine.low %v3407_v39, %v3409_v17  ;;  %6539 = vmatpush1.bf16.msra.mxu0 %v6519_v9  ;;  %6562 = vmatprep.mubr.bf16.mxu0 %v14454_v56  ;;  %v13870_v9 = vld [vmem:[%s18170_s5 + $0xa38] ss:$16 sps:$4 sm:$0xff]   ;;  %v13878_v17 = vld [vmem:[%s18170_s5 + $0xa1c] ss:$16 sps:$4 sm:$0xff]  }
 0x7d7   : > { %v3411_v25 = vpop.f32.mrf.mxu1  ;;  %v16198_v32 = vpop.f32.mrf.mxu0  ;;  %6540 = vmatprep.subr.bf16.mxu0 %v13847_v51 }
 0x7d8   : > { %v3433_v16 = vrot.slane %v3419_v23, %v15574_v53  ;;  %v3845_v31 = vcombine.low %v16186_v21, %v16198_v32  ;;  %6156 = vmatpush1.bf16.msra.mxu1 %v13842_v15  ;;  %v13881_v23 = vld [vmem:[%s18170_s5 + $0xaf4] ss:$16 sps:$4 sm:$0xff]   ;;  %v13876_v25 = vld [vmem:[%s18170_s5 + $0xa18] ss:$16 sps:$4 sm:$0xff]   ;;  %v13895_v21 = vld [vmem:[%s18170_s5 + $0xb80] ss:$16 sps:$4 sm:$0xff]  }
 0x7d9   : > { %v3412_v35 = vpop.f32.mrf.mxu1  ;;  %v3797_v40 = vpop.f32.mrf.mxu0  ;;  %6157 = vmatprep.subr.bf16.mxu1 %v13850_v13  ;;  %v12343_v32 = vld [vmem:[%s18170_s5 + $0xb58] sm:$0x11] }
 0x7da   : > { %v3434_v42 = vcombine.low %v3426_v47, %v3433_v16  ;;  %6541 = vmatpush1.bf16.msra.mxu0 %v13845_v49  ;;  %v12324_v47 = vcombine.low %v12309_v44, %v12309_v44 }
 0x7db   : > { %v3798_v61 = vpop.f32.mrf.mxu0  ;;  %6542 = vmatprep.subr.bf16.mxu0 %v13853_v48  ;;  %v12376_v48 = vld [vmem:[%s18170_s5 + $0xbc0] sm:$0x11] }
 0x7dc   : > { %v3441_v46 = vrot.slane %v3434_v42, %v15574_v53  ;;  %6158 = vmatpush1.bf16.msra.mxu1 %v13848_v33  ;;  %v13879_v33 = vld [vmem:[%s18170_s5 + $0xaf0] ss:$16 sps:$4 sm:$0xff]   ;;  %v12391_v35 = vcombine.high %v12376_v48, %v12376_v48  ;;  %v12390_v40 = vcombine.low %v12376_v48, %v12376_v48  ;;  %v13888_v42 = vld [vmem:[%s18170_s5 + $0xacc] ss:$16 sps:$4 sm:$0xff]   ;;  %v13891_v61 = vld [vmem:[%s18170_s5 + $0xba4] ss:$16 sps:$4 sm:$0xff]  }
 0x7dd   : > { %6159 = vmatprep.subr.bf16.mxu1 %v13856_v7  ;;  %v6525_v7 = vsel %vm1399_vm6, %v12324_v47, 0  ;;  %v13919_v47 = vld [vmem:[%s18170_s5 + $0xbf4] ss:$16 sps:$4 sm:$0xff]  }
 0x7de   : > { %v3443_v45 = vadd.f32 %v3441_v46, %v3229_v3  ;;  %6543 = vmatpush1.bf16.msra.mxu0 %v13851_v57  ;;  %v6947_v30 = vsel %vm1399_vm6, %v12390_v40, 0  ;;  %v13894_v46 = vld [vmem:[%s18170_s5 + $0xaac] ss:$16 sps:$4 sm:$0xff]   ;;  %v13914_v40 = vld [vmem:[%s18170_s5 + $0xb18] ss:$16 sps:$4 sm:$0xff]  }
 0x7df   : > { %6544 = vmatprep.subr.bf16.mxu0 %v13859_v1  ;;  %v13886_v1 = vld [vmem:[%s18170_s5 + $0xac8] ss:$16 sps:$4 sm:$0xff]  }
 0x7e0   : > { %6160 = vmatpush1.bf16.msra.mxu1 %v13854_v50 }
 0x7e1   : > { %12294 = vmatprep.subr.msk.bf16.mxu1 %vm1399_vm6, %v12291_v54 }
 0x7e2   : > { %6545 = vmatpush1.bf16.msra.mxu0 %v13857_v10  ;;  %v3853_v10 = vrot.slane %v3845_v31, %v15574_v53 }
 0x7e3   : > { %v3621_v60 = vpop.f32.mrf.mxu1  ;;  %12261 = vmatmul.mubr.msk.bf16.vlgmr.msra.gmra.mxu1 %vm418_vm1, %v6018_v59  ;;  %12360 = vmatprep.subr.msk.bf16.mxu0 %vm1399_vm6, %v12357_v41 }
 0x7e4   : > { %6367 = vmatpush1.bf16.msra.mxu1 %v6312_v5  ;;  %6390 = vmatprep.mubr.bf16.mxu1 %v14454_v56 }
 0x7e5   : > { %v3623_v26 = vpop.f32.mrf.mxu1  ;;  %v16255_v3 = vpop.f32.mrf.mxu0  ;;  %12327 = vmatmul.mubr.msk.bf16.vlgmr.msra.gmra.mxu0 %vm418_vm1, %v16241_v58  ;;  %6368 = vmatprep.subr.bf16.mxu1 %v13866_v38 }
 0x7e6   : > { %v3633_v59 = vcombine.low %v3621_v60, %v3623_v26  ;;  %6753 = vmatpush1.bf16.msra.mxu0 %v6733_v63  ;;  %6776 = vmatprep.mubr.bf16.mxu0 %v14454_v56  ;;  %v13900_v60 = vld [vmem:[%s18170_s5 + $0xa8c] ss:$16 sps:$4 sm:$0xff]   ;;  %v13898_v26 = vld [vmem:[%s18170_s5 + $0xa88] ss:$16 sps:$4 sm:$0xff]  }
 0x7e7   : > { %v3625_v14 = vpop.f32.mrf.mxu1  ;;  %v16266_v8 = vpop.f32.mrf.mxu0  ;;  %6754 = vmatprep.subr.bf16.mxu0 %v13869_v2  ;;  %v13903_v2 = vld [vmem:[%s18170_s5 + $0xb64] ss:$16 sps:$4 sm:$0xff]  }
 0x7e8   : > { %v3647_v39 = vrot.slane %v3633_v59, %v15574_v53  ;;  %6369 = vmatpush1.bf16.msra.mxu1 %v13864_v36  ;;  %v12359_v59 = vcombine.high %v12343_v32, %v12343_v32  ;;  %v4058_v44 = vcombine.low %v16255_v3, %v16266_v8  ;;  %v13911_v8 = vld [vmem:[%s18170_s5 + $0xc10] ss:$16 sps:$4 sm:$0xff]  }
 0x7e9   : > { %v3626_v51 = vpop.f32.mrf.mxu1  ;;  %v4010_v15 = vpop.f32.mrf.mxu0  ;;  %6370 = vmatprep.subr.bf16.mxu1 %v13872_v6  ;;  %v12410_v6 = vld [vmem:[%s18170_s5 + $0xc30] sm:$0x11] }
 0x7ea   : > { %v3648_v13 = vcombine.low %v3640_v20, %v3647_v39  ;;  %6755 = vmatpush1.bf16.msra.mxu0 %v13867_v22  ;;  %v12358_v22 = vcombine.low %v12343_v32, %v12343_v32  ;;  %v12425_v20 = vcombine.high %v12410_v6, %v12410_v6  ;;  %v12424_v39 = vcombine.low %v12410_v6, %v12410_v6  ;;  %v13910_v51 = vld [vmem:[%s18170_s5 + $0xb3c] ss:$16 sps:$4 sm:$0xff]  }
 0x7eb   : > { %v4011_v52 = vpop.f32.mrf.mxu0  ;;  %6756 = vmatprep.subr.bf16.mxu0 %v13875_v55  ;;  %v13901_v55 = vld [vmem:[%s18170_s5 + $0xb60] ss:$16 sps:$4 sm:$0xff]   ;;  %v7085_v32 = vrot.slane %v16310_v0, 1 }
 0x7ec   : > { %v3655_v49 = vrot.slane %v3648_v13, %v15574_v53  ;;  %6371 = vmatpush1.bf16.msra.mxu1 %v13870_v9  ;;  %v6739_v9 = vsel %vm1399_vm6, %v12358_v22, 0  ;;  %v7160_v13 = vsel %vm1399_vm6, %v12424_v39, 0  ;;  %v13908_v52 = vld [vmem:[%s18170_s5 + $0xb38] ss:$16 sps:$4 sm:$0xff]   ;;  %v13941_v39 = vld [vmem:[%s18170_s5 + $0xc64] ss:$16 sps:$4 sm:$0xff]  }
 0x7ed   : > { %6372 = vmatprep.subr.bf16.mxu1 %v13878_v17  ;;  %v6872_v17 = vrot.slane %v16241_v58, 1 }
 0x7ee   : > { %v3657_v16 = vadd.f32 %v3655_v49, %v3443_v45  ;;  %6757 = vmatpush1.bf16.msra.mxu0 %v13873_v18  ;;  %v13897_v45 = vld [vmem:[%s18170_s5 + $0xb84] ss:$16 sps:$4 sm:$0xff]  }
 0x7ef   : > { %6758 = vmatprep.subr.bf16.mxu0 %v13881_v23  ;;  %v13913_v18 = vld [vmem:[%s18170_s5 + $0xc14] ss:$16 sps:$4 sm:$0xff]  }
 0x7f0   : > { %6373 = vmatpush1.bf16.msra.mxu1 %v13876_v25  ;;  %v13916_v25 = vld [vmem:[%s18170_s5 + $0xb1c] ss:$16 sps:$4 sm:$0xff]  }
 0x7f1   : > { %12328 = vmatprep.subr.msk.bf16.mxu1 %vm1399_vm6, %v12325_v27 }
 0x7f2   : > { %6759 = vmatpush1.bf16.msra.mxu0 %v13879_v33 }
 0x7f3   : > { %v3834_v57 = vpop.f32.mrf.mxu1  ;;  %12295 = vmatmul.mubr.msk.bf16.vlgmr.msra.gmra.mxu1 %vm418_vm1, %v6231_v43  ;;  %12394 = vmatprep.subr.msk.bf16.mxu0 %vm1399_vm6, %v12391_v35 }
 0x7f4   : > { %6580 = vmatpush1.bf16.msra.mxu1 %v6525_v7  ;;  %6603 = vmatprep.mubr.bf16.mxu1 %v14454_v56 }
 0x7f5   : > { %v3836_v62 = vpop.f32.mrf.mxu1  ;;  %v16321_v43 = vpop.f32.mrf.mxu0  ;;  %12361 = vmatmul.mubr.msk.bf16.vlgmr.msra.gmra.mxu0 %vm418_vm1, %v16310_v0  ;;  %6581 = vmatprep.subr.bf16.mxu1 %v13888_v42 }
 0x7f6   : > { %v3846_v50 = vcombine.low %v3834_v57, %v3836_v62  ;;  %6967 = vmatpush1.bf16.msra.mxu0 %v6947_v30  ;;  %6990 = vmatprep.mubr.bf16.mxu0 %v14454_v56  ;;  %v13922_v57 = vld [vmem:[%s18170_s5 + $0xafc] ss:$16 sps:$4 sm:$0xff]  }
 0x7f7   : > { %v3838_v54 = vpop.f32.mrf.mxu1  ;;  %v16332_v28 = vpop.f32.mrf.mxu0  ;;  %6968 = vmatprep.subr.bf16.mxu0 %v13891_v61  ;;  %v13917_v61 = vld [vmem:[%s18170_s5 + $0xbf0] ss:$16 sps:$4 sm:$0xff]  }
 0x7f8   : > { %v3860_v19 = vrot.slane %v3846_v50, %v15574_v53  ;;  %v4271_v41 = vcombine.low %v16321_v43, %v16332_v28  ;;  %6582 = vmatpush1.bf16.msra.mxu1 %v13886_v1  ;;  %v12377_v1 = vld [vmem:[%s18170_s5 + $0xbc8] sm:$0x11]  ;;  %v12444_v54 = vld [vmem:[%s18170_s5 + $0xca0] sm:$0x11]  ;;  %v12411_v28 = vld [vmem:[%s18170_s5 + $0xc38] sm:$0x11] }
 0x7f9   : > { %v3839_v5 = vpop.f32.mrf.mxu1  ;;  %v4223_v38 = vpop.f32.mrf.mxu0  ;;  %6583 = vmatprep.subr.bf16.mxu1 %v13894_v46  ;;  %v13925_v46 = vld [vmem:[%s18170_s5 + $0xbd4] ss:$16 sps:$4 sm:$0xff]   ;;  %v13939_v43 = vld [vmem:[%s18170_s5 + $0xc60] ss:$16 sps:$4 sm:$0xff]  }
 0x7fa   : > { %v3861_v63 = vcombine.low %v3853_v10, %v3860_v19  ;;  %6969 = vmatpush1.bf16.msra.mxu0 %v13889_v29  ;;  %v13920_v29 = vld [vmem:[%s18170_s5 + $0xaf8] ss:$16 sps:$4 sm:$0xff]   ;;  %v12392_v10 = vcombine.low %v12377_v1, %v12377_v1  ;;  %v12459_v5 = vcombine.high %v12444_v54, %v12444_v54  ;;  %v12458_v38 = vcombine.low %v12444_v54, %v12444_v54 }
 0x7fb   : > { %v4224_v31 = vpop.f32.mrf.mxu0  ;;  %6970 = vmatprep.subr.bf16.mxu0 %v13897_v45  ;;  %v12393_v45 = vcombine.high %v12377_v1, %v12377_v1  ;;  %v7298_v1 = vrot.slane %v16241_v58, 2 }
 0x7fc   : > { %v3868_v36 = vrot.slane %v3861_v63, %v15574_v53  ;;  %6584 = vmatpush1.bf16.msra.mxu1 %v13892_v4  ;;  %v13923_v4 = vld [vmem:[%s18170_s5 + $0xbd0] ss:$16 sps:$4 sm:$0xff]   ;;  %v13932_v63 = vld [vmem:[%s18170_s5 + $0xbac] ss:$16 sps:$4 sm:$0xff]   ;;  %v7373_v31 = vsel %vm1399_vm6, %v12458_v38, 0 }
 0x7fd   : > { %6585 = vmatprep.subr.bf16.mxu1 %v13900_v60  ;;  %v6953_v60 = vsel %vm1399_vm6, %v12392_v10, 0  ;;  %v13955_v10 = vld [vmem:[%s18170_s5 + $0xcf0] ss:$16 sps:$4 sm:$0xff]  }
 0x7fe   : > { %v3870_v14 = vadd.f32 %v3868_v36, %v3657_v16  ;;  %6971 = vmatpush1.bf16.msra.mxu0 %v13895_v21  ;;  %v4066_v16 = vrot.slane %v4058_v44, %v15574_v53  ;;  %v13930_v36 = vld [vmem:[%s18170_s5 + $0xba8] ss:$16 sps:$4 sm:$0xff]  }
 0x7ff   : > { %6972 = vmatprep.subr.bf16.mxu0 %v13903_v2  ;;  %v13935_v2 = vld [vmem:[%s18170_s5 + $0xc84] ss:$16 sps:$4 sm:$0xff]  }
 0x800   : > { %6586 = vmatpush1.bf16.msra.mxu1 %v13898_v26 }
 0x801   : > { %12362 = vmatprep.subr.msk.bf16.mxu1 %vm1399_vm6, %v12359_v59  ;;  %v13938_v59 = vld [vmem:[%s18170_s5 + $0xb8c] ss:$16 sps:$4 sm:$0xff]  }
 0x802   : > { %6973 = vmatpush1.bf16.msra.mxu0 %v13901_v55 }
 0x803   : > { %v4047_v15 = vpop.f32.mrf.mxu1  ;;  %12329 = vmatmul.mubr.msk.bf16.vlgmr.msra.gmra.mxu1 %vm418_vm1, %v16241_v58  ;;  %12428 = vmatprep.subr.msk.bf16.mxu0 %vm1399_vm6, %v12425_v20 }
 0x804   : > { %6794 = vmatpush1.bf16.msra.mxu1 %v6739_v9  ;;  %6817 = vmatprep.mubr.bf16.mxu1 %v14454_v56  ;;  %v4279_v9 = vrot.slane %v4271_v41, %v15574_v53 }
 0x805   : > { %v4049_v23 = vpop.f32.mrf.mxu1  ;;  %v16388_v49 = vpop.f32.mrf.mxu0  ;;  %12395 = vmatmul.mubr.msk.bf16.vlgmr.msra.gmra.mxu0 %vm418_vm1, %v6872_v17  ;;  %6795 = vmatprep.subr.bf16.mxu1 %v13910_v51 }
 0x806   : > { %v4059_v3 = vcombine.low %v4047_v15, %v4049_v23  ;;  %7180 = vmatpush1.bf16.msra.mxu0 %v7160_v13  ;;  %7203 = vmatprep.mubr.bf16.mxu0 %v14454_v56  ;;  %v13936_v13 = vld [vmem:[%s18170_s5 + $0xb88] ss:$16 sps:$4 sm:$0xff]  }
 0x807   : > { %v4051_v48 = vpop.f32.mrf.mxu1  ;;  %v16400_v27 = vpop.f32.mrf.mxu0  ;;  %7181 = vmatprep.subr.bf16.mxu0 %v13913_v18 }
 0x808   : > { %v4073_v33 = vrot.slane %v4059_v3, %v15574_v53  ;;  %v4484_v35 = vcombine.low %v16388_v49, %v16400_v27  ;;  %6796 = vmatpush1.bf16.msra.mxu1 %v13908_v52  ;;  %v13944_v52 = vld [vmem:[%s18170_s5 + $0xb6c] ss:$16 sps:$4 sm:$0xff]   ;;  %v12478_v48 = vld [vmem:[%s18170_s5 + $0xd10] sm:$0x11] }
 0x809   : > { %v4052_v7 = vpop.f32.mrf.mxu1  ;;  %v4436_v42 = vpop.f32.mrf.mxu0  ;;  %6797 = vmatprep.subr.bf16.mxu1 %v13916_v25  ;;  %v13947_v25 = vld [vmem:[%s18170_s5 + $0xc44] ss:$16 sps:$4 sm:$0xff]   ;;  %v13961_v49 = vld [vmem:[%s18170_s5 + $0xcd0] ss:$16 sps:$4 sm:$0xff]   ;;  %v12445_v27 = vld [vmem:[%s18170_s5 + $0xca8] sm:$0x11] }
 0x80a   : > { %v4074_v30 = vcombine.low %v4066_v16, %v4073_v33  ;;  %7182 = vmatpush1.bf16.msra.mxu0 %v13911_v8  ;;  %v13942_v8 = vld [vmem:[%s18170_s5 + $0xb68] ss:$16 sps:$4 sm:$0xff]   ;;  %v12426_v16 = vcombine.low %v12411_v28, %v12411_v28  ;;  %v12493_v7 = vcombine.high %v12478_v48, %v12478_v48  ;;  %v12492_v42 = vcombine.low %v12478_v48, %v12478_v48 }
 0x80b   : > { %v4437_v62 = vpop.f32.mrf.mxu0  ;;  %7183 = vmatprep.subr.bf16.mxu0 %v13919_v47  ;;  %v12427_v47 = vcombine.high %v12411_v28, %v12411_v28  ;;  %v4492_v38 = vrot.slane %v4484_v35, %v15574_v53  ;;  %v7511_v28 = vrot.slane %v16310_v0, 2 }
 0x80c   : > { %v4081_v50 = vrot.slane %v4074_v30, %v15574_v53  ;;  %6798 = vmatpush1.bf16.msra.mxu1 %v13914_v40  ;;  %v13945_v40 = vld [vmem:[%s18170_s5 + $0xc40] ss:$16 sps:$4 sm:$0xff]   ;;  %v13954_v30 = vld [vmem:[%s18170_s5 + $0xc1c] ss:$16 sps:$4 sm:$0xff]   ;;  %v7586_v62 = vsel %vm1399_vm6, %v12492_v42, 0 }
 0x80d   : > { %6799 = vmatprep.subr.bf16.mxu1 %v13922_v57  ;;  %v7166_v57 = vsel %vm1399_vm6, %v12426_v16, 0  ;;  %v13977_v16 = vld [vmem:[%s18170_s5 + $0xd60] ss:$16 sps:$4 sm:$0xff]  }
 0x80e   : > { %v4083_v19 = vadd.f32 %v4081_v50, %v3870_v14  ;;  %7184 = vmatpush1.bf16.msra.mxu0 %v13917_v61  ;;  %v13933_v14 = vld [vmem:[%s18170_s5 + $0xc80] ss:$16 sps:$4 sm:$0xff]   ;;  %v13952_v50 = vld [vmem:[%s18170_s5 + $0xc18] ss:$16 sps:$4 sm:$0xff]  }
 0x80f   : > { %7185 = vmatprep.subr.bf16.mxu0 %v13925_v46  ;;  %v13957_v46 = vld [vmem:[%s18170_s5 + $0xcf4] ss:$16 sps:$4 sm:$0xff]  }
 0x810   : > { %6800 = vmatpush1.bf16.msra.mxu1 %v13920_v29 }
 0x811   : > { %12396 = vmatprep.subr.msk.bf16.mxu1 %vm1399_vm6, %v12393_v45 }
 0x812   : > { %7186 = vmatpush1.bf16.msra.mxu0 %v13923_v4 }
 0x813   : > { %v4260_v21 = vpop.f32.mrf.mxu1  ;;  %12363 = vmatmul.mubr.msk.bf16.vlgmr.msra.gmra.mxu1 %vm418_vm1, %v16310_v0  ;;  %12462 = vmatprep.subr.msk.bf16.mxu0 %vm1399_vm6, %v12459_v5  ;;  %v13963_v5 = vld [vmem:[%s18170_s5 + $0xcd4] ss:$16 sps:$4 sm:$0xff]  }
 0x814   : > { %7008 = vmatpush1.bf16.msra.mxu1 %v6953_v60  ;;  %7031 = vmatprep.mubr.bf16.mxu1 %v14454_v56 }
 0x815   : > { %v4262_v26 = vpop.f32.mrf.mxu1  ;;  %v16451_v6 = vpop.f32.mrf.mxu0  ;;  %12429 = vmatmul.mubr.msk.bf16.vlgmr.msra.gmra.mxu0 %vm418_vm1, %v7085_v32  ;;  %7009 = vmatprep.subr.bf16.mxu1 %v13932_v63 }
 0x816   : > { %v4272_v22 = vcombine.low %v4260_v21, %v4262_v26  ;;  %7393 = vmatpush1.bf16.msra.mxu0 %v7373_v31  ;;  %7416 = vmatprep.mubr.bf16.mxu0 %v14454_v56  ;;  %v13958_v21 = vld [vmem:[%s18170_s5 + $0xbf8] ss:$16 sps:$4 sm:$0xff]  }
 0x817   : > { %v4264_v55 = vpop.f32.mrf.mxu1  ;;  %v16463_v20 = vpop.f32.mrf.mxu0  ;;  %7394 = vmatprep.subr.bf16.mxu0 %v13935_v2 }
 0x818   : > { %v4286_v51 = vrot.slane %v4272_v22, %v15574_v53  ;;  %v4697_v15 = vcombine.low %v16451_v6, %v16463_v20  ;;  %7010 = vmatpush1.bf16.msra.mxu1 %v13930_v36  ;;  %v13966_v36 = vld [vmem:[%s18170_s5 + $0xbdc] ss:$16 sps:$4 sm:$0xff]   ;;  %v12512_v55 = vld [vmem:[%s18170_s5 + $0xd80] sm:$0x11] }
 0x819   : > { %v4265_v18 = vpop.f32.mrf.mxu1  ;;  %v4649_v44 = vpop.f32.mrf.mxu0  ;;  %7011 = vmatprep.subr.bf16.mxu1 %v13938_v59  ;;  %v13969_v59 = vld [vmem:[%s18170_s5 + $0xcb4] ss:$16 sps:$4 sm:$0xff]   ;;  %v13983_v6 = vld [vmem:[%s18170_s5 + $0xd40] ss:$16 sps:$4 sm:$0xff]   ;;  %v12479_v20 = vld [vmem:[%s18170_s5 + $0xd18] sm:$0x11] }
 0x81a   : > { %v4287_v23 = vcombine.low %v4279_v9, %v4286_v51  ;;  %7395 = vmatpush1.bf16.msra.mxu0 %v13933_v14  ;;  %v13964_v14 = vld [vmem:[%s18170_s5 + $0xbd8] ss:$16 sps:$4 sm:$0xff]   ;;  %v12460_v9 = vcombine.low %v12445_v27, %v12445_v27  ;;  %v12527_v18 = vcombine.high %v12512_v55, %v12512_v55  ;;  %v12526_v44 = vcombine.low %v12512_v55, %v12512_v55 }
 0x81b   : > { %v4650_v41 = vpop.f32.mrf.mxu0  ;;  %7396 = vmatprep.subr.bf16.mxu0 %v13941_v39  ;;  %v12461_v39 = vcombine.high %v12445_v27, %v12445_v27  ;;  %v4705_v42 = vrot.slane %v4697_v15, %v15574_v53  ;;  %v7724_v27 = vrot.slane %v16241_v58, 3  ;;  %v14048_v58 = vld [vmem:[%s18170_s5 + $0xdbc] ss:$16 sps:$4 sm:$0xff]  }
 0x81c   : > { %v4294_v3 = vrot.slane %v4287_v23, %v15574_v53  ;;  %7012 = vmatpush1.bf16.msra.mxu1 %v13936_v13  ;;  %v13967_v13 = vld [vmem:[%s18170_s5 + $0xcb0] ss:$16 sps:$4 sm:$0xff]   ;;  %v13976_v23 = vld [vmem:[%s18170_s5 + $0xc8c] ss:$16 sps:$4 sm:$0xff]   ;;  %v7799_v41 = vsel %vm1399_vm6, %v12526_v44, 0 }
 0x81d   : > { %7013 = vmatprep.subr.bf16.mxu1 %v13944_v52  ;;  %v7379_v52 = vsel %vm1399_vm6, %v12460_v9, 0  ;;  %v13999_v9 = vld [vmem:[%s18170_s5 + $0xdd0] ss:$16 sps:$4 sm:$0xff]  }
 0x81e   : > { %v4296_v33 = vadd.f32 %v4294_v3, %v4083_v19  ;;  %7397 = vmatpush1.bf16.msra.mxu0 %v13939_v43  ;;  %v13974_v3 = vld [vmem:[%s18170_s5 + $0xc88] ss:$16 sps:$4 sm:$0xff]  }
 0x81f   : > { %7398 = vmatprep.subr.bf16.mxu0 %v13947_v25  ;;  %v13979_v25 = vld [vmem:[%s18170_s5 + $0xd64] ss:$16 sps:$4 sm:$0xff]  }
 0x820   : > { %7014 = vmatpush1.bf16.msra.mxu1 %v13942_v8 }
 0x821   : > { %12430 = vmatprep.subr.msk.bf16.mxu1 %vm1399_vm6, %v12427_v47 }
 0x822   : > { %7399 = vmatpush1.bf16.msra.mxu0 %v13945_v40 }
 0x823   : > { %v4473_v61 = vpop.f32.mrf.mxu1  ;;  %12397 = vmatmul.mubr.msk.bf16.vlgmr.msra.gmra.mxu1 %vm418_vm1, %v6872_v17  ;;  %12496 = vmatprep.subr.msk.bf16.mxu0 %vm1399_vm6, %v12493_v7  ;;  %v13960_v17 = vld [vmem:[%s18170_s5 + $0xbfc] ss:$16 sps:$4 sm:$0xff]   ;;  %v13985_v7 = vld [vmem:[%s18170_s5 + $0xd44] ss:$16 sps:$4 sm:$0xff]  }
 0x824   : > { %7221 = vmatpush1.bf16.msra.mxu1 %v7166_v57  ;;  %7244 = vmatprep.mubr.bf16.mxu1 %v14454_v56 }
 0x825   : > { %v4475_v29 = vpop.f32.mrf.mxu1  ;;  %v16518_v54 = vpop.f32.mrf.mxu0  ;;  %12463 = vmatmul.mubr.msk.bf16.vlgmr.msra.gmra.mxu0 %vm418_vm1, %v7298_v1  ;;  %7222 = vmatprep.subr.bf16.mxu1 %v13954_v30 }
 0x826   : > { %v4485_v45 = vcombine.low %v4473_v61, %v4475_v29  ;;  %7606 = vmatpush1.bf16.msra.mxu0 %v7586_v62  ;;  %7629 = vmatprep.mubr.bf16.mxu0 %v14454_v56  ;;  %v13980_v61 = vld [vmem:[%s18170_s5 + $0xc68] ss:$16 sps:$4 sm:$0xff]  }
 0x827   : > { %v4477_v19 = vpop.f32.mrf.mxu1  ;;  %v16530_v4 = vpop.f32.mrf.mxu0  ;;  %7607 = vmatprep.subr.bf16.mxu0 %v13957_v46 }
 0x828   : > { %v4499_v60 = vrot.slane %v4485_v45, %v15574_v53  ;;  %v4910_v63 = vcombine.low %v16518_v54, %v16530_v4  ;;  %7223 = vmatpush1.bf16.msra.mxu1 %v13952_v50  ;;  %v13988_v50 = vld [vmem:[%s18170_s5 + $0xc4c] ss:$16 sps:$4 sm:$0xff]   ;;  %v12546_v19 = vld [vmem:[%s18170_s5 + $0xdf0] sm:$0x11] }
 0x829   : > { %v4478_v31 = vpop.f32.mrf.mxu1  ;;  %v4862_v2 = vpop.f32.mrf.mxu0  ;;  %7224 = vmatprep.subr.bf16.mxu1 %v13960_v17  ;;  %v13991_v17 = vld [vmem:[%s18170_s5 + $0xd24] ss:$16 sps:$4 sm:$0xff]   ;;  %v14005_v54 = vld [vmem:[%s18170_s5 + $0xdb0] ss:$16 sps:$4 sm:$0xff]   ;;  %v12513_v4 = vld [vmem:[%s18170_s5 + $0xd88] sm:$0x11] }
 0x82a   : > { %v4500_v26 = vcombine.low %v4492_v38, %v4499_v60  ;;  %7608 = vmatpush1.bf16.msra.mxu0 %v13955_v10  ;;  %v13986_v10 = vld [vmem:[%s18170_s5 + $0xc48] ss:$16 sps:$4 sm:$0xff]   ;;  %v12494_v38 = vcombine.low %v12479_v20, %v12479_v20  ;;  %v12561_v31 = vcombine.high %v12546_v19, %v12546_v19  ;;  %v12560_v2 = vcombine.low %v12546_v19, %v12546_v19 }
 0x82b   : > { %v4863_v35 = vpop.f32.mrf.mxu0  ;;  %7609 = vmatprep.subr.bf16.mxu0 %v13963_v5  ;;  %v12495_v5 = vcombine.high %v12479_v20, %v12479_v20  ;;  %v4918_v44 = vrot.slane %v4910_v63, %v15574_v53  ;;  %v7937_v20 = vrot.slane %v16310_v0, 3  ;;  %v14070_v0 = vld [vmem:[%s18170_s5 + $0xe2c] ss:$16 sps:$4 sm:$0xff]  }
 0x82c   : > { %v4507_v22 = vrot.slane %v4500_v26, %v15574_v53  ;;  %7225 = vmatpush1.bf16.msra.mxu1 %v13958_v21  ;;  %v13989_v21 = vld [vmem:[%s18170_s5 + $0xd20] ss:$16 sps:$4 sm:$0xff]   ;;  %v13998_v26 = vld [vmem:[%s18170_s5 + $0xcfc] ss:$16 sps:$4 sm:$0xff]   ;;  %v8012_v35 = vsel %vm1399_vm6, %v12560_v2, 0 }
 0x82d   : > { %7226 = vmatprep.subr.bf16.mxu1 %v13966_v36  ;;  %v7592_v36 = vsel %vm1399_vm6, %v12494_v38, 0  ;;  %v14021_v38 = vld [vmem:[%s18170_s5 + $0xe40] ss:$16 sps:$4 sm:$0xff]  }
 0x82e   : > { %v4509_v51 = vadd.f32 %v4507_v22, %v4296_v33  ;;  %7610 = vmatpush1.bf16.msra.mxu0 %v13961_v49  ;;  %v13996_v22 = vld [vmem:[%s18170_s5 + $0xcf8] ss:$16 sps:$4 sm:$0xff]  }
 0x82f   : > { %7611 = vmatprep.subr.bf16.mxu0 %v13969_v59  ;;  %v14001_v59 = vld [vmem:[%s18170_s5 + $0xdd4] ss:$16 sps:$4 sm:$0xff]  }
 0x830   : > { %7227 = vmatpush1.bf16.msra.mxu1 %v13964_v14 }
 0x831   : > { %12464 = vmatprep.subr.msk.bf16.mxu1 %vm1399_vm6, %v12461_v39 }
 0x832   : > { %7612 = vmatpush1.bf16.msra.mxu0 %v13967_v13 }
 0x833   : > { %v4686_v43 = vpop.f32.mrf.mxu1  ;;  %12431 = vmatmul.mubr.msk.bf16.vlgmr.msra.gmra.mxu1 %vm418_vm1, %v7085_v32  ;;  %12530 = vmatprep.subr.msk.bf16.mxu0 %vm1399_vm6, %v12527_v18  ;;  %v13982_v32 = vld [vmem:[%s18170_s5 + $0xc6c] ss:$16 sps:$4 sm:$0xff]   ;;  %v14007_v18 = vld [vmem:[%s18170_s5 + $0xdb4] ss:$16 sps:$4 sm:$0xff]  }
 0x834   : > { %7434 = vmatpush1.bf16.msra.mxu1 %v7379_v52  ;;  %7457 = vmatprep.mubr.bf16.mxu1 %v14454_v56 }
 0x835   : > { %v4688_v8 = vpop.f32.mrf.mxu1  ;;  %v16585_v48 = vpop.f32.mrf.mxu0  ;;  %12497 = vmatmul.mubr.msk.bf16.vlgmr.msra.gmra.mxu0 %vm418_vm1, %v7511_v28  ;;  %7435 = vmatprep.subr.bf16.mxu1 %v13976_v23 }
 0x836   : > { %v4698_v47 = vcombine.low %v4686_v43, %v4688_v8  ;;  %7819 = vmatpush1.bf16.msra.mxu0 %v7799_v41  ;;  %7842 = vmatprep.mubr.bf16.mxu0 %v14454_v56  ;;  %v14002_v43 = vld [vmem:[%s18170_s5 + $0xcd8] ss:$16 sps:$4 sm:$0xff]  }
 0x837   : > { %v4690_v33 = vpop.f32.mrf.mxu1  ;;  %v16597_v40 = vpop.f32.mrf.mxu0  ;;  %7820 = vmatprep.subr.bf16.mxu0 %v13979_v25 }
 0x838   : > { %v4712_v57 = vrot.slane %v4698_v47, %v15574_v53  ;;  %v5124_v30 = vcombine.low %v16585_v48, %v16597_v40  ;;  %7436 = vmatpush1.bf16.msra.mxu1 %v13974_v3  ;;  %v14010_v3 = vld [vmem:[%s18170_s5 + $0xcbc] ss:$16 sps:$4 sm:$0xff]   ;;  %v12580_v33 = vld [vmem:[%s18170_s5 + $0xe60] sm:$0x11] }
 0x839   : > { %v4691_v62 = vpop.f32.mrf.mxu1  ;;  %v5076_v46 = vpop.f32.mrf.mxu0  ;;  %7437 = vmatprep.subr.bf16.mxu1 %v13982_v32  ;;  %v14013_v32 = vld [vmem:[%s18170_s5 + $0xd94] ss:$16 sps:$4 sm:$0xff]   ;;  %v14027_v40 = vld [vmem:[%s18170_s5 + $0xe20] ss:$16 sps:$4 sm:$0xff]  }
 0x83a   : > { %v4713_v29 = vcombine.low %v4705_v42, %v4712_v57  ;;  %7821 = vmatpush1.bf16.msra.mxu0 %v13977_v16  ;;  %v14008_v16 = vld [vmem:[%s18170_s5 + $0xcb8] ss:$16 sps:$4 sm:$0xff]   ;;  %v12528_v42 = vcombine.low %v12513_v4, %v12513_v4  ;;  %v12595_v62 = vcombine.high %v12580_v33, %v12580_v33  ;;  %v12594_v46 = vcombine.low %v12580_v33, %v12580_v33 }
 0x83b   : > { %v5077_v15 = vpop.f32.mrf.mxu0  ;;  %7822 = vmatprep.subr.bf16.mxu0 %v13985_v7  ;;  %v12529_v7 = vcombine.high %v12513_v4, %v12513_v4  ;;  %v5132_v2 = vrot.slane %v5124_v30, %v15574_v53  ;;  %v12547_v30 = vld [vmem:[%s18170_s5 + $0xdf8] sm:$0x11] }
 0x83c   : > { %v4720_v45 = vrot.slane %v4713_v29, %v15574_v53  ;;  %7438 = vmatpush1.bf16.msra.mxu1 %v13980_v61  ;;  %v14011_v61 = vld [vmem:[%s18170_s5 + $0xd90] ss:$16 sps:$4 sm:$0xff]   ;;  %v14020_v29 = vld [vmem:[%s18170_s5 + $0xd6c] ss:$16 sps:$4 sm:$0xff]   ;;  %v8225_v15 = vsel %vm1399_vm6, %v12594_v46, 0 }
 0x83d   : > { %7439 = vmatprep.subr.bf16.mxu1 %v13988_v50  ;;  %v7805_v50 = vsel %vm1399_vm6, %v12528_v42, 0  ;;  %v14042_v4 = vld [vmem:[%s18170_s5 + $0xddc] ss:$16 sps:$4 sm:$0xff]   ;;  %v14040_v33 = vld [vmem:[%s18170_s5 + $0xdd8] ss:$16 sps:$4 sm:$0xff]  }
 0x83e   : > { %v4722_v60 = vadd.f32 %v4720_v45, %v4509_v51  ;;  %7823 = vmatpush1.bf16.msra.mxu0 %v13983_v6  ;;  %v14018_v45 = vld [vmem:[%s18170_s5 + $0xd68] ss:$16 sps:$4 sm:$0xff]   ;;  %v14051_v46 = vld [vmem:[%s18170_s5 + $0xe94] ss:$16 sps:$4 sm:$0xff]  }
 0x83f   : > { %7824 = vmatprep.subr.bf16.mxu0 %v13991_v17  ;;  %v14023_v17 = vld [vmem:[%s18170_s5 + $0xe44] ss:$16 sps:$4 sm:$0xff]  }
 0x840   : > { %7440 = vmatpush1.bf16.msra.mxu1 %v13986_v10 }
 0x841   : > { %12498 = vmatprep.subr.msk.bf16.mxu1 %vm1399_vm6, %v12495_v5 }
 0x842   : > { %7825 = vmatpush1.bf16.msra.mxu0 %v13989_v21 }
 0x843   : > { %v4899_v49 = vpop.f32.mrf.mxu1  ;;  %12465 = vmatmul.mubr.msk.bf16.vlgmr.msra.gmra.mxu1 %vm418_vm1, %v7298_v1  ;;  %12564 = vmatprep.subr.msk.bf16.mxu0 %vm1399_vm6, %v12561_v31  ;;  %v14004_v1 = vld [vmem:[%s18170_s5 + $0xcdc] ss:$16 sps:$4 sm:$0xff]   ;;  %v14029_v31 = vld [vmem:[%s18170_s5 + $0xe24] ss:$16 sps:$4 sm:$0xff]  }
 0x844   : > { %7647 = vmatpush1.bf16.msra.mxu1 %v7592_v36  ;;  %7670 = vmatprep.mubr.bf16.mxu1 %v14454_v56 }
 0x845   : > { %v4901_v14 = vpop.f32.mrf.mxu1  ;;  %v16652_v55 = vpop.f32.mrf.mxu0  ;;  %12531 = vmatmul.mubr.msk.bf16.vlgmr.msra.gmra.mxu0 %vm418_vm1, %v7724_v27  ;;  %7648 = vmatprep.subr.bf16.mxu1 %v13998_v26 }
 0x846   : > { %v4911_v39 = vcombine.low %v4899_v49, %v4901_v14  ;;  %8032 = vmatpush1.bf16.msra.mxu0 %v8012_v35  ;;  %8055 = vmatprep.mubr.bf16.mxu0 %v14454_v56  ;;  %v14024_v49 = vld [vmem:[%s18170_s5 + $0xd48] ss:$16 sps:$4 sm:$0xff]   ;;  %v1182_v14 = vpop.permute.xlu0 %1181 }
 0x847   : > { %v4903_v51 = vpop.f32.mrf.mxu1  ;;  %v16664_v13 = vpop.f32.mrf.mxu0  ;;  %8033 = vmatprep.subr.bf16.mxu0 %v14001_v59 }
 0x848   : > { %v4925_v52 = vrot.slane %v4911_v39, %v15574_v53  ;;  %v5338_v23 = vcombine.low %v16652_v55, %v16664_v13  ;;  %7649 = vmatpush1.bf16.msra.mxu1 %v13996_v22  ;;  %v14032_v22 = vld [vmem:[%s18170_s5 + $0xd2c] ss:$16 sps:$4 sm:$0xff]   ;;  %v14049_v55 = vld [vmem:[%s18170_s5 + $0xe90] ss:$16 sps:$4 sm:$0xff]  }
 0x849   : > { %v4904_v41 = vpop.f32.mrf.mxu1  ;;  %v5290_v25 = vpop.f32.mrf.mxu0  ;;  %7650 = vmatprep.subr.bf16.mxu1 %v14004_v1  ;;  %v1303_v1 = vadd.f32 %v14878_v37, %v1182_v14  ;;  %v12562_v37 = vcombine.low %v12547_v30, %v12547_v30  ;;  %v12581_v13 = vld [vmem:[%s18170_s5 + $0xe68] sm:$0x11] }
 0x84a   : > { %v4926_v8 = vcombine.low %v4918_v44, %v4925_v52  ;;  %8034 = vmatpush1.bf16.msra.mxu0 %v13999_v9  ;;  %v14035_v9 = vld [vmem:[%s18170_s5 + $0xe04] ss:$16 sps:$4 sm:$0xff]   ;;  %v12563_v52 = vcombine.high %v12547_v30, %v12547_v30  ;;  %v14033_v41 = vld [vmem:[%s18170_s5 + $0xe00] ss:$16 sps:$4 sm:$0xff]  }
 0x84b   : > { %v5291_v63 = vpop.f32.mrf.mxu0  ;;  %8035 = vmatprep.subr.bf16.mxu0 %v14007_v18  ;;  %v14030_v18 = vld [vmem:[%s18170_s5 + $0xd28] ss:$16 sps:$4 sm:$0xff]   ;;  %v12614_v44 = vld [vmem:[%s18170_s5 + $0xed0] sm:$0x11]  ;;  %v1310_v25 = vmax.f32 %v1303_v1, 0.0 }
 0x84c   : > { %v4933_v47 = vrot.slane %v4926_v8, %v15574_v53  ;;  %7651 = vmatpush1.bf16.msra.mxu1 %v14002_v43  ;;  %v12628_v8 = vcombine.low %v12614_v44, %v12614_v44 }
 0x84d   : > { %7652 = vmatprep.subr.bf16.mxu1 %v14010_v3  ;;  %v12629_v3 = vcombine.high %v12614_v44, %v12614_v44  ;;  %v16774_v63 = vpack.c.bf16 %v1310_v25, %v1310_v25  ;;  %v14065_v44 = vld [vmem:[%s18170_s5 + $0xf20] ss:$16 sps:$4 sm:$0xff]  }
 0x84e   : > { %v4935_v57 = vadd.f32 %v4933_v47, %v4722_v60  ;;  %8036 = vmatpush1.bf16.msra.mxu0 %v14005_v54  ;;  %v8018_v54 = vsel %vm1399_vm6, %v12562_v37, 0  ;;  %v8439_v47 = vsel %vm1399_vm6, %v12628_v8, 0  ;;  %v14068_v8 = vld [vmem:[%s18170_s5 + $0xe28] ss:$16 sps:$4 sm:$0xff]  }
 0x84f   : > { %8037 = vmatprep.subr.bf16.mxu0 %v14013_v32 }
 0x850   : > { %7653 = vmatpush1.bf16.msra.mxu1 %v14008_v16  ;;  %v14045_v16 = vld [vmem:[%s18170_s5 + $0xeb4] ss:$16 sps:$4 sm:$0xff]  }
 0x851   : > { %12532 = vmatprep.subr.msk.bf16.mxu1 %vm1399_vm6, %v12529_v7 }
 0x852   : > { %8038 = vmatpush1.bf16.msra.mxu0 %v14011_v61 }
 0x853   : > { %v5113_v6 = vpop.f32.mrf.mxu1  ;;  %12499 = vmatmul.mubr.msk.bf16.vlgmr.msra.gmra.mxu1 %vm418_vm1, %v7511_v28  ;;  %12598 = vmatprep.subr.msk.bf16.mxu0 %vm1399_vm6, %v12595_v62  ;;  %v14026_v28 = vld [vmem:[%s18170_s5 + $0xd4c] ss:$16 sps:$4 sm:$0xff]  }
 0x854   : > { %7860 = vmatpush1.bf16.msra.mxu1 %v7805_v50  ;;  %7883 = vmatprep.mubr.bf16.mxu1 %v14454_v56  ;;  %v5346_v50 = vrot.slane %v5338_v23, %v15574_v53 }
 0x855   : > { %v5115_v10 = vpop.f32.mrf.mxu1  ;;  %v16719_v19 = vpop.f32.mrf.mxu0  ;;  %12565 = vmatmul.mubr.msk.bf16.vlgmr.msra.gmra.mxu0 %vm418_vm1, %v7937_v20  ;;  %7861 = vmatprep.subr.bf16.mxu1 %v14020_v29 }
 0x856   : > { %v5125_v5 = vcombine.low %v5113_v6, %v5115_v10  ;;  %8245 = vmatpush1.bf16.msra.mxu0 %v8225_v15  ;;  %8268 = vmatprep.mubr.bf16.mxu0 %v14454_v56  ;;  %v14046_v15 = vld [vmem:[%s18170_s5 + $0xdb8] ss:$16 sps:$4 sm:$0xff]   ;;  %v14054_v10 = vld [vmem:[%s18170_s5 + $0xd9c] ss:$16 sps:$4 sm:$0xff]  }
 0x857   : > { %v5117_v60 = vpop.f32.mrf.mxu1  ;;  %v16731_v21 = vpop.f32.mrf.mxu0  ;;  %8246 = vmatprep.subr.bf16.mxu0 %v14023_v17 }
 0x858   : > { %v5139_v36 = vrot.slane %v5125_v5, %v15574_v53  ;;  %v5551_v26 = vcombine.low %v16719_v19, %v16731_v21  ;;  %7862 = vmatpush1.bf16.msra.mxu1 %v14018_v45  ;;  %v14057_v5 = vld [vmem:[%s18170_s5 + $0xe74] ss:$16 sps:$4 sm:$0xff]   ;;  %v14052_v60 = vld [vmem:[%s18170_s5 + $0xd98] ss:$16 sps:$4 sm:$0xff]   ;;  %v14071_v19 = vld [vmem:[%s18170_s5 + $0xf00] ss:$16 sps:$4 sm:$0xff]  }
 0x859   : > { %v5118_v35 = vpop.f32.mrf.mxu1  ;;  %v5503_v59 = vpop.f32.mrf.mxu0  ;;  %7863 = vmatprep.subr.bf16.mxu1 %v14026_v28  ;;  %v12615_v21 = vld [vmem:[%s18170_s5 + $0xed8] sm:$0x11] }
 0x85a   : > { %v5140_v48 = vcombine.low %v5132_v2, %v5139_v36  ;;  %8247 = vmatpush1.bf16.msra.mxu0 %v14021_v38  ;;  %v12597_v2 = vcombine.high %v12581_v13, %v12581_v13  ;;  %v12596_v36 = vcombine.low %v12581_v13, %v12581_v13  ;;  %v14055_v35 = vld [vmem:[%s18170_s5 + $0xe70] ss:$16 sps:$4 sm:$0xff]   ;;  %v14084_v13 = vld [vmem:[%s18170_s5 + $0xeb8] ss:$16 sps:$4 sm:$0xff]  }
 0x85b   : > { %v5504_v39 = vpop.f32.mrf.mxu0  ;;  %8248 = vmatprep.subr.bf16.mxu0 %v14029_v31  ;;  %v12648_v31 = vld [vmem:[%s18170_s5 + $0xf40] sm:$0x11] }
 0x85c   : > { %v5147_v51 = vrot.slane %v5140_v48, %v15574_v53  ;;  %7864 = vmatpush1.bf16.msra.mxu1 %v14024_v49  ;;  %v12663_v59 = vcombine.high %v12648_v31, %v12648_v31  ;;  %v8231_v14 = vsel %vm1399_vm6, %v12596_v36, 0  ;;  %v14064_v48 = vld [vmem:[%s18170_s5 + $0xe4c] ss:$16 sps:$4 sm:$0xff]   ;;  %v14067_v39 = vld [vmem:[%s18170_s5 + $0xf24] ss:$16 sps:$4 sm:$0xff]  }
 0x85d   : > { %7865 = vmatprep.subr.bf16.mxu1 %v14032_v22  ;;  %v12662_v22 = vcombine.low %v12648_v31, %v12648_v31  ;;  %v14087_v31 = vld [vmem:[%s18170_s5 + $0xf90] ss:$16 sps:$4 sm:$0xff]  }
 0x85e   : > { %v5149_v43 = vadd.f32 %v5147_v51, %v4935_v57  ;;  %8249 = vmatpush1.bf16.msra.mxu0 %v14027_v40  ;;  %v14043_v57 = vld [vmem:[%s18170_s5 + $0xeb0] ss:$16 sps:$4 sm:$0xff]   ;;  %v16842_v40 = vshrl.u32 %v16774_v63, 16 }
 0x85f   : > { %8250 = vmatprep.subr.bf16.mxu0 %v14035_v9  ;;  %v8653_v1 = vsel %vm1399_vm6, %v12662_v22, 0  ;;  %v14062_v9 = vld [vmem:[%s18170_s5 + $0xe48] ss:$16 sps:$4 sm:$0xff]  }
 0x860   : > { %7866 = vmatpush1.bf16.msra.mxu1 %v14030_v18 }
 0x861   : > { %12566 = vmatprep.subr.msk.bf16.mxu1 %vm1399_vm6, %v12563_v52 }
 0x862   : > { %8251 = vmatpush1.bf16.msra.mxu0 %v14033_v41  ;;  %v5559_v41 = vrot.slane %v5551_v26, %v15574_v53 }
 0x863   : > { %v5327_v32 = vpop.f32.mrf.mxu1  ;;  %12533 = vmatmul.mubr.msk.bf16.vlgmr.msra.gmra.mxu1 %vm418_vm1, %v7724_v27  ;;  %12632 = vmatprep.subr.msk.bf16.mxu0 %vm1399_vm6, %v12629_v3 }
 0x864   : > { %8073 = vmatpush1.bf16.msra.mxu1 %v8018_v54  ;;  %8096 = vmatprep.mubr.bf16.mxu1 %v14454_v56 }
 0x865   : > { %v5329_v7 = vpop.f32.mrf.mxu1  ;;  %v16788_v42 = vpop.f32.mrf.mxu0  ;;  %12599 = vmatmul.mubr.msk.bf16.vlgmr.msra.gmra.mxu0 %vm418_vm1, %v16774_v63  ;;  %8074 = vmatprep.subr.bf16.mxu1 %v14042_v4 }
 0x866   : > { %v5339_v27 = vcombine.low %v5327_v32, %v5329_v7  ;;  %8459 = vmatpush1.bf16.msra.mxu0 %v8439_v47  ;;  %8482 = vmatprep.mubr.bf16.mxu0 %v14454_v56  ;;  %v14076_v32 = vld [vmem:[%s18170_s5 + $0xe0c] ss:$16 sps:$4 sm:$0xff]   ;;  %v14074_v7 = vld [vmem:[%s18170_s5 + $0xe08] ss:$16 sps:$4 sm:$0xff]  }
 0x867   : > { %v5331_v61 = vpop.f32.mrf.mxu1  ;;  %v16799_v62 = vpop.f32.mrf.mxu0  ;;  %8460 = vmatprep.subr.bf16.mxu0 %v14045_v16  ;;  %v14079_v16 = vld [vmem:[%s18170_s5 + $0xee4] ss:$16 sps:$4 sm:$0xff]  }
 0x868   : > { %v5353_v29 = vrot.slane %v5339_v27, %v15574_v53  ;;  %v5764_v6 = vcombine.low %v16788_v42, %v16799_v62  ;;  %8075 = vmatpush1.bf16.msra.mxu1 %v14040_v33  ;;  %v12631_v27 = vcombine.high %v12615_v21, %v12615_v21  ;;  %v14093_v42 = vld [vmem:[%s18170_s5 + $0xf70] ss:$16 sps:$4 sm:$0xff]   ;;  %v12649_v62 = vld [vmem:[%s18170_s5 + $0xf48] sm:$0x11] }
 0x869   : > { %v5332_v17 = vpop.f32.mrf.mxu1  ;;  %v5716_v45 = vpop.f32.mrf.mxu0  ;;  %8076 = vmatprep.subr.bf16.mxu1 %v14048_v58  ;;  %v12682_v58 = vld [vmem:[%s18170_s5 + $0xfb0] sm:$0x11] }
 0x86a   : > { %v5354_v28 = vcombine.low %v5346_v50, %v5353_v29  ;;  %8461 = vmatpush1.bf16.msra.mxu0 %v14043_v57  ;;  %v12630_v57 = vcombine.low %v12615_v21, %v12615_v21  ;;  %v12697_v50 = vcombine.high %v12682_v58, %v12682_v58  ;;  %v12696_v29 = vcombine.low %v12682_v58, %v12682_v58  ;;  %v14086_v17 = vld [vmem:[%s18170_s5 + $0xebc] ss:$16 sps:$4 sm:$0xff]  }
 0x86b   : > { %v5717_v23 = vpop.f32.mrf.mxu0  ;;  %8462 = vmatprep.subr.bf16.mxu0 %v14051_v46  ;;  %v14077_v46 = vld [vmem:[%s18170_s5 + $0xee0] ss:$16 sps:$4 sm:$0xff]   ;;  %v8578_v45 = vrot.slane %v16774_v63, 1 }
 0x86c   : > { %v5361_v38 = vrot.slane %v5354_v28, %v15574_v53  ;;  %8077 = vmatpush1.bf16.msra.mxu1 %v14046_v15  ;;  %v8445_v15 = vsel %vm1399_vm6, %v12630_v57, 0  ;;  %v8866_v28 = vsel %vm1399_vm6, %v12696_v29, 0  ;;  %v14110_v29 = vld [vmem:[%s18170_s5 + $0xee8] ss:$16 sps:$4 sm:$0xff]  }
 0x86d   : > { %8078 = vmatprep.subr.bf16.mxu1 %v14054_v10 }
 0x86e   : > { %v5363_v49 = vadd.f32 %v5361_v38, %v5149_v43  ;;  %8463 = vmatpush1.bf16.msra.mxu0 %v14049_v55  ;;  %v14073_v43 = vld [vmem:[%s18170_s5 + $0xf04] ss:$16 sps:$4 sm:$0xff]   ;;  %v14092_v38 = vld [vmem:[%s18170_s5 + $0xe9c] ss:$16 sps:$4 sm:$0xff]  }
 0x86f   : > { %8464 = vmatprep.subr.bf16.mxu0 %v14057_v5  ;;  %v14089_v55 = vld [vmem:[%s18170_s5 + $0xf94] ss:$16 sps:$4 sm:$0xff]  }
 0x870   : > { %8079 = vmatpush1.bf16.msra.mxu1 %v14052_v60 }
 0x871   : > { %12600 = vmatprep.subr.msk.bf16.mxu1 %vm1399_vm6, %v12597_v2 }
 0x872   : > { %8465 = vmatpush1.bf16.msra.mxu0 %v14055_v35  ;;  %v5772_v35 = vrot.slane %v5764_v6, %v15574_v53 }
 0x873   : > { %v5540_v30 = vpop.f32.mrf.mxu1  ;;  %12567 = vmatmul.mubr.msk.bf16.vlgmr.msra.gmra.mxu1 %vm418_vm1, %v7937_v20  ;;  %12666 = vmatprep.subr.msk.bf16.mxu0 %vm1399_vm6, %v12663_v59 }
 0x874   : > { %8286 = vmatpush1.bf16.msra.mxu1 %v8231_v14  ;;  %8309 = vmatprep.mubr.bf16.mxu1 %v14454_v56  ;;  %v14090_v14 = vld [vmem:[%s18170_s5 + $0xe98] ss:$16 sps:$4 sm:$0xff]  }
 0x875   : > { %v5542_v51 = vpop.f32.mrf.mxu1  ;;  %v16856_v18 = vpop.f32.mrf.mxu0  ;;  %12633 = vmatmul.mubr.msk.bf16.vlgmr.msra.gmra.mxu0 %vm418_vm1, %v16842_v40  ;;  %8287 = vmatprep.subr.bf16.mxu1 %v14064_v48 }
 0x876   : > { %v5552_v20 = vcombine.low %v5540_v30, %v5542_v51  ;;  %8673 = vmatpush1.bf16.msra.mxu0 %v8653_v1  ;;  %8696 = vmatprep.mubr.bf16.mxu0 %v14454_v56  ;;  %v14098_v1 = vld [vmem:[%s18170_s5 + $0xe7c] ss:$16 sps:$4 sm:$0xff]  }
 0x877   : > { %v5544_v52 = vpop.f32.mrf.mxu1  ;;  %v16867_v37 = vpop.f32.mrf.mxu0  ;;  %8674 = vmatprep.subr.bf16.mxu0 %v14067_v39 }
 0x878   : > { %v5566_v25 = vrot.slane %v5552_v20, %v15574_v53  ;;  %v5977_v3 = vcombine.low %v16856_v18, %v16867_v37  ;;  %8288 = vmatpush1.bf16.msra.mxu1 %v14062_v9  ;;  %v14101_v9 = vld [vmem:[%s18170_s5 + $0xf54] ss:$16 sps:$4 sm:$0xff]   ;;  %v12665_v20 = vcombine.high %v12649_v62, %v12649_v62  ;;  %v12683_v18 = vld [vmem:[%s18170_s5 + $0xfb8] sm:$0x11] }
 0x879   : > { %v5545_v54 = vpop.f32.mrf.mxu1  ;;  %v5929_v4 = vpop.f32.mrf.mxu0  ;;  %8289 = vmatprep.subr.bf16.mxu1 %v14070_v0  ;;  %v14096_v0 = vld [vmem:[%s18170_s5 + $0xe78] ss:$16 sps:$4 sm:$0xff]  }
 0x87a   : > { %v5567_v47 = vcombine.low %v5559_v41, %v5566_v25  ;;  %8675 = vmatpush1.bf16.msra.mxu0 %v14065_v44  ;;  %v12664_v44 = vcombine.low %v12649_v62, %v12649_v62  ;;  %v14106_v25 = vld [vmem:[%s18170_s5 + $0xf2c] ss:$16 sps:$4 sm:$0xff]   ;;  %v14104_v4 = vld [vmem:[%s18170_s5 + $0xf28] ss:$16 sps:$4 sm:$0xff]  }
 0x87b   : > { %v5930_v26 = vpop.f32.mrf.mxu0  ;;  %8676 = vmatprep.subr.bf16.mxu0 %v14073_v43  ;;  %v14099_v43 = vld [vmem:[%s18170_s5 + $0xf50] ss:$16 sps:$4 sm:$0xff]  }
 0x87c   : > { %v5574_v33 = vrot.slane %v5567_v47, %v15574_v53  ;;  %8290 = vmatpush1.bf16.msra.mxu1 %v14068_v8  ;;  %v8659_v41 = vsel %vm1399_vm6, %v12664_v44, 0  ;;  %v8791_v8 = vrot.slane %v16842_v40, 1 }
 0x87d   : > { %8291 = vmatprep.subr.bf16.mxu1 %v14076_v32 }
 0x87e   : > { %v5576_v61 = vadd.f32 %v5574_v33, %v5363_v49  ;;  %8677 = vmatpush1.bf16.msra.mxu0 %v14071_v19  ;;  %v14095_v49 = vld [vmem:[%s18170_s5 + $0xf74] ss:$16 sps:$4 sm:$0xff]   ;;  %v14109_v19 = vld [vmem:[%s18170_s5 + $0xf0c] ss:$16 sps:$4 sm:$0xff]   ;;  %v5985_v33 = vrot.slane %v5977_v3, %v15574_v53 }
 0x87f   : > { %8678 = vmatprep.subr.bf16.mxu0 %v14079_v16 }
 0x880   : > { %8292 = vmatpush1.bf16.msra.mxu1 %v14074_v7 }
 0x881   : > { %12634 = vmatprep.subr.msk.bf16.mxu1 %vm1399_vm6, %v12631_v27  ;;  %v14107_v27 = vld [vmem:[%s18170_s5 + $0xf08] ss:$16 sps:$4 sm:$0xff]  }
 0x882   : > { %8679 = vmatpush1.bf16.msra.mxu0 %v14077_v46  ;;  %v14112_v46 = vld [vmem:[%s18170_s5 + $0xeec] ss:$16 sps:$4 sm:$0xff]  }
 0x883   : > { %v5753_v10 = vpop.f32.mrf.mxu1  ;;  %12601 = vmatmul.mubr.msk.bf16.vlgmr.msra.gmra.mxu1 %vm418_vm1, %v16774_v63  ;;  %12700 = vmatprep.subr.msk.bf16.mxu0 %vm1399_vm6, %v12697_v50 }
 0x884   : > { %8500 = vmatpush1.bf16.msra.mxu1 %v8445_v15  ;;  %8523 = vmatprep.mubr.bf16.mxu1 %v14454_v56  ;;  %v12699_v15 = vcombine.high %v12683_v18, %v12683_v18 }
 0x885   : > { %v5755_v23 = vpop.f32.mrf.mxu1  ;;  %v16921_v5 = vpop.f32.mrf.mxu0  ;;  %12667 = vmatmul.mubr.msk.bf16.vlgmr.msra.gmra.mxu0 %vm418_vm1, %v8578_v45  ;;  %8501 = vmatprep.subr.bf16.mxu1 %v14086_v17  ;;  %v12698_v17 = vcombine.low %v12683_v18, %v12683_v18 }
 0x886   : > { %v5765_v60 = vcombine.low %v5753_v10, %v5755_v23  ;;  %8886 = vmatpush1.bf16.msra.mxu0 %v8866_v28  ;;  %8909 = vmatprep.mubr.bf16.mxu0 %v14454_v56  ;;  %v14115_v23 = vld [vmem:[%s18170_s5 + $0xf98] ss:$16 sps:$4 sm:$0xff]  }
 0x887   : > { %v5757_v2 = vpop.f32.mrf.mxu1  ;;  %v16933_v36 = vpop.f32.mrf.mxu0  ;;  %8887 = vmatprep.subr.bf16.mxu0 %v14089_v55  ;;  %v8872_v28 = vsel %vm1399_vm6, %v12698_v17, 0  ;;  %v14117_v55 = vld [vmem:[%s18170_s5 + $0xf9c] ss:$16 sps:$4 sm:$0xff]  }
 0x888   : > { %v5779_v59 = vrot.slane %v5765_v60, %v15574_v53  ;;  %v6190_v22 = vcombine.low %v16921_v5, %v16933_v36  ;;  %8502 = vmatpush1.bf16.msra.mxu1 %v14084_v13  ;;  %v17038_v5 = vld [vmem:[%s18174_s9 + $0x3] sm:$0x3] }
 0x889   : > { %v5758_v48 = vpop.f32.mrf.mxu1  ;;  %v6142_v30 = vpop.f32.mrf.mxu0  ;;  %8503 = vmatprep.subr.bf16.mxu1 %v14092_v38  ;;  %8996 = vrot.lane.b32.xlu1 %v17038_v5, %s14456_s24 }
 0x88a   : > { %v5780_v39 = vcombine.low %v5772_v35, %v5779_v59  ;;  %8888 = vmatpush1.bf16.msra.mxu0 %v14087_v31  ;;  %v14120_v31 = vld [vmem:[%s18170_s5 + $0xf7c] ss:$16 sps:$4 sm:$0xff]   ;;  %v6198_v63 = vrot.slane %v6190_v22, %v15574_v53 }
 0x88b   : > { %v6143_v6 = vpop.f32.mrf.mxu0  ;;  %8889 = vmatprep.subr.bf16.mxu0 %v14095_v49 }
 0x88c   : > { %v5787_v51 = vrot.slane %v5780_v39, %v15574_v53  ;;  %8504 = vmatpush1.bf16.msra.mxu1 %v14090_v14  ;;  %v14118_v14 = vld [vmem:[%s18170_s5 + $0xf78] ss:$16 sps:$4 sm:$0xff]  }
 0x88d   : > { %8505 = vmatprep.subr.bf16.mxu1 %v14098_v1  ;;  %v14123_v1 = vld [vmem:[%s18170_s5 + $0xf5c] ss:$16 sps:$4 sm:$0xff]  }
 0x88e   : > { %v5789_v52 = vadd.f32 %v5787_v51, %v5576_v61  ;;  %8890 = vmatpush1.bf16.msra.mxu0 %v14093_v42  ;;  %v14121_v42 = vld [vmem:[%s18170_s5 + $0xf58] ss:$16 sps:$4 sm:$0xff]  }
 0x88f   : > { %8891 = vmatprep.subr.bf16.mxu0 %v14101_v9 }
 0x890   : > { %8506 = vmatpush1.bf16.msra.mxu1 %v14096_v0 }
 0x891   : > { %12668 = vmatprep.subr.msk.bf16.mxu1 %vm1399_vm6, %v12665_v20 }
 0x892   : > { %8892 = vmatpush1.bf16.msra.mxu0 %v14099_v43 }
 0x893   : > { %v5966_v54 = vpop.f32.mrf.mxu1  ;;  %12635 = vmatmul.mubr.msk.bf16.vlgmr.msra.gmra.mxu1 %vm418_vm1, %v16842_v40 }
 0x894   : > { %8714 = vmatpush1.bf16.msra.mxu1 %v8659_v41  ;;  %8737 = vmatprep.mubr.bf16.mxu1 %v14454_v56 }
 0x895   : > { %v5968_v32 = vpop.f32.mrf.mxu1  ;;  %v16979_v47 = vpop.f32.mrf.mxu0  ;;  %12701 = vmatmul.mubr.msk.bf16.vlgmr.msra.gmra.mxu0 %vm418_vm1, %v8791_v8  ;;  %8715 = vmatprep.subr.bf16.mxu1 %v14106_v25 }
 0x896   : > { %v5978_v21 = vcombine.low %v5966_v54, %v5968_v32 }
 0x897   : > { %v5970_v26 = vpop.f32.mrf.mxu1  ;;  %v16987_v16 = vpop.f32.mrf.mxu0 }
 0x898   : > { %v5992_v7 = vrot.slane %v5978_v21, %v15574_v53  ;;  %v6403_v58 = vcombine.low %v16979_v47, %v16987_v16  ;;  %8716 = vmatpush1.bf16.msra.mxu1 %v14104_v4 }
 0x899   : > { %v5971_v57 = vpop.f32.mrf.mxu1  ;;  %v6355_v61 = vpop.f32.mrf.mxu0  ;;  %8717 = vmatprep.subr.bf16.mxu1 %v14109_v19 }
 0x89a   : > { %v5993_v50 = vcombine.low %v5985_v33, %v5992_v7 }
 0x89b   : > { %v6356_v37 = vpop.f32.mrf.mxu0 }
 0x89c   : > { %v6000_v3 = vrot.slane %v5993_v50, %v15574_v53  ;;  %8718 = vmatpush1.bf16.msra.mxu1 %v14107_v27 }
 0x89d   : > { %8719 = vmatprep.subr.bf16.mxu1 %v14112_v46 }
 0x89e   : > { %v6002_v10 = vadd.f32 %v6000_v3, %v5789_v52  ;;  %v6411_v52 = vrot.slane %v6403_v58, %v15574_v53 }
 0x8a0   : > { %8720 = vmatpush1.bf16.msra.mxu1 %v14110_v29 }
 0x8a1   : > { %12702 = vmatprep.subr.msk.bf16.mxu1 %vm1399_vm6, %v12699_v15  ;;  %vm11343_vm6 = vcmask 8192  }
 0x8a3   : > { %v6179_v13 = vpop.f32.mrf.mxu1  ;;  %12669 = vmatmul.mubr.msk.bf16.vlgmr.msra.gmra.mxu1 %vm418_vm1, %v8578_v45 }
 0x8a4   : > { %8927 = vmatpush1.bf16.msra.mxu1 %v8872_v28  ;;  %8950 = vmatprep.mubr.bf16.mxu1 %v14454_v56 }
 0x8a5   : > { %v6181_v38 = vpop.f32.mrf.mxu1  ;;  %v6564_v60 = vpop.f32.mrf.mxu0  ;;  %8928 = vmatprep.subr.bf16.mxu1 %v14117_v55 }
 0x8a6   : > { %v6191_v2 = vcombine.low %v6179_v13, %v6181_v38 }
 0x8a7   : > { %v6183_v49 = vpop.f32.mrf.mxu1  ;;  %v6566_v35 = vpop.f32.mrf.mxu0 }
 0x8a8   : > { %v6205_v45 = vrot.slane %v6191_v2, %v15574_v53  ;;  %v6616_v59 = vcombine.low %v6564_v60, %v6566_v35  ;;  %8929 = vmatpush1.bf16.msra.mxu1 %v14115_v23 }
 0x8a9   : > { %v6184_v48 = vpop.f32.mrf.mxu1  ;;  %v6568_v30 = vpop.f32.mrf.mxu0  ;;  %8930 = vmatprep.subr.bf16.mxu1 %v14120_v31 }
 0x8aa   : > { %v6206_v36 = vcombine.low %v6198_v63, %v6205_v45  ;;  %v6624_v7 = vrot.slane %v6616_v59, %v15574_v53 }
 0x8ab   : > { %v6569_v22 = vpop.f32.mrf.mxu0 }
 0x8ac   : > { %v6213_v39 = vrot.slane %v6206_v36, %v15574_v53  ;;  %8931 = vmatpush1.bf16.msra.mxu1 %v14118_v14 }
 0x8ad   : > { %8932 = vmatprep.subr.bf16.mxu1 %v14123_v1 }
 0x8ae   : > { %v6215_v62 = vadd.f32 %v6213_v39, %v6002_v10 }
 0x8b0   : > { %8933 = vmatpush1.bf16.msra.mxu1 %v14121_v42 }
 0x8b3   : > { %v6392_v6 = vpop.f32.mrf.mxu1  ;;  %12703 = vmatmul.mubr.msk.bf16.vlgmr.msra.gmra.mxu1 %vm418_vm1, %v8791_v8 }
 0x8b5   : > { %v6394_v9 = vpop.f32.mrf.mxu1  ;;  %v6778_v51 = vpop.f32.mrf.mxu0 }
 0x8b6   : > { %v6404_v0 = vcombine.low %v6392_v6, %v6394_v9 }
 0x8b7   : > { %v6396_v20 = vpop.f32.mrf.mxu1  ;;  %v6780_v44 = vpop.f32.mrf.mxu0 }
 0x8b8   : > { %v6418_v43 = vrot.slane %v6404_v0, %v15574_v53  ;;  %v6830_v41 = vcombine.low %v6778_v51, %v6780_v44 }
 0x8b9   : > { %v6397_v25 = vpop.f32.mrf.mxu1  ;;  %v6782_v54 = vpop.f32.mrf.mxu0 }
 0x8ba   : > { %v6419_v4 = vcombine.low %v6411_v52, %v6418_v43  ;;  %v6838_v55 = vrot.slane %v6830_v41, %v15574_v53 }
 0x8bb   : > { %v6783_v32 = vpop.f32.mrf.mxu0 }
 0x8bc   : > { %v6426_v47 = vrot.slane %v6419_v4, %v15574_v53 }
 0x8be   : > { %v6428_v19 = vadd.f32 %v6426_v47, %v6215_v62 }
 0x8c3   : > { %v6605_v40 = vpop.f32.mrf.mxu1 }
 0x8c5   : > { %v6607_v21 = vpop.f32.mrf.mxu1  ;;  %v6992_v8 = vpop.f32.mrf.mxu0 }
 0x8c6   : > { %v6617_v26 = vcombine.low %v6605_v40, %v6607_v21 }
 0x8c7   : > { %v6609_v16 = vpop.f32.mrf.mxu1  ;;  %v6994_v33 = vpop.f32.mrf.mxu0 }
 0x8c8   : > { %v6631_v58 = vrot.slane %v6617_v26, %v15574_v53  ;;  %v7044_v27 = vcombine.low %v6992_v8, %v6994_v33 }
 0x8c9   : > { %v6610_v57 = vpop.f32.mrf.mxu1  ;;  %v6996_v61 = vpop.f32.mrf.mxu0 }
 0x8ca   : > { %v6632_v46 = vcombine.low %v6624_v7, %v6631_v58  ;;  %v7052_v1 = vrot.slane %v7044_v27, %v15574_v53 }
 0x8cb   : > { %v6997_v50 = vpop.f32.mrf.mxu0 }
 0x8cc   : > { %v6639_v18 = vrot.slane %v6632_v46, %v15574_v53 }
 0x8ce   : > { %v6641_v37 = vadd.f32 %v6639_v18, %v6428_v19 }
 0x8d3   : > { %v6819_v3 = vpop.f32.mrf.mxu1 }
 0x8d5   : > { %v6821_v29 = vpop.f32.mrf.mxu1  ;;  %v7205_v15 = vpop.f32.mrf.mxu0 }
 0x8d6   : > { %v6831_v17 = vcombine.low %v6819_v3, %v6821_v29 }
 0x8d7   : > { %v6823_v10 = vpop.f32.mrf.mxu1  ;;  %v7207_v28 = vpop.f32.mrf.mxu0 }
 0x8d8   : > { %v6845_v13 = vrot.slane %v6831_v17, %v15574_v53  ;;  %v7257_v23 = vcombine.low %v7205_v15, %v7207_v28 }
 0x8d9   : > { %v6824_v38 = vpop.f32.mrf.mxu1  ;;  %v7209_v60 = vpop.f32.mrf.mxu0 }
 0x8da   : > { %v6846_v31 = vcombine.low %v6838_v55, %v6845_v13  ;;  %v7265_v25 = vrot.slane %v7257_v23, %v15574_v53 }
 0x8db   : > { %v7210_v2 = vpop.f32.mrf.mxu0 }
 0x8dc   : > { %v6853_v49 = vrot.slane %v6846_v31, %v15574_v53 }
 0x8de   : > { %v6855_v35 = vadd.f32 %v6853_v49, %v6641_v37 }
 0x8e3   : > { %v7033_v63 = vpop.f32.mrf.mxu1 }
 0x8e5   : > { %v7035_v45 = vpop.f32.mrf.mxu1  ;;  %v7418_v59 = vpop.f32.mrf.mxu0 }
 0x8e6   : > { %v7045_v14 = vcombine.low %v7033_v63, %v7035_v45 }
 0x8e7   : > { %v7037_v48 = vpop.f32.mrf.mxu1  ;;  %v7420_v30 = vpop.f32.mrf.mxu0 }
 0x8e8   : > { %v7059_v36 = vrot.slane %v7045_v14, %v15574_v53  ;;  %v7470_v22 = vcombine.low %v7418_v59, %v7420_v30 }
 0x8e9   : > { %v7038_v39 = vpop.f32.mrf.mxu1  ;;  %v7422_v42 = vpop.f32.mrf.mxu0 }
 0x8ea   : > { %v7060_v62 = vcombine.low %v7052_v1, %v7059_v36  ;;  %v7478_v57 = vrot.slane %v7470_v22, %v15574_v53 }
 0x8eb   : > { %v7423_v6 = vpop.f32.mrf.mxu0 }
 0x8ec   : > { %v7067_v9 = vrot.slane %v7060_v62, %v15574_v53 }
 0x8ee   : > { %v7069_v51 = vadd.f32 %v7067_v9, %v6855_v35 }
 0x8f3   : > { %v7246_v0 = vpop.f32.mrf.mxu1 }
 0x8f5   : > { %v7248_v20 = vpop.f32.mrf.mxu1  ;;  %v7631_v44 = vpop.f32.mrf.mxu0 }
 0x8f6   : > { %v7258_v52 = vcombine.low %v7246_v0, %v7248_v20 }
 0x8f7   : > { %v7250_v43 = vpop.f32.mrf.mxu1  ;;  %v7633_v41 = vpop.f32.mrf.mxu0 }
 0x8f8   : > { %v7272_v54 = vrot.slane %v7258_v52, %v15574_v53  ;;  %v7683_v4 = vcombine.low %v7631_v44, %v7633_v41 }
 0x8f9   : > { %v7251_v32 = vpop.f32.mrf.mxu1  ;;  %v7635_v47 = vpop.f32.mrf.mxu0 }
 0x8fa   : > { %v7273_v19 = vcombine.low %v7265_v25, %v7272_v54  ;;  %v7691_v38 = vrot.slane %v7683_v4, %v15574_v53 }
 0x8fb   : > { %v7636_v40 = vpop.f32.mrf.mxu0 }
 0x8fc   : > { %v7280_v21 = vrot.slane %v7273_v19, %v15574_v53 }
 0x8fe   : > { %v7282_v8 = vadd.f32 %v7280_v21, %v7069_v51 }
 0x903   : > { %v7459_v26 = vpop.f32.mrf.mxu1 }
 0x905   : > { %v7461_v16 = vpop.f32.mrf.mxu1  ;;  %v7844_v33 = vpop.f32.mrf.mxu0 }
 0x906   : > { %v7471_v7 = vcombine.low %v7459_v26, %v7461_v16 }
 0x907   : > { %v7463_v58 = vpop.f32.mrf.mxu1  ;;  %v7846_v27 = vpop.f32.mrf.mxu0 }
 0x908   : > { %v7485_v61 = vrot.slane %v7471_v7, %v15574_v53  ;;  %v7896_v46 = vcombine.low %v7844_v33, %v7846_v27 }
 0x909   : > { %v7464_v50 = vpop.f32.mrf.mxu1  ;;  %v7848_v18 = vpop.f32.mrf.mxu0 }
 0x90a   : > { %v7486_v37 = vcombine.low %v7478_v57, %v7485_v61  ;;  %v7904_v39 = vrot.slane %v7896_v46, %v15574_v53 }
 0x90b   : > { %v7849_v3 = vpop.f32.mrf.mxu0 }
 0x90c   : > { %v7493_v29 = vrot.slane %v7486_v37, %v15574_v53 }
 0x90e   : > { %v7495_v15 = vadd.f32 %v7493_v29, %v7282_v8 }
 0x913   : > { %v7672_v17 = vpop.f32.mrf.mxu1 }
 0x915   : > { %v7674_v10 = vpop.f32.mrf.mxu1  ;;  %v8057_v28 = vpop.f32.mrf.mxu0 }
 0x916   : > { %v7684_v55 = vcombine.low %v7672_v17, %v7674_v10 }
 0x917   : > { %v7676_v13 = vpop.f32.mrf.mxu1  ;;  %v8059_v23 = vpop.f32.mrf.mxu0 }
 0x918   : > { %v7698_v60 = vrot.slane %v7684_v55, %v15574_v53  ;;  %v8109_v31 = vcombine.low %v8057_v28, %v8059_v23 }
 0x919   : > { %v7677_v2 = vpop.f32.mrf.mxu1  ;;  %v8061_v49 = vpop.f32.mrf.mxu0 }
 0x91a   : > { %v7699_v35 = vcombine.low %v7691_v38, %v7698_v60  ;;  %v8117_v32 = vrot.slane %v8109_v31, %v15574_v53 }
 0x91b   : > { %v8062_v63 = vpop.f32.mrf.mxu0 }
 0x91c   : > { %v7706_v45 = vrot.slane %v7699_v35, %v15574_v53 }
 0x91e   : > { %v7708_v59 = vadd.f32 %v7706_v45, %v7495_v15 }
 0x923   : > { %v7885_v14 = vpop.f32.mrf.mxu1 }
 0x925   : > { %v7887_v48 = vpop.f32.mrf.mxu1  ;;  %v8270_v30 = vpop.f32.mrf.mxu0 }
 0x926   : > { %v7897_v1 = vcombine.low %v7885_v14, %v7887_v48 }
 0x927   : > { %v7889_v36 = vpop.f32.mrf.mxu1  ;;  %v8272_v22 = vpop.f32.mrf.mxu0 }
 0x928   : > { %v7911_v42 = vrot.slane %v7897_v1, %v15574_v53  ;;  %v8322_v62 = vcombine.low %v8270_v30, %v8272_v22 }
 0x929   : > { %v7890_v6 = vpop.f32.mrf.mxu1  ;;  %v8274_v9 = vpop.f32.mrf.mxu0 }
 0x92a   : > { %v7912_v51 = vcombine.low %v7904_v39, %v7911_v42  ;;  %v8330_v46 = vrot.slane %v8322_v62, %v15574_v53 }
 0x92b   : > { %v8275_v0 = vpop.f32.mrf.mxu0 }
 0x92c   : > { %v7919_v20 = vrot.slane %v7912_v51, %v15574_v53 }
 0x92e   : > { %v7921_v44 = vadd.f32 %v7919_v20, %v7708_v59 }
 0x933   : > { %v8098_v52 = vpop.f32.mrf.mxu1 }
 0x935   : > { %v8100_v43 = vpop.f32.mrf.mxu1  ;;  %v8484_v41 = vpop.f32.mrf.mxu0 }
 0x936   : > { %v8110_v25 = vcombine.low %v8098_v52, %v8100_v43 }
 0x937   : > { %v8102_v54 = vpop.f32.mrf.mxu1  ;;  %v8486_v4 = vpop.f32.mrf.mxu0 }
 0x938   : > { %v8124_v47 = vrot.slane %v8110_v25, %v15574_v53  ;;  %v8536_v59 = vcombine.low %v8484_v41, %v8486_v4 }
 0x939   : > { %v8103_v19 = vpop.f32.mrf.mxu1  ;;  %v8488_v40 = vpop.f32.mrf.mxu0 }
 0x93a   : > { %v8125_v21 = vcombine.low %v8117_v32, %v8124_v47  ;;  %v8544_v1 = vrot.slane %v8536_v59, %v15574_v53  ;;  %v14127_v59 = vld [vmem:[%s18171_s6 + $0xe8] ss:$16 sps:$4 sm:$0xff]  }
 0x93b   : > { %v8489_v8 = vpop.f32.mrf.mxu0 }
 0x93c   : > { %v8132_v26 = vrot.slane %v8125_v21, %v15574_v53  ;;  %v8997_v8 = vpop.permute.xlu1 %8996 }
 0x93e   : > { %v8134_v16 = vadd.f32 %v8132_v26, %v7921_v44 }
 0x943   : > { %v8311_v33 = vpop.f32.mrf.mxu1 }
 0x945   : > { %v8313_v7 = vpop.f32.mrf.mxu1  ;;  %v8698_v58 = vpop.f32.mrf.mxu0 }
 0x946   : > { %v8323_v27 = vcombine.low %v8311_v33, %v8313_v7 }
 0x947   : > { %v8315_v57 = vpop.f32.mrf.mxu1  ;;  %v8700_v61 = vpop.f32.mrf.mxu0 }
 0x948   : > { %v8337_v50 = vrot.slane %v8323_v27, %v15574_v53  ;;  %v8750_v48 = vcombine.low %v8698_v58, %v8700_v61 }
 0x949   : > { %v8316_v18 = vpop.f32.mrf.mxu1  ;;  %v8702_v37 = vpop.f32.mrf.mxu0 }
 0x94a   : > { %v8338_v3 = vcombine.low %v8330_v46, %v8337_v50  ;;  %v8758_v22 = vrot.slane %v8750_v48, %v15574_v53  ;;  %v14132_v48 = vld [vmem:[%s18171_s6 + $0xc4] ss:$16 sps:$4 sm:$0xff]  }
 0x94b   : > { %v8703_v29 = vpop.f32.mrf.mxu0 }
 0x94c   : > { %v8345_v15 = vrot.slane %v8338_v3, %v15574_v53 }
 0x94e   : > { %v8347_v17 = vadd.f32 %v8345_v15, %v8134_v16 }
 0x953   : > { %v8525_v10 = vpop.f32.mrf.mxu1 }
 0x955   : > { %v8527_v28 = vpop.f32.mrf.mxu1  ;;  %v8911_v55 = vpop.f32.mrf.mxu0 }
 0x956   : > { %v8537_v45 = vcombine.low %v8525_v10, %v8527_v28 }
 0x957   : > { %v8529_v13 = vpop.f32.mrf.mxu1  ;;  %v8913_v23 = vpop.f32.mrf.mxu0 }
 0x958   : > { %v8551_v30 = vrot.slane %v8537_v45, %v15574_v53  ;;  %v8963_v62 = vcombine.low %v8911_v55, %v8913_v23  ;;  %v14126_v45 = vld [vmem:[%s18171_s6 + $0xe4] ss:$16 sps:$4 sm:$0xff]  }
 0x959   : > { %v8530_v38 = vpop.f32.mrf.mxu1  ;;  %v8915_v60 = vpop.f32.mrf.mxu0  ;;  %9370 = vmatprep.subr.bf16.mxu0 %v14126_v45 }
 0x95a   : > { %v8552_v39 = vcombine.low %v8544_v1, %v8551_v30  ;;  %v8971_v44 = vrot.slane %v8963_v62, %v15574_v53  ;;  %v14135_v1 = vld [vmem:[%s18171_s6 + $0xcc] ss:$16 sps:$4 sm:$0xff]   ;;  %v17121_v62 = vsub.s32 0, %v14578_v11 }
 0x95b   : > { %v8916_v31 = vpop.f32.mrf.mxu0 }
 0x95c   : > { %v8559_v51 = vrot.slane %v8552_v39, %v15574_v53  ;;  %v14138_v39 = vld [vmem:[%s18171_s6 + $0xa4] ss:$16 sps:$4 sm:$0xff]  }
 0x95e   : > { %v8561_v25 = vadd.f32 %v8559_v51, %v8347_v17 }
 0x963   : > { %v8739_v2 = vpop.f32.mrf.mxu1 }
 0x965   : > { %v8741_v49 = vpop.f32.mrf.mxu1 }
 0x966   : > { %v8751_v14 = vcombine.low %v8739_v2, %v8741_v49 }
 0x967   : > { %v8743_v35 = vpop.f32.mrf.mxu1 }
 0x968   : > { %v8765_v36 = vrot.slane %v8751_v14, %v15574_v53  ;;  %v14129_v14 = vld [vmem:[%s18171_s6 + $0xec] ss:$16 sps:$4 sm:$0xff]  }
 0x969   : > { %v8744_v63 = vpop.f32.mrf.mxu1  ;;  %9411 = vmatprep.subr.bf16.mxu1 %v14129_v14 }
 0x96a   : > { %v8766_v6 = vcombine.low %v8758_v22, %v8765_v36  ;;  %v14124_v63 = vld [vmem:[%s18171_s6 + $0xe0] ss:$16 sps:$4 sm:$0xff]   ;;  %9412 = vmatpush1.bf16.msra.mxu1 %v14127_v59  ;;  %v14133_v22 = vld [vmem:[%s18171_s6 + $0xc8] ss:$16 sps:$4 sm:$0xff]  }
 0x96b   : > { %9371 = vmatpush1.bf16.msra.mxu0 %v14124_v63  ;;  %v14130_v36 = vld [vmem:[%s18171_s6 + $0xc0] ss:$16 sps:$4 sm:$0xff]   ;;  %9413 = vmatprep.subr.bf16.mxu1 %v14135_v1  ;;  %v400_v59 = vld [vmem:[%s18174_s9 + $0x8] sm:$0x3]  ;;  %v9328_v1 = vsub.s32 3, %v14578_v11 }
 0x96c   : > { %v8773_v52 = vrot.slane %v8766_v6, %v15574_v53  ;;  %9372 = vmatprep.subr.bf16.mxu0 %v14132_v48  ;;  %v14141_v6 = vld [vmem:[%s18171_s6 + $0xac] ss:$16 sps:$4 sm:$0xff]  }
 0x96e   : > { %v8775_v4 = vadd.f32 %v8773_v52, %v8561_v25  ;;  %9414 = vmatpush1.bf16.msra.mxu1 %v14133_v22  ;;  %v14145_v25 = vld [vmem:[%s18171_s6 + $0x88] ss:$16 sps:$4 sm:$0xff]  }
 0x96f   : > { %9373 = vmatpush1.bf16.msra.mxu0 %v14130_v36  ;;  %9415 = vmatprep.subr.bf16.mxu1 %v14141_v6  ;;  %v9332_v36 = vsub.s32 4, %v14578_v11 }
 0x970   : > { %9374 = vmatprep.subr.bf16.mxu0 %v14138_v39 }
 0x973   : > { %v8952_v42 = vpop.f32.mrf.mxu1 }
 0x975   : > { %v8954_v9 = vpop.f32.mrf.mxu1 }
 0x976   : > { %v8964_v0 = vcombine.low %v8952_v42, %v8954_v9 }
 0x977   : > { %v8956_v20 = vpop.f32.mrf.mxu1 }
 0x978   : > { %v8978_v43 = vrot.slane %v8964_v0, %v15574_v53  ;;  %v14136_v0 = vld [vmem:[%s18171_s6 + $0xa0] ss:$16 sps:$4 sm:$0xff]   ;;  %v14139_v20 = vld [vmem:[%s18171_s6 + $0xa8] ss:$16 sps:$4 sm:$0xff]  }
 0x979   : > { %v8957_v41 = vpop.f32.mrf.mxu1  ;;  %9375 = vmatpush1.bf16.msra.mxu0 %v14136_v0  ;;  %9416 = vmatpush1.bf16.msra.mxu1 %v14139_v20 }
 0x97a   : > { %v8979_v54 = vcombine.low %v8971_v44, %v8978_v43  ;;  %v14144_v44 = vld [vmem:[%s18171_s6 + $0x84] ss:$16 sps:$4 sm:$0xff]   ;;  %v14147_v43 = vld [vmem:[%s18171_s6 + $0x8c] ss:$16 sps:$4 sm:$0xff]   ;;  %v14142_v41 = vld [vmem:[%s18171_s6 + $0x80] ss:$16 sps:$4 sm:$0xff]  }
 0x97b   : > { %9376 = vmatprep.subr.bf16.mxu0 %v14144_v44  ;;  %9417 = vmatprep.subr.bf16.mxu1 %v14147_v43 }
 0x97c   : > { %v8986_v32 = vrot.slane %v8979_v54, %v15574_v53  ;;  %v8998_v53 = vrot.slane %v8997_v8, 1  ;;  %v14150_v54 = vld [vmem:[%s18171_s6 + $0x64] ss:$16 sps:$4 sm:$0xff]  }
 0x97d   : > { %9377 = vmatpush1.bf16.msra.mxu0 %v14142_v41  ;;  %9418 = vmatpush1.bf16.msra.mxu1 %v14145_v25 }
 0x97e   : > { %v8988_v47 = vadd.f32 %v8986_v32, %v8775_v4  ;;  %v9000_v16 = vsel %vm8999_vm8, %v8997_v8, %v8998_v53  ;;  %v14153_v4 = vld [vmem:[%s18171_s6 + $0x6c] ss:$16 sps:$4 sm:$0xff]   ;;  %v14148_v32 = vld [vmem:[%s18171_s6 + $0x60] ss:$16 sps:$4 sm:$0xff]   ;;  %9378 = vmatprep.subr.bf16.mxu0 %v14150_v54  ;;  %v14157_v8 = vld [vmem:[%s18171_s6 + $0x48] ss:$16 sps:$4 sm:$0xff]  }
 0x97f   : > { %9419 = vmatprep.subr.bf16.mxu1 %v14153_v4  ;;  %v14162_v53 = vld [vmem:[%s18171_s6 + $0x24] ss:$16 sps:$4 sm:$0xff]  }
 0x980   : > { %9019 = vrot.lane.b32.xlu1 %v8988_v47, %s14457_s27  ;;  %9004 = vrot.lane.b32.xlu0 %v8988_v47, %s14458_s29  ;;  %v12704_v19 = vmul.f32 -1.442695, %v8988_v47 }
 0x981   : > { %9379 = vmatpush1.bf16.msra.mxu0 %v14148_v32 }
 0x982   : > { %14402 = vpow2.f32 %v12704_v19  ;;  %v14156_v19 = vld [vmem:[%s18171_s6 + $0x44] ss:$16 sps:$4 sm:$0xff]  }
 0x983   : > { %9380 = vmatprep.subr.bf16.mxu0 %v14156_v19 }
 0x984   : > { %9032 = vrot.lane.b32.xlu0 %v8988_v47, %s14459_s30  ;;  %9042 = vrot.lane.b32.xlu1 %v17038_v5, %s14460_s11  ;;  %s14464_s11 = smov 53  }
 0x988   : > { %9047 = vrot.lane.b32.xlu0 %v8988_v47, %s14461_s12  ;;  %v14151_v47 = vld [vmem:[%s18171_s6 + $0x68] ss:$16 sps:$4 sm:$0xff]   ;;  %s14465_s12 = smov 124  }
 0x989   : > { %9420 = vmatpush1.bf16.msra.mxu1 %v14151_v47 }
 0x98f   : > { %v14403_v40 = vpop.eup %14402 }
 0x990   : > { %v8992_v21 = vadd.f32 1.0, %v14403_v40  ;;  %v14159_v40 = vld [vmem:[%s18171_s6 + $0x4c] ss:$16 sps:$4 sm:$0xff]  }
 0x991   : > { %9421 = vmatprep.subr.bf16.mxu1 %v14159_v40 }
 0x992   : > { %14404 = vrcp.f32 %v8992_v21  ;;  %v14154_v21 = vld [vmem:[%s18171_s6 + $0x40] ss:$16 sps:$4 sm:$0xff]   ;;  %9422 = vmatpush1.bf16.msra.mxu1 %v14157_v8 }
 0x993   : > { %9381 = vmatpush1.bf16.msra.mxu0 %v14154_v21 }
 0x994   : > { %9382 = vmatprep.subr.bf16.mxu0 %v14162_v53 }
 0x99f   : > { %v17089_v26 = vpop.eup %14404 }
 0x9a0   : > { %v9002_v58 = vmul.f32 %v17089_v26, %v9000_v16  ;;  %v14165_v16 = vld [vmem:[%s18171_s6 + $0x2c] ss:$16 sps:$4 sm:$0xff]  }
 0x9a1   : > { %9423 = vmatprep.subr.bf16.mxu1 %v14165_v16 }
 0x9f2   : > { %v9020_v33 = vpop.permute.xlu1 %9019  ;;  %v9005_v7 = vpop.permute.xlu0 %9004 }
 0x9f3   : > { %v9021_v27 = vrot.slane %v9020_v33, 1  ;;  %v9022_v5 = vrot.slane %v9020_v33, 2  ;;  %v9006_v57 = vrot.slane %v9005_v7, 1  ;;  %v14160_v33 = vld [vmem:[%s18171_s6 + $0x20] ss:$16 sps:$4 sm:$0xff]  }
 0x9f4   : > { %v14163_v7 = vld [vmem:[%s18171_s6 + $0x28] ss:$16 sps:$4 sm:$0xff]   ;;  %9383 = vmatpush1.bf16.msra.mxu0 %v14160_v33 }
 0x9f5   : > { %v9024_v61 = vsel %vm9023_vm9, %v9021_v27, %v9022_v5  ;;  %v9008_v46 = vadd.f32 %v9006_v57, %v9002_v58  ;;  %v14168_v58 = vld [vmem:[%s18171_s6 + $0x4] ss:$16 sps:$4 sm:$0xff]   ;;  %v14171_v27 = vld [vmem:[%s18171_s6 + $0xc] ss:$16 sps:$4 sm:$0xff]   ;;  %9424 = vmatpush1.bf16.msra.mxu1 %v14163_v7 }
 0x9f6   : > { %v12705_v50 = vmul.f32 -1.442695, %v9024_v61  ;;  %v9033_v18 = vpop.permute.xlu0 %9032  ;;  %v9043_v28 = vpop.permute.xlu1 %9042  ;;  %v9121_v5 = vld [vmem:[%s18171_s6 + $0x120] sm:$0x77]  ;;  %v9122_v57 = vld [vmem:[%s18171_s6 + $0x128] sm:$0x77]  ;;  %9384 = vmatprep.subr.bf16.mxu0 %v14168_v58  ;;  %9425 = vmatprep.subr.bf16.mxu1 %v14171_v27 }
 0x9f7   : > { %14406 = vtanh.f32 %v9008_v46  ;;  %v9034_v37 = vrot.slane %v9033_v18, 2  ;;  %v9044_v23 = vrot.slane %v9043_v28, 1  ;;  %v14166_v61 = vld [vmem:[%s18171_s6] ss:$16 sps:$4 sm:$0xff]   ;;  %v14169_v46 = vld [vmem:[%s18171_s6 + $0x8] ss:$16 sps:$4 sm:$0xff]   ;;  %v12743_v18 = vcombine.low %v9121_v5, %v9121_v5 }
 0x9f8   : > { %14408 = vpow2.f32 %v12705_v50  ;;  %v12744_v50 = vcombine.high %v9121_v5, %v9121_v5  ;;  %9385 = vmatpush1.bf16.msra.mxu0 %v14166_v61  ;;  %v14176_v28 = vld [vmem:[%s18171_s6 + $0x100] ss:$16 sps:$4 sm:$0xff]  }
 0x9f9   : > { %v12706_v3 = vmul.f32 -1.442695, %v9034_v37  ;;  %v12746_v37 = vcombine.high %v9122_v57, %v9122_v57  ;;  %9426 = vmatpush1.bf16.msra.mxu1 %v14169_v46 }
 0x9fa   : > { %v9048_v55 = vpop.permute.xlu0 %9047  ;;  %12747 = vmatprep.subr.msk.bf16.mxu0 %vm9357_vm11, %v12744_v50 }
 0x9fb   : > { %14410 = vpow2.f32 %v12706_v3  ;;  %v9049_v38 = vrot.slane %v9048_v55, 2  ;;  %v9050_v60 = vrot.slane %v9048_v55, 3  ;;  %v12745_v3 = vcombine.low %v9122_v57, %v9122_v57  ;;  %12749 = vmatprep.subr.msk.bf16.mxu1 %vm9357_vm11, %v12746_v37  ;;  %v14179_v55 = vld [vmem:[%s18171_s6 + $0x108] ss:$16 sps:$4 sm:$0xff]  }
 0x9fd   : > { %v9052_v49 = vsel %vm9051_vm10, %v9049_v38, %v9050_v60  ;;  %v9010_v38 = vsub.f32 1.0, %v17089_v26  ;;  %v17217_v60 = vsub.s32 1, %v14578_v11 }
 0xa04   : > { %v14407_v29 = vpop.eup %14406 }
 0xa05   : > { %v14409_v15 = vpop.eup %14408  ;;  %9012 = vrot.lane.b32.xlu1 %v14407_v29, %s14462_s15  ;;  %v9359_v29 = vsel %vm9357_vm11, %v12743_v18, 0 }
 0xa06   : > { %v9029_v17 = vadd.f32 1.0, %v14409_v15  ;;  %v9365_v15 = vsel %vm9357_vm11, %v12745_v3, 0  ;;  %9399 = vmatpush2.bf16.msra.mxu0 %v9359_v29 }
 0xa07   : > { %9440 = vmatpush2.bf16.msra.mxu1 %v9365_v15 }
 0xa08   : > { %14412 = vrcp.f32 %v9029_v17  ;;  %v14411_v10 = vpop.eup %14410  ;;  %v14178_v17 = vld [vmem:[%s18171_s6 + $0x104] ss:$16 sps:$4 sm:$0xff]  }
 0xa09   : > { %v9039_v13 = vadd.f32 1.0, %v14411_v10  ;;  %v14181_v10 = vld [vmem:[%s18171_s6 + $0x10c] ss:$16 sps:$4 sm:$0xff]   ;;  %9400 = vmatprep.subr.bf16.mxu0 %v14178_v17 }
 0xa0a   : > { %9441 = vmatprep.subr.bf16.mxu1 %v14181_v10  ;;  %9401 = vmatpush2.bf16.msra.mxu0 %v14176_v28 }
 0xa0b   : > { %14414 = vrcp.f32 %v9039_v13  ;;  %9442 = vmatpush2.bf16.msra.mxu1 %v14179_v55 }
 0xa15   : > { %v14413_v31 = vpop.eup %14412 }
 0xa16   : > { %v9046_v2 = vmul.f32 %v14413_v31, %v9044_v23 }
 0xa18   : > { %v9054_v35 = vadd.f32 %v9052_v49, %v9046_v2  ;;  %v14415_v30 = vpop.eup %14414  ;;  %v399_v2 = vld [vmem:[%s18174_s9 + $0x4] sm:$0x1f] }
 0xa19   : > { %v9056_v42 = vsub.f32 1.0, %v14415_v30  ;;  %v9317_v26 = vrot.slane %v399_v2, %v17121_v62  ;;  %v9321_v48 = vrot.slane %v399_v2, %v17217_v60  ;;  %v9496_v30 = vrot.slane %v400_v59, %v17217_v60 }
 0xa1a   : > { %14416 = vtanh.f32 %v9054_v35  ;;  %v9325_v35 = vrot.slane %v399_v2, %v14581_v12  ;;  %v9329_v22 = vrot.slane %v399_v2, %v9328_v1  ;;  %v9333_v39 = vrot.slane %v399_v2, %v9332_v36 }
 0xa27   : > { %v14417_v9 = vpop.eup %14416 }
 0xa28   : > { %v9057_v51 = vmul.f32 %v14417_v9, %v9056_v42  ;;  %v9468_v42 = vrot.slane %v400_v59, %v17121_v62 }
 0xa2a   : > { %v17136_v52 = vrot.slane %v9057_v51, %v17121_v62 }
 0xa2c   : > { %9079 = vrot.lane.b32.xlu1 %v17136_v52, %s14462_s15 }
 0xa30   : > { %9338 = vrot.lane.b32.xlu1 %v9325_v35, %s14463_s26 }
 0xa34   : > { %9334 = vrot.lane.b32.xlu1 %v9317_v26, %s14463_s26 }
 0xa38   : > { %9499 = vrot.lane.b32.xlu1 %v9496_v30, %s14465_s12 }
 0xa3c   : > { %9342 = vrot.lane.b32.xlu1 %v9333_v39, %s14463_s26 }
 0xa77   : > { %v9013_v13 = vpop.permute.xlu1 %9012 }
 0xa78   : > { %v9014_v23 = vrot.slane %v9013_v13, 7 }
 0xa7a   : > { %v9016_v31 = vsel %vm9015_vm12, %v9014_v23, %v9013_v13 }
 0xa7b   : > { %v9018_v49 = vmul.f32 %v9016_v31, %v9010_v38 }
 0xa7d   : > { %v17225_v63 = vrot.slane %v9018_v49, %v17121_v62  ;;  %v17228_v45 = vrot.slane %v9018_v49, %v17217_v60 }
 0xa7f   : > { %v13322_v14 = vpack.i.bf16 %v17228_v45, %v17225_v63 }
 0xa81   : > { %13323 = vrot.lane.b32.xlu0 %v13322_v14, %s14464_s11 }
 0xa85   : > { %9336 = vrot.lane.b32.xlu0 %v9321_v48, %s14463_s26 }
 0xa89   : > { %9340 = vrot.lane.b32.xlu0 %v9329_v22, %s14463_s26 }
 0xa8d   : > { %9497 = vrot.lane.b32.xlu0 %v9468_v42, %s14465_s12  ;;  %s14470_s12 = smov 8  }
 0xa91   : > { %9469 = vrot.lane.b32.xlu0 %v9468_v42, %s14466_s16 }
 0xa9e   : > { %v9080_v6 = vpop.permute.xlu1 %9079 }
 0xa9f   : > { %v9084_v9 = vpack.c.bf16 %v9080_v6, %v9080_v6 }
 0xaa1   : > { %12748 = vmatprep.mubr.msk.bf16.mxu0 %vm9353_vm13, %v9084_v9  ;;  %12750 = vmatprep.mubr.msk.bf16.mxu1 %vm9353_vm13, %v9084_v9 }
 0xaa2   : > { %v9339_v25 = vpop.permute.xlu1 %9338 }
 0xaa6   : > { %v9335_v54 = vpop.permute.xlu1 %9334 }
 0xaaa   : > { %v9500_v32 = vpop.permute.xlu1 %9499 }
 0xaae   : > { %v9343_v19 = vpop.permute.xlu1 %9342 }
 0xaf3   : > { %v13324_v51 = vpop.permute.xlu0 %13323 }
 0xaf4   : > { %v13326_v0 = vunpack.i.h.bf16 %v13324_v51  ;;  %v13325_v20 = vunpack.i.l.bf16 %v13324_v51 }
 0xaf6   : > { %v9072_v44 = vsel %vm9071_vm14, %v13325_v20, %v13326_v0 }
 0xaf7   : > { %v9082_v43 = vsel %vm9015_vm12, %v9072_v44, %v9080_v6  ;;  %v9337_v4 = vpop.permute.xlu0 %9336  ;;  %v14182_v44 = vld [vmem:[%s18172_s7 + $0x49c] ss:$28 sps:$4 sm:$0x7f]  }
 0xaf8   : > { %v9083_v41 = vpack.c.bf16 %v9082_v43, %v9082_v43  ;;  %v9345_v21 = vsel %vm9344_vm15, %v9335_v54, %v9337_v4  ;;  %v9346_v58 = vsel %vm9344_vm15, %v9337_v4, %v9339_v25  ;;  %v14184_v43 = vld [vmem:[%s18172_s7 + $0x498] ss:$28 sps:$4 sm:$0x7f]   ;;  %12908 = vmatprep.subr.msk.bf16.mxu1 %vm10591_vm2, %v14182_v44  ;;  %v14185_v4 = vld [vmem:[%s18172_s7 + $0x460] ss:$28 sps:$4 sm:$0xff]  }
 0xaf9   : > { %v10593_v54 = vsel %vm10591_vm2, %v14184_v43, 0  ;;  %v14260_v44 = vld [vmem:[%s18172_s7 + $0x2d8] ss:$28 sps:$4 sm:$0xff]   ;;  %v14268_v43 = vld [vmem:[%s18172_s7 + $0x2a4] ss:$28 sps:$4 sm:$0xff]  }
 0xafa   : > { %9403 = vmatmul.mubr.bf16.vlgmr.msra.gmra.mxu0 %v9083_v41  ;;  %9444 = vmatmul.mubr.bf16.vlgmr.msra.gmra.mxu1 %v9083_v41  ;;  %v14187_v41 = vld [vmem:[%s18172_s7 + $0x464] ss:$28 sps:$4 sm:$0xff]  }
 0xafb   : > { %10686 = vmatprep.mubr.bf16.mxu1 %v14454_v56  ;;  %v9341_v47 = vpop.permute.xlu0 %9340  ;;  %10659 = vmatpush1.bf16.msra.mxu1 %v10593_v54  ;;  %v14272_v54 = vld [vmem:[%s18172_s7 + $0x268] ss:$28 sps:$4 sm:$0xff]  }
 0xafc   : > { %v9347_v40 = vsel %vm9344_vm15, %v9339_v25, %v9341_v47  ;;  %v9348_v16 = vsel %vm9344_vm15, %v9341_v47, %v9343_v19  ;;  %10660 = vmatprep.subr.bf16.mxu1 %v14187_v41  ;;  %v14191_v47 = vld [vmem:[%s18172_s7 + $0x3f0] ss:$28 sps:$4 sm:$0xff]   ;;  %v14266_v41 = vld [vmem:[%s18172_s7 + $0x2a0] ss:$28 sps:$4 sm:$0xff]  }
 0xafd   : > { %v14193_v19 = vld [vmem:[%s18172_s7 + $0x3f4] ss:$28 sps:$4 sm:$0xff]  }
 0xaff   : > { %v9498_v38 = vpop.permute.xlu0 %9497  ;;  %10661 = vmatpush1.bf16.msra.mxu1 %v14185_v4  ;;  %v14280_v4 = vld [vmem:[%s18172_s7 + $0x234] ss:$28 sps:$4 sm:$0xff]  }
 0xb00   : > { %v9502_v31 = vsel %vm9501_vm0, %v9498_v38, %v9500_v32  ;;  %v14214_v38 = vld [vmem:[%s18172_s7 + $0x11c] ss:$28 sps:$4 sm:$0xff]  }
 0xb03   : > { %v9470_v14 = vpop.permute.xlu0 %9469 }
 0xbba   : > { %v9404_v8 = vpop.f32.mrf.mxu0  ;;  %v9445_v53 = vpop.f32.mrf.mxu1 }
 0xbbb   : > { %v9405_v33 = vadd.f32 %v9404_v8, %v9345_v21  ;;  %v9446_v7 = vadd.f32 %v9445_v53, %v9347_v40 }
 0xbbc   : > { %v9406_v27 = vpop.f32.mrf.mxu0  ;;  %v9447_v5 = vpop.f32.mrf.mxu1 }
 0xbbd   : > { %v12751_v57 = vmul.f32 -1.442695, %v9405_v33  ;;  %v12753_v61 = vmul.f32 -1.442695, %v9446_v7  ;;  %v9407_v46 = vadd.f32 %v9406_v27, %v9346_v58  ;;  %v9448_v50 = vadd.f32 %v9447_v5, %v9348_v16  ;;  %v14199_v16 = vld [vmem:[%s18172_s7 + $0x384] ss:$28 sps:$4 sm:$0xff]  }
 0xbbe   : > { %v9408_v18 = vpop.f32.mrf.mxu0  ;;  %v9449_v37 = vpop.f32.mrf.mxu1  ;;  %v14197_v27 = vld [vmem:[%s18172_s7 + $0x380] ss:$28 sps:$4 sm:$0xff]  }
 0xbbf   : > { %14418 = vpow2.f32 %v12751_v57  ;;  %v12752_v3 = vmul.f32 -1.442695, %v9407_v46  ;;  %v14200_v18 = vld [vmem:[%s18172_s7 + $0x188] ss:$28 sps:$4 sm:$0xff]  }
 0xbc0   : > { %14420 = vpow2.f32 %v12753_v61  ;;  %v9409_v29 = vpop.f32.mrf.mxu0  ;;  %v9450_v15 = vpop.f32.mrf.mxu1  ;;  %v14202_v37 = vld [vmem:[%s18172_s7 + $0x18c] ss:$28 sps:$4 sm:$0xff]  }
 0xbc1   : > { %14422 = vpow2.f32 %v12752_v3  ;;  %v14205_v29 = vld [vmem:[%s18172_s7 + $0x194] ss:$28 sps:$4 sm:$0xff]   ;;  %10613 = vmatprep.subr.bf16.mxu0 %v14202_v37 }
 0xbc2   : > { %v14208_v15 = vld [vmem:[%s18172_s7 + $0x154] ss:$28 sps:$4 sm:$0xff]   ;;  %10614 = vmatpush1.bf16.msra.mxu0 %v14200_v18  ;;  %v14221_v18 = vld [vmem:[%s18172_s7 + $0xe8] ss:$28 sps:$4 sm:$0xff]  }
 0xbc3   : > { %10615 = vmatprep.subr.bf16.mxu0 %v14208_v15  ;;  %v14229_v37 = vld [vmem:[%s18172_s7 + $0xb4] ss:$28 sps:$4 sm:$0xff]  }
 0xbc4   : > { %v14233_v15 = vld [vmem:[%s18172_s7 + $0x78] ss:$28 sps:$4 sm:$0xff]  }
 0xbcc   : > { %v14419_v17 = vpop.eup %14418 }
 0xbcd   : > { %v14421_v10 = vpop.eup %14420  ;;  %v9455_v13 = vadd.f32 1.0, %v14419_v17 }
 0xbce   : > { %v14423_v28 = vpop.eup %14422  ;;  %v9490_v55 = vadd.f32 1.0, %v14421_v10 }
 0xbcf   : > { %v9461_v23 = vadd.f32 1.0, %v14423_v28 }
 0xbd0   : > { %14424 = vrcp.f32 %v9490_v55 }
 0xbd1   : > { %14426 = vrcp.f32 %v9461_v23 }
 0xbd2   : > { %14428 = vrcp.f32 %v9455_v13  ;;  %v14206_v13 = vld [vmem:[%s18172_s7 + $0x150] ss:$28 sps:$4 sm:$0xff]  }
 0xbd3   : > { %10616 = vmatpush1.bf16.msra.mxu0 %v14206_v13  ;;  %v14253_v13 = vld [vmem:[%s18172_s7 + $0x354] ss:$28 sps:$4 sm:$0xff]  }
 0xbd4   : > { %10617 = vmatprep.subr.bf16.mxu0 %v14214_v38  ;;  %v14259_v38 = vld [vmem:[%s18172_s7 + $0x31c] ss:$28 sps:$4 sm:$0xff]  }
 0xbdd   : > { %v14425_v2 = vpop.eup %14424 }
 0xbde   : > { %v17251_v49 = vpop.eup %14426  ;;  %v9506_v35 = vmul.f32 %v14425_v2, %v9500_v32  ;;  %v14190_v32 = vld [vmem:[%s18172_s7 + $0x42c] ss:$28 sps:$4 sm:$0xff]   ;;  %v9520_v21 = vsub.f32 1.0, %v14425_v2  ;;  %v14212_v2 = vld [vmem:[%s18172_s7 + $0x118] ss:$28 sps:$4 sm:$0xff]  }
 0xbdf   : > { %v9505_v26 = vmul.f32 %v17251_v49, %v9502_v31  ;;  %v14429_v59 = vpop.eup %14428  ;;  %10662 = vmatprep.subr.bf16.mxu1 %v14190_v32  ;;  %v9480_v58 = vsub.f32 1.0, %v17251_v49  ;;  %v14220_v49 = vld [vmem:[%s18172_s7 + $0xe4] ss:$28 sps:$4 sm:$0xff]   ;;  %10618 = vmatpush1.bf16.msra.mxu0 %v14212_v2  ;;  %v14278_v32 = vld [vmem:[%s18172_s7 + $0x230] ss:$28 sps:$4 sm:$0xff]  }
 0xbe0   : > { %9511 = vrot.lane.b32.xlu1 %v9506_v35, %s14467_s28  ;;  %v9472_v48 = vmul.f32 %v14429_v59, %v9470_v14  ;;  %v14218_v35 = vld [vmem:[%s18172_s7 + $0xe0] ss:$28 sps:$4 sm:$0xff]   ;;  %10619 = vmatprep.subr.bf16.mxu0 %v14220_v49  ;;  %v14232_v14 = vld [vmem:[%s18172_s7 + $0x74] ss:$28 sps:$4 sm:$0xff]  }
 0xbe1   : > { %9509 = vrot.lane.b32.xlu0 %v9505_v26, %s14467_s28  ;;  %v14226_v26 = vld [vmem:[%s18172_s7 + $0xac] ss:$28 sps:$4 sm:$0xff]   ;;  %v14265_v2 = vld [vmem:[%s18172_s7 + $0x2e4] ss:$28 sps:$4 sm:$0xff]  }
 0xbe2   : > { %v14263_v49 = vld [vmem:[%s18172_s7 + $0x2e0] ss:$28 sps:$4 sm:$0xff]  }
 0xbe3   : > { %10620 = vmatpush1.bf16.msra.mxu0 %v14218_v35  ;;  %v14271_v35 = vld [vmem:[%s18172_s7 + $0x2ac] ss:$28 sps:$4 sm:$0xff]  }
 0xbe4   : > { %10621 = vmatprep.subr.bf16.mxu0 %v14226_v26  ;;  %v14269_v26 = vld [vmem:[%s18172_s7 + $0x2a8] ss:$28 sps:$4 sm:$0xff]  }
 0xbe5   : > { %9474 = vrot.lane.b32.xlu0 %v9472_v48, %s14467_s28  ;;  %v14230_v48 = vld [vmem:[%s18172_s7 + $0x70] ss:$28 sps:$4 sm:$0xff]  }
 0xc52   : > { %v9512_v30 = vpop.permute.xlu1 %9511 }
 0xc53   : > { %v9510_v22 = vpop.permute.xlu0 %9509 }
 0xc54   : > { %v9513_v39 = vsel %vm9353_vm13, %v9510_v22, %v9512_v30  ;;  %v9516_v42 = vadd.f32 %v9510_v22, %v9446_v7  ;;  %v9479_v7 = vsub.f32 1.0, %v14429_v59  ;;  %v14224_v59 = vld [vmem:[%s18172_s7 + $0xa8] ss:$28 sps:$4 sm:$0xff]   ;;  %v14238_v30 = vld [vmem:[%s18172_s7 + $0x3c] ss:$28 sps:$4 sm:$0xff]  }
 0xc55   : > { %v9517_v6 = vadd.f32 %v9513_v39, %v9448_v50  ;;  %10622 = vmatpush1.bf16.msra.mxu0 %v14224_v59  ;;  %v14236_v22 = vld [vmem:[%s18172_s7 + $0x38] ss:$28 sps:$4 sm:$0xff]   ;;  %v14244_v39 = vld [vmem:[%s18172_s7 + $0x4] ss:$28 sps:$4 sm:$0xff]  }
 0xc56   : > { %14430 = vtanh.f32 %v9516_v42  ;;  %10623 = vmatprep.subr.bf16.mxu0 %v14232_v14  ;;  %v14242_v42 = vld [vmem:[%s18172_s7] ss:$28 sps:$4 sm:$0xff]   ;;  %v14277_v59 = vld [vmem:[%s18172_s7 + $0x274] ss:$28 sps:$4 sm:$0xff]  }
 0xc57   : > { %14432 = vtanh.f32 %v9517_v6  ;;  %v9475_v9 = vpop.permute.xlu0 %9474  ;;  %v14250_v6 = vld [vmem:[%s18172_s7 + $0x34c] ss:$28 sps:$4 sm:$0xff]  }
 0xc58   : > { %v9477_v51 = vadd.f32 %v9475_v9, %v9407_v46  ;;  %v14248_v9 = vld [vmem:[%s18172_s7 + $0x348] ss:$28 sps:$4 sm:$0xff]   ;;  %v14275_v14 = vld [vmem:[%s18172_s7 + $0x270] ss:$28 sps:$4 sm:$0xff]  }
 0xc59   : > { %10624 = vmatpush1.bf16.msra.mxu0 %v14230_v48  ;;  %v14283_v48 = vld [vmem:[%s18172_s7 + $0x23c] ss:$28 sps:$4 sm:$0xff]  }
 0xc5a   : > { %14434 = vtanh.f32 %v9477_v51  ;;  %10625 = vmatprep.subr.bf16.mxu0 %v14238_v30  ;;  %v14256_v51 = vld [vmem:[%s18172_s7 + $0x314] ss:$28 sps:$4 sm:$0xff]  }
 0xc5b   : > { %v14281_v30 = vld [vmem:[%s18172_s7 + $0x238] ss:$28 sps:$4 sm:$0xff]  }
 0xc5d   : > { %10626 = vmatpush1.bf16.msra.mxu0 %v14236_v22  ;;  %v401_v22 = vld [vmem:[%s18174_s9 + $0x9] sm:$0x7f] }
 0xc5e   : > { %10627 = vmatprep.subr.bf16.mxu0 %v14244_v39  ;;  %v14289_v39 = vld [vmem:[%s18172_s7 + $0x204] ss:$28 sps:$4 sm:$0xff]  }
 0xc61   : > { %10628 = vmatpush1.bf16.msra.mxu0 %v14242_v42  ;;  %v10538_v42 = vrot.slane %v401_v22, %v17217_v60  ;;  %v10546_v60 = vrot.slane %v401_v22, %v9328_v1  ;;  %v10557_v1 = vsub.s32 6, %v14578_v11 }
 0xc62   : > { %10629 = vmatprep.subr.bf16.mxu0 %v14250_v6  ;;  %v10542_v6 = vrot.slane %v401_v22, %v14581_v12  ;;  %v14293_v12 = vld [vmem:[%s18172_s7 + $0x1c8] ss:$28 sps:$4 sm:$0xff]  }
 0xc63   : > { %v14431_v0 = vpop.eup %14430 }
 0xc64   : > { %v14433_v20 = vpop.eup %14432  ;;  %9523 = vrot.lane.b32.xlu1 %v14431_v0, %s14464_s11  ;;  %v14254_v0 = vld [vmem:[%s18172_s7 + $0x310] ss:$28 sps:$4 sm:$0xff]  }
 0xc65   : > { %9525 = vrot.lane.b32.xlu0 %v14433_v20, %s14464_s11  ;;  %10630 = vmatpush2.bf16.msra.mxu0 %v14248_v9  ;;  %v14262_v20 = vld [vmem:[%s18172_s7 + $0x2dc] ss:$28 sps:$4 sm:$0xff]  }
 0xc66   : > { %10631 = vmatprep.subr.bf16.mxu0 %v14256_v51  ;;  %v14287_v9 = vld [vmem:[%s18172_s7 + $0x200] ss:$28 sps:$4 sm:$0xff]   ;;  %v10534_v51 = vrot.slane %v401_v22, %v17121_v62  ;;  %v14298_v62 = vld [vmem:[%s18172_s7 + $0x4ac] ss:$28 sps:$4 sm:$0x7f]  }
 0xc67   : > { %v14435_v25 = vpop.eup %14434 }
 0xc68   : > { %9482 = vrot.lane.b32.xlu1 %v14435_v25, %s14464_s11  ;;  %v14274_v25 = vld [vmem:[%s18172_s7 + $0x26c] ss:$28 sps:$4 sm:$0xff]  }
 0xc69   : > { %9534 = vrot.lane.b32.xlu0 %v17136_v52, %s14467_s28  ;;  %v14188_v52 = vld [vmem:[%s18172_s7 + $0x428] ss:$28 sps:$4 sm:$0xff]   ;;  %10632 = vmatpush2.bf16.msra.mxu0 %v14254_v0 }
 0xc6a   : > { %10663 = vmatpush1.bf16.msra.mxu1 %v14188_v52  ;;  %10633 = vmatprep.subr.bf16.mxu0 %v14262_v20  ;;  %v14286_v52 = vld [vmem:[%s18172_s7 + $0x1fc] ss:$28 sps:$4 sm:$0xff]   ;;  %v14295_v0 = vld [vmem:[%s18172_s7 + $0x1cc] ss:$28 sps:$4 sm:$0xff]   ;;  %v10550_v20 = vrot.slane %v401_v22, %v9332_v36  ;;  %v1140_v36 = vrot.slane %v14824_v34, 4 }
 0xc6b   : > { %10664 = vmatprep.subr.bf16.mxu1 %v14193_v19  ;;  %v14292_v19 = vld [vmem:[%s18172_s7 + $0x1c4] ss:$28 sps:$4 sm:$0xff]  }
 0xc6c   : > { %9537 = vrot.lane.b32.xlu1 %v17225_v63, %s14467_s28  ;;  %v14196_v63 = vld [vmem:[%s18172_s7 + $0x3bc] ss:$28 sps:$4 sm:$0xff]  }
 0xc6d   : > { %9539 = vrot.lane.b32.xlu0 %v17228_v45, %s14467_s28  ;;  %v14194_v45 = vld [vmem:[%s18172_s7 + $0x3b8] ss:$28 sps:$4 sm:$0xff]   ;;  %10634 = vmatpush2.bf16.msra.mxu0 %v14260_v44  ;;  %v10553_v44 = vsub.s32 5, %v14578_v11  ;;  %v14301_v11 = vld [vmem:[%s18172_s7 + $0x4a8] ss:$28 sps:$4 sm:$0x7f]  }
 0xc6e   : > { %10665 = vmatpush1.bf16.msra.mxu1 %v14191_v47  ;;  %10635 = vmatprep.subr.bf16.mxu0 %v14268_v43  ;;  %v14284_v47 = vld [vmem:[%s18172_s7 + $0x1f8] ss:$28 sps:$4 sm:$0xff]   ;;  %v10558_v43 = vrot.slane %v401_v22, %v10557_v1  ;;  %v14357_v1 = vld [vmem:[%s18172_s7 + $0x80] ss:$28 sps:$4 sm:$0xff]  }
 0xc6f   : > { %10666 = vmatprep.subr.bf16.mxu1 %v14196_v63  ;;  %v14290_v63 = vld [vmem:[%s18172_s7 + $0x1c0] ss:$28 sps:$4 sm:$0xff]  }
 0xc71   : > { %10636 = vmatpush2.bf16.msra.mxu0 %v14266_v41  ;;  %v10554_v41 = vrot.slane %v401_v22, %v10553_v44  ;;  %v14346_v22 = vld [vmem:[%s18172_s7 + $0x130] ss:$28 sps:$4 sm:$0xff]   ;;  %v14361_v44 = vld [vmem:[%s18172_s7 + $0x88] ss:$28 sps:$4 sm:$0xff]  }
 0xc72   : > { %10667 = vmatpush1.bf16.msra.mxu1 %v14194_v45  ;;  %10637 = vmatprep.subr.bf16.mxu0 %v14274_v25  ;;  %v14296_v45 = vld [vmem:[%s18172_s7 + $0x4a4] ss:$28 sps:$4 sm:$0x7f]   ;;  %v1141_v25 = vadd.f32 %v1140_v36, %v14824_v34 }
 0xc73   : > { %10668 = vmatprep.subr.bf16.mxu1 %v14199_v16  ;;  %v14362_v36 = vld [vmem:[%s18172_s7 + $0x48] ss:$28 sps:$4 sm:$0xff]  }
 0xc75   : > { %10638 = vmatpush2.bf16.msra.mxu0 %v14272_v54  ;;  %v1142_v54 = vrot.slane %v1141_v25, 2 }
 0xc76   : > { %10669 = vmatpush1.bf16.msra.mxu1 %v14197_v27  ;;  %10639 = vmatprep.subr.bf16.mxu0 %v14280_v4 }
 0xc77   : > { %10695 = vmatprep.subr.bf16.mxu1 %v14205_v29  ;;  %v14235_v29 = vld [vmem:[%s18172_s7 + $0x7c] ss:$28 sps:$4 sm:$0xff]   ;;  %v1143_v4 = vadd.f32 %v1142_v54, %v1141_v25  ;;  %v14366_v25 = vld [vmem:[%s18172_s7 + $0x50] ss:$28 sps:$4 sm:$0xff]  }
 0xc78   : > { %v14369_v54 = vld [vmem:[%s18172_s7 + $0x14] ss:$28 sps:$4 sm:$0xff]  }
 0xc79   : > { %10640 = vmatpush2.bf16.msra.mxu0 %v14278_v32  ;;  %v1144_v32 = vrot.slane %v1143_v4, 1 }
 0xc7a   : > { %10641 = vmatprep.subr.bf16.mxu0 %v14286_v52 }
 0xc7b   : > { %v1145_v52 = vadd.f32 %v1144_v32, %v1143_v4  ;;  %v14370_v4 = vld [vmem:[%s18172_s7 + $0x1d8] ss:$28 sps:$4 sm:$0xff]   ;;  %v14367_v32 = vld [vmem:[%s18172_s7 + $0x10] ss:$28 sps:$4 sm:$0xff]  }
 0xc7d   : > { %10642 = vmatpush2.bf16.msra.mxu0 %v14284_v47  ;;  %v1146_v47 = vmul.f32 0.083333336, %v1145_v52  ;;  %v14371_v52 = vld [vmem:[%s18172_s7 + $0x18] ss:$28 sps:$4 sm:$0xff]  }
 0xc7e   : > { %10643 = vmatprep.subr.bf16.mxu0 %v14292_v19  ;;  %v14300_v19 = vld [vmem:[%s18172_s7 + $0x4a0] ss:$28 sps:$4 sm:$0x7f]  }
 0xc81   : > { %10644 = vmatpush2.bf16.msra.mxu0 %v14290_v63 }
 0xc82   : > { %12910 = vmatprep.subr.msk.bf16.mxu0 %vm10591_vm2, %v14296_v45 }
 0xcd6   : > { %v9524_v40 = vpop.permute.xlu1 %9523 }
 0xcd7   : > { %v9526_v8 = vpop.permute.xlu0 %9525 }
 0xcd8   : > { %v9527_v53 = vsel %vm9071_vm14, %v9524_v40, %v9526_v8 }
 0xcd9   : > { %v9529_v33 = vmul.f32 %v9527_v53, %v9520_v21 }
 0xcda   : > { %v9483_v5 = vpop.permute.xlu1 %9482 }
 0xcdb   : > { %v17307_v57 = vmul.f32 %v9483_v5, %v9479_v7  ;;  %v9486_v61 = vmul.f32 %v9483_v5, %v9480_v58  ;;  %9531 = vrot.lane.b32.xlu1 %v9529_v33, %s14459_s30  ;;  %v9535_v46 = vpop.permute.xlu0 %9534  ;;  %v14203_v58 = vld [vmem:[%s18172_s7 + $0x190] ss:$28 sps:$4 sm:$0xff]   ;;  %v14211_v5 = vld [vmem:[%s18172_s7 + $0x15c] ss:$28 sps:$4 sm:$0xff]  }
 0xcdd   : > { %v9545_v50 = vsel %vm9353_vm13, %v9486_v61, %v9535_v46  ;;  %v14217_v61 = vld [vmem:[%s18172_s7 + $0x124] ss:$28 sps:$4 sm:$0xff]  }
 0xcde   : > { %v9538_v3 = vpop.permute.xlu1 %9537  ;;  %v14215_v46 = vld [vmem:[%s18172_s7 + $0x120] ss:$28 sps:$4 sm:$0xff]  }
 0xcdf   : > { %v9547_v17 = vsel %vm9546_vm3, %v9545_v50, %v9538_v3  ;;  %v9540_v10 = vpop.permute.xlu0 %9539  ;;  %v14223_v50 = vld [vmem:[%s18172_s7 + $0xec] ss:$28 sps:$4 sm:$0xff]  }
 0xce0   : > { %v9549_v28 = vmul.f32 4.0, %v9547_v17  ;;  %v9541_v55 = vsel %vm9353_vm13, %v9538_v3, %v9540_v10  ;;  %v14227_v3 = vld [vmem:[%s18172_s7 + $0xb0] ss:$28 sps:$4 sm:$0xff]   ;;  %v14241_v17 = vld [vmem:[%s18172_s7 + $0x44] ss:$28 sps:$4 sm:$0xff]  }
 0xce1   : > { %v9550_v23 = vmul.f32 4.0, %v9541_v55  ;;  %v14239_v10 = vld [vmem:[%s18172_s7 + $0x40] ss:$28 sps:$4 sm:$0xff]   ;;  %v14245_v55 = vld [vmem:[%s18172_s7 + $0x8] ss:$28 sps:$4 sm:$0xff]  }
 0xce3   : > { %v13327_v31 = vpack.i.bf16 %v9550_v23, %v9549_v28  ;;  %v14247_v28 = vld [vmem:[%s18172_s7 + $0xc] ss:$28 sps:$4 sm:$0xff]  }
 0xce4   : > { %v14251_v23 = vld [vmem:[%s18172_s7 + $0x350] ss:$28 sps:$4 sm:$0xff]  }
 0xce5   : > { %13328 = vrot.lane.b32.xlu0 %v13327_v31, %s14468_s19  ;;  %v14257_v31 = vld [vmem:[%s18172_s7 + $0x318] ss:$28 sps:$4 sm:$0xff]  }
 0xd4d   : > { %v9532_v40 = vpop.permute.xlu1 %9531 }
 0xd4e   : > { %v9544_v21 = vsel %vm9015_vm12, %v9532_v40, %v17307_v57  ;;  %v14209_v57 = vld [vmem:[%s18172_s7 + $0x158] ss:$28 sps:$4 sm:$0xff]  }
 0xd4f   : > { %v9548_v8 = vmul.f32 4.0, %v9544_v21 }
 0xd51   : > { %9554 = vrot.lane.b32.xlu1 %v9548_v8, %s14468_s19  ;;  %s14469_s19 = smov 80   ;;  %v10599_v8 = vsel %vm10591_vm2, %v14300_v19, 0  ;;  %v14375_v19 = vld [vmem:[%s18172_s7 + $0x4b0] ss:$28 sps:$4 sm:$0x7f]  }
 0xd52   : > { %10561 = vrot.lane.b32.xlu0 %v10538_v42, %s14469_s19  ;;  %v14350_v42 = vld [vmem:[%s18172_s7 + $0x2b8] ss:$28 sps:$4 sm:$0xff]  }
 0xd55   : > { %10563 = vrot.lane.b32.xlu1 %v10542_v6, %s14469_s19  ;;  %v14347_v6 = vld [vmem:[%s18172_s7 + $0xf0] ss:$28 sps:$4 sm:$0xff]  }
 0xd56   : > { %10559 = vrot.lane.b32.xlu0 %v10534_v51, %s14469_s19  ;;  %v14354_v51 = vld [vmem:[%s18172_s7 + $0xbc] ss:$28 sps:$4 sm:$0xff]  }
 0xd57   : > { %v17419_v53 = vpop.permute.xlu0 %13328 }
 0xd58   : > { %v13331_v16 = vunpack.i.h.bf16 %v17419_v53  ;;  %v13330_v33 = vunpack.i.l.bf16 %v17419_v53  ;;  %v14307_v53 = vld [vmem:[%s18172_s7 + $0x474] ss:$28 sps:$4 sm:$0xff]  }
 0xd59   : > { %10565 = vrot.lane.b32.xlu1 %v10546_v60, %s14469_s19  ;;  %v14352_v60 = vld [vmem:[%s18172_s7 + $0xb8] ss:$28 sps:$4 sm:$0xff]  }
 0xd5a   : > { %v9561_v7 = vsel %vm418_vm1, %v13330_v33, %v13331_v16  ;;  %10567 = vrot.lane.b32.xlu0 %v10550_v20, %s14469_s19  ;;  %v10605_v16 = vsel %vm10591_vm2, %v14301_v11, 0  ;;  %v14359_v20 = vld [vmem:[%s18172_s7 + $0x84] ss:$28 sps:$4 sm:$0xff]   ;;  %v14372_v11 = vld [vmem:[%s18172_s7 + $0x358] ss:$28 sps:$4 sm:$0xff]  }
 0xd5b   : > { %v17429_v27 = vpack.c.bf16 %v9561_v7, %v9561_v7  ;;  %v14304_v7 = vld [vmem:[%s18172_s7 + $0x46c] ss:$28 sps:$4 sm:$0xff]  }
 0xd5d   : > { %12909 = vmatmul.mubr.msk.bf16.vlgmr.msra.gmra.mxu1 %vm10587_vm4, %v17429_v27  ;;  %10569 = vrot.lane.b32.xlu1 %v10554_v41, %s14469_s19  ;;  %v14365_v41 = vld [vmem:[%s18172_s7 + $0x210] ss:$28 sps:$4 sm:$0xff]  }
 0xd5e   : > { %10696 = vmatpush1.bf16.msra.mxu1 %v14203_v58  ;;  %10571 = vrot.lane.b32.xlu0 %v10558_v43, %s14469_s19  ;;  %v14305_v58 = vld [vmem:[%s18172_s7 + $0x470] ss:$28 sps:$4 sm:$0xff]  }
 0xd5f   : > { %10697 = vmatprep.subr.bf16.mxu1 %v14211_v5  ;;  %v14310_v5 = vld [vmem:[%s18172_s7 + $0x434] ss:$28 sps:$4 sm:$0xff]   ;;  %v14364_v43 = vld [vmem:[%s18172_s7 + $0x4c] ss:$28 sps:$4 sm:$0xff]  }
 0xd62   : > { %10698 = vmatpush1.bf16.msra.mxu1 %v14209_v57  ;;  %v14313_v57 = vld [vmem:[%s18172_s7 + $0x43c] ss:$28 sps:$4 sm:$0xff]  }
 0xd63   : > { %10699 = vmatprep.subr.bf16.mxu1 %v14217_v61  ;;  %v14308_v61 = vld [vmem:[%s18172_s7 + $0x430] ss:$28 sps:$4 sm:$0xff]  }
 0xd66   : > { %10700 = vmatpush1.bf16.msra.mxu1 %v14215_v46  ;;  %v14311_v46 = vld [vmem:[%s18172_s7 + $0x438] ss:$28 sps:$4 sm:$0xff]  }
 0xd67   : > { %10701 = vmatprep.subr.bf16.mxu1 %v14223_v50  ;;  %v14316_v50 = vld [vmem:[%s18172_s7 + $0x3fc] ss:$28 sps:$4 sm:$0xff]  }
 0xd6a   : > { %10702 = vmatpush1.bf16.msra.mxu1 %v14221_v18  ;;  %v14314_v18 = vld [vmem:[%s18172_s7 + $0x3f8] ss:$28 sps:$4 sm:$0xff]  }
 0xd6b   : > { %10703 = vmatprep.subr.bf16.mxu1 %v14229_v37  ;;  %v14317_v37 = vld [vmem:[%s18172_s7 + $0x400] ss:$28 sps:$4 sm:$0xff]  }
 0xd6e   : > { %10704 = vmatpush1.bf16.msra.mxu1 %v14227_v3  ;;  %v14322_v3 = vld [vmem:[%s18172_s7 + $0x3c4] ss:$28 sps:$4 sm:$0xff]  }
 0xd6f   : > { %10705 = vmatprep.subr.bf16.mxu1 %v14235_v29  ;;  %v14325_v29 = vld [vmem:[%s18172_s7 + $0x3cc] ss:$28 sps:$4 sm:$0xff]  }
 0xd72   : > { %10706 = vmatpush1.bf16.msra.mxu1 %v14233_v15  ;;  %v14320_v15 = vld [vmem:[%s18172_s7 + $0x3c0] ss:$28 sps:$4 sm:$0xff]  }
 0xd73   : > { %10707 = vmatprep.subr.bf16.mxu1 %v14241_v17  ;;  %v14323_v17 = vld [vmem:[%s18172_s7 + $0x3c8] ss:$28 sps:$4 sm:$0xff]  }
 0xd76   : > { %10708 = vmatpush1.bf16.msra.mxu1 %v14239_v10  ;;  %v14328_v10 = vld [vmem:[%s18172_s7 + $0x38c] ss:$28 sps:$4 sm:$0xff]  }
 0xd77   : > { %10709 = vmatprep.subr.bf16.mxu1 %v14247_v28  ;;  %v14331_v28 = vld [vmem:[%s18172_s7 + $0x394] ss:$28 sps:$4 sm:$0xff]  }
 0xd7a   : > { %10710 = vmatpush1.bf16.msra.mxu1 %v14245_v55  ;;  %v14326_v55 = vld [vmem:[%s18172_s7 + $0x388] ss:$28 sps:$4 sm:$0xff]  }
 0xd7b   : > { %10711 = vmatprep.subr.bf16.mxu1 %v14253_v13  ;;  %v14329_v13 = vld [vmem:[%s18172_s7 + $0x390] ss:$28 sps:$4 sm:$0xff]  }
 0xd7e   : > { %10712 = vmatpush2.bf16.msra.mxu1 %v14251_v23  ;;  %v14334_v23 = vld [vmem:[%s18172_s7 + $0x19c] ss:$28 sps:$4 sm:$0xff]  }
 0xd7f   : > { %10713 = vmatprep.subr.bf16.mxu1 %v14259_v38  ;;  %v14335_v38 = vld [vmem:[%s18172_s7 + $0x360] ss:$28 sps:$4 sm:$0xff]  }
 0xd82   : > { %10714 = vmatpush2.bf16.msra.mxu1 %v14257_v31  ;;  %v14332_v31 = vld [vmem:[%s18172_s7 + $0x198] ss:$28 sps:$4 sm:$0xff]  }
 0xd83   : > { %10715 = vmatprep.subr.bf16.mxu1 %v14265_v2  ;;  %v14336_v2 = vld [vmem:[%s18172_s7 + $0x1a0] ss:$28 sps:$4 sm:$0xff]  }
 0xd86   : > { %10716 = vmatpush2.bf16.msra.mxu1 %v14263_v49  ;;  %v14339_v49 = vld [vmem:[%s18172_s7 + $0x164] ss:$28 sps:$4 sm:$0xff]  }
 0xd87   : > { %10717 = vmatprep.subr.bf16.mxu1 %v14271_v35  ;;  %v14340_v35 = vld [vmem:[%s18172_s7 + $0x328] ss:$28 sps:$4 sm:$0xff]  }
 0xd8a   : > { %10718 = vmatpush2.bf16.msra.mxu1 %v14269_v26  ;;  %v14337_v26 = vld [vmem:[%s18172_s7 + $0x160] ss:$28 sps:$4 sm:$0xff]  }
 0xd8b   : > { %10719 = vmatprep.subr.bf16.mxu1 %v14277_v59  ;;  %v14341_v59 = vld [vmem:[%s18172_s7 + $0x168] ss:$28 sps:$4 sm:$0xff]  }
 0xd8e   : > { %10720 = vmatpush2.bf16.msra.mxu1 %v14275_v14  ;;  %v14344_v14 = vld [vmem:[%s18172_s7 + $0x12c] ss:$28 sps:$4 sm:$0xff]  }
 0xd8f   : > { %10721 = vmatprep.subr.bf16.mxu1 %v14283_v48  ;;  %v14345_v48 = vld [vmem:[%s18172_s7 + $0x2f0] ss:$28 sps:$4 sm:$0xff]  }
 0xd92   : > { %10722 = vmatpush2.bf16.msra.mxu1 %v14281_v30  ;;  %v14342_v30 = vld [vmem:[%s18172_s7 + $0x128] ss:$28 sps:$4 sm:$0xff]  }
 0xd93   : > { %10723 = vmatprep.subr.bf16.mxu1 %v14289_v39  ;;  %v14349_v39 = vld [vmem:[%s18172_s7 + $0xf4] ss:$28 sps:$4 sm:$0xff]  }
 0xd96   : > { %10724 = vmatpush2.bf16.msra.mxu1 %v14287_v9  ;;  %v14351_v9 = vld [vmem:[%s18172_s7 + $0xf8] ss:$28 sps:$4 sm:$0xff]  }
 0xd97   : > { %10725 = vmatprep.subr.bf16.mxu1 %v14295_v0  ;;  %v14355_v0 = vld [vmem:[%s18172_s7 + $0x280] ss:$28 sps:$4 sm:$0xff]  }
 0xd9a   : > { %10726 = vmatpush2.bf16.msra.mxu1 %v14293_v12  ;;  %v14356_v12 = vld [vmem:[%s18172_s7 + $0xc0] ss:$28 sps:$4 sm:$0xff]  }
 0xd9b   : > { %12912 = vmatprep.subr.msk.bf16.mxu1 %vm10591_vm2, %v14298_v62  ;;  %v14360_v62 = vld [vmem:[%s18172_s7 + $0x248] ss:$28 sps:$4 sm:$0xff]  }
 0xdc3   : > { %v9555_v63 = vpop.permute.xlu1 %9554 }
 0xdc4   : > { %v9560_v45 = vsel %vm418_vm1, %v9555_v63, %v13330_v33  ;;  %v9565_v34 = vsel %vm418_vm1, %v1146_v47, %v9555_v63  ;;  %v14302_v33 = vld [vmem:[%s18172_s7 + $0x468] ss:$28 sps:$4 sm:$0xff]   ;;  %v14374_v47 = vld [vmem:[%s18172_s7 + $0x35c] ss:$28 sps:$4 sm:$0xff]   ;;  %vm10573_vm1 = vcmask 654336  }
 0xdc5   : > { %v17551_v40 = vpack.c.bf16 %v9565_v34, %v9565_v34  ;;  %v17553_v21 = vpack.c.bf16 %v9560_v45, %v9560_v45  ;;  %v14378_v63 = vld [vmem:[%s18172_s7 + $0x324] ss:$28 sps:$4 sm:$0xff]   ;;  %v10611_v45 = vsel %vm10591_vm2, %v14375_v19, 0 }
 0xdc6   : > { %v14376_v34 = vld [vmem:[%s18172_s7 + $0x320] ss:$28 sps:$4 sm:$0xff]  }
 0xdc7   : > { %10645 = vmatprep.mubr.bf16.mxu0 %v17553_v21  ;;  %10727 = vmatprep.mubr.bf16.mxu1 %v17553_v21  ;;  %v10954_v19 = vld [vmem:[%s18173_s8 + $0x40] sm:$0xff] }
 0xdc8   : > { %10646 = vmatmul.mubr.bf16.vlgmr.msra.gmra.mxu0 %v17551_v40  ;;  %10728 = vmatmul.mubr.bf16.vlgmr.msra.gmra.mxu1 %v17551_v40 }
 0xdc9   : > { %10741 = vmatpush1.bf16.msra.mxu0 %v10599_v8  ;;  %10823 = vmatpush1.bf16.msra.mxu1 %v10605_v16  ;;  %v14382_v8 = vld [vmem:[%s18172_s7 + $0x2ec] ss:$28 sps:$4 sm:$0xff]  }
 0xdca   : > { %10742 = vmatprep.subr.bf16.mxu0 %v14304_v7  ;;  %10824 = vmatprep.subr.bf16.mxu1 %v14307_v53  ;;  %v14380_v16 = vld [vmem:[%s18172_s7 + $0x2e8] ss:$28 sps:$4 sm:$0xff]   ;;  %v14383_v7 = vld [vmem:[%s18172_s7 + $0x440] ss:$28 sps:$4 sm:$0xff]   ;;  %v14386_v53 = vld [vmem:[%s18172_s7 + $0x2b4] ss:$28 sps:$4 sm:$0xff]  }
 0xdcb   : > { %10768 = vmatprep.mubr.bf16.mxu0 %v14454_v56  ;;  %10850 = vmatprep.mubr.bf16.mxu1 %v14454_v56  ;;  %v14319_v56 = vld [vmem:[%s18172_s7 + $0x404] ss:$28 sps:$4 sm:$0xff]  }
 0xdcd   : > { %10743 = vmatpush1.bf16.msra.mxu0 %v14302_v33  ;;  %10825 = vmatpush1.bf16.msra.mxu1 %v14305_v58  ;;  %v14384_v33 = vld [vmem:[%s18172_s7 + $0x2b0] ss:$28 sps:$4 sm:$0xff]   ;;  %v14387_v58 = vld [vmem:[%s18172_s7 + $0x408] ss:$28 sps:$4 sm:$0xff]  }
 0xdce   : > { %10744 = vmatprep.subr.bf16.mxu0 %v14310_v5  ;;  %10826 = vmatprep.subr.bf16.mxu1 %v14313_v57  ;;  %v14390_v5 = vld [vmem:[%s18172_s7 + $0x27c] ss:$28 sps:$4 sm:$0xff]  }
 0xdcf   : > { %v14388_v57 = vld [vmem:[%s18172_s7 + $0x278] ss:$28 sps:$4 sm:$0xff]  }
 0xdd1   : > { %10745 = vmatpush1.bf16.msra.mxu0 %v14308_v61  ;;  %10827 = vmatpush1.bf16.msra.mxu1 %v14311_v46  ;;  %v14391_v61 = vld [vmem:[%s18172_s7 + $0x3d0] ss:$28 sps:$4 sm:$0xff]   ;;  %v14394_v46 = vld [vmem:[%s18172_s7 + $0x244] ss:$28 sps:$4 sm:$0xff]  }
 0xdd2   : > { %10746 = vmatprep.subr.bf16.mxu0 %v14316_v50  ;;  %10828 = vmatprep.subr.bf16.mxu1 %v14319_v56  ;;  %v14392_v50 = vld [vmem:[%s18172_s7 + $0x240] ss:$28 sps:$4 sm:$0xff]   ;;  %v14395_v56 = vld [vmem:[%s18172_s7 + $0x398] ss:$28 sps:$4 sm:$0xff]  }
 0xdd5   : > { %10747 = vmatpush1.bf16.msra.mxu0 %v14314_v18  ;;  %10829 = vmatpush1.bf16.msra.mxu1 %v14317_v37  ;;  %v14398_v18 = vld [vmem:[%s18172_s7 + $0x20c] ss:$28 sps:$4 sm:$0xff]   ;;  %v11009_v37 = vld [vmem:[%s18173_s8 + $0x1f8] sm:$0xff] }
 0xdd6   : > { %10748 = vmatprep.subr.bf16.mxu0 %v14322_v3  ;;  %10830 = vmatprep.subr.bf16.mxu1 %v14325_v29  ;;  %v14396_v3 = vld [vmem:[%s18172_s7 + $0x208] ss:$28 sps:$4 sm:$0xff]   ;;  %v14401_v29 = vld [vmem:[%s18172_s7 + $0x1d4] ss:$28 sps:$4 sm:$0xff]  }
 0xdd9   : > { %10749 = vmatpush1.bf16.msra.mxu0 %v14320_v15  ;;  %10831 = vmatpush1.bf16.msra.mxu1 %v14323_v17  ;;  %v10993_v15 = vld [vmem:[%s18173_s8 + $0x178] sm:$0xff]  ;;  %v11008_v17 = vld [vmem:[%s18173_s8 + $0x1f0] sm:$0xff] }
 0xdda   : > { %10750 = vmatprep.subr.bf16.mxu0 %v14328_v10  ;;  %10832 = vmatprep.subr.bf16.mxu1 %v14331_v28  ;;  %v14399_v10 = vld [vmem:[%s18172_s7 + $0x1d0] ss:$28 sps:$4 sm:$0xff]  }
 0xddb   : > { %v10992_v28 = vld [vmem:[%s18173_s8 + $0x170] sm:$0xff] }
 0xddd   : > { %10751 = vmatpush1.bf16.msra.mxu0 %v14326_v55  ;;  %10833 = vmatpush1.bf16.msra.mxu1 %v14329_v13  ;;  %v11007_v55 = vld [vmem:[%s18173_s8 + $0x1e8] sm:$0xff]  ;;  %v10977_v13 = vld [vmem:[%s18173_s8 + $0xf8] sm:$0xff] }
 0xdde   : > { %10777 = vmatprep.subr.bf16.mxu0 %v14334_v23  ;;  %12985 = vmatprep.subr.bf16.mxu1 %v14335_v38  ;;  %v11006_v23 = vld [vmem:[%s18173_s8 + $0x1e0] sm:$0xff] }
 0xde0   : > { %12911 = vmatmul.mubr.msk.bf16.vlgmr.msra.gmra.mxu0 %vm10587_vm4, %v17429_v27  ;;  %12913 = vmatmul.mubr.msk.bf16.vlgmr.msra.gmra.mxu1 %vm10587_vm4, %v17429_v27 }
 0xde1   : > { %10778 = vmatpush1.bf16.msra.mxu0 %v14332_v31  ;;  %10809 = vmatprep.mubr.bf16.mxu0 %v17553_v21  ;;  %v10990_v31 = vld [vmem:[%s18173_s8 + $0x160] sm:$0xff] }
 0xde2   : > { %12986 = vmatpush3.bf16.msra.mxu1 %v14336_v2  ;;  %10891 = vmatprep.mubr.bf16.mxu1 %v17553_v21  ;;  %v14379_v21 = vld [vmem:[%s18172_s7 + $0x478] ss:$28 sps:$4 sm:$0xff]  }
 0xde3   : > { %10779 = vmatprep.subr.bf16.mxu0 %v14339_v49  ;;  %12987 = vmatprep.subr.bf16.mxu1 %v14340_v35  ;;  %v10961_v2 = vld [vmem:[%s18173_s8 + $0x78] sm:$0xff] }
 0xde4   : > { %v11005_v49 = vld [vmem:[%s18173_s8 + $0x1d8] sm:$0xff] }
 0xde5   : > { %10780 = vmatpush1.bf16.msra.mxu0 %v14337_v26  ;;  %v10976_v26 = vld [vmem:[%s18173_s8 + $0xf0] sm:$0xff] }
 0xde6   : > { %12988 = vmatpush3.bf16.msra.mxu1 %v14341_v59  ;;  %10781 = vmatprep.subr.bf16.mxu0 %v14344_v14  ;;  %v10989_v59 = vld [vmem:[%s18173_s8 + $0x158] sm:$0xff]  ;;  %v10960_v14 = vld [vmem:[%s18173_s8 + $0x70] sm:$0xff] }
 0xde7   : > { %12989 = vmatprep.subr.bf16.mxu1 %v14345_v48  ;;  %v11004_v48 = vld [vmem:[%s18173_s8 + $0x1d0] sm:$0xff] }
 0xde9   : > { %10782 = vmatpush1.bf16.msra.mxu0 %v14342_v30 }
 0xdea   : > { %12990 = vmatpush3.bf16.msra.mxu1 %v14346_v22  ;;  %10783 = vmatprep.subr.bf16.mxu0 %v14349_v39  ;;  %v10975_v22 = vld [vmem:[%s18173_s8 + $0xe8] sm:$0xff] }
 0xdeb   : > { %12991 = vmatprep.subr.bf16.mxu1 %v14350_v42  ;;  %v10959_v39 = vld [vmem:[%s18173_s8 + $0x68] sm:$0xff] }
 0xdec   : > { %v11003_v42 = vld [vmem:[%s18173_s8 + $0x1c8] sm:$0xff] }
 0xded   : > { %10784 = vmatpush1.bf16.msra.mxu0 %v14347_v6 }
 0xdee   : > { %12992 = vmatpush3.bf16.msra.mxu1 %v14351_v9  ;;  %10785 = vmatprep.subr.bf16.mxu0 %v14354_v51  ;;  %v10974_v9 = vld [vmem:[%s18173_s8 + $0xe0] sm:$0xff]  ;;  %v10987_v51 = vld [vmem:[%s18173_s8 + $0x148] sm:$0xff] }
 0xdef   : > { %12993 = vmatprep.subr.bf16.mxu1 %v14355_v0  ;;  %v10958_v0 = vld [vmem:[%s18173_s8 + $0x60] sm:$0xff] }
 0xdf1   : > { %10786 = vmatpush1.bf16.msra.mxu0 %v14352_v60  ;;  %v11002_v60 = vld [vmem:[%s18173_s8 + $0x1c0] sm:$0xff] }
 0xdf2   : > { %12994 = vmatpush3.bf16.msra.mxu1 %v14356_v12  ;;  %10787 = vmatprep.subr.bf16.mxu0 %v14359_v20  ;;  %v10973_v12 = vld [vmem:[%s18173_s8 + $0xd8] sm:$0xff]  ;;  %v10986_v20 = vld [vmem:[%s18173_s8 + $0x140] sm:$0xff] }
 0xdf3   : > { %12995 = vmatprep.subr.bf16.mxu1 %v14360_v62  ;;  %v10957_v62 = vld [vmem:[%s18173_s8 + $0x58] sm:$0xff] }
 0xdf5   : > { %10788 = vmatpush1.bf16.msra.mxu0 %v14357_v1  ;;  %v11001_v1 = vld [vmem:[%s18173_s8 + $0x1b8] sm:$0xff] }
 0xdf6   : > { %12996 = vmatpush3.bf16.msra.mxu1 %v14361_v44  ;;  %10789 = vmatprep.subr.bf16.mxu0 %v14364_v43  ;;  %v10972_v44 = vld [vmem:[%s18173_s8 + $0xd0] sm:$0xff]  ;;  %v10985_v43 = vld [vmem:[%s18173_s8 + $0x138] sm:$0xff] }
 0xdf7   : > { %12997 = vmatprep.subr.bf16.mxu1 %v14365_v41  ;;  %v10956_v41 = vld [vmem:[%s18173_s8 + $0x50] sm:$0xff] }
 0xdf9   : > { %10790 = vmatpush1.bf16.msra.mxu0 %v14362_v36  ;;  %v11000_v36 = vld [vmem:[%s18173_s8 + $0x1b0] sm:$0xff] }
 0xdfa   : > { %12998 = vmatpush3.bf16.msra.mxu1 %v14366_v25  ;;  %10791 = vmatprep.subr.bf16.mxu0 %v14369_v54  ;;  %v10971_v25 = vld [vmem:[%s18173_s8 + $0xc8] sm:$0xff]  ;;  %v10984_v54 = vld [vmem:[%s18173_s8 + $0x130] sm:$0xff] }
 0xdfb   : > { %12999 = vmatprep.subr.bf16.mxu1 %v14370_v4  ;;  %v10955_v4 = vld [vmem:[%s18173_s8 + $0x48] sm:$0xff] }
 0xdfd   : > { %10792 = vmatpush1.bf16.msra.mxu0 %v14367_v32  ;;  %v10999_v32 = vld [vmem:[%s18173_s8 + $0x1a8] sm:$0xff] }
 0xdfe   : > { %13000 = vmatpush3.bf16.msra.mxu1 %v14371_v52  ;;  %10793 = vmatprep.subr.bf16.mxu0 %v14374_v47  ;;  %v10970_v52 = vld [vmem:[%s18173_s8 + $0xc0] sm:$0xff]  ;;  %v10983_v47 = vld [vmem:[%s18173_s8 + $0x128] sm:$0xff] }
 0xdff   : > { %13254 = vmatprep.subr.bf16.mxu1 %v14452_v24 }
 0xe01   : > { %10892 = vmatmul.mubr.bf16.vlgmr.msra.gmra.mxu1 %v17551_v40  ;;  %10794 = vmatpush2.bf16.msra.mxu0 %v14372_v11  ;;  %v10998_v11 = vld [vmem:[%s18173_s8 + $0x1a0] sm:$0xff] }
 0xe02   : > { %13255 = vmatpush3.bf16.msra.mxu1 %v10611_v45  ;;  %10795 = vmatprep.subr.bf16.mxu0 %v14378_v63  ;;  %v10969_v63 = vld [vmem:[%s18173_s8 + $0xb8] sm:$0xff]  ;;  %v10982_v45 = vld [vmem:[%s18173_s8 + $0x120] sm:$0xff] }
 0xe03   : > { %13256 = vmatprep.subr.bf16.mxu1 %v14452_v24  ;;  %13266 = vmatprep.mubr.msk.bf16.mxu1 %vm14453_vm5, %v14452_v24 }
 0xe05   : > { %10796 = vmatpush2.bf16.msra.mxu0 %v14376_v34  ;;  %v10953_v34 = vld [vmem:[%s18173_s8 + $0x38] sm:$0xff] }
 0xe06   : > { %13257 = vmatpush3.bf16.msra.mxu1 %v14379_v21  ;;  %10797 = vmatprep.subr.bf16.mxu0 %v14382_v8  ;;  %v10997_v21 = vld [vmem:[%s18173_s8 + $0x198] sm:$0xff]  ;;  %v10968_v8 = vld [vmem:[%s18173_s8 + $0xb0] sm:$0xff] }
 0xe07   : > { %13258 = vmatprep.subr.bf16.mxu1 %v14452_v24 }
 0xe09   : > { %10798 = vmatpush2.bf16.msra.mxu0 %v14380_v16  ;;  %v10981_v16 = vld [vmem:[%s18173_s8 + $0x118] sm:$0xff] }
 0xe0a   : > { %13259 = vmatpush3.bf16.msra.mxu1 %v14383_v7  ;;  %10799 = vmatprep.subr.bf16.mxu0 %v14386_v53  ;;  %v10952_v7 = vld [vmem:[%s18173_s8 + $0x30] sm:$0xff] }
 0xe0b   : > { %13260 = vmatprep.subr.bf16.mxu1 %v14452_v24  ;;  %v10996_v53 = vld [vmem:[%s18173_s8 + $0x190] sm:$0xff] }
 0xe0d   : > { %10800 = vmatpush2.bf16.msra.mxu0 %v14384_v33  ;;  %v10967_v33 = vld [vmem:[%s18173_s8 + $0xa8] sm:$0xff] }
 0xe0e   : > { %13261 = vmatpush3.bf16.msra.mxu1 %v14387_v58  ;;  %10801 = vmatprep.subr.bf16.mxu0 %v14390_v5  ;;  %v10980_v58 = vld [vmem:[%s18173_s8 + $0x110] sm:$0xff]  ;;  %v10951_v5 = vld [vmem:[%s18173_s8 + $0x28] sm:$0xff] }
 0xe0f   : > { %13262 = vmatprep.subr.bf16.mxu1 %v14452_v24 }
 0xe11   : > { %10802 = vmatpush2.bf16.msra.mxu0 %v14388_v57  ;;  %v10995_v57 = vld [vmem:[%s18173_s8 + $0x188] sm:$0xff] }
 0xe12   : > { %13263 = vmatpush3.bf16.msra.mxu1 %v14391_v61  ;;  %10803 = vmatprep.subr.bf16.mxu0 %v14394_v46  ;;  %v10966_v61 = vld [vmem:[%s18173_s8 + $0xa0] sm:$0xff]  ;;  %v10979_v46 = vld [vmem:[%s18173_s8 + $0x108] sm:$0xff] }
 0xe13   : > { %13264 = vmatprep.subr.bf16.mxu1 %v14452_v24 }
 0xe15   : > { %10804 = vmatpush2.bf16.msra.mxu0 %v14392_v50  ;;  %v10950_v50 = vld [vmem:[%s18173_s8 + $0x20] sm:$0xff] }
 0xe16   : > { %13265 = vmatpush3.bf16.msra.mxu1 %v14395_v56  ;;  %10805 = vmatprep.subr.bf16.mxu0 %v14398_v18  ;;  %v10994_v56 = vld [vmem:[%s18173_s8 + $0x180] sm:$0xff]  ;;  %v10965_v18 = vld [vmem:[%s18173_s8 + $0x98] sm:$0xff] }
 0xe17   : > { %13049 = vmatprep.subr.mxu1 %v11009_v37  ;;  %v10978_v37 = vld [vmem:[%s18173_s8 + $0x100] sm:$0xff] }
 0xe19   : > { %13267 = vmatmul.mubr.msk.bf16.vlgmr.msra.gmra.mxu1 %vm10587_vm4, %v17429_v27  ;;  %10806 = vmatpush2.bf16.msra.mxu0 %v14396_v3  ;;  %v10991_v27 = vld [vmem:[%s18173_s8 + $0x168] sm:$0xff]  ;;  %v10949_v3 = vld [vmem:[%s18173_s8 + $0x18] sm:$0xff] }
 0xe1a   : > { %10807 = vmatprep.subr.bf16.mxu0 %v14401_v29  ;;  %13050 = vmatpush3.msra.mxu1 %v10993_v15  ;;  %v10964_v29 = vld [vmem:[%s18173_s8 + $0x90] sm:$0xff] }
 0xe1b   : > { %13051 = vmatprep.subr.mxu1 %v11008_v17  ;;  %v10948_v15 = vld [vmem:[%s18173_s8 + $0x10] sm:$0xff]  ;;  %v10963_v17 = vld [vmem:[%s18173_s8 + $0x88] sm:$0xff] }
 0xe1c   : > { %13052 = vmatpush3.msra.mxu1 %v10992_v28  ;;  %v10962_v28 = vld [vmem:[%s18173_s8 + $0x80] sm:$0xff] }
 0xe1d   : > { %10808 = vmatpush2.bf16.msra.mxu0 %v14399_v10  ;;  %v17827_v38 = vpop.f32.mrf.mxu1  ;;  %13053 = vmatprep.subr.mxu1 %v11007_v55  ;;  %v10947_v10 = vld [vmem:[%s18173_s8 + $0x8] sm:$0xff]  ;;  %v10946_v55 = vld [vmem:[%s18173_s8] sm:$0xff] }
 0xe1e   : > { %13014 = vmatprep.subr.mxu0 %v10977_v13  ;;  %13054 = vmatpush3.msra.mxu1 %v10991_v27  ;;  %v11041_v13 = vld [vmem:[%s18173_s8 + $0x2f8] sm:$0xff]  ;;  %v12915_v27 = vld [vmem:[%s18174_s9 + $0xf] ss:$0 sm:$0xff] }
 0xe1f   : > { %v17838_v35 = vpop.f32.mrf.mxu1  ;;  %13055 = vmatprep.subr.mxu1 %v11006_v23  ;;  %11056 = vrot.lane.b32.xlu1 %v12915_v27, %s14470_s12  ;;  %v10562_v23 = vpop.permute.xlu0 %10561  ;;  %v11029_v27 = vld [vmem:[%s18173_s8 + $0x298] sm:$0xff] }
 0xe20   : > { %10810 = vmatmul.mubr.bf16.vlgmr.msra.gmra.mxu0 %v17551_v40  ;;  %13056 = vmatpush3.msra.mxu1 %v10990_v31  ;;  %v10988_v40 = vld [vmem:[%s18173_s8 + $0x150] sm:$0xff] }
 0xe21   : > { %v10692_v30 = vpop.f32.mrf.mxu1  ;;  %13015 = vmatpush3.msra.mxu0 %v10961_v2  ;;  %13057 = vmatprep.subr.mxu1 %v11005_v49  ;;  %v10564_v49 = vpop.permute.xlu1 %10563 }
 0xe22   : > { %13016 = vmatprep.subr.mxu0 %v10976_v26  ;;  %13058 = vmatpush3.msra.mxu1 %v10989_v59 }
 0xe23   : > { %v10693_v6 = vpop.f32.mrf.mxu1  ;;  %13017 = vmatpush3.msra.mxu0 %v10960_v14  ;;  %13059 = vmatprep.subr.mxu1 %v11004_v48  ;;  %v10560_v31 = vpop.permute.xlu0 %10559  ;;  %v10575_v14 = vsel %vm10573_vm1, %v10562_v23, %v10564_v49 }
 0xe24   : > { %13018 = vmatprep.subr.mxu0 %v10975_v22  ;;  %13060 = vmatpush3.msra.mxu1 %v10988_v40  ;;  %v10574_v2 = vsel %vm10573_vm1, %v10560_v31, %v10562_v23  ;;  %v11013_v23 = vld [vmem:[%s18173_s8 + $0x218] sm:$0xff]  ;;  %v11048_v31 = vld [vmem:[%s18173_s8 + $0x330] sm:$0xff] }
 0xe25   : > { %13019 = vmatpush3.msra.mxu0 %v10959_v39  ;;  %13061 = vmatprep.subr.mxu1 %v11003_v42 }
 0xe26   : > { %13020 = vmatprep.subr.mxu0 %v10974_v9  ;;  %13062 = vmatpush3.msra.mxu1 %v10987_v51 }
 0xe27   : > { %13021 = vmatpush3.msra.mxu0 %v10958_v0  ;;  %13063 = vmatprep.subr.mxu1 %v11002_v60 }
 0xe28   : > { %13022 = vmatprep.subr.mxu0 %v10973_v12  ;;  %13064 = vmatpush3.msra.mxu1 %v10986_v20  ;;  %v11025_v20 = vld [vmem:[%s18173_s8 + $0x278] sm:$0xff] }
 0xe29   : > { %13023 = vmatpush3.msra.mxu0 %v10957_v62  ;;  %13065 = vmatprep.subr.mxu1 %v11001_v1  ;;  %v11040_v62 = vld [vmem:[%s18173_s8 + $0x2f0] sm:$0xff]  ;;  %v11023_v1 = vld [vmem:[%s18173_s8 + $0x268] sm:$0xff] }
 0xe2a   : > { %13024 = vmatprep.subr.mxu0 %v10972_v44  ;;  %13066 = vmatpush3.msra.mxu1 %v10985_v43  ;;  %v11038_v44 = vld [vmem:[%s18173_s8 + $0x2e0] sm:$0xff] }
 0xe2b   : > { %13025 = vmatpush3.msra.mxu0 %v10956_v41  ;;  %13067 = vmatprep.subr.mxu1 %v11000_v36  ;;  %v11022_v43 = vld [vmem:[%s18173_s8 + $0x260] sm:$0xff]  ;;  %v11037_v41 = vld [vmem:[%s18173_s8 + $0x2d8] sm:$0xff] }
 0xe2c   : > { %13026 = vmatprep.subr.mxu0 %v10971_v25  ;;  %13068 = vmatpush3.msra.mxu1 %v10984_v54  ;;  %v11021_v36 = vld [vmem:[%s18173_s8 + $0x258] sm:$0xff]  ;;  %v11036_v25 = vld [vmem:[%s18173_s8 + $0x2d0] sm:$0xff]  ;;  %v10566_v54 = vpop.permute.xlu1 %10565 }
 0xe2d   : > { %13027 = vmatpush3.msra.mxu0 %v10955_v4  ;;  %13069 = vmatprep.subr.mxu1 %v10999_v32  ;;  %v11020_v4 = vld [vmem:[%s18173_s8 + $0x250] sm:$0xff]  ;;  %v18044_v32 = vpop.permute.xlu0 %10567 }
 0xe2e   : > { %13028 = vmatprep.subr.mxu0 %v10970_v52  ;;  %13070 = vmatpush3.msra.mxu1 %v10983_v47  ;;  %v11035_v52 = vld [vmem:[%s18173_s8 + $0x2c8] sm:$0xff] }
 0xe2f   : > { %13029 = vmatpush3.msra.mxu0 %v10954_v19  ;;  %13071 = vmatprep.subr.mxu1 %v10998_v11  ;;  %v11019_v47 = vld [vmem:[%s18173_s8 + $0x248] sm:$0xff]  ;;  %v10576_v19 = vsel %vm10573_vm1, %v10564_v49, %v10566_v54  ;;  %v11034_v11 = vld [vmem:[%s18173_s8 + $0x2c0] sm:$0xff]  ;;  %v11012_v49 = vld [vmem:[%s18173_s8 + $0x210] sm:$0xff] }
 0xe30   : > { %13030 = vmatprep.subr.mxu0 %v10969_v63  ;;  %13072 = vmatpush3.msra.mxu1 %v10982_v45  ;;  %v10577_v63 = vsel %vm10573_vm1, %v10566_v54, %v18044_v32  ;;  %v11018_v45 = vld [vmem:[%s18173_s8 + $0x240] sm:$0xff] }
 0xe31   : > { %13031 = vmatpush3.msra.mxu0 %v10953_v34  ;;  %13073 = vmatprep.subr.mxu1 %v10997_v21  ;;  %v11033_v34 = vld [vmem:[%s18173_s8 + $0x2b8] sm:$0xff] }
 0xe32   : > { %13032 = vmatprep.subr.mxu0 %v10968_v8  ;;  %13074 = vmatpush3.msra.mxu1 %v10981_v16 }
 0xe33   : > { %13033 = vmatpush3.msra.mxu0 %v10952_v7  ;;  %13075 = vmatprep.subr.mxu1 %v10996_v53  ;;  %v11017_v7 = vld [vmem:[%s18173_s8 + $0x238] sm:$0xff] }
 0xe34   : > { %13034 = vmatprep.subr.mxu0 %v10967_v33  ;;  %13076 = vmatpush3.msra.mxu1 %v10980_v58  ;;  %v11032_v33 = vld [vmem:[%s18173_s8 + $0x2b0] sm:$0xff] }
 0xe35   : > { %13035 = vmatpush3.msra.mxu0 %v10951_v5  ;;  %13077 = vmatprep.subr.mxu1 %v10995_v57 }
 0xe36   : > { %13036 = vmatprep.subr.mxu0 %v10966_v61  ;;  %13078 = vmatpush3.msra.mxu1 %v10979_v46  ;;  %v11016_v61 = vld [vmem:[%s18173_s8 + $0x230] sm:$0xff] }
 0xe37   : > { %13037 = vmatpush3.msra.mxu0 %v10950_v50  ;;  %13079 = vmatprep.subr.mxu1 %v10994_v56  ;;  %v11031_v50 = vld [vmem:[%s18173_s8 + $0x2a8] sm:$0xff] }
 0xe38   : > { %13038 = vmatprep.subr.mxu0 %v10965_v18  ;;  %13080 = vmatpush3.msra.mxu1 %v10978_v37  ;;  %v11015_v37 = vld [vmem:[%s18173_s8 + $0x228] sm:$0xff] }
 0xe39   : > { %13039 = vmatpush3.msra.mxu0 %v10949_v3  ;;  %13270 = vmatprep.subr.mxu1 %v14452_v24 }
 0xe3a   : > { %13040 = vmatprep.subr.mxu0 %v10964_v29  ;;  %v11030_v29 = vld [vmem:[%s18173_s8 + $0x2a0] sm:$0xff] }
 0xe3b   : > { %13041 = vmatpush3.msra.mxu0 %v10948_v15 }
 0xe3c   : > { %13042 = vmatprep.subr.mxu0 %v10963_v17 }
 0xe3d   : > { %13043 = vmatpush3.msra.mxu0 %v10947_v10 }
 0xe3e   : > { %13044 = vmatprep.subr.mxu0 %v10962_v28  ;;  %v11050_v28 = vld [vmem:[%s18173_s8 + $0x340] sm:$0xff] }
 0xe3f   : > { %13045 = vmatpush3.msra.mxu0 %v10946_v55  ;;  %v11014_v55 = vld [vmem:[%s18173_s8 + $0x220] sm:$0xff] }
 0xe40   : > { %13084 = vmatprep.subr.mxu0 %v11041_v13  ;;  %v11049_v13 = vld [vmem:[%s18173_s8 + $0x338] sm:$0xff] }
 0xe88   : > { %v10647_v26 = vpop.f32.mrf.mxu0  ;;  %v10729_v59 = vpop.f32.mrf.mxu1 }
 0xe89   : > { %v10648_v48 = vadd.f32 %v10647_v26, %v10574_v2  ;;  %v10730_v21 = vadd.f32 %v10729_v59, %v10576_v19  ;;  %v11028_v2 = vld [vmem:[%s18173_s8 + $0x290] sm:$0xff]  ;;  %v11047_v26 = vld [vmem:[%s18173_s8 + $0x328] sm:$0xff] }
 0xe8a   : > { %v10649_v30 = vpop.f32.mrf.mxu0  ;;  %v10731_v22 = vpop.f32.mrf.mxu1  ;;  %v11027_v59 = vld [vmem:[%s18173_s8 + $0x288] sm:$0xff] }
 0xe8b   : > { %v10650_v40 = vadd.f32 %v10649_v30, %v10575_v14  ;;  %v10689_v39 = vadd.f32 %v17827_v38, %v10648_v48  ;;  %v11024_v38 = vld [vmem:[%s18173_s8 + $0x270] sm:$0xff]  ;;  %v10732_v53 = vadd.f32 %v10731_v22, %v10577_v63  ;;  %v11011_v14 = vld [vmem:[%s18173_s8 + $0x208] sm:$0xff]  ;;  %v11046_v48 = vld [vmem:[%s18173_s8 + $0x320] sm:$0xff] }
 0xe8c   : > { %v10651_v42 = vpop.f32.mrf.mxu0  ;;  %v10733_v6 = vpop.f32.mrf.mxu1  ;;  %v11026_v30 = vld [vmem:[%s18173_s8 + $0x280] sm:$0xff] }
 0xe8d   : > { %v10691_v9 = vadd.f32 %v17838_v35, %v10650_v40  ;;  %v10939_v12 = vmax.f32 %v10689_v39, 0.0  ;;  %v11039_v35 = vld [vmem:[%s18173_s8 + $0x2e8] sm:$0xff]  ;;  %v11010_v22 = vld [vmem:[%s18173_s8 + $0x200] sm:$0xff]  ;;  %v11045_v40 = vld [vmem:[%s18173_s8 + $0x318] sm:$0xff] }
 0xe8e   : > { %v10652_v51 = vpop.f32.mrf.mxu0  ;;  %v10734_v0 = vpop.f32.mrf.mxu1  ;;  %v11044_v39 = vld [vmem:[%s18173_s8 + $0x310] sm:$0xff]  ;;  %v11043_v42 = vld [vmem:[%s18173_s8 + $0x308] sm:$0xff]  ;;  %v11042_v6 = vld [vmem:[%s18173_s8 + $0x300] sm:$0xff] }
 0xe8f   : > { %v10940_v60 = vmax.f32 %v10691_v9, 0.0 }
 0xe91   : > { %11127 = vmatprep.mubr.f32.mxu0 %v10940_v60 }
 0xe92   : > { %11128 = vmatmul.mubr.f32.vlgmr.msra.gmra.mxu0 %v10939_v12 }
 0xe93   : > { %13085 = vmatpush3.msra.mxu0 %v11025_v20  ;;  %v10572_v20 = vpop.permute.xlu0 %10571 }
 0xe94   : > { %13086 = vmatprep.subr.mxu0 %v11040_v62 }
 0xe95   : > { %13087 = vmatpush3.msra.mxu0 %v11024_v38 }
 0xe96   : > { %13088 = vmatprep.subr.mxu0 %v11039_v35 }
 0xe97   : > { %13089 = vmatpush3.msra.mxu0 %v11023_v1 }
 0xe98   : > { %13090 = vmatprep.subr.mxu0 %v11038_v44 }
 0xe99   : > { %13091 = vmatpush3.msra.mxu0 %v11022_v43  ;;  %v10570_v43 = vpop.permute.xlu1 %10569 }
 0xe9a   : > { %13092 = vmatprep.subr.mxu0 %v11037_v41  ;;  %v10579_v54 = vsel %vm10573_vm1, %v10570_v43, %v10572_v20 }
 0xe9b   : > { %13093 = vmatpush3.msra.mxu0 %v11021_v36 }
 0xe9c   : > { %13094 = vmatprep.subr.mxu0 %v11036_v25 }
 0xe9d   : > { %13095 = vmatpush3.msra.mxu0 %v11020_v4 }
 0xe9e   : > { %13096 = vmatprep.subr.mxu0 %v11035_v52 }
 0xe9f   : > { %13097 = vmatpush3.msra.mxu0 %v11019_v47 }
 0xea0   : > { %v10770_v8 = vpop.f32.mrf.mxu0  ;;  %v18064_v16 = vpop.f32.mrf.mxu1  ;;  %13098 = vmatprep.subr.mxu0 %v11034_v11 }
 0xea1   : > { %13099 = vmatpush3.msra.mxu0 %v11018_v45  ;;  %v10771_v58 = vadd.f32 %v10770_v8, %v10730_v21 }
 0xea2   : > { %v10772_v5 = vpop.f32.mrf.mxu0  ;;  %v18072_v57 = vpop.f32.mrf.mxu1  ;;  %13100 = vmatprep.subr.mxu0 %v11033_v34 }
 0xea3   : > { %v10773_v46 = vadd.f32 %v10772_v5, %v10732_v53  ;;  %13101 = vmatpush3.msra.mxu0 %v11017_v7  ;;  %v10941_v15 = vmax.f32 %v10771_v58, 0.0 }
 0xea4   : > { %v10774_v56 = vpop.f32.mrf.mxu0  ;;  %v10856_v18 = vpop.f32.mrf.mxu1  ;;  %13102 = vmatprep.subr.mxu0 %v11032_v33 }
 0xea5   : > { %v10942_v3 = vmax.f32 %v10773_v46, 0.0  ;;  %13103 = vmatpush3.msra.mxu0 %v11016_v61  ;;  %v11057_v61 = vpop.permute.xlu1 %11056 }
 0xea6   : > { %v10775_v17 = vpop.f32.mrf.mxu0  ;;  %v10857_v10 = vpop.f32.mrf.mxu1  ;;  %13104 = vmatprep.subr.mxu0 %v11031_v50 }
 0xea7   : > { %11197 = vmatprep.mubr.f32.mxu1 %v10942_v3  ;;  %13105 = vmatpush3.msra.mxu0 %v11015_v37 }
 0xea8   : > { %11198 = vmatmul.mubr.f32.vlgmr.msra.gmra.mxu1 %v10941_v15  ;;  %13106 = vmatprep.subr.mxu0 %v11030_v29 }
 0xea9   : > { %13271 = vmatpush3.msra.mxu1 %v11050_v28  ;;  %13288 = vmatprep.mubr.msk.f32.mxu1 %vm14453_vm5, %v14452_v24  ;;  %vm11059_vm5 = vcmask 588800  }
 0xeaa   : > { %13272 = vmatprep.subr.mxu1 %v14452_v24  ;;  %13107 = vmatpush3.msra.mxu0 %v11014_v55 }
 0xeab   : > { %13273 = vmatpush3.msra.mxu1 %v11049_v13  ;;  %13108 = vmatprep.subr.mxu0 %v11029_v27 }
 0xeac   : > { %13274 = vmatprep.subr.mxu1 %v14452_v24  ;;  %13109 = vmatpush3.msra.mxu0 %v11013_v23 }
 0xead   : > { %13275 = vmatpush3.msra.mxu1 %v11048_v31  ;;  %13110 = vmatprep.subr.mxu0 %v11028_v2 }
 0xeae   : > { %13276 = vmatprep.subr.mxu1 %v14452_v24  ;;  %13111 = vmatpush3.msra.mxu0 %v11012_v49 }
 0xeaf   : > { %13277 = vmatpush3.msra.mxu1 %v11047_v26  ;;  %13112 = vmatprep.subr.mxu0 %v11027_v59 }
 0xeb0   : > { %13278 = vmatprep.subr.mxu1 %v14452_v24  ;;  %13113 = vmatpush3.msra.mxu0 %v11011_v14 }
 0xeb1   : > { %13279 = vmatpush3.msra.mxu1 %v11046_v48  ;;  %13114 = vmatprep.subr.mxu0 %v11026_v30 }
 0xeb2   : > { %13280 = vmatprep.subr.mxu1 %v14452_v24  ;;  %13115 = vmatpush3.msra.mxu0 %v11010_v22 }
 0xeb3   : > { %13281 = vmatpush3.msra.mxu1 %v11045_v40 }
 0xeb4   : > { %13282 = vmatprep.subr.mxu1 %v14452_v24 }
 0xeb5   : > { %13283 = vmatpush3.msra.mxu1 %v11044_v39 }
 0xeb6   : > { %13284 = vmatprep.subr.mxu1 %v14452_v24 }
 0xeb7   : > { %13285 = vmatpush3.msra.mxu1 %v11043_v42 }
 0xeb8   : > { %13286 = vmatprep.subr.mxu1 %v14452_v24  ;;  %v10578_v24 = vsel %vm10573_vm1, %v18044_v32, %v10570_v43 }
 0xeb9   : > { %13287 = vmatpush3.msra.mxu1 %v11042_v6 }
 0xec1   : > { %v13001_v9 = vpop.f32.mrf.mxu1 }
 0xec3   : > { %v13002_v51 = vpop.f32.mrf.mxu1 }
 0xec4   : > { %v13003_v12 = vadd.f32 %v13002_v51, %v13001_v9 }
 0xec5   : > { %v13004_v0 = vpop.f32.mrf.mxu1 }
 0xec6   : > { %v10894_v62 = vadd.f32 %v13003_v12, %v10572_v20 }
 0xec7   : > { %v13005_v60 = vpop.f32.mrf.mxu1 }
 0xed9   : > { %v10933_v38 = vpop.f32.mrf.mxu1 }
 0xeda   : > { %v10934_v35 = vadd.f32 %v10933_v38, %v10894_v62 }
 0xedb   : > { %v13268_v1 = vpop.f32.mrf.mxu1 }
 0xedc   : > { %v10945_v44 = vmax.f32 %v10934_v35, 0.0 }
 0xedd   : > { %v10936_v41 = vpop.f32.mrf.mxu1 }
 0xede   : > { %13289 = vmatmul.mubr.msk.f32.vlgmr.msra.gmra.mxu1 %vm11059_vm5, %v10945_v44 }
 0xedf   : > { %v13269_v36 = vpop.f32.mrf.mxu1 }
 0xee0   : > { %v10811_v25 = vpop.f32.mrf.mxu0 }
 0xee1   : > { %v10812_v4 = vadd.f32 %v10811_v25, %v10578_v24 }
 0xee2   : > { %v10813_v52 = vpop.f32.mrf.mxu0 }
 0xee3   : > { %v10814_v47 = vadd.f32 %v10813_v52, %v10579_v54  ;;  %v10853_v19 = vadd.f32 %v18064_v16, %v10812_v4 }
 0xee4   : > { %v10815_v11 = vpop.f32.mrf.mxu0 }
 0xee5   : > { %v10855_v63 = vadd.f32 %v18072_v57, %v10814_v47  ;;  %v10943_v21 = vmax.f32 %v10853_v19, 0.0 }
 0xee6   : > { %v10816_v45 = vpop.f32.mrf.mxu0 }
 0xee7   : > { %v10944_v34 = vmax.f32 %v10855_v63, 0.0 }
 0xee9   : > { %11267 = vmatprep.mubr.f32.mxu0 %v10944_v34 }
 0xeea   : > { %11268 = vmatmul.mubr.f32.vlgmr.msra.gmra.mxu0 %v10943_v21 }
 0xf52   : > { %v13046_v32 = vpop.f32.mrf.mxu0 }
 0xf54   : > { %v13047_v58 = vpop.f32.mrf.mxu0 }
 0xf55   : > { %v13048_v5 = vadd.f32 %v13047_v58, %v13046_v32 }
 0xf57   : > { %v11130_v56 = vadd.f32 %v13048_v5, %v11057_v61 }
 0xf68   : > { %v13081_v8 = vpop.f32.mrf.mxu1 }
 0xf6a   : > { %v13082_v7 = vpop.f32.mrf.mxu1 }
 0xf6b   : > { %v13083_v46 = vadd.f32 %v13082_v7, %v13081_v8 }
 0xf6d   : > { %v11200_v18 = vadd.f32 %v13083_v46, %v11130_v56 }
 0xf9e   : > { %v11339_v53 = vpop.f32.mrf.mxu1 }
 0xfa0   : > { %v13290_v33 = vpop.f32.mrf.mxu1 }
 0xfaa   : > { %v13116_v50 = vpop.f32.mrf.mxu0 }
 0xfac   : > { %v13117_v16 = vpop.f32.mrf.mxu0 }
 0xfad   : > { %v13118_v37 = vadd.f32 %v13117_v16, %v13116_v50 }
 0xfaf   : > { %v11270_v57 = vadd.f32 %v13118_v37, %v11200_v18 }
 0xfb1   : > { %v11340_v3 = vadd.f32 %v11339_v53, %v11270_v57 }
 0xfb3   : > { %v11344_v29 = vsel %vm11343_vm6, %v11340_v3, -inf }
 0xfb4   : > { %11345 = vmax.xlane.f32.xlu0 %v11344_v29 }
0x103d   : > { %v11346_v15 = vpop.xlane.xlu0 %11345 }
0x103e   : > { %v11347_v17 = vsub.f32 %v11340_v3, %v11346_v15 }
0x1040   : > { %v11348_v10 = vmul.f32 1.442695, %v11347_v17 }
0x1042   : > { %14436 = vpow2.f32 %v11348_v10 }
0x104f   : > { %v14437_v28 = vpop.eup %14436 }
0x1050   : > { %v11350_v55 = vsel %vm11343_vm6, %v14437_v28, 0.0 }
0x1051   : > { %11351 = vadd.xlane.f32.xlu1 %v11350_v55 }
0x10da   : > { %v11352_v13 = vpop.xlane.xlu1 %11351 }
0x10db   : > { %14438 = vrcp.f32 %v11352_v13 }
0x10e8   : > { %v14439_v27 = vpop.eup %14438 }
0x10e9   : > { %v11354_v23 = vmul.f32 %v14439_v27, %v14437_v28 }
0x10eb   : > { %11355 = vst.msk [vmem:[%s395_s25] sm:$0x1] %vm11343_vm6, %v11354_v23 }
0x10ec PF: > { %s20_s13 = sadd.s32 1, %s14449_s13  }
0x10ed   : > { %p17_p4 = scmp.ge.s32.totalorder %s20_s13, 10  }
0x10ef   :  { %19 = sbr.rel (!%p17_p4) target bundleno = 1 (0x1), region = 134 }

</bundles_post_ra>
